<compile_context>
chip_gen: v6e
topology: v6e:2x2x1
jax: 0.10.0
libtpu: 0.0.40
codegen_flags: <defaults>
</compile_context>

<pallas_src>
import functools

import jax
import jax.numpy as jnp
from jax import lax
from jax.experimental import pallas as pl
from jax.experimental.pallas import tpu as pltpu

# Column order of the horizontal-halo masks passed to the kernel
# (one mask per non-zero horizontal tap offset ox = dx - 2).
_OX_ORDER = (-2, -1, 1, 2)


def decoder_cell_kernel(
    x_ref,        # (1, C, HW)   channel-major input slab (lane-dense HW)
    w1_ref,       # (C, E)       1x1 conv C->E, BN0/BN1 scales folded in
    b1_ref,       # (1, E)       folded BN1 bias
    dw_ref,       # (25, E)      depthwise 5x5 taps (row = dy*5+dx), BN2 folded
    b2_ref,       # (1, E)       folded BN2 bias
    w2_ref,       # (E, C)       1x1 conv E->C, BN3 scale folded
    b3_ref,       # (1, C)       folded BN3 bias
    sew1_ref,     # (C, CR)      SE fc1
    seb1_ref,     # (1, CR)
    sew2_ref,     # (CR, C)      SE fc2
    seb2_ref,     # (1, C)
    masks_ref,    # (HW, 4)      f32 horizontal-edge masks (see _OX_ORDER)
    o_ref,        # (1, C, HW)
    pad_ref,      # scratch VMEM ((H + 4) * W, E): vertically padded activation
    *,
    W: int,
):
    C, HW = x_ref.shape[1], x_ref.shape[2]
    E = w1_ref.shape[1]

    xc = x_ref[0]                                   # (C, HW)
    xt = jnp.transpose(xc)                          # (HW, C)  "NHWC-flat"

    # ---- 1x1 conv C -> E (BN0/BN1 folded) + Swish ----
    h = jnp.dot(xt, w1_ref[...], preferred_element_type=jnp.float32)  # (HW, E)
    h = h + b1_ref[...]
    h = h * jax.nn.sigmoid(h)

    # ---- depthwise 5x5, padding=2 (BN2 scale folded into the taps) ----
    # Only the 4*W halo rows are zeroed (every step: scratch is per-core and
    # the interior is fully overwritten, so this stays correct under megacore
    # "parallel" scheduling); the interior write and all 5 vertical slab reads
    # are sublane-aligned because W % 8 == 0.
    zero_halo = jnp.zeros((2 * W, E), jnp.float32)
    pad_ref[0:2 * W, :] = zero_halo
    pad_ref[2 * W + HW:, :] = zero_halo
    pad_ref[2 * W:2 * W + HW, :] = h

    acc = jnp.zeros((HW, E), jnp.float32)
    for dx in range(5):
        ox = dx - 2
        # Column-filtered partial sum over the 5 vertical taps (aligned loads).
        colf = jnp.zeros((HW, E), jnp.float32)
        for dy in range(5):
            colf = colf + pad_ref[dy * W:dy * W + HW, :] * dw_ref[dy * 5 + dx, :]
        if ox == 0:
            acc = acc + colf
        else:
            # Horizontal tap: one XLU sublane roll of the flat layout plus a
            # mask that zeroes positions that crossed a row / image edge.
            k = _OX_ORDER.index(ox)
            shifted = pltpu.roll(colf, shift=(-ox) % HW, axis=0)
            acc = acc + shifted * masks_ref[:, k:k + 1]

    h = acc + b2_ref[...]
    h = h * jax.nn.sigmoid(h)

    # ---- 1x1 conv E -> C (BN3 folded) ----
    h = jnp.dot(h, w2_ref[...], preferred_element_type=jnp.float32)   # (HW, C)
    h = h + b3_ref[...]

    # ---- SqueezeExcitation: gap -> fc -> relu -> fc -> sigmoid -> scale ----
    pooled = jnp.mean(h, axis=0, keepdims=True)                       # (1, C)
    s = jnp.dot(pooled, sew1_ref[...],
                preferred_element_type=jnp.float32) + seb1_ref[...]   # (1, CR)
    s = jnp.maximum(s, 0.0)
    s = jnp.dot(s, sew2_ref[...],
                preferred_element_type=jnp.float32) + seb2_ref[...]   # (1, C)
    h = h * jax.nn.sigmoid(s)

    # ---- residual, back to channel-major, lane-dense store ----
    o_ref[0] = jnp.transpose(xt + h).astype(o_ref.dtype)              # (C, HW)


def fold_params(params):
    """Fold the four eval-mode BN affines into the conv weights/biases."""
    (w1, dw, w2,
     bn0s, bn0b, bn1s, bn1b, bn2s, bn2b, bn3s, bn3b,
     sew1, seb1, sew2, seb2) = params
    s0, b0 = bn0s[0], bn0b[0]     # (C,)
    s1, b1 = bn1s[0], bn1b[0]     # (E,)
    s2, b2 = bn2s[0], bn2b[0]     # (E,)
    s3, b3 = bn3s[0], bn3b[0]     # (C,)
    E = w1.shape[1]

    w1f = (s0[:, None] * w1) * s1[None, :]           # BN0 rows, BN1 cols
    b1f = ((b0 @ w1) * s1 + b1)[None, :]             # (1, E)
    dwf = (dw * s2[None, None, :]).reshape(25, E)    # BN2 scale, taps-major
    b2f = b2[None, :]                                # (1, E)
    w2f = w2 * s3[None, :]                           # BN3 cols
    b3f = b3[None, :]                                # (1, C)
    return w1f, b1f, dwf, b2f, w2f, b3f, sew1, seb1, sew2, seb2


def decoder_cell(x_nchw, params):
    """x_nchw: (N, C, H, W) float32.  Returns (N, C, H, W)."""
    N, C, H, W = x_nchw.shape
    (w1f, b1f, dwf, b2f, w2f, b3f,
     sew1, seb1, sew2, seb2) = fold_params(params)
    E = w1f.shape[1]
    CR = sew1.shape[1]
    HW = H * W

    # Channel-major, lane-dense layout: pure metadata reshape, no HBM transpose.
    x = x_nchw.reshape(N, C, HW)

    # Horizontal edge masks for the 4 shifted depthwise taps.
    col = jnp.arange(HW, dtype=jnp.int32) % W
    masks = jnp.stack(
        [((col + ox >= 0) & (col + ox < W)).astype(jnp.float32)
         for ox in _OX_ORDER], axis=1)                          # (HW, 4)

    full = lambda shape: pl.BlockSpec(shape, lambda n: (0,) * len(shape))

    out = pl.pallas_call(
        functools.partial(decoder_cell_kernel, W=W),
        out_shape=jax.ShapeDtypeStruct((N, C, HW), jnp.float32),
        grid=(N,),
        in_specs=[
            pl.BlockSpec((1, C, HW), lambda n: (n, 0, 0)),      # x
            full((C, E)), full((1, E)),                         # conv1 (+BN0/1)
            full((25, E)), full((1, E)),                        # depthwise(+BN2)
            full((E, C)), full((1, C)),                         # conv2 (+BN3)
            full((C, CR)), full((1, CR)),                       # SE fc1
            full((CR, C)), full((1, C)),                        # SE fc2
            full((HW, 4)),                                      # edge masks
        ],
        out_specs=pl.BlockSpec((1, C, HW), lambda n: (n, 0, 0)),
        scratch_shapes=[pltpu.VMEM(((H + 4) * W, E), jnp.float32)],
        compiler_params=pltpu.CompilerParams(
            dimension_semantics=("parallel",),
            vmem_limit_bytes=32 * 1024 * 1024),
    )(x, w1f, b1f, dwf, b2f, w2f, b3f, sew1, seb1, sew2, seb2, masks)

    return out.reshape(N, C, H, W)


def reference(x_nchw, params):
    """Pure-JAX reference with identical (eval-mode BN) semantics."""
    (w1, dw, w2,
     bn0s, bn0b, bn1s, bn1b, bn2s, bn2b, bn3s, bn3b,
     sew1, seb1, sew2, seb2) = params
    x = jnp.transpose(x_nchw, (0, 2, 3, 1))                  # NHWC
    h = x * bn0s[0] + bn0b[0]
    h = jnp.einsum('nhwc,ce->nhwe', h, w1)
    h = h * bn1s[0] + bn1b[0]
    h = h * jax.nn.sigmoid(h)
    E = w1.shape[1]
    h = lax.conv_general_dilated(
        h, dw[:, :, None, :], window_strides=(1, 1),
        padding=((2, 2), (2, 2)),
        dimension_numbers=('NHWC', 'HWIO', 'NHWC'),
        feature_group_count=E)
    h = h * bn2s[0] + bn2b[0]
    h = h * jax.nn.sigmoid(h)
    h = jnp.einsum('nhwe,ec->nhwc', h, w2)
    h = h * bn3s[0] + bn3b[0]
    pooled = jnp.mean(h, axis=(1, 2))                        # (N, C)
    s = jnp.maximum(pooled @ sew1 + seb1[0], 0.0)
    gate = jax.nn.sigmoid(s @ sew2 + seb2[0])                # (N, C)
    h = h * gate[:, None, None, :]
    return jnp.transpose(x + h, (0, 3, 1, 2))


def make_params(key, C):
    E = C * 6
    CR = max(C // 16, 4)
    ks = jax.random.split(key, 24)

    def rnd(k, shape, s):
        return (s * jax.random.normal(k, shape)).astype(jnp.float32)

    def bn_fold(k0, k1, k2, k3, ch):
        gamma = 1.0 + 0.1 * jax.random.normal(k0, (ch,))
        beta = 0.1 * jax.random.normal(k1, (ch,))
        mean = 0.1 * jax.random.normal(k2, (ch,))
        var = jnp.abs(1.0 + 0.1 * jax.random.normal(k3, (ch,)))
        scale = gamma / jnp.sqrt(var + 1e-5)
        bias = beta - mean * scale
        return (scale.reshape(1, ch).astype(jnp.float32),
                bias.reshape(1, ch).astype(jnp.float32))

    w1 = rnd(ks[0], (C, E), 0.3)          # Conv2d(C, 6C, 1)
    dw = rnd(ks[1], (5, 5, E), 0.2)       # Conv2d(6C, 6C, 5, groups=6C)
    w2 = rnd(ks[2], (E, C), 0.3)          # Conv2d(6C, C, 1)
    sew1 = rnd(ks[3], (C, CR), 0.3)       # SE fc1
    seb1 = rnd(ks[4], (1, CR), 0.1)
    sew2 = rnd(ks[5], (CR, C), 0.3)       # SE fc2
    seb2 = rnd(ks[6], (1, C), 0.1)
    bn0s, bn0b = bn_fold(ks[7], ks[8], ks[9], ks[10], C)
    bn1s, bn1b = bn_fold(ks[11], ks[12], ks[13], ks[14], E)
    bn2s, bn2b = bn_fold(ks[15], ks[16], ks[17], ks[18], E)
    bn3s, bn3b = bn_fold(ks[19], ks[20], ks[21], ks[22], C)

    return (w1, dw, w2,
            bn0s, bn0b, bn1s, bn1b, bn2s, bn2b, bn3s, bn3b,
            sew1, seb1, sew2, seb2)


if __name__ == "__main__":
    N, C, H, W = 2, 8, 16, 16
    key = jax.random.PRNGKey(0)
    kx, kp = jax.random.split(key)
    x = jax.random.normal(kx, (N, C, H, W), dtype=jnp.float32)   # NCHW input
    params = make_params(kp, C)

    y = jax.block_until_ready(decoder_cell(x, params))
    y_ref = jax.block_until_ready(reference(x, params))

    assert y.shape == (N, C, H, W)
    assert jnp.max(jnp.abs(y - y_ref)) < 2e-3, "mismatch vs pure-JAX reference"
    print("KERNEL_OK")
</pallas_src>

<mosaic_0001>
module attributes {stable_mosaic.version = 11 : i64} {
  func.func @decoder_cell_kernel(%arg0: i32, %arg1: memref<1x8x256xf32, #tpu.memory_space<vmem>>, %arg2: memref<8x48xf32, #tpu.memory_space<vmem>>, %arg3: memref<1x48xf32, #tpu.memory_space<vmem>>, %arg4: memref<25x48xf32, #tpu.memory_space<vmem>>, %arg5: memref<1x48xf32, #tpu.memory_space<vmem>>, %arg6: memref<48x8xf32, #tpu.memory_space<vmem>>, %arg7: memref<1x8xf32, #tpu.memory_space<vmem>>, %arg8: memref<8x4xf32, #tpu.memory_space<vmem>>, %arg9: memref<1x4xf32, #tpu.memory_space<vmem>>, %arg10: memref<4x8xf32, #tpu.memory_space<vmem>>, %arg11: memref<1x8xf32, #tpu.memory_space<vmem>>, %arg12: memref<256x4xf32, #tpu.memory_space<vmem>>, %arg13: memref<1x8x256xf32, #tpu.memory_space<vmem>>, %arg14: memref<320x48xf32, #tpu.memory_space<vmem>>) attributes {dimension_semantics = [#tpu.dimension_semantics<parallel>], iteration_bounds = array<i64: 2>, scalar_prefetch = 0 : i64, scratch_operands = 1 : i64, tpu.core_type = #tpu.core_type<tc>, window_params = [{transform_indices = @transform_0, window_bounds = array<i64: 1, 8, 256>}, {pipeline_mode = #tpu.pipeline_mode<synchronous>, transform_indices = @transform_1, window_bounds = array<i64: 8, 48>}, {pipeline_mode = #tpu.pipeline_mode<synchronous>, transform_indices = @transform_2, window_bounds = array<i64: 1, 48>}, {pipeline_mode = #tpu.pipeline_mode<synchronous>, transform_indices = @transform_3, window_bounds = array<i64: 25, 48>}, {pipeline_mode = #tpu.pipeline_mode<synchronous>, transform_indices = @transform_4, window_bounds = array<i64: 1, 48>}, {pipeline_mode = #tpu.pipeline_mode<synchronous>, transform_indices = @transform_5, window_bounds = array<i64: 48, 8>}, {pipeline_mode = #tpu.pipeline_mode<synchronous>, transform_indices = @transform_6, window_bounds = array<i64: 1, 8>}, {pipeline_mode = #tpu.pipeline_mode<synchronous>, transform_indices = @transform_7, window_bounds = array<i64: 8, 4>}, {pipeline_mode = #tpu.pipeline_mode<synchronous>, transform_indices = @transform_8, window_bounds = array<i64: 1, 4>}, {pipeline_mode = #tpu.pipeline_mode<synchronous>, transform_indices = @transform_9, window_bounds = array<i64: 4, 8>}, {pipeline_mode = #tpu.pipeline_mode<synchronous>, transform_indices = @transform_10, window_bounds = array<i64: 1, 8>}, {pipeline_mode = #tpu.pipeline_mode<synchronous>, transform_indices = @transform_11, window_bounds = array<i64: 256, 4>}, {transform_indices = @transform_12, window_bounds = array<i64: 1, 8, 256>}]} {
    %c0 = arith.constant 0 : index
    %c0_0 = arith.constant 0 : index
    %c0_1 = arith.constant 0 : index
    %0 = vector.load %arg1[%c0, %c0_0, %c0_1] : memref<1x8x256xf32, #tpu.memory_space<vmem>>, vector<1x8x256xf32>
    %1 = vector.shape_cast %0 : vector<1x8x256xf32> to vector<8x256xf32>
    %2 = tpu.transpose %1, [1, 0] : vector<8x256xf32> -> vector<256x8xf32>
    %c0_2 = arith.constant 0 : index
    %c0_3 = arith.constant 0 : index
    %3 = vector.load %arg2[%c0_2, %c0_3] : memref<8x48xf32, #tpu.memory_space<vmem>>, vector<8x48xf32>
    %cst = arith.constant dense<0.000000e+00> : vector<256x48xf32>
    %4 = tpu.matmul %2, %3, %cst {dimension_numbers = #tpu.dot_dimension_numbers<[1], [0], [0], [1], [0, 0, 1, 1], [], []>} : vector<256x8xf32>, vector<8x48xf32>, vector<256x48xf32> -> vector<256x48xf32>
    %c0_4 = arith.constant 0 : index
    %c0_5 = arith.constant 0 : index
    %5 = vector.load %arg3[%c0_4, %c0_5] : memref<1x48xf32, #tpu.memory_space<vmem>>, vector<1x48xf32>
    %6 = vector.broadcast %5 : vector<1x48xf32> to vector<256x48xf32>
    %7 = arith.addf %4, %6 : vector<256x48xf32>
    %8 = arith.negf %7 : vector<256x48xf32>
    %9 = math.exp %8 : vector<256x48xf32>
    %cst_6 = arith.constant 1.000000e+00 : f32
    %10 = vector.broadcast %cst_6 : f32 to vector<256x48xf32>
    %11 = arith.addf %10, %9 : vector<256x48xf32>
    %12 = arith.divf %10, %11 : vector<256x48xf32>
    %13 = arith.mulf %7, %12 : vector<256x48xf32>
    %cst_7 = arith.constant 0.000000e+00 : f32
    %14 = vector.broadcast %cst_7 : f32 to vector<32x48xf32>
    %c0_8 = arith.constant 0 : index
    %c0_9 = arith.constant 0 : index
    %15 = vector.load %arg14[%c0_8, %c0_9] : memref<320x48xf32, #tpu.memory_space<vmem>>, vector<32x48xf32>
    tpu.vector_store %arg14[%c0_8, %c0_9], %14 {strides = array<i32>} : memref<320x48xf32, #tpu.memory_space<vmem>>, vector<32x48xf32>,
    %c288 = arith.constant 288 : index
    %c0_10 = arith.constant 0 : index
    %16 = vector.load %arg14[%c288, %c0_10] : memref<320x48xf32, #tpu.memory_space<vmem>>, vector<32x48xf32>
    tpu.vector_store %arg14[%c288, %c0_10], %14 {strides = array<i32>} : memref<320x48xf32, #tpu.memory_space<vmem>>, vector<32x48xf32>,
    %c32 = arith.constant 32 : index
    %c0_11 = arith.constant 0 : index
    %17 = vector.load %arg14[%c32, %c0_11] : memref<320x48xf32, #tpu.memory_space<vmem>>, vector<256x48xf32>
    tpu.vector_store %arg14[%c32, %c0_11], %13 {strides = array<i32>} : memref<320x48xf32, #tpu.memory_space<vmem>>, vector<256x48xf32>,
    %cst_12 = arith.constant 0.000000e+00 : f32
    %18 = vector.broadcast %cst_12 : f32 to vector<256x48xf32>
    %cst_13 = arith.constant 0.000000e+00 : f32
    %19 = vector.broadcast %cst_13 : f32 to vector<256x48xf32>
    %c0_14 = arith.constant 0 : index
    %c0_15 = arith.constant 0 : index
    %20 = vector.load %arg14[%c0_14, %c0_15] : memref<320x48xf32, #tpu.memory_space<vmem>>, vector<256x48xf32>
    %c0_16 = arith.constant 0 : index
    %c0_17 = arith.constant 0 : index
    %21 = vector.load %arg4[%c0_16, %c0_17] : memref<25x48xf32, #tpu.memory_space<vmem>>, vector<1x48xf32>
    %22 = vector.shape_cast %21 : vector<1x48xf32> to vector<48xf32>
    %23 = vector.shape_cast %22 : vector<48xf32> to vector<1x48xf32>
    %24 = vector.broadcast %23 : vector<1x48xf32> to vector<256x48xf32>
    %25 = arith.mulf %20, %24 : vector<256x48xf32>
    %26 = arith.addf %19, %25 : vector<256x48xf32>
    %c16 = arith.constant 16 : index
    %c0_18 = arith.constant 0 : index
    %27 = vector.load %arg14[%c16, %c0_18] : memref<320x48xf32, #tpu.memory_space<vmem>>, vector<256x48xf32>
    %c5 = arith.constant 5 : index
    %c0_19 = arith.constant 0 : index
    %28 = vector.load %arg4[%c5, %c0_19] : memref<25x48xf32, #tpu.memory_space<vmem>>, vector<1x48xf32>
    %29 = vector.shape_cast %28 : vector<1x48xf32> to vector<48xf32>
    %30 = vector.shape_cast %29 : vector<48xf32> to vector<1x48xf32>
    %31 = vector.broadcast %30 : vector<1x48xf32> to vector<256x48xf32>
    %32 = arith.mulf %27, %31 : vector<256x48xf32>
    %33 = arith.addf %26, %32 : vector<256x48xf32>
    %c32_20 = arith.constant 32 : index
    %c0_21 = arith.constant 0 : index
    %34 = vector.load %arg14[%c32_20, %c0_21] : memref<320x48xf32, #tpu.memory_space<vmem>>, vector<256x48xf32>
    %c10 = arith.constant 10 : index
    %c0_22 = arith.constant 0 : index
    %35 = vector.load %arg4[%c10, %c0_22] : memref<25x48xf32, #tpu.memory_space<vmem>>, vector<1x48xf32>
    %36 = vector.shape_cast %35 : vector<1x48xf32> to vector<48xf32>
    %37 = vector.shape_cast %36 : vector<48xf32> to vector<1x48xf32>
    %38 = vector.broadcast %37 : vector<1x48xf32> to vector<256x48xf32>
    %39 = arith.mulf %34, %38 : vector<256x48xf32>
    %40 = arith.addf %33, %39 : vector<256x48xf32>
    %c48 = arith.constant 48 : index
    %c0_23 = arith.constant 0 : index
    %41 = vector.load %arg14[%c48, %c0_23] : memref<320x48xf32, #tpu.memory_space<vmem>>, vector<256x48xf32>
    %c15 = arith.constant 15 : index
    %c0_24 = arith.constant 0 : index
    %42 = vector.load %arg4[%c15, %c0_24] : memref<25x48xf32, #tpu.memory_space<vmem>>, vector<1x48xf32>
    %43 = vector.shape_cast %42 : vector<1x48xf32> to vector<48xf32>
    %44 = vector.shape_cast %43 : vector<48xf32> to vector<1x48xf32>
    %45 = vector.broadcast %44 : vector<1x48xf32> to vector<256x48xf32>
    %46 = arith.mulf %41, %45 : vector<256x48xf32>
    %47 = arith.addf %40, %46 : vector<256x48xf32>
    %c64 = arith.constant 64 : index
    %c0_25 = arith.constant 0 : index
    %48 = vector.load %arg14[%c64, %c0_25] : memref<320x48xf32, #tpu.memory_space<vmem>>, vector<256x48xf32>
    %c20 = arith.constant 20 : index
    %c0_26 = arith.constant 0 : index
    %49 = vector.load %arg4[%c20, %c0_26] : memref<25x48xf32, #tpu.memory_space<vmem>>, vector<1x48xf32>
    %50 = vector.shape_cast %49 : vector<1x48xf32> to vector<48xf32>
    %51 = vector.shape_cast %50 : vector<48xf32> to vector<1x48xf32>
    %52 = vector.broadcast %51 : vector<1x48xf32> to vector<256x48xf32>
    %53 = arith.mulf %48, %52 : vector<256x48xf32>
    %54 = arith.addf %47, %53 : vector<256x48xf32>
    %c2_i32 = arith.constant 2 : i32
    %55 = tpu.dynamic_rotate %54 by %c2_i32 dim 0 : vector<256x48xf32>, i32 -> vector<256x48xf32>
    %c0_27 = arith.constant 0 : index
    %c0_28 = arith.constant 0 : index
    %56 = vector.load %arg12[%c0_27, %c0_28] : memref<256x4xf32, #tpu.memory_space<vmem>>, vector<256x1xf32>
    %57 = vector.broadcast %56 : vector<256x1xf32> to vector<256x48xf32>
    %58 = arith.mulf %55, %57 : vector<256x48xf32>
    %59 = arith.addf %18, %58 : vector<256x48xf32>
    %cst_29 = arith.constant 0.000000e+00 : f32
    %60 = vector.broadcast %cst_29 : f32 to vector<256x48xf32>
    %c0_30 = arith.constant 0 : index
    %c0_31 = arith.constant 0 : index
    %61 = vector.load %arg14[%c0_30, %c0_31] : memref<320x48xf32, #tpu.memory_space<vmem>>, vector<256x48xf32>
    %c1 = arith.constant 1 : index
    %c0_32 = arith.constant 0 : index
    %62 = vector.load %arg4[%c1, %c0_32] : memref<25x48xf32, #tpu.memory_space<vmem>>, vector<1x48xf32>
    %63 = vector.shape_cast %62 : vector<1x48xf32> to vector<48xf32>
    %64 = vector.shape_cast %63 : vector<48xf32> to vector<1x48xf32>
    %65 = vector.broadcast %64 : vector<1x48xf32> to vector<256x48xf32>
    %66 = arith.mulf %61, %65 : vector<256x48xf32>
    %67 = arith.addf %60, %66 : vector<256x48xf32>
    %c16_33 = arith.constant 16 : index
    %c0_34 = arith.constant 0 : index
    %68 = vector.load %arg14[%c16_33, %c0_34] : memref<320x48xf32, #tpu.memory_space<vmem>>, vector<256x48xf32>
    %c6 = arith.constant 6 : index
    %c0_35 = arith.constant 0 : index
    %69 = vector.load %arg4[%c6, %c0_35] : memref<25x48xf32, #tpu.memory_space<vmem>>, vector<1x48xf32>
    %70 = vector.shape_cast %69 : vector<1x48xf32> to vector<48xf32>
    %71 = vector.shape_cast %70 : vector<48xf32> to vector<1x48xf32>
    %72 = vector.broadcast %71 : vector<1x48xf32> to vector<256x48xf32>
    %73 = arith.mulf %68, %72 : vector<256x48xf32>
    %74 = arith.addf %67, %73 : vector<256x48xf32>
    %c32_36 = arith.constant 32 : index
    %c0_37 = arith.constant 0 : index
    %75 = vector.load %arg14[%c32_36, %c0_37] : memref<320x48xf32, #tpu.memory_space<vmem>>, vector<256x48xf32>
    %c11 = arith.constant 11 : index
    %c0_38 = arith.constant 0 : index
    %76 = vector.load %arg4[%c11, %c0_38] : memref<25x48xf32, #tpu.memory_space<vmem>>, vector<1x48xf32>
    %77 = vector.shape_cast %76 : vector<1x48xf32> to vector<48xf32>
    %78 = vector.shape_cast %77 : vector<48xf32> to vector<1x48xf32>
    %79 = vector.broadcast %78 : vector<1x48xf32> to vector<256x48xf32>
    %80 = arith.mulf %75, %79 : vector<256x48xf32>
    %81 = arith.addf %74, %80 : vector<256x48xf32>
    %c48_39 = arith.constant 48 : index
    %c0_40 = arith.constant 0 : index
    %82 = vector.load %arg14[%c48_39, %c0_40] : memref<320x48xf32, #tpu.memory_space<vmem>>, vector<256x48xf32>
    %c16_41 = arith.constant 16 : index
    %c0_42 = arith.constant 0 : index
    %83 = vector.load %arg4[%c16_41, %c0_42] : memref<25x48xf32, #tpu.memory_space<vmem>>, vector<1x48xf32>
    %84 = vector.shape_cast %83 : vector<1x48xf32> to vector<48xf32>
    %85 = vector.shape_cast %84 : vector<48xf32> to vector<1x48xf32>
    %86 = vector.broadcast %85 : vector<1x48xf32> to vector<256x48xf32>
    %87 = arith.mulf %82, %86 : vector<256x48xf32>
    %88 = arith.addf %81, %87 : vector<256x48xf32>
    %c64_43 = arith.constant 64 : index
    %c0_44 = arith.constant 0 : index
    %89 = vector.load %arg14[%c64_43, %c0_44] : memref<320x48xf32, #tpu.memory_space<vmem>>, vector<256x48xf32>
    %c21 = arith.constant 21 : index
    %c0_45 = arith.constant 0 : index
    %90 = vector.load %arg4[%c21, %c0_45] : memref<25x48xf32, #tpu.memory_space<vmem>>, vector<1x48xf32>
    %91 = vector.shape_cast %90 : vector<1x48xf32> to vector<48xf32>
    %92 = vector.shape_cast %91 : vector<48xf32> to vector<1x48xf32>
    %93 = vector.broadcast %92 : vector<1x48xf32> to vector<256x48xf32>
    %94 = arith.mulf %89, %93 : vector<256x48xf32>
    %95 = arith.addf %88, %94 : vector<256x48xf32>
    %c1_i32 = arith.constant 1 : i32
    %96 = tpu.dynamic_rotate %95 by %c1_i32 dim 0 : vector<256x48xf32>, i32 -> vector<256x48xf32>
    %c0_46 = arith.constant 0 : index
    %c1_47 = arith.constant 1 : index
    %97 = vector.load %arg12[%c0_46, %c1_47] : memref<256x4xf32, #tpu.memory_space<vmem>>, vector<256x1xf32>
    %98 = vector.broadcast %97 : vector<256x1xf32> to vector<256x48xf32>
    %99 = arith.mulf %96, %98 : vector<256x48xf32>
    %100 = arith.addf %59, %99 : vector<256x48xf32>
    %cst_48 = arith.constant 0.000000e+00 : f32
    %101 = vector.broadcast %cst_48 : f32 to vector<256x48xf32>
    %c0_49 = arith.constant 0 : index
    %c0_50 = arith.constant 0 : index
    %102 = vector.load %arg14[%c0_49, %c0_50] : memref<320x48xf32, #tpu.memory_space<vmem>>, vector<256x48xf32>
    %c2 = arith.constant 2 : index
    %c0_51 = arith.constant 0 : index
    %103 = vector.load %arg4[%c2, %c0_51] : memref<25x48xf32, #tpu.memory_space<vmem>>, vector<1x48xf32>
    %104 = vector.shape_cast %103 : vector<1x48xf32> to vector<48xf32>
    %105 = vector.shape_cast %104 : vector<48xf32> to vector<1x48xf32>
    %106 = vector.broadcast %105 : vector<1x48xf32> to vector<256x48xf32>
    %107 = arith.mulf %102, %106 : vector<256x48xf32>
    %108 = arith.addf %101, %107 : vector<256x48xf32>
    %c16_52 = arith.constant 16 : index
    %c0_53 = arith.constant 0 : index
    %109 = vector.load %arg14[%c16_52, %c0_53] : memref<320x48xf32, #tpu.memory_space<vmem>>, vector<256x48xf32>
    %c7 = arith.constant 7 : index
    %c0_54 = arith.constant 0 : index
    %110 = vector.load %arg4[%c7, %c0_54] : memref<25x48xf32, #tpu.memory_space<vmem>>, vector<1x48xf32>
    %111 = vector.shape_cast %110 : vector<1x48xf32> to vector<48xf32>
    %112 = vector.shape_cast %111 : vector<48xf32> to vector<1x48xf32>
    %113 = vector.broadcast %112 : vector<1x48xf32> to vector<256x48xf32>
    %114 = arith.mulf %109, %113 : vector<256x48xf32>
    %115 = arith.addf %108, %114 : vector<256x48xf32>
    %c32_55 = arith.constant 32 : index
    %c0_56 = arith.constant 0 : index
    %116 = vector.load %arg14[%c32_55, %c0_56] : memref<320x48xf32, #tpu.memory_space<vmem>>, vector<256x48xf32>
    %c12 = arith.constant 12 : index
    %c0_57 = arith.constant 0 : index
    %117 = vector.load %arg4[%c12, %c0_57] : memref<25x48xf32, #tpu.memory_space<vmem>>, vector<1x48xf32>
    %118 = vector.shape_cast %117 : vector<1x48xf32> to vector<48xf32>
    %119 = vector.shape_cast %118 : vector<48xf32> to vector<1x48xf32>
    %120 = vector.broadcast %119 : vector<1x48xf32> to vector<256x48xf32>
    %121 = arith.mulf %116, %120 : vector<256x48xf32>
    %122 = arith.addf %115, %121 : vector<256x48xf32>
    %c48_58 = arith.constant 48 : index
    %c0_59 = arith.constant 0 : index
    %123 = vector.load %arg14[%c48_58, %c0_59] : memref<320x48xf32, #tpu.memory_space<vmem>>, vector<256x48xf32>
    %c17 = arith.constant 17 : index
    %c0_60 = arith.constant 0 : index
    %124 = vector.load %arg4[%c17, %c0_60] : memref<25x48xf32, #tpu.memory_space<vmem>>, vector<1x48xf32>
    %125 = vector.shape_cast %124 : vector<1x48xf32> to vector<48xf32>
    %126 = vector.shape_cast %125 : vector<48xf32> to vector<1x48xf32>
    %127 = vector.broadcast %126 : vector<1x48xf32> to vector<256x48xf32>
    %128 = arith.mulf %123, %127 : vector<256x48xf32>
    %129 = arith.addf %122, %128 : vector<256x48xf32>
    %c64_61 = arith.constant 64 : index
    %c0_62 = arith.constant 0 : index
    %130 = vector.load %arg14[%c64_61, %c0_62] : memref<320x48xf32, #tpu.memory_space<vmem>>, vector<256x48xf32>
    %c22 = arith.constant 22 : index
    %c0_63 = arith.constant 0 : index
    %131 = vector.load %arg4[%c22, %c0_63] : memref<25x48xf32, #tpu.memory_space<vmem>>, vector<1x48xf32>
    %132 = vector.shape_cast %131 : vector<1x48xf32> to vector<48xf32>
    %133 = vector.shape_cast %132 : vector<48xf32> to vector<1x48xf32>
    %134 = vector.broadcast %133 : vector<1x48xf32> to vector<256x48xf32>
    %135 = arith.mulf %130, %134 : vector<256x48xf32>
    %136 = arith.addf %129, %135 : vector<256x48xf32>
    %137 = arith.addf %100, %136 : vector<256x48xf32>
    %cst_64 = arith.constant 0.000000e+00 : f32
    %138 = vector.broadcast %cst_64 : f32 to vector<256x48xf32>
    %c0_65 = arith.constant 0 : index
    %c0_66 = arith.constant 0 : index
    %139 = vector.load %arg14[%c0_65, %c0_66] : memref<320x48xf32, #tpu.memory_space<vmem>>, vector<256x48xf32>
    %c3 = arith.constant 3 : index
    %c0_67 = arith.constant 0 : index
    %140 = vector.load %arg4[%c3, %c0_67] : memref<25x48xf32, #tpu.memory_space<vmem>>, vector<1x48xf32>
    %141 = vector.shape_cast %140 : vector<1x48xf32> to vector<48xf32>
    %142 = vector.shape_cast %141 : vector<48xf32> to vector<1x48xf32>
    %143 = vector.broadcast %142 : vector<1x48xf32> to vector<256x48xf32>
    %144 = arith.mulf %139, %143 : vector<256x48xf32>
    %145 = arith.addf %138, %144 : vector<256x48xf32>
    %c16_68 = arith.constant 16 : index
    %c0_69 = arith.constant 0 : index
    %146 = vector.load %arg14[%c16_68, %c0_69] : memref<320x48xf32, #tpu.memory_space<vmem>>, vector<256x48xf32>
    %c8 = arith.constant 8 : index
    %c0_70 = arith.constant 0 : index
    %147 = vector.load %arg4[%c8, %c0_70] : memref<25x48xf32, #tpu.memory_space<vmem>>, vector<1x48xf32>
    %148 = vector.shape_cast %147 : vector<1x48xf32> to vector<48xf32>
    %149 = vector.shape_cast %148 : vector<48xf32> to vector<1x48xf32>
    %150 = vector.broadcast %149 : vector<1x48xf32> to vector<256x48xf32>
    %151 = arith.mulf %146, %150 : vector<256x48xf32>
    %152 = arith.addf %145, %151 : vector<256x48xf32>
    %c32_71 = arith.constant 32 : index
    %c0_72 = arith.constant 0 : index
    %153 = vector.load %arg14[%c32_71, %c0_72] : memref<320x48xf32, #tpu.memory_space<vmem>>, vector<256x48xf32>
    %c13 = arith.constant 13 : index
    %c0_73 = arith.constant 0 : index
    %154 = vector.load %arg4[%c13, %c0_73] : memref<25x48xf32, #tpu.memory_space<vmem>>, vector<1x48xf32>
    %155 = vector.shape_cast %154 : vector<1x48xf32> to vector<48xf32>
    %156 = vector.shape_cast %155 : vector<48xf32> to vector<1x48xf32>
    %157 = vector.broadcast %156 : vector<1x48xf32> to vector<256x48xf32>
    %158 = arith.mulf %153, %157 : vector<256x48xf32>
    %159 = arith.addf %152, %158 : vector<256x48xf32>
    %c48_74 = arith.constant 48 : index
    %c0_75 = arith.constant 0 : index
    %160 = vector.load %arg14[%c48_74, %c0_75] : memref<320x48xf32, #tpu.memory_space<vmem>>, vector<256x48xf32>
    %c18 = arith.constant 18 : index
    %c0_76 = arith.constant 0 : index
    %161 = vector.load %arg4[%c18, %c0_76] : memref<25x48xf32, #tpu.memory_space<vmem>>, vector<1x48xf32>
    %162 = vector.shape_cast %161 : vector<1x48xf32> to vector<48xf32>
    %163 = vector.shape_cast %162 : vector<48xf32> to vector<1x48xf32>
    %164 = vector.broadcast %163 : vector<1x48xf32> to vector<256x48xf32>
    %165 = arith.mulf %160, %164 : vector<256x48xf32>
    %166 = arith.addf %159, %165 : vector<256x48xf32>
    %c64_77 = arith.constant 64 : index
    %c0_78 = arith.constant 0 : index
    %167 = vector.load %arg14[%c64_77, %c0_78] : memref<320x48xf32, #tpu.memory_space<vmem>>, vector<256x48xf32>
    %c23 = arith.constant 23 : index
    %c0_79 = arith.constant 0 : index
    %168 = vector.load %arg4[%c23, %c0_79] : memref<25x48xf32, #tpu.memory_space<vmem>>, vector<1x48xf32>
    %169 = vector.shape_cast %168 : vector<1x48xf32> to vector<48xf32>
    %170 = vector.shape_cast %169 : vector<48xf32> to vector<1x48xf32>
    %171 = vector.broadcast %170 : vector<1x48xf32> to vector<256x48xf32>
    %172 = arith.mulf %167, %171 : vector<256x48xf32>
    %173 = arith.addf %166, %172 : vector<256x48xf32>
    %c255_i32 = arith.constant 255 : i32
    %174 = tpu.dynamic_rotate %173 by %c255_i32 dim 0 : vector<256x48xf32>, i32 -> vector<256x48xf32>
    %c0_80 = arith.constant 0 : index
    %c2_81 = arith.constant 2 : index
    %175 = vector.load %arg12[%c0_80, %c2_81] : memref<256x4xf32, #tpu.memory_space<vmem>>, vector<256x1xf32>
    %176 = vector.broadcast %175 : vector<256x1xf32> to vector<256x48xf32>
    %177 = arith.mulf %174, %176 : vector<256x48xf32>
    %178 = arith.addf %137, %177 : vector<256x48xf32>
    %cst_82 = arith.constant 0.000000e+00 : f32
    %179 = vector.broadcast %cst_82 : f32 to vector<256x48xf32>
    %c0_83 = arith.constant 0 : index
    %c0_84 = arith.constant 0 : index
    %180 = vector.load %arg14[%c0_83, %c0_84] : memref<320x48xf32, #tpu.memory_space<vmem>>, vector<256x48xf32>
    %c4 = arith.constant 4 : index
    %c0_85 = arith.constant 0 : index
    %181 = vector.load %arg4[%c4, %c0_85] : memref<25x48xf32, #tpu.memory_space<vmem>>, vector<1x48xf32>
    %182 = vector.shape_cast %181 : vector<1x48xf32> to vector<48xf32>
    %183 = vector.shape_cast %182 : vector<48xf32> to vector<1x48xf32>
    %184 = vector.broadcast %183 : vector<1x48xf32> to vector<256x48xf32>
    %185 = arith.mulf %180, %184 : vector<256x48xf32>
    %186 = arith.addf %179, %185 : vector<256x48xf32>
    %c16_86 = arith.constant 16 : index
    %c0_87 = arith.constant 0 : index
    %187 = vector.load %arg14[%c16_86, %c0_87] : memref<320x48xf32, #tpu.memory_space<vmem>>, vector<256x48xf32>
    %c9 = arith.constant 9 : index
    %c0_88 = arith.constant 0 : index
    %188 = vector.load %arg4[%c9, %c0_88] : memref<25x48xf32, #tpu.memory_space<vmem>>, vector<1x48xf32>
    %189 = vector.shape_cast %188 : vector<1x48xf32> to vector<48xf32>
    %190 = vector.shape_cast %189 : vector<48xf32> to vector<1x48xf32>
    %191 = vector.broadcast %190 : vector<1x48xf32> to vector<256x48xf32>
    %192 = arith.mulf %187, %191 : vector<256x48xf32>
    %193 = arith.addf %186, %192 : vector<256x48xf32>
    %c32_89 = arith.constant 32 : index
    %c0_90 = arith.constant 0 : index
    %194 = vector.load %arg14[%c32_89, %c0_90] : memref<320x48xf32, #tpu.memory_space<vmem>>, vector<256x48xf32>
    %c14 = arith.constant 14 : index
    %c0_91 = arith.constant 0 : index
    %195 = vector.load %arg4[%c14, %c0_91] : memref<25x48xf32, #tpu.memory_space<vmem>>, vector<1x48xf32>
    %196 = vector.shape_cast %195 : vector<1x48xf32> to vector<48xf32>
    %197 = vector.shape_cast %196 : vector<48xf32> to vector<1x48xf32>
    %198 = vector.broadcast %197 : vector<1x48xf32> to vector<256x48xf32>
    %199 = arith.mulf %194, %198 : vector<256x48xf32>
    %200 = arith.addf %193, %199 : vector<256x48xf32>
    %c48_92 = arith.constant 48 : index
    %c0_93 = arith.constant 0 : index
    %201 = vector.load %arg14[%c48_92, %c0_93] : memref<320x48xf32, #tpu.memory_space<vmem>>, vector<256x48xf32>
    %c19 = arith.constant 19 : index
    %c0_94 = arith.constant 0 : index
    %202 = vector.load %arg4[%c19, %c0_94] : memref<25x48xf32, #tpu.memory_space<vmem>>, vector<1x48xf32>
    %203 = vector.shape_cast %202 : vector<1x48xf32> to vector<48xf32>
    %204 = vector.shape_cast %203 : vector<48xf32> to vector<1x48xf32>
    %205 = vector.broadcast %204 : vector<1x48xf32> to vector<256x48xf32>
    %206 = arith.mulf %201, %205 : vector<256x48xf32>
    %207 = arith.addf %200, %206 : vector<256x48xf32>
    %c64_95 = arith.constant 64 : index
    %c0_96 = arith.constant 0 : index
    %208 = vector.load %arg14[%c64_95, %c0_96] : memref<320x48xf32, #tpu.memory_space<vmem>>, vector<256x48xf32>
    %c24 = arith.constant 24 : index
    %c0_97 = arith.constant 0 : index
    %209 = vector.load %arg4[%c24, %c0_97] : memref<25x48xf32, #tpu.memory_space<vmem>>, vector<1x48xf32>
    %210 = vector.shape_cast %209 : vector<1x48xf32> to vector<48xf32>
    %211 = vector.shape_cast %210 : vector<48xf32> to vector<1x48xf32>
    %212 = vector.broadcast %211 : vector<1x48xf32> to vector<256x48xf32>
    %213 = arith.mulf %208, %212 : vector<256x48xf32>
    %214 = arith.addf %207, %213 : vector<256x48xf32>
    %c254_i32 = arith.constant 254 : i32
    %215 = tpu.dynamic_rotate %214 by %c254_i32 dim 0 : vector<256x48xf32>, i32 -> vector<256x48xf32>
    %c0_98 = arith.constant 0 : index
    %c3_99 = arith.constant 3 : index
    %216 = vector.load %arg12[%c0_98, %c3_99] : memref<256x4xf32, #tpu.memory_space<vmem>>, vector<256x1xf32>
    %217 = vector.broadcast %216 : vector<256x1xf32> to vector<256x48xf32>
    %218 = arith.mulf %215, %217 : vector<256x48xf32>
    %219 = arith.addf %178, %218 : vector<256x48xf32>
    %c0_100 = arith.constant 0 : index
    %c0_101 = arith.constant 0 : index
    %220 = vector.load %arg5[%c0_100, %c0_101] : memref<1x48xf32, #tpu.memory_space<vmem>>, vector<1x48xf32>
    %221 = vector.broadcast %220 : vector<1x48xf32> to vector<256x48xf32>
    %222 = arith.addf %219, %221 : vector<256x48xf32>
    %223 = arith.negf %222 : vector<256x48xf32>
    %224 = math.exp %223 : vector<256x48xf32>
    %cst_102 = arith.constant 1.000000e+00 : f32
    %225 = vector.broadcast %cst_102 : f32 to vector<256x48xf32>
    %226 = arith.addf %225, %224 : vector<256x48xf32>
    %227 = arith.divf %225, %226 : vector<256x48xf32>
    %228 = arith.mulf %222, %227 : vector<256x48xf32>
    %c0_103 = arith.constant 0 : index
    %c0_104 = arith.constant 0 : index
    %229 = vector.load %arg6[%c0_103, %c0_104] : memref<48x8xf32, #tpu.memory_space<vmem>>, vector<48x8xf32>
    %cst_105 = arith.constant dense<0.000000e+00> : vector<256x8xf32>
    %230 = tpu.matmul %228, %229, %cst_105 {dimension_numbers = #tpu.dot_dimension_numbers<[1], [0], [0], [1], [0, 0, 1, 1], [], []>} : vector<256x48xf32>, vector<48x8xf32>, vector<256x8xf32> -> vector<256x8xf32>
    %c0_106 = arith.constant 0 : index
    %c0_107 = arith.constant 0 : index
    %231 = vector.load %arg7[%c0_106, %c0_107] : memref<1x8xf32, #tpu.memory_space<vmem>>, vector<1x8xf32>
    %232 = vector.broadcast %231 : vector<1x8xf32> to vector<256x8xf32>
    %233 = arith.addf %230, %232 : vector<256x8xf32>
    %cst_108 = arith.constant dense<0.000000e+00> : vector<8xf32>
    %234 = vector.multi_reduction <add>, %233, %cst_108 [0] : vector<256x8xf32> to vector<8xf32>
    %235 = vector.shape_cast %234 : vector<8xf32> to vector<1x8xf32>
    %cst_109 = arith.constant 2.560000e+02 : f32
    %236 = vector.broadcast %cst_109 : f32 to vector<1x8xf32>
    %237 = arith.divf %235, %236 : vector<1x8xf32>
    %c0_110 = arith.constant 0 : index
    %c0_111 = arith.constant 0 : index
    %238 = vector.load %arg8[%c0_110, %c0_111] : memref<8x4xf32, #tpu.memory_space<vmem>>, vector<8x4xf32>
    %cst_112 = arith.constant dense<0.000000e+00> : vector<1x4xf32>
    %239 = tpu.matmul %237, %238, %cst_112 {dimension_numbers = #tpu.dot_dimension_numbers<[1], [0], [0], [1], [0, 0, 1, 1], [], []>} : vector<1x8xf32>, vector<8x4xf32>, vector<1x4xf32> -> vector<1x4xf32>
    %c0_113 = arith.constant 0 : index
    %c0_114 = arith.constant 0 : index
    %240 = vector.load %arg9[%c0_113, %c0_114] : memref<1x4xf32, #tpu.memory_space<vmem>>, vector<1x4xf32>
    %241 = arith.addf %239, %240 : vector<1x4xf32>
    %cst_115 = arith.constant 0.000000e+00 : f32
    %242 = vector.broadcast %cst_115 : f32 to vector<1x4xf32>
    %243 = arith.maximumf %241, %242 : vector<1x4xf32>
    %c0_116 = arith.constant 0 : index
    %c0_117 = arith.constant 0 : index
    %244 = vector.load %arg10[%c0_116, %c0_117] : memref<4x8xf32, #tpu.memory_space<vmem>>, vector<4x8xf32>
    %cst_118 = arith.constant dense<0.000000e+00> : vector<1x8xf32>
    %245 = tpu.matmul %243, %244, %cst_118 {dimension_numbers = #tpu.dot_dimension_numbers<[1], [0], [0], [1], [0, 0, 1, 1], [], []>} : vector<1x4xf32>, vector<4x8xf32>, vector<1x8xf32> -> vector<1x8xf32>
    %c0_119 = arith.constant 0 : index
    %c0_120 = arith.constant 0 : index
    %246 = vector.load %arg11[%c0_119, %c0_120] : memref<1x8xf32, #tpu.memory_space<vmem>>, vector<1x8xf32>
    %247 = arith.addf %245, %246 : vector<1x8xf32>
    %248 = arith.negf %247 : vector<1x8xf32>
    %249 = math.exp %248 : vector<1x8xf32>
    %cst_121 = arith.constant 1.000000e+00 : f32
    %250 = vector.broadcast %cst_121 : f32 to vector<1x8xf32>
    %251 = arith.addf %250, %249 : vector<1x8xf32>
    %252 = arith.divf %250, %251 : vector<1x8xf32>
    %253 = vector.broadcast %252 : vector<1x8xf32> to vector<256x8xf32>
    %254 = arith.mulf %233, %253 : vector<256x8xf32>
    %255 = arith.addf %2, %254 : vector<256x8xf32>
    %256 = tpu.transpose %255, [1, 0] : vector<256x8xf32> -> vector<8x256xf32>
    %c0_122 = arith.constant 0 : index
    %c0_123 = arith.constant 0 : index
    %c0_124 = arith.constant 0 : index
    %257 = vector.load %arg13[%c0_122, %c0_123, %c0_124] : memref<1x8x256xf32, #tpu.memory_space<vmem>>, vector<1x8x256xf32>
    %258 = vector.shape_cast %257 : vector<1x8x256xf32> to vector<8x256xf32>
    %259 = vector.shape_cast %256 : vector<8x256xf32> to vector<1x8x256xf32>
    tpu.vector_store %arg13[%c0_122, %c0_123, %c0_124], %259 {strides = array<i32>} : memref<1x8x256xf32, #tpu.memory_space<vmem>>, vector<1x8x256xf32>,
    return
  }
  func.func @transform_0(%arg0: i32) -> (i32, i32, i32) {
    %c0_i32 = arith.constant 0 : i32
    %c0_i32_0 = arith.constant 0 : i32
    %c0_i32_1 = arith.constant 0 : i32
    return %arg0, %c0_i32, %c0_i32_0 : i32, i32, i32
  }
  func.func @transform_1(%arg0: i32) -> (i32, i32) {
    %c0_i32 = arith.constant 0 : i32
    %c0_i32_0 = arith.constant 0 : i32
    %c0_i32_1 = arith.constant 0 : i32
    return %c0_i32, %c0_i32_0 : i32, i32
  }
  func.func @transform_2(%arg0: i32) -> (i32, i32) {
    %c0_i32 = arith.constant 0 : i32
    %c0_i32_0 = arith.constant 0 : i32
    %c0_i32_1 = arith.constant 0 : i32
    return %c0_i32, %c0_i32_0 : i32, i32
  }
  func.func @transform_3(%arg0: i32) -> (i32, i32) {
    %c0_i32 = arith.constant 0 : i32
    %c0_i32_0 = arith.constant 0 : i32
    %c0_i32_1 = arith.constant 0 : i32
    return %c0_i32, %c0_i32_0 : i32, i32
  }
  func.func @transform_4(%arg0: i32) -> (i32, i32) {
    %c0_i32 = arith.constant 0 : i32
    %c0_i32_0 = arith.constant 0 : i32
    %c0_i32_1 = arith.constant 0 : i32
    return %c0_i32, %c0_i32_0 : i32, i32
  }
  func.func @transform_5(%arg0: i32) -> (i32, i32) {
    %c0_i32 = arith.constant 0 : i32
    %c0_i32_0 = arith.constant 0 : i32
    %c0_i32_1 = arith.constant 0 : i32
    return %c0_i32, %c0_i32_0 : i32, i32
  }
  func.func @transform_6(%arg0: i32) -> (i32, i32) {
    %c0_i32 = arith.constant 0 : i32
    %c0_i32_0 = arith.constant 0 : i32
    %c0_i32_1 = arith.constant 0 : i32
    return %c0_i32, %c0_i32_0 : i32, i32
  }
  func.func @transform_7(%arg0: i32) -> (i32, i32) {
    %c0_i32 = arith.constant 0 : i32
    %c0_i32_0 = arith.constant 0 : i32
    %c0_i32_1 = arith.constant 0 : i32
    return %c0_i32, %c0_i32_0 : i32, i32
  }
  func.func @transform_8(%arg0: i32) -> (i32, i32) {
    %c0_i32 = arith.constant 0 : i32
    %c0_i32_0 = arith.constant 0 : i32
    %c0_i32_1 = arith.constant 0 : i32
    return %c0_i32, %c0_i32_0 : i32, i32
  }
  func.func @transform_9(%arg0: i32) -> (i32, i32) {
    %c0_i32 = arith.constant 0 : i32
    %c0_i32_0 = arith.constant 0 : i32
    %c0_i32_1 = arith.constant 0 : i32
    return %c0_i32, %c0_i32_0 : i32, i32
  }
  func.func @transform_10(%arg0: i32) -> (i32, i32) {
    %c0_i32 = arith.constant 0 : i32
    %c0_i32_0 = arith.constant 0 : i32
    %c0_i32_1 = arith.constant 0 : i32
    return %c0_i32, %c0_i32_0 : i32, i32
  }
  func.func @transform_11(%arg0: i32) -> (i32, i32) {
    %c0_i32 = arith.constant 0 : i32
    %c0_i32_0 = arith.constant 0 : i32
    %c0_i32_1 = arith.constant 0 : i32
    return %c0_i32, %c0_i32_0 : i32, i32
  }
  func.func @transform_12(%arg0: i32) -> (i32, i32, i32) {
    %c0_i32 = arith.constant 0 : i32
    %c0_i32_0 = arith.constant 0 : i32
    %c0_i32_1 = arith.constant 0 : i32
    return %arg0, %c0_i32, %c0_i32_0 : i32, i32, i32
  }
}

</mosaic_0001>

<bundles_post_ra>
// kernel: tpu_custom_call.1
= control target key start
LH: loop header
LB: loop body
LE: loop exit
PB: predicated region body
PF: predicated region fallthrough
CT: control target
= control target key end

     0   :  { %s11324_s0 = inlined_call_operand.vmem [shape: f32[2,8,256], index: 0, kind: input, shape index: {}]   ;;  %s11325_s1 = inlined_call_operand.vmem [shape: f32[8,48], index: 1, kind: input, shape index: {}]   ;;  %s11326_s2 = inlined_call_operand.vmem [shape: f32[1,48], index: 2, kind: input, shape index: {}]   ;;  %s11327_s3 = inlined_call_operand.vmem [shape: f32[25,48], index: 3, kind: input, shape index: {}]   ;;  %s11328_s4 = inlined_call_operand.vmem [shape: f32[1,48], index: 4, kind: input, shape index: {}]   ;;  %s11329_s5 = inlined_call_operand.vmem [shape: f32[48,8], index: 5, kind: input, shape index: {}]   ;;  %s11330_s6 = inlined_call_operand.vmem [shape: f32[1,8], index: 6, kind: input, shape index: {}]   ;;  %s11331_s7 = inlined_call_operand.vmem [shape: f32[8,4], index: 7, kind: input, shape index: {}]   ;;  %s11332_s8 = inlined_call_operand.vmem [shape: f32[1,4], index: 8, kind: input, shape index: {}]   ;;  %s11333_s9 = inlined_call_operand.vmem [shape: f32[4,8], index: 9, kind: input, shape index: {}]   ;;  %s11334_s10 = inlined_call_operand.vmem [shape: f32[1,8], index: 10, kind: input, shape index: {}]   ;;  %s11335_s11 = inlined_call_operand.vmem [shape: f32[256,4], index: 11, kind: input, shape index: {}]   ;;  %s11336_s12 = inlined_call_operand.hbm [shape: f32[2,8,256], index: 12, kind: output, shape index: {}]  }
   0x1   :  { %11716 = sst [smem:[#allocation173_spill]] %s11324_s0 }
   0x2   :  { %11717 = sst [smem:[#allocation174_spill]] %s11325_s1 }
   0x3   :  { %11718 = sst [smem:[#allocation175_spill]] %s11326_s2 }
   0x4   :  { %17 = vsyncpa [#allocation4], 0 }
   0x5   :  { %19 = vsyncpa [#allocation4 + $0x1], 0  ;;  %s6036_s21 = smov 0   ;;  %s6038_s22 = smov 0  }
   0x6   :  { %s6040_s23 = smov 0   ;;  %s6042_s24 = smov 0  }
   0x7 LB: > { %s6057_s25 = sadd.s32 4294967295, %s5962_s24   ;;  %s5002_s26 = sadd.s32 4294967294, %s5962_s24   ;;  %s5962_s24 = sphi %s6042_s24, %s12566_s24   ;;  %s5958_s23 = sphi %s6040_s23, %s12565_s23   ;;  %s5954_s22 = sphi %s6038_s22, %s12564_s22   ;;  %s5950_s21 = sphi %s6036_s21, %s12563_s21  }
   0x8   : > { %s6061_s27 = sadd.s32 1, %s5962_s24   ;;  %s289_s28 = sadd.s32 1, %s5958_s23 }
   0x9   : > { %s286_s29 = ssub.s32 %s5962_s24, %s6061_s27  ;;  %p299_p0 = scmp.ne.s32.totalorder %s5958_s23, %s5954_s22 }
   0xa   : > { %p287_p1 = scmp.eq.s32.totalorder %s286_s29, 0  ;;  %p300_p2 = scmp.eq.s32.totalorder %s6057_s25, 1 }
   0xb   : > { %p305_p3 = scmp.ne.s32.totalorder %s5954_s22, %s5950_s21  ;;  %p306_p4 = scmp.eq.s32.totalorder %s5002_s26, 1 }
   0xc   : > { %s6072_s30 = scalar_select %p287_p1, %s5958_s23, %s289_s28  }
   0xd   : > { %p6074_p5 = por %p300_p2, %p299_p0  ;;  %p6078_p6 = por %p306_p4, %p305_p3 }
   0xe   : > { %p5005_p7 = scmp.ge.s32.totalorder %s5962_s24, 1  ;;  %p365_p8 = scmp.lt.s32.totalorder %s5962_s24, 3 }
  0x10   : > { %p366_p9 = pnand %p5005_p7, %p365_p8 }
  0x12   : > { %369 = sbr.rel (%p366_p9) target bundleno = 1848 (0x738), region = 68 }
  0x17   : > { %v1525_v0 = vld [vmem:[%s11335_s11] sm:$0xff]  ;;  %p407_p10 = scmp.lt.s32.totalorder %s6057_s25, 1  ;;  %v11340_v1 = vmov 0   ;;  %s11721_s0 = sld [smem:[#allocation173_spill]]  ;;  %v11338_v3 = vmov 1   ;;  %v1526_v5 = vld [vmem:[%s11335_s11 + $0x8] sm:$0xff] }
  0x18   : > { %5416 = vset.pattern.permute.xlu1 %v11340_v1  ;;  %s11722_s1 = sld [smem:[#allocation174_spill]]  ;;  %v1527_v6 = vld [vmem:[%s11335_s11 + $0x10] sm:$0xff]  ;;  %v11337_v7 = vmov 2   ;;  %v6114_v8 = vld [vmem:[%s11335_s11 + $0x18] sm:$0xff]  ;;  %v11344_v9 = vmov 3   ;;  %v1529_v10 = vld [vmem:[%s11335_s11 + $0x20] sm:$0xff] }
  0x19   : > { %1559 = vperm.xlu1 %5416, %v1525_v0   ;;  %s408_s17 = scalar_select %p407_p10, %s6057_s25, 1  ;;  %v1530_v12 = vld [vmem:[%s11335_s11 + $0x28] sm:$0xff]  ;;  %v1531_v13 = vld [vmem:[%s11335_s11 + $0x30] sm:$0xff]  ;;  %v1532_v14 = vld [vmem:[%s11335_s11 + $0x38] sm:$0xff]  ;;  %vm486_vm0 = vcmask 64512   ;;  %vm1032_vm1 = vcmask 392192  }
  0x1a   : > { %v6159_v18 = vld [vmem:[%s11335_s11 + $0x40] sm:$0xff]  ;;  %v6189_v25 = vld [vmem:[%s11335_s11 + $0x48] sm:$0xff]  ;;  %v6235_v37 = vld [vmem:[%s11335_s11 + $0x50] sm:$0xff]  ;;  %s11795_s2 = sld [smem:[#allocation175_spill]]  ;;  %vm5969_vm6 = vmmov 0   ;;  %vm4714_vm7 = vcmask 1043456  }
  0x1b   : > { %s5174_s18 = sshll.u32 %s408_s17, 4  ;;  %v6253_v41 = vld [vmem:[%s11335_s11 + $0x58] sm:$0xff]  ;;  %v6267_v44 = vld [vmem:[%s11335_s11 + $0x60] sm:$0xff]  ;;  %v6281_v47 = vld [vmem:[%s11335_s11 + $0x68] sm:$0xff]  ;;  %vm4710_vm8 = vcmask 31744   ;;  %s404_s17 = sand.u32 1, %s5954_s22  }
  0x1c   : > { %v6293_v49 = vld [vmem:[%s11335_s11 + $0x70] sm:$0xff]  ;;  %v6306_v52 = vld [vmem:[%s11335_s11 + $0x78] sm:$0xff]  ;;  %v6315_v54 = vld [vmem:[%s11335_s11 + $0x80] sm:$0xff]  ;;  %s5175_s28 = sshll.u32 %s6057_s25, 8  ;;  %s5970_s25 = smov [#allocation3]  }
  0x1d   : > { %s6093_s26 = scalar_lea.vmem %s11721_s0, %s5174_s18  ;;  %5417 = vset.pattern.permute.xlu1 %v11338_v3  ;;  %v6327_v56 = vld [vmem:[%s11335_s11 + $0x88] sm:$0xff]  ;;  %v6340_v59 = vld [vmem:[%s11335_s11 + $0x90] sm:$0xff]  ;;  %v6353_v62 = vld [vmem:[%s11335_s11 + $0x98] sm:$0xff]  ;;  %s5006_s18 = sshll.u32 %s404_s17, 4 }
  0x1e   : > { %v478_v2 = vld [vmem:[%s11722_s1] sm:$0xff]  ;;  %2192 = vperm.xlu1 %5417, %v1525_v0   ;;  %v413_v11 = vld [vmem:[%s6093_s26 + $0x8] sm:$0xff]  ;;  %s406_s19 = scalar_lea.vmem [#allocation3], %s5006_s18  ;;  %s4941_s16 = scalar_lea.hbm %s11336_s12, %s5175_s28 }
  0x1f   : > { %v412_v4 = vld [vmem:[%s6093_s26] sm:$0xff]  ;;  %5251 = vmatprep.subr.mxu0 %v478_v2  ;;  %s4943_s20 = sshll.u32 %s406_s19, 4  ;;  %s4929_s26 = scalar_lea.sflag [#allocation4], %s404_s17  ;;  %s11286_s20 = int_to_ptr.vmem [resolvable:$true] %s4943_s20 }
  0x20   : > { %414 = vxpose.xlu0.b32.start.end [1/1] (short) %v412_v4, 128  ;;  %5252 = vmatpush3.msra.mxu0 %v478_v2  ;;  %s5902_s0 = scalar_lea.vmem %s11286_s20, 256  ;;  %s5906_s18 = sshll.u32 %s5970_s25, 4  ;;  %s5907_s18 = int_to_ptr.vmem [resolvable:$false] %s5906_s18 }
  0x21   : > { %p5903_p11 = scmp.ne.s32.totalorder %s11286_s20, %s5902_s0  ;;  %s5908_s1 = scalar_lea.vmem %s5907_s18, 512 }
  0x22   : > { %5418 = vset.pattern.permute.xlu1 %v11340_v1  ;;  %p5909_p0 = scmp.lt.s32.totalorder %s11286_s20, %s5907_s18  ;;  %p5910_p1 = scmp.lt.s32.totalorder %s5908_s1, %s5902_s0 }
  0x23   : > { %1564 = vperm.xlu1 %5418, %v1526_v5   ;;  %p5904_p12 = pnand %p5903_p11, %p6074_p5 }
  0x24   : > { %p5911_p2 = por %p5910_p1, %p5909_p0 }
  0x25   : > { %p5905_p13 = pneg %p5904_p12 }
  0x27   : > { %5419 = vset.pattern.permute.xlu1 %v11338_v3  ;;  %p5912_p3 = pnand %p5911_p2, %p5905_p13 }
  0x28   : > { %2196 = vperm.xlu1 %5419, %v1526_v5  }
  0x2c   : > { %5420 = vset.pattern.permute.xlu1 %v11340_v1 }
  0x2d   : > { %1569 = vperm.xlu1 %5420, %v1527_v6  }
  0x31   : > { %5421 = vset.pattern.permute.xlu1 %v11338_v3 }
  0x32   : > { %2200 = vperm.xlu1 %5421, %v1527_v6  }
  0x36   : > { %5422 = vset.pattern.permute.xlu1 %v11337_v7 }
  0x37   : > { %3171 = vperm.xlu1 %5422, %v1525_v0  }
  0x3b   : > { %5423 = vset.pattern.permute.xlu1 %v11340_v1 }
  0x3c   : > { %1574 = vperm.xlu1 %5423, %v6114_v8  }
  0x40   : > { %5424 = vset.pattern.permute.xlu1 %v11338_v3 }
  0x41   : > { %2204 = vperm.xlu1 %5424, %v6114_v8  }
  0x45   : > { %5425 = vset.pattern.permute.xlu1 %v11337_v7 }
  0x46   : > { %3175 = vperm.xlu1 %5425, %v1526_v5  }
  0x4a   : > { %5426 = vset.pattern.permute.xlu1 %v11344_v9 }
  0x4b   : > { %3773 = vperm.xlu1 %5426, %v1525_v0   ;;  %v6365_v0 = vld [vmem:[%s11335_s11 + $0xa0] sm:$0xff] }
  0x4f   : > { %3777 = vperm.xlu1 %5426, %v1526_v5   ;;  %v6379_v5 = vld [vmem:[%s11335_s11 + $0xa8] sm:$0xff] }
  0x53   : > { %5427 = vset.pattern.permute.xlu1 %v11340_v1 }
  0x54   : > { %1579 = vperm.xlu1 %5427, %v1529_v10  }
  0x58   : > { %5428 = vset.pattern.permute.xlu1 %v11338_v3 }
  0x59   : > { %2208 = vperm.xlu1 %5428, %v1529_v10  }
  0x5d   : > { %446 = vxpose.xlu0.b32.start.end [1/1] (short) %v413_v11, 128  ;;  %5429 = vset.pattern.permute.xlu1 %v11337_v7 }
  0x5e   : > { %3179 = vperm.xlu1 %5429, %v1527_v6  }
  0x62   : > { %5430 = vset.pattern.permute.xlu1 %v11340_v1 }
  0x63   : > { %1584 = vperm.xlu1 %5430, %v1530_v12  }
  0x67   : > { %5431 = vset.pattern.permute.xlu1 %v11338_v3 }
  0x68   : > { %2212 = vperm.xlu1 %5431, %v1530_v12  }
  0x6c   : > { %5433 = vset.pattern.permute.xlu1 %v11344_v9 }
  0x6d   : > { %3781 = vperm.xlu1 %5433, %v1527_v6  }
  0x71   : > { %3785 = vperm.xlu1 %5433, %v6114_v8  }
  0x75   : > { %5434 = vset.pattern.permute.xlu1 %v11340_v1 }
  0x76   : > { %1589 = vperm.xlu1 %5434, %v1531_v13  }
  0x7a   : > { %5435 = vset.pattern.permute.xlu1 %v11338_v3 }
  0x7b   : > { %2216 = vperm.xlu1 %5435, %v1531_v13  }
  0x7f   : > { %5436 = vset.pattern.permute.xlu1 %v11337_v7 }
  0x80   : > { %3187 = vperm.xlu1 %5436, %v1529_v10  }
  0x84   : > { %5437 = vset.pattern.permute.xlu1 %v11340_v1 }
  0x85   : > { %1594 = vperm.xlu1 %5437, %v1532_v14  }
  0x86   : > { %5432 = vset.pattern.permute.xlu0 %v11337_v7 }
  0x89   : > { %5438 = vset.pattern.permute.xlu1 %v11338_v3 }
  0x8a   : > { %2220 = vperm.xlu1 %5438, %v1532_v14  }
  0x8e   : > { %5439 = vset.pattern.permute.xlu1 %v11337_v7 }
  0x8f   : > { %3191 = vperm.xlu1 %5439, %v1530_v12  }
  0x93   : > { %5440 = vset.pattern.permute.xlu1 %v11344_v9 }
  0x94   : > { %3789 = vperm.xlu1 %5440, %v1529_v10   ;;  %v6150_v15 = vpop.permute.xlu1 %1559  ;;  %v6393_v10 = vld [vmem:[%s11335_s11 + $0xb0] sm:$0xff] }
  0x95   : > { %11723 = vst [vmem:[#allocation6_spill] sm:$0xff] %v6150_v15 }
  0x98   : > { %3793 = vperm.xlu1 %5440, %v1530_v12   ;;  %v6404_v12 = vld [vmem:[%s11335_s11 + $0xb8] sm:$0xff] }
  0x99   : > { %v6152_v16 = vpop.permute.xlu1 %2192 }
  0x9a   : > { %11724 = vst [vmem:[#allocation7_spill] sm:$0xff] %v6152_v16 }
  0x9c   : > { %v6154_v17 = vpop.trf.xlu0  ;;  %5441 = vset.pattern.permute.xlu1 %v11340_v1 }
  0x9d   : > { %11725 = vst [vmem:[#allocation8_spill] sm:$0xff] %v6154_v17  ;;  %5253 = vmatprep.mubr.msk.f32.mxu0 %vm486_vm0, %v6154_v17  ;;  %1599 = vperm.xlu1 %5441, %v6159_v18  }
  0x9e   : > { %v6165_v19 = vpop.permute.xlu1 %1564 }
  0x9f   : > { %11726 = vst [vmem:[#allocation9_spill] sm:$0xff] %v6165_v19 }
  0xa0   : > { %v6167_v20 = vpop.trf.xlu0 }
  0xa1   : > { %11727 = vst [vmem:[#allocation10_spill] sm:$0xff] %v6167_v20  ;;  %5254 = vmatmul.mubr.msk.f32.vlgmr.msra.gmra.mxu0 %vm486_vm0, %v6167_v20  ;;  %5442 = vset.pattern.permute.xlu1 %v11338_v3 }
  0xa2   : > { %2224 = vperm.xlu1 %5442, %v6159_v18  }
  0xa3   : > { %v6175_v22 = vpop.permute.xlu1 %2196 }
  0xa4   : > { %v6173_v21 = vpop.trf.xlu0  ;;  %11729 = vst [vmem:[#allocation12_spill] sm:$0xff] %v6175_v22  ;;  %v6857_v22 = vld [vmem:[%s11327_s3 + $0x8] ss:$0 sm:$0xff] }
  0xa5   : > { %11728 = vst [vmem:[#allocation11_spill] sm:$0xff] %v6173_v21  ;;  %5256 = vmatprep.mubr.msk.f32.mxu0 %vm486_vm0, %v6173_v21  ;;  %11825 = vst [vmem:[#allocation104_spill] sm:$0xff] %v6857_v22 }
  0xa6   : > { %5443 = vset.pattern.permute.xlu1 %v11337_v7 }
  0xa7   : > { %3195 = vperm.xlu1 %5443, %v1531_v13  }
  0xa8   : > { %v6180_v23 = vpop.trf.xlu0  ;;  %v6184_v24 = vpop.permute.xlu1 %1569 }
  0xa9   : > { %11730 = vst [vmem:[#allocation13_spill] sm:$0xff] %v6180_v23  ;;  %5257 = vmatmul.mubr.msk.f32.gmra.mxu0 %vm486_vm0, %v6180_v23  ;;  %11731 = vst [vmem:[#allocation14_spill] sm:$0xff] %v6184_v24 }
  0xab   : > { %5444 = vset.pattern.permute.xlu1 %v11340_v1 }
  0xac   : > { %v6191_v26 = vpop.trf.xlu0  ;;  %1604 = vperm.xlu1 %5444, %v6189_v25  }
  0xad   : > { %11732 = vst [vmem:[#allocation15_spill] sm:$0xff] %v6191_v26  ;;  %5259 = vmatprep.mubr.msk.f32.mxu0 %vm486_vm0, %v6191_v26  ;;  %v6197_v27 = vpop.permute.xlu1 %2200 }
  0xae   : > { %11733 = vst [vmem:[#allocation16_spill] sm:$0xff] %v6197_v27 }
  0xb0   : > { %v6199_v28 = vpop.trf.xlu0  ;;  %5445 = vset.pattern.permute.xlu1 %v11338_v3 }
  0xb1   : > { %11734 = vst [vmem:[#allocation17_spill] sm:$0xff] %v6199_v28  ;;  %5260 = vmatmul.mubr.msk.f32.gmra.mxu0 %vm486_vm0, %v6199_v28  ;;  %2228 = vperm.xlu1 %5445, %v6189_v25  }
  0xb2   : > { %v6205_v29 = vpop.permute.xlu1 %3171 }
  0xb3   : > { %11735 = vst [vmem:[#allocation18_spill] sm:$0xff] %v6205_v29 }
  0xb4   : > { %v6207_v30 = vpop.trf.xlu0 }
  0xb5   : > { %11736 = vst [vmem:[#allocation19_spill] sm:$0xff] %v6207_v30  ;;  %5262 = vmatprep.mubr.msk.f32.mxu0 %vm486_vm0, %v6207_v30  ;;  %5446 = vset.pattern.permute.xlu1 %v11337_v7 }
  0xb6   : > { %3199 = vperm.xlu1 %5446, %v1532_v14  }
  0xb7   : > { %v6214_v32 = vpop.permute.xlu1 %1574 }
  0xb8   : > { %v6212_v31 = vpop.trf.xlu0  ;;  %11738 = vst [vmem:[#allocation21_spill] sm:$0xff] %v6214_v32 }
  0xb9   : > { %11737 = vst [vmem:[#allocation20_spill] sm:$0xff] %v6212_v31  ;;  %5263 = vmatmul.mubr.msk.f32.gmra.mxu0 %vm486_vm0, %v6212_v31 }
  0xba   : > { %5447 = vset.pattern.permute.xlu1 %v11344_v9 }
  0xbb   : > { %3797 = vperm.xlu1 %5447, %v1531_v13  }
  0xbc   : > { %v6219_v33 = vpop.trf.xlu0  ;;  %v6223_v34 = vpop.permute.xlu1 %2204 }
  0xbd   : > { %11739 = vst [vmem:[#allocation22_spill] sm:$0xff] %v6219_v33  ;;  %5265 = vmatprep.mubr.msk.f32.mxu0 %vm486_vm0, %v6219_v33  ;;  %11740 = vst [vmem:[#allocation23_spill] sm:$0xff] %v6223_v34 }
  0xbf   : > { %3801 = vperm.xlu1 %5447, %v1532_v14  }
  0xc0   : > { %v6225_v35 = vpop.trf.xlu0 }
  0xc1   : > { %11741 = vst [vmem:[#allocation24_spill] sm:$0xff] %v6225_v35  ;;  %5266 = vmatmul.mubr.msk.f32.gmra.mxu0 %vm486_vm0, %v6225_v35  ;;  %v6230_v36 = vpop.permute.xlu1 %3175 }
  0xc2   : > { %3183 = vperm.xlu0 %5432, %v6114_v8   ;;  %11742 = vst [vmem:[#allocation25_spill] sm:$0xff] %v6230_v36 }
  0xc3   : > { %5448 = vset.pattern.permute.xlu1 %v11340_v1 }
  0xc4   : > { %v6237_v38 = vpop.trf.xlu0  ;;  %1609 = vperm.xlu1 %5448, %v6235_v37  }
  0xc5   : > { %11743 = vst [vmem:[#allocation26_spill] sm:$0xff] %v6237_v38  ;;  %5268 = vmatprep.mubr.msk.f32.mxu0 %vm486_vm0, %v6237_v38 }
  0xc6   : > { %3211 = vperm.xlu0 %5432, %v6235_v37   ;;  %v6244_v39 = vpop.permute.xlu1 %3773 }
  0xc7   : > { %11744 = vst [vmem:[#allocation27_spill] sm:$0xff] %v6244_v39 }
  0xc8   : > { %v6246_v40 = vpop.trf.xlu0  ;;  %5449 = vset.pattern.permute.xlu1 %v11338_v3 }
  0xc9   : > { %11745 = vst [vmem:[#allocation28_spill] sm:$0xff] %v6246_v40  ;;  %5269 = vmatmul.mubr.msk.f32.gmra.mxu0 %vm486_vm0, %v6246_v40  ;;  %2232 = vperm.xlu1 %5449, %v6235_v37   ;;  %v6457_v40 = vld [vmem:[%s11335_s11 + $0xd8] sm:$0xff] }
  0xca   : > { %3215 = vperm.xlu0 %5432, %v6253_v41   ;;  %v6258_v42 = vpop.permute.xlu1 %3777 }
  0xcb   : > { %11746 = vst [vmem:[#allocation29_spill] sm:$0xff] %v6258_v42 }
  0xcc   : > { %v6260_v43 = vpop.trf.xlu0 }
  0xcd   : > { %11747 = vst [vmem:[#allocation30_spill] sm:$0xff] %v6260_v43  ;;  %5271 = vmatprep.mubr.msk.f32.mxu0 %vm486_vm0, %v6260_v43  ;;  %5450 = vset.pattern.permute.xlu1 %v11337_v7  ;;  %v11773_v43 = vmov 1  }
  0xce   : > { %3219 = vperm.xlu0 %5432, %v6267_v44   ;;  %3203 = vperm.xlu1 %5450, %v6159_v18  }
  0xcf   : > { %v6274_v46 = vpop.permute.xlu1 %1579 }
  0xd0   : > { %v6272_v45 = vpop.trf.xlu0  ;;  %11749 = vst [vmem:[#allocation32_spill] sm:$0xff] %v6274_v46  ;;  %v6813_v46 = vld [vmem:[%s11327_s3 + $0x6] ss:$0 sm:$0xff] }
  0xd1   : > { %11748 = vst [vmem:[#allocation31_spill] sm:$0xff] %v6272_v45  ;;  %5272 = vmatmul.mubr.msk.f32.gmra.mxu0 %vm486_vm0, %v6272_v45  ;;  %11822 = vst [vmem:[#allocation101_spill] sm:$0xff] %v6813_v46 }
  0xd2   : > { %3223 = vperm.xlu0 %5432, %v6281_v47   ;;  %5451 = vset.pattern.permute.xlu1 %v11340_v1 }
  0xd3   : > { %1614 = vperm.xlu1 %5451, %v6253_v41  }
  0xd4   : > { %v6285_v48 = vpop.trf.xlu0  ;;  %v6295_v50 = vpop.permute.xlu1 %2208 }
  0xd5   : > { %11750 = vst [vmem:[#allocation33_spill] sm:$0xff] %v6285_v48  ;;  %5274 = vmatprep.mubr.msk.f32.mxu0 %vm486_vm0, %v6285_v48  ;;  %11751 = vst [vmem:[#allocation34_spill] sm:$0xff] %v6295_v50  ;;  %v11770_v48 = vmov 0  }
  0xd6   : > { %3227 = vperm.xlu0 %5432, %v6293_v49  }
  0xd7   : > { %5452 = vset.pattern.permute.xlu1 %v11338_v3 }
  0xd8   : > { %v6298_v51 = vpop.trf.xlu0  ;;  %2236 = vperm.xlu1 %5452, %v6253_v41  }
  0xd9   : > { %11752 = vst [vmem:[#allocation35_spill] sm:$0xff] %v6298_v51  ;;  %5275 = vmatmul.mubr.msk.f32.gmra.mxu0 %vm486_vm0, %v6298_v51  ;;  %v6310_v53 = vpop.permute.xlu1 %3179 }
  0xda   : > { %3231 = vperm.xlu0 %5432, %v6306_v52   ;;  %11753 = vst [vmem:[#allocation36_spill] sm:$0xff] %v6310_v53 }
  0xdc   : > { %v6317_v55 = vpop.trf.xlu0  ;;  %5453 = vset.pattern.permute.xlu1 %v11337_v7 }
  0xdd   : > { %11754 = vst [vmem:[#allocation37_spill] sm:$0xff] %v6317_v55  ;;  %5277 = vmatprep.mubr.msk.f32.mxu0 %vm486_vm0, %v6317_v55  ;;  %3207 = vperm.xlu1 %5453, %v6189_v25  }
  0xde   : > { %3235 = vperm.xlu0 %5432, %v6315_v54   ;;  %v6331_v58 = vpop.permute.xlu1 %1584 }
  0xdf   : > { %11756 = vst [vmem:[#allocation39_spill] sm:$0xff] %v6331_v58 }
  0xe0   : > { %v6329_v57 = vpop.trf.xlu0 }
  0xe1   : > { %11755 = vst [vmem:[#allocation38_spill] sm:$0xff] %v6329_v57  ;;  %5278 = vmatmul.mubr.msk.f32.gmra.mxu0 %vm486_vm0, %v6329_v57  ;;  %5454 = vset.pattern.permute.xlu1 %v11344_v9 }
  0xe2   : > { %3239 = vperm.xlu0 %5432, %v6327_v56   ;;  %3805 = vperm.xlu1 %5454, %v6159_v18   ;;  %v6417_v18 = vld [vmem:[%s11335_s11 + $0xc0] sm:$0xff] }
  0xe3   : > { %v6348_v61 = vpop.permute.xlu1 %2212 }
  0xe4   : > { %v6343_v60 = vpop.trf.xlu0  ;;  %11758 = vst [vmem:[#allocation41_spill] sm:$0xff] %v6348_v61 }
  0xe5   : > { %11757 = vst [vmem:[#allocation40_spill] sm:$0xff] %v6343_v60  ;;  %5280 = vmatprep.mubr.msk.f32.mxu0 %vm486_vm0, %v6343_v60 }
  0xe6   : > { %3243 = vperm.xlu0 %5432, %v6340_v59   ;;  %5455 = vset.pattern.permute.xlu1 %v11340_v1 }
  0xe7   : > { %1619 = vperm.xlu1 %5455, %v6267_v44  }
  0xe8   : > { %v6356_v63 = vpop.trf.xlu0  ;;  %v6369_v4 = vpop.permute.xlu1 %3781 }
  0xe9   : > { %11759 = vst [vmem:[#allocation42_spill] sm:$0xff] %v6356_v63  ;;  %5281 = vmatmul.mubr.msk.f32.gmra.mxu0 %vm486_vm0, %v6356_v63  ;;  %11761 = vst [vmem:[#allocation44_spill] sm:$0xff] %v6369_v4 }
  0xea   : > { %3247 = vperm.xlu0 %5432, %v6353_v62  }
  0xeb   : > { %5456 = vset.pattern.permute.xlu1 %v11338_v3 }
  0xec   : > { %v6367_v2 = vpop.trf.xlu0  ;;  %2240 = vperm.xlu1 %5456, %v6267_v44   ;;  %v6387_v8 = vpop.permute.xlu1 %3785 }
  0xed   : > { %11760 = vst [vmem:[#allocation43_spill] sm:$0xff] %v6367_v2  ;;  %5283 = vmatprep.mubr.msk.f32.mxu0 %vm486_vm0, %v6367_v2  ;;  %11763 = vst [vmem:[#allocation46_spill] sm:$0xff] %v6387_v8 }
  0xee   : > { %3251 = vperm.xlu0 %5432, %v6365_v0  }
  0xf0   : > { %v6381_v6 = vpop.trf.xlu0  ;;  %5457 = vset.pattern.permute.xlu1 %v11340_v1  ;;  %v6431_v1 = vld [vmem:[%s11335_s11 + $0xc8] sm:$0xff] }
  0xf1   : > { %11762 = vst [vmem:[#allocation45_spill] sm:$0xff] %v6381_v6  ;;  %5284 = vmatmul.mubr.msk.f32.gmra.mxu0 %vm486_vm0, %v6381_v6  ;;  %1624 = vperm.xlu1 %5457, %v6281_v47   ;;  %v6409_v14 = vpop.permute.xlu1 %1589  ;;  %v6577_v6 = vld [vmem:[%s11795_s2] ss:$0 sm:$0xff] }
  0xf2   : > { %3255 = vperm.xlu0 %5432, %v6379_v5   ;;  %11766 = vst [vmem:[#allocation49_spill] sm:$0xff] %v6409_v14 }
  0xf4   : > { %v6395_v11 = vpop.trf.xlu0 }
  0xf5   : > { %11764 = vst [vmem:[#allocation47_spill] sm:$0xff] %v6395_v11  ;;  %5286 = vmatprep.mubr.msk.f32.mxu0 %vm486_vm0, %v6395_v11  ;;  %5458 = vset.pattern.permute.xlu1 %v11338_v3 }
  0xf6   : > { %3259 = vperm.xlu0 %5432, %v6393_v10   ;;  %2244 = vperm.xlu1 %5458, %v6281_v47   ;;  %v6426_v3 = vpop.permute.xlu1 %2216 }
  0xf7   : > { %11768 = vst [vmem:[#allocation51_spill] sm:$0xff] %v6426_v3 }
  0xf8   : > { %v6407_v13 = vpop.trf.xlu0 }
  0xf9   : > { %11765 = vst [vmem:[#allocation48_spill] sm:$0xff] %v6407_v13  ;;  %5287 = vmatmul.mubr.msk.f32.gmra.mxu0 %vm486_vm0, %v6407_v13  ;;  %v11780_v13 = vmov 3  }
  0xfa   : > { %3263 = vperm.xlu0 %5432, %v6404_v12   ;;  %5459 = vset.pattern.permute.xlu1 %v11344_v9 }
  0xfb   : > { %3813 = vperm.xlu1 %5459, %v6235_v37   ;;  %v6443_v37 = vld [vmem:[%s11335_s11 + $0xd0] sm:$0xff]  ;;  %v6447_v45 = vpop.permute.xlu1 %3187 }
  0xfc   : > { %v6420_v7 = vpop.trf.xlu0  ;;  %11772 = vst [vmem:[#allocation54_spill] sm:$0xff] %v6447_v45 }
  0xfd   : > { %11767 = vst [vmem:[#allocation50_spill] sm:$0xff] %v6420_v7  ;;  %5289 = vmatprep.mubr.msk.f32.mxu0 %vm486_vm0, %v6420_v7 }
  0xfe   : > { %3267 = vperm.xlu0 %5432, %v6417_v18  }
  0xff   : > { %5460 = vset.pattern.permute.xlu1 %v11770_v48 }
 0x100   : > { %v6433_v51 = vpop.trf.xlu0  ;;  %1629 = vperm.xlu1 %5460, %v6293_v49  }
 0x101   : > { %11769 = vst [vmem:[#allocation52_spill] sm:$0xff] %v6433_v51  ;;  %5290 = vmatmul.mubr.msk.f32.gmra.mxu0 %vm486_vm0, %v6433_v51  ;;  %v6464_v51 = vpop.permute.xlu1 %1594 }
 0x102   : > { %3271 = vperm.xlu0 %5432, %v6431_v1   ;;  %11775 = vst [vmem:[#allocation56_spill] sm:$0xff] %v6464_v51 }
 0x104   : > { %v6445_v9 = vpop.trf.xlu0  ;;  %5461 = vset.pattern.permute.xlu1 %v11773_v43 }
 0x105   : > { %11771 = vst [vmem:[#allocation53_spill] sm:$0xff] %v6445_v9  ;;  %5292 = vmatprep.mubr.msk.f32.mxu0 %vm486_vm0, %v6445_v9  ;;  %2248 = vperm.xlu1 %5461, %v6293_v49   ;;  %v6470_v9 = vld [vmem:[%s11335_s11 + $0xe0] sm:$0xff]  ;;  %v6486_v33 = vpop.permute.xlu1 %2220 }
 0x106   : > { %3275 = vperm.xlu0 %5432, %v6443_v37   ;;  %11778 = vst [vmem:[#allocation59_spill] sm:$0xff] %v6486_v33 }
 0x108   : > { %v6459_v38 = vpop.trf.xlu0 }
 0x109   : > { %11774 = vst [vmem:[#allocation55_spill] sm:$0xff] %v6459_v38  ;;  %5293 = vmatmul.mubr.msk.f32.gmra.mxu0 %vm486_vm0, %v6459_v38  ;;  %5462 = vset.pattern.permute.xlu1 %v11770_v48  ;;  %v6481_v38 = vld [vmem:[%s11335_s11 + $0xe8] sm:$0xff] }
 0x10a   : > { %3279 = vperm.xlu0 %5432, %v6457_v40   ;;  %1634 = vperm.xlu1 %5462, %v6306_v52   ;;  %v6499_v31 = vpop.permute.xlu1 %3191 }
 0x10b   : > { %11781 = vst [vmem:[#allocation61_spill] sm:$0xff] %v6499_v31 }
 0x10c   : > { %v6473_v35 = vpop.trf.xlu0 }
 0x10d   : > { %11776 = vst [vmem:[#allocation57_spill] sm:$0xff] %v6473_v35  ;;  %5295 = vmatprep.mubr.msk.f32.mxu0 %vm486_vm0, %v6473_v35 }
 0x10e   : > { %3283 = vperm.xlu0 %5432, %v6470_v9   ;;  %5463 = vset.pattern.permute.xlu1 %v11773_v43 }
 0x10f   : > { %2252 = vperm.xlu1 %5463, %v6306_v52  }
 0x110   : > { %v6484_v7 = vpop.trf.xlu0 }
 0x111   : > { %11777 = vst [vmem:[#allocation58_spill] sm:$0xff] %v6484_v7  ;;  %5296 = vmatmul.mubr.msk.f32.gmra.mxu0 %vm486_vm0, %v6484_v7 }
 0x112   : > { %3287 = vperm.xlu0 %5432, %v6481_v38  }
 0x113   : > { %5464 = vset.pattern.permute.xlu1 %v11780_v13 }
 0x114   : > { %v6492_v35 = vpop.trf.xlu0  ;;  %3821 = vperm.xlu1 %5464, %v6267_v44  }
 0x115   : > { %11779 = vst [vmem:[#allocation60_spill] sm:$0xff] %v6492_v35  ;;  %5298 = vmatprep.mubr.msk.f32.mxu0 %vm486_vm0, %v6492_v35  ;;  %v6509_v35 = vpop.permute.xlu1 %3789 }
 0x116   : > { %5504 = vset.pattern.permute.xlu0 %v11780_v13  ;;  %11783 = vst [vmem:[#allocation63_spill] sm:$0xff] %v6509_v35  ;;  %v6806_v35 = vld [vmem:[%s11327_s3 + $0x5] ss:$0 sm:$0xff] }
 0x117   : > { %3809 = vperm.xlu0 %5504, %v6189_v25   ;;  %11821 = vst [vmem:[#allocation100_spill] sm:$0xff] %v6806_v35 }
 0x118   : > { %v6502_v11 = vpop.trf.xlu0  ;;  %5465 = vset.pattern.permute.xlu1 %v11770_v48 }
 0x119   : > { %11782 = vst [vmem:[#allocation62_spill] sm:$0xff] %v6502_v11  ;;  %5299 = vmatmul.mubr.msk.f32.gmra.mxu0 %vm486_vm0, %v6502_v11  ;;  %1639 = vperm.xlu1 %5465, %v6315_v54   ;;  %v6514_v25 = vpop.permute.xlu1 %3793 }
 0x11a   : > { %11784 = vst [vmem:[#allocation64_spill] sm:$0xff] %v6514_v25 }
 0x11b   : > { %3817 = vperm.xlu0 %5504, %v6253_v41  }
 0x11d   : > { %5466 = vset.pattern.permute.xlu1 %v11773_v43  ;;  %v6520_v44 = vpop.permute.xlu1 %1599 }
 0x11e   : > { %2256 = vperm.xlu1 %5466, %v6315_v54   ;;  %11785 = vst [vmem:[#allocation65_spill] sm:$0xff] %v6520_v44 }
 0x11f   : > { %3825 = vperm.xlu0 %5504, %v6281_v47  }
 0x121   : > { %v6526_v41 = vpop.permute.xlu1 %2224 }
 0x122   : > { %5467 = vset.pattern.permute.xlu1 %v11770_v48  ;;  %11786 = vst [vmem:[#allocation66_spill] sm:$0xff] %v6526_v41 }
 0x123   : > { %3833 = vperm.xlu0 %5504, %v6306_v52   ;;  %1644 = vperm.xlu1 %5467, %v6327_v56  }
 0x125   : > { %v6533_v47 = vpop.permute.xlu1 %3195 }
 0x126   : > { %11787 = vst [vmem:[#allocation67_spill] sm:$0xff] %v6533_v47 }
 0x127   : > { %3841 = vperm.xlu0 %5504, %v6327_v56   ;;  %5468 = vset.pattern.permute.xlu1 %v11773_v43 }
 0x128   : > { %2260 = vperm.xlu1 %5468, %v6327_v56  }
 0x129   : > { %v6538_v52 = vpop.permute.xlu1 %1604 }
 0x12a   : > { %11788 = vst [vmem:[#allocation68_spill] sm:$0xff] %v6538_v52 }
 0x12b   : > { %3849 = vperm.xlu0 %5504, %v6353_v62  }
 0x12c   : > { %5469 = vset.pattern.permute.xlu1 %v11780_v13 }
 0x12d   : > { %3829 = vperm.xlu1 %5469, %v6293_v49   ;;  %v6547_v49 = vld [vmem:[%s11335_s11 + $0xf0] sm:$0xff]  ;;  %v6549_v56 = vpop.permute.xlu1 %2228 }
 0x12e   : > { %11789 = vst [vmem:[#allocation69_spill] sm:$0xff] %v6549_v56 }
 0x12f   : > { %3857 = vperm.xlu0 %5504, %v6379_v5  }
 0x131   : > { %5470 = vset.pattern.permute.xlu1 %v11770_v48  ;;  %v6554_v11 = vpop.permute.xlu1 %3199 }
 0x132   : > { %1649 = vperm.xlu1 %5470, %v6340_v59   ;;  %11790 = vst [vmem:[#allocation70_spill] sm:$0xff] %v6554_v11 }
 0x133   : > { %3865 = vperm.xlu0 %5504, %v6404_v12  }
 0x136   : > { %5471 = vset.pattern.permute.xlu1 %v11773_v43  ;;  %v6559_v7 = vpop.permute.xlu1 %3797 }
 0x137   : > { %3873 = vperm.xlu0 %5504, %v6431_v1   ;;  %2264 = vperm.xlu1 %5471, %v6340_v59   ;;  %11791 = vst [vmem:[#allocation71_spill] sm:$0xff] %v6559_v7 }
 0x13a   : > { %v6564_v30 = vpop.permute.xlu1 %3801 }
 0x13b   : > { %3881 = vperm.xlu0 %5504, %v6457_v40   ;;  %5472 = vset.pattern.permute.xlu1 %v11770_v48  ;;  %11792 = vst [vmem:[#allocation72_spill] sm:$0xff] %v6564_v30 }
 0x13c   : > { %1654 = vperm.xlu1 %5472, %v6353_v62  }
 0x13f   : > { %3889 = vperm.xlu0 %5504, %v6481_v38  }
 0x140   : > { %5473 = vset.pattern.permute.xlu1 %v11773_v43 }
 0x141   : > { %2268 = vperm.xlu1 %5473, %v6353_v62   ;;  %v6568_v62 = vpop.permute.xlu1 %1609 }
 0x142   : > { %11793 = vst [vmem:[#allocation73_spill] sm:$0xff] %v6568_v62 }
 0x143   : > { %3893 = vperm.xlu0 %5504, %v6547_v49  }
 0x145   : > { %5474 = vset.pattern.permute.xlu1 %v11780_v13 }
 0x146   : > { %3837 = vperm.xlu1 %5474, %v6315_v54   ;;  %v6572_v54 = vpop.permute.xlu1 %2232 }
 0x147   : > { %11794 = vst [vmem:[#allocation74_spill] sm:$0xff] %v6572_v54 }
 0x14a   : > { %5475 = vset.pattern.permute.xlu1 %v11770_v48  ;;  %v6588_v23 = vpop.permute.xlu1 %3203 }
 0x14b   : > { %1659 = vperm.xlu1 %5475, %v6365_v0   ;;  %11796 = vst [vmem:[#allocation75_spill] sm:$0xff] %v6588_v23 }
 0x14e   : > { %v6597_v21 = vpop.permute.xlu1 %1614 }
 0x14f   : > { %5476 = vset.pattern.permute.xlu1 %v11773_v43  ;;  %11797 = vst [vmem:[#allocation76_spill] sm:$0xff] %v6597_v21 }
 0x150   : > { %2272 = vperm.xlu1 %5476, %v6365_v0  }
 0x154   : > { %5477 = vset.pattern.permute.xlu1 %v11770_v48 }
 0x155   : > { %1664 = vperm.xlu1 %5477, %v6379_v5  }
 0x159   : > { %5478 = vset.pattern.permute.xlu1 %v11773_v43 }
 0x15a   : > { %2276 = vperm.xlu1 %5478, %v6379_v5  }
 0x15e   : > { %5479 = vset.pattern.permute.xlu1 %v11780_v13 }
 0x15f   : > { %3845 = vperm.xlu1 %5479, %v6340_v59  }
 0x161   : > { %v5255_v28 = vpop.f32.mrf.mxu0 }
 0x162   : > { %v6582_v2 = vadd.f32 %v5255_v28, %v6577_v6 }
 0x163   : > { %v649_v26 = vpop.f32.mrf.mxu0  ;;  %5480 = vset.pattern.permute.xlu1 %v11770_v48 }
 0x164   : > { %v5043_v63 = vmul.f32 -1.442695, %v6582_v2  ;;  %v6586_v5 = vadd.f32 %v6577_v6, %v649_v26  ;;  %1669 = vperm.xlu1 %5480, %v6393_v10  }
 0x166   : > { %5508 = vpow2.f32 %v5043_v63  ;;  %v5042_v60 = vmul.f32 -1.442695, %v6586_v5 }
 0x168   : > { %5510 = vpow2.f32 %v5042_v60  ;;  %5481 = vset.pattern.permute.xlu1 %v11773_v43  ;;  %v6607_v60 = vpop.permute.xlu1 %2236 }
 0x169   : > { %v5258_v59 = vpop.f32.mrf.mxu0  ;;  %2280 = vperm.xlu1 %5481, %v6393_v10   ;;  %11798 = vst [vmem:[#allocation77_spill] sm:$0xff] %v6607_v60 }
 0x16a   : > { %v6594_v28 = vadd.f32 %v5258_v59, %v6577_v6 }
 0x16b   : > { %v659_v26 = vpop.f32.mrf.mxu0 }
 0x16c   : > { %v5045_v57 = vmul.f32 -1.442695, %v6594_v28  ;;  %v6602_v63 = vadd.f32 %v6577_v6, %v659_v26  ;;  %v6619_v62 = vpop.permute.xlu1 %3207 }
 0x16d   : > { %5482 = vset.pattern.permute.xlu1 %v11770_v48  ;;  %11799 = vst [vmem:[#allocation78_spill] sm:$0xff] %v6619_v62 }
 0x16e   : > { %5512 = vpow2.f32 %v5045_v57  ;;  %v5044_v20 = vmul.f32 -1.442695, %v6602_v63  ;;  %1674 = vperm.xlu1 %5482, %v6404_v12  }
 0x170   : > { %5514 = vpow2.f32 %v5044_v20 }
 0x171   : > { %v5261_v59 = vpop.f32.mrf.mxu0 }
 0x172   : > { %v6610_v55 = vadd.f32 %v5261_v59, %v6577_v6  ;;  %5483 = vset.pattern.permute.xlu1 %v11773_v43 }
 0x173   : > { %v5509_v17 = vpop.eup %5508  ;;  %v669_v23 = vpop.f32.mrf.mxu0  ;;  %2284 = vperm.xlu1 %5483, %v6404_v12  }
 0x174   : > { %v905_v30 = vadd.f32 1.0, %v5509_v17  ;;  %v5047_v26 = vmul.f32 -1.442695, %v6610_v55  ;;  %v6614_v57 = vadd.f32 %v6577_v6, %v669_v23 }
 0x175   : > { %v5511_v11 = vpop.eup %5510 }
 0x176   : > { %5516 = vrcp.f32 %v905_v30  ;;  %v904_v20 = vadd.f32 1.0, %v5511_v11  ;;  %v5046_v54 = vmul.f32 -1.442695, %v6614_v57 }
 0x177   : > { %5518 = vpow2.f32 %v5047_v26  ;;  %5484 = vset.pattern.permute.xlu1 %v11780_v13  ;;  %v6630_v26 = vpop.permute.xlu1 %3805 }
 0x178   : > { %5520 = vrcp.f32 %v904_v20  ;;  %3853 = vperm.xlu1 %5484, %v6365_v0   ;;  %11800 = vst [vmem:[#allocation79_spill] sm:$0xff] %v6630_v26 }
 0x179   : > { %5522 = vpow2.f32 %v5046_v54  ;;  %v5264_v17 = vpop.f32.mrf.mxu0 }
 0x17a   : > { %v6623_v23 = vadd.f32 %v5264_v17, %v6577_v6 }
 0x17b   : > { %v5513_v59 = vpop.eup %5512  ;;  %v679_v41 = vpop.f32.mrf.mxu0 }
 0x17c   : > { %v907_v12 = vadd.f32 1.0, %v5513_v59  ;;  %v5049_v30 = vmul.f32 -1.442695, %v6623_v23  ;;  %v6628_v11 = vadd.f32 %v6577_v6, %v679_v41  ;;  %5485 = vset.pattern.permute.xlu1 %v11770_v48  ;;  %v6638_v59 = vpop.permute.xlu1 %1619 }
 0x17d   : > { %v5515_v44 = vpop.eup %5514  ;;  %1679 = vperm.xlu1 %5485, %v6417_v18   ;;  %11801 = vst [vmem:[#allocation80_spill] sm:$0xff] %v6638_v59 }
 0x17e   : > { %5524 = vrcp.f32 %v907_v12  ;;  %v906_v54 = vadd.f32 1.0, %v5515_v44  ;;  %v5048_v20 = vmul.f32 -1.442695, %v6628_v11 }
 0x17f   : > { %5526 = vpow2.f32 %v5049_v30 }
 0x180   : > { %5528 = vrcp.f32 %v906_v54 }
 0x181   : > { %5530 = vpow2.f32 %v5048_v20  ;;  %v5267_v0 = vpop.f32.mrf.mxu0  ;;  %5486 = vset.pattern.permute.xlu1 %v11773_v43 }
 0x182   : > { %v6636_v17 = vadd.f32 %v5267_v0, %v6577_v6  ;;  %2288 = vperm.xlu1 %5486, %v6417_v18  }
 0x183   : > { %v5517_v41 = vpop.eup %5516  ;;  %v689_v12 = vpop.f32.mrf.mxu0 }
 0x184   : > { %v5519_v44 = vpop.eup %5518  ;;  %v1001_v33 = vmul.f32 %v5517_v41, %v6582_v2  ;;  %v5051_v51 = vmul.f32 -1.442695, %v6636_v17  ;;  %v6644_v30 = vadd.f32 %v6577_v6, %v689_v12  ;;  %v6652_v41 = vpop.permute.xlu1 %2240 }
 0x185   : > { %v5521_v54 = vpop.eup %5520  ;;  %v909_v20 = vadd.f32 1.0, %v5519_v44  ;;  %11802 = vst [vmem:[#allocation81_spill] sm:$0xff] %v6652_v41 }
 0x186   : > { %v5523_v0 = vpop.eup %5522  ;;  %1042 = vst.msk [vmem:[#allocation2 + $0x28] sm:$0xff] %vm1032_vm1, %v1001_v33  ;;  %v1000_v59 = vmul.f32 %v5521_v54, %v6586_v5  ;;  %5532 = vpow2.f32 %v5051_v51  ;;  %v5050_v7 = vmul.f32 -1.442695, %v6644_v30  ;;  %5487 = vset.pattern.permute.xlu1 %v11770_v48 }
 0x187   : > { %5534 = vrcp.f32 %v909_v20  ;;  %v908_v2 = vadd.f32 1.0, %v5523_v0  ;;  %1684 = vperm.xlu1 %5487, %v6431_v1  }
 0x188   : > { %1041 = vst.msk [vmem:[#allocation2 + $0x20] sm:$0xff] %vm1032_vm1, %v1000_v59  ;;  %5536 = vpow2.f32 %v5050_v7 }
 0x189   : > { %5538 = vrcp.f32 %v908_v2  ;;  %v5270_v12 = vpop.f32.mrf.mxu0 }
 0x18a   : > { %v6656_v33 = vadd.f32 %v5270_v12, %v6577_v6 }
 0x18b   : > { %v5525_v5 = vpop.eup %5524  ;;  %v699_v51 = vpop.f32.mrf.mxu0  ;;  %5488 = vset.pattern.permute.xlu1 %v11773_v43 }
 0x18c   : > { %v5527_v44 = vpop.eup %5526  ;;  %v1003_v54 = vmul.f32 %v5525_v5, %v6594_v28  ;;  %v5053_v20 = vmul.f32 -1.442695, %v6656_v33  ;;  %v6661_v7 = vadd.f32 %v6577_v6, %v699_v51  ;;  %2292 = vperm.xlu1 %5488, %v6431_v1   ;;  %v6668_v28 = vpop.permute.xlu1 %1624 }
 0x18d   : > { %v5529_v59 = vpop.eup %5528  ;;  %v911_v0 = vadd.f32 1.0, %v5527_v44  ;;  %11803 = vst [vmem:[#allocation82_spill] sm:$0xff] %v6668_v28 }
 0x18e   : > { %v5531_v2 = vpop.eup %5530  ;;  %1044 = vst.msk [vmem:[#allocation2 + $0x38] sm:$0xff] %vm1032_vm1, %v1003_v54  ;;  %v1002_v12 = vmul.f32 %v5529_v59, %v6602_v63  ;;  %5540 = vpow2.f32 %v5053_v20  ;;  %v5052_v41 = vmul.f32 -1.442695, %v6661_v7 }
 0x18f   : > { %5542 = vrcp.f32 %v911_v0  ;;  %v910_v5 = vadd.f32 1.0, %v5531_v2 }
 0x190   : > { %1043 = vst.msk [vmem:[#allocation2 + $0x30] sm:$0xff] %vm1032_vm1, %v1002_v12  ;;  %5544 = vpow2.f32 %v5052_v41  ;;  %5489 = vset.pattern.permute.xlu1 %v11780_v13  ;;  %v6681_v12 = vpop.permute.xlu1 %2244 }
 0x191   : > { %5546 = vrcp.f32 %v910_v5  ;;  %v5273_v51 = vpop.f32.mrf.mxu0  ;;  %3861 = vperm.xlu1 %5489, %v6393_v10   ;;  %11804 = vst [vmem:[#allocation83_spill] sm:$0xff] %v6681_v12 }
 0x192   : > { %v6672_v44 = vadd.f32 %v5273_v51, %v6577_v6 }
 0x193   : > { %v5533_v63 = vpop.eup %5532  ;;  %v709_v54 = vpop.f32.mrf.mxu0 }
 0x194   : > { %v5535_v20 = vpop.eup %5534  ;;  %v913_v1 = vadd.f32 1.0, %v5533_v63  ;;  %v5055_v59 = vmul.f32 -1.442695, %v6672_v44  ;;  %v6678_v0 = vadd.f32 %v6577_v6, %v709_v54 }
 0x195   : > { %v5537_v2 = vpop.eup %5536  ;;  %v1005_v41 = vmul.f32 %v5535_v20, %v6610_v55  ;;  %5490 = vset.pattern.permute.xlu1 %v11770_v48  ;;  %v6692_v20 = vpop.permute.xlu1 %3813 }
 0x196   : > { %v5539_v5 = vpop.eup %5538  ;;  %5548 = vrcp.f32 %v913_v1  ;;  %v912_v51 = vadd.f32 1.0, %v5537_v2  ;;  %v5054_v47 = vmul.f32 -1.442695, %v6678_v0  ;;  %1689 = vperm.xlu1 %5490, %v6443_v37   ;;  %11805 = vst [vmem:[#allocation84_spill] sm:$0xff] %v6692_v20 }
 0x197   : > { %1046 = vst.msk [vmem:[#allocation2 + $0x48] sm:$0xff] %vm1032_vm1, %v1005_v41  ;;  %v1004_v10 = vmul.f32 %v5539_v5, %v6614_v57  ;;  %5550 = vpow2.f32 %v5055_v59 }
 0x198   : > { %5552 = vrcp.f32 %v912_v51  ;;  %v6700_v51 = vpop.permute.xlu0 %3183 }
 0x199   : > { %1045 = vst.msk [vmem:[#allocation2 + $0x40] sm:$0xff] %vm1032_vm1, %v1004_v10  ;;  %5554 = vpow2.f32 %v5054_v47  ;;  %v5276_v55 = vpop.f32.mrf.mxu0  ;;  %11806 = vst [vmem:[#allocation85_spill] sm:$0xff] %v6700_v51 }
 0x19a   : > { %v6690_v63 = vadd.f32 %v5276_v55, %v6577_v6  ;;  %5491 = vset.pattern.permute.xlu1 %v11773_v43 }
 0x19b   : > { %v5541_v54 = vpop.eup %5540  ;;  %v719_v1 = vpop.f32.mrf.mxu0  ;;  %2296 = vperm.xlu1 %5491, %v6443_v37  }
 0x19c   : > { %v5543_v2 = vpop.eup %5542  ;;  %v915_v41 = vadd.f32 1.0, %v5541_v54  ;;  %v5057_v57 = vmul.f32 -1.442695, %v6690_v63  ;;  %v6696_v59 = vadd.f32 %v6577_v6, %v719_v1  ;;  %v6707_v1 = vpop.permute.xlu1 %1629 }
 0x19d   : > { %v5545_v5 = vpop.eup %5544  ;;  %v1007_v47 = vmul.f32 %v5543_v2, %v6623_v23  ;;  %11807 = vst [vmem:[#allocation86_spill] sm:$0xff] %v6707_v1 }
 0x19e   : > { %v5547_v10 = vpop.eup %5546  ;;  %5556 = vrcp.f32 %v915_v41  ;;  %v914_v55 = vadd.f32 1.0, %v5545_v5  ;;  %v5056_v3 = vmul.f32 -1.442695, %v6696_v59  ;;  %v6714_v5 = vpop.permute.xlu0 %3211  ;;  %v1082_v31 = vld [vmem:[#allocation2 + $0x48] sm:$0xff] }
 0x19f   : > { %1048 = vst.msk [vmem:[#allocation2 + $0x58] sm:$0xff] %vm1032_vm1, %v1007_v47  ;;  %v1006_v54 = vmul.f32 %v5547_v10, %v6628_v11  ;;  %5558 = vpow2.f32 %v5057_v57  ;;  %5492 = vset.pattern.permute.xlu1 %v11770_v48  ;;  %11808 = vst [vmem:[#allocation87_spill] sm:$0xff] %v6714_v5 }
 0x1a0   : > { %5560 = vrcp.f32 %v914_v55  ;;  %1694 = vperm.xlu1 %5492, %v6457_v40   ;;  %v6725_v5 = vpop.permute.xlu1 %2248  ;;  %v1081_v34 = vld [vmem:[#allocation2 + $0x40] sm:$0xff] }
 0x1a1   : > { %1047 = vst.msk [vmem:[#allocation2 + $0x50] sm:$0xff] %vm1032_vm1, %v1006_v54  ;;  %5562 = vpow2.f32 %v5056_v3  ;;  %v5279_v23 = vpop.f32.mrf.mxu0  ;;  %11809 = vst [vmem:[#allocation88_spill] sm:$0xff] %v6725_v5 }
 0x1a2   : > { %v6711_v2 = vadd.f32 %v5279_v23, %v6577_v6 }
 0x1a3   : > { %v5549_v41 = vpop.eup %5548  ;;  %v729_v47 = vpop.f32.mrf.mxu0 }
 0x1a4   : > { %v5551_v11 = vpop.eup %5550  ;;  %v1009_v57 = vmul.f32 %v5549_v41, %v6636_v17  ;;  %v5059_v10 = vmul.f32 -1.442695, %v6711_v2  ;;  %v6719_v55 = vadd.f32 %v6577_v6, %v729_v47  ;;  %5493 = vset.pattern.permute.xlu1 %v11773_v43  ;;  %v6729_v41 = vpop.permute.xlu0 %3215 }
 0x1a5   : > { %v5553_v3 = vpop.eup %5552  ;;  %v917_v54 = vadd.f32 1.0, %v5551_v11  ;;  %2300 = vperm.xlu1 %5493, %v6457_v40   ;;  %11810 = vst [vmem:[#allocation89_spill] sm:$0xff] %v6729_v41 }
 0x1a6   : > { %v5555_v1 = vpop.eup %5554  ;;  %1050 = vst.msk [vmem:[#allocation2 + $0x68] sm:$0xff] %vm1032_vm1, %v1009_v57  ;;  %v1008_v23 = vmul.f32 %v5553_v3, %v6644_v30  ;;  %5564 = vpow2.f32 %v5059_v10  ;;  %v5058_v14 = vmul.f32 -1.442695, %v6719_v55 }
 0x1a7   : > { %5566 = vrcp.f32 %v917_v54  ;;  %v916_v17 = vadd.f32 1.0, %v5555_v1  ;;  %v6741_v54 = vpop.permute.xlu1 %1634 }
 0x1a8   : > { %1049 = vst.msk [vmem:[#allocation2 + $0x60] sm:$0xff] %vm1032_vm1, %v1008_v23  ;;  %5568 = vpow2.f32 %v5058_v14  ;;  %11811 = vst [vmem:[#allocation90_spill] sm:$0xff] %v6741_v54  ;;  %v6891_v54 = vld [vmem:[%s11327_s3 + $0xc] ss:$0 sm:$0xff] }
 0x1a9   : > { %5570 = vrcp.f32 %v916_v17  ;;  %v5282_v47 = vpop.f32.mrf.mxu0  ;;  %5494 = vset.pattern.permute.xlu1 %v11780_v13  ;;  %11828 = vst [vmem:[#allocation107_spill] sm:$0xff] %v6891_v54 }
 0x1aa   : > { %v6732_v30 = vadd.f32 %v5282_v47, %v6577_v6  ;;  %3869 = vperm.xlu1 %5494, %v6417_v18  }
 0x1ab   : > { %v5557_v11 = vpop.eup %5556  ;;  %v739_v57 = vpop.f32.mrf.mxu0 }
 0x1ac   : > { %v5559_v10 = vpop.eup %5558  ;;  %v1011_v3 = vmul.f32 %v5557_v11, %v6656_v33  ;;  %v5061_v1 = vmul.f32 -1.442695, %v6732_v30  ;;  %v6738_v40 = vadd.f32 %v6577_v6, %v739_v57  ;;  %v6746_v33 = vpop.permute.xlu0 %3219 }
 0x1ad   : > { %v5561_v14 = vpop.eup %5560  ;;  %v919_v23 = vadd.f32 1.0, %v5559_v10  ;;  %11812 = vst [vmem:[#allocation91_spill] sm:$0xff] %v6746_v33  ;;  %v6754_v10 = vpop.permute.xlu1 %2252 }
 0x1ae   : > { %v5563_v17 = vpop.eup %5562  ;;  %1052 = vst.msk [vmem:[#allocation2 + $0x78] sm:$0xff] %vm1032_vm1, %v1011_v3  ;;  %v1010_v47 = vmul.f32 %v5561_v14, %v6661_v7  ;;  %5572 = vpow2.f32 %v5061_v1  ;;  %v5060_v5 = vmul.f32 -1.442695, %v6738_v40  ;;  %5495 = vset.pattern.permute.xlu1 %v11770_v48  ;;  %11813 = vst [vmem:[#allocation92_spill] sm:$0xff] %v6754_v10 }
 0x1af   : > { %5574 = vrcp.f32 %v919_v23  ;;  %v918_v11 = vadd.f32 1.0, %v5563_v17  ;;  %1699 = vperm.xlu1 %5495, %v6470_v9  }
 0x1b0   : > { %1051 = vst.msk [vmem:[#allocation2 + $0x70] sm:$0xff] %vm1032_vm1, %v1010_v47  ;;  %5576 = vpow2.f32 %v5060_v5  ;;  %v6760_v47 = vpop.permute.xlu0 %3223 }
 0x1b1   : > { %5578 = vrcp.f32 %v918_v11  ;;  %v5285_v18 = vpop.f32.mrf.mxu0  ;;  %11814 = vst [vmem:[#allocation93_spill] sm:$0xff] %v6760_v47  ;;  %v6768_v61 = vpop.permute.xlu1 %3821  ;;  %v6896_v47 = vld [vmem:[%s11327_s3 + $0xa] ss:$0 sm:$0xff] }
 0x1b2   : > { %v6752_v57 = vadd.f32 %v5285_v18, %v6577_v6  ;;  %11815 = vst [vmem:[#allocation94_spill] sm:$0xff] %v6768_v61  ;;  %v6878_v61 = vld [vmem:[#allocation2 + $0x60] sm:$0xff]  ;;  %11829 = vst [vmem:[#allocation108_spill] sm:$0xff] %v6896_v47 }
 0x1b3   : > { %v5565_v7 = vpop.eup %5564  ;;  %v749_v3 = vpop.f32.mrf.mxu0  ;;  %5496 = vset.pattern.permute.xlu1 %v11773_v43  ;;  %11827 = vst [vmem:[#allocation106_spill] sm:$0xff] %v6878_v61 }
 0x1b4   : > { %v5567_v1 = vpop.eup %5566  ;;  %v921_v14 = vadd.f32 1.0, %v5565_v7  ;;  %v5063_v23 = vmul.f32 -1.442695, %v6752_v57  ;;  %v6758_v17 = vadd.f32 %v6577_v6, %v749_v3  ;;  %2304 = vperm.xlu1 %5496, %v6470_v9   ;;  %v1490_v3 = vlaneseq  ;;  %v6780_v9 = vld [vmem:[%s11327_s3 + $0x1] ss:$0 sm:$0xff] }
 0x1b5   : > { %v5569_v5 = vpop.eup %5568  ;;  %v1013_v11 = vmul.f32 %v5567_v1, %v6672_v44  ;;  %v6771_v1 = vld [vmem:[#allocation2 + $0x58] sm:$0xff]  ;;  %11816 = vst [vmem:[#allocation95_spill] sm:$0xff] %v6780_v9  ;;  %v6827_v53 = vpop.permute.xlu1 %1639 }
 0x1b6   : > { %v5571_v18 = vpop.eup %5570  ;;  %5580 = vrcp.f32 %v921_v14  ;;  %v920_v33 = vadd.f32 1.0, %v5569_v5  ;;  %v5062_v25 = vmul.f32 -1.442695, %v6758_v17  ;;  %v6793_v5 = vld [vmem:[%s11327_s3] ss:$0 sm:$0xff]  ;;  %v2843_v29 = vmul.f32 %v6857_v22, %v6771_v1  ;;  %v6935_v62 = vld [vmem:[#allocation2 + $0x78] sm:$0xff] }
 0x1b7   : > { %1054 = vst.msk [vmem:[#allocation2 + $0x88] sm:$0xff] %vm1032_vm1, %v1013_v11  ;;  %v1012_v7 = vmul.f32 %v5571_v18, %v6678_v0  ;;  %5582 = vpow2.f32 %v5063_v23  ;;  %11819 = vst [vmem:[#allocation98_spill] sm:$0xff] %v6793_v5  ;;  %v6795_v11 = vshrl.u32 %v1490_v3, 7  ;;  %v1119_v45 = vmul.f32 %v6793_v5, %v1082_v31 }
 0x1b8   : > { %5584 = vrcp.f32 %v920_v33  ;;  %5497 = vset.pattern.permute.xlu1 %v11770_v48  ;;  %v6782_v33 = vpop.permute.xlu0 %3227  ;;  %11833 = vst [vmem:[#allocation112_spill] sm:$0xff] %v6935_v62 }
 0x1b9   : > { %1053 = vst.msk [vmem:[#allocation2 + $0x80] sm:$0xff] %vm1032_vm1, %v1012_v7  ;;  %5586 = vpow2.f32 %v5062_v25  ;;  %v5288_v44 = vpop.f32.mrf.mxu0  ;;  %11817 = vst [vmem:[#allocation96_spill] sm:$0xff] %v6782_v33  ;;  %1704 = vperm.xlu1 %5497, %v6481_v38   ;;  %v6788_v25 = vld [vmem:[%s11327_s3 + $0x2] ss:$0 sm:$0xff]  ;;  %v6797_v7 = vld [vmem:[#allocation2 + $0x50] sm:$0xff]  ;;  %vm1492_vm2 = vcmp.lt.s32.totalorder %v6795_v11, 2 }
 0x1ba   : > { %v6774_v14 = vadd.f32 %v5288_v44, %v6577_v6  ;;  %11818 = vst [vmem:[#allocation97_spill] sm:$0xff] %v6788_v25  ;;  %11820 = vst [vmem:[#allocation99_spill] sm:$0xff] %v6797_v7  ;;  %v2397_v8 = vmul.f32 %v6788_v25, %v1082_v31  ;;  %v1189_v24 = vmul.f32 %v6806_v35, %v6797_v7  ;;  %vm2158_vm3 = vcmp.lt.s32.totalorder %v6795_v11, 1 }
 0x1bb   : > { %v5573_v0 = vpop.eup %5572  ;;  %v759_v23 = vpop.f32.mrf.mxu0  ;;  %vm3137_vm4 = vcmp.lt.s32.totalorder %v6795_v11, 7  ;;  %vm3739_vm5 = vcmp.lt.s32.totalorder %v6795_v11, 6 }
 0x1bc   : > { %v5575_v18 = vpop.eup %5574  ;;  %v923_v44 = vadd.f32 1.0, %v5573_v0  ;;  %v5065_v33 = vmul.f32 -1.442695, %v6774_v14  ;;  %v6801_v58 = vadd.f32 %v6577_v6, %v759_v23  ;;  %v1190_v0 = vmul.f32 %v6806_v35, %v6771_v1  ;;  %v6851_v42 = vpop.permute.xlu0 %3231 }
 0x1bd   : > { %v5577_v50 = vpop.eup %5576  ;;  %v1015_v3 = vmul.f32 %v5575_v18, %v6690_v63  ;;  %v1795_v23 = vmul.f32 %v6780_v9, %v1082_v31  ;;  %v6823_v63 = vld [vmem:[%s11327_s3 + $0x7] ss:$0 sm:$0xff]  ;;  %v1864_v18 = vmul.f32 %v6813_v46, %v6771_v1  ;;  %5498 = vset.pattern.permute.xlu1 %v11773_v43  ;;  %11824 = vst [vmem:[#allocation103_spill] sm:$0xff] %v6851_v42 }
 0x1be   : > { %v5579_v51 = vpop.eup %5578  ;;  %5588 = vrcp.f32 %v923_v44  ;;  %v922_v32 = vadd.f32 1.0, %v5577_v50  ;;  %v5064_v4 = vmul.f32 -1.442695, %v6801_v58  ;;  %11823 = vst [vmem:[#allocation102_spill] sm:$0xff] %v6823_v63  ;;  %v6835_v50 = vld [vmem:[%s11327_s3 + $0x3] ss:$0 sm:$0xff]  ;;  %2308 = vperm.xlu1 %5498, %v6481_v38   ;;  %v1118_v38 = vmul.f32 %v6793_v5, %v1081_v34 }
 0x1bf   : > { %1056 = vst.msk [vmem:[#allocation2 + $0x98] sm:$0xff] %vm1032_vm1, %v1015_v3  ;;  %v1014_v27 = vmul.f32 %v5579_v51, %v6696_v59  ;;  %5590 = vpow2.f32 %v5065_v33  ;;  %v6840_v44 = vld [vmem:[%s11327_s3 + $0x4] ss:$0 sm:$0xff]  ;;  %v2466_v3 = vmul.f32 %v6823_v63, %v6771_v1  ;;  %v1863_v59 = vmul.f32 %v6813_v46, %v6797_v7 }
 0x1c0   : > { %5592 = vrcp.f32 %v922_v32  ;;  %v2774_v51 = vmul.f32 %v6835_v50, %v1082_v31  ;;  %v3376_v33 = vmul.f32 %v6840_v44, %v1082_v31  ;;  %v6862_v32 = vld [vmem:[%s11327_s3 + $0x9] ss:$0 sm:$0xff]  ;;  %v1794_v31 = vmul.f32 %v6780_v9, %v1081_v34  ;;  %v6922_v26 = vpop.permute.xlu0 %3235 }
 0x1c1   : > { %1055 = vst.msk [vmem:[#allocation2 + $0x90] sm:$0xff] %vm1032_vm1, %v1014_v27  ;;  %5594 = vpow2.f32 %v5064_v4  ;;  %v5291_v36 = vpop.f32.mrf.mxu0  ;;  %v6867_v19 = vmul.f32 %v6840_v44, %v1081_v34  ;;  %v6869_v27 = vld [vmem:[#allocation2 + $0x68] sm:$0xff]  ;;  %v1222_v39 = vadd.f32 %v1190_v0, %v1119_v45  ;;  %v3445_v16 = vmul.f32 %v6862_v32, %v6771_v1  ;;  %11831 = vst [vmem:[#allocation110_spill] sm:$0xff] %v6922_v26 }
 0x1c2   : > { %11826 = vst [vmem:[#allocation105_spill] sm:$0xff] %v6869_v27  ;;  %v6872_v4 = vadd.f32 %v5291_v36, %v6577_v6  ;;  %v6883_v34 = vld [vmem:[%s11327_s3 + $0xb] ss:$0 sm:$0xff]  ;;  %v1221_v20 = vadd.f32 %v1189_v24, %v1118_v38  ;;  %v1896_v42 = vadd.f32 %v1864_v18, %v1795_v23  ;;  %v2498_v10 = vadd.f32 %v2466_v3, %v2397_v8 }
 0x1c3   : > { %v5581_v15 = vpop.eup %5580  ;;  %v2775_v36 = vmul.f32 %v6835_v50, %v6797_v7  ;;  %5499 = vset.pattern.permute.xlu1 %v11780_v13  ;;  %v1895_v8 = vadd.f32 %v1863_v59, %v1794_v31  ;;  %v3444_v23 = vmul.f32 %v6862_v32, %v6797_v7  ;;  %v1261_v3 = vmul.f32 %v6896_v47, %v6869_v27  ;;  %v6916_v31 = vld [vmem:[%s11327_s3 + $0xd] ss:$0 sm:$0xff] }
 0x1c4   : > { %v5583_v45 = vpop.eup %5582  ;;  %v1017_v0 = vmul.f32 %v5581_v15, %v6711_v2  ;;  %v5067_v24 = vmul.f32 -1.442695, %v6872_v4  ;;  %v6902_v15 = vpop.permute.xlu1 %2256  ;;  %3877 = vperm.xlu1 %5499, %v6443_v37   ;;  %v1933_v38 = vmul.f32 %v6883_v34, %v6869_v27  ;;  %v2535_v12 = vmul.f32 %v6891_v54, %v6869_v27  ;;  %11830 = vst [vmem:[#allocation109_spill] sm:$0xff] %v6916_v31 }
 0x1c5   : > { %v5585_v18 = vpop.eup %5584  ;;  %v925_v2 = vadd.f32 1.0, %v5583_v45  ;;  %v1260_v37 = vmul.f32 %v6896_v47, %v6878_v61  ;;  %v1932_v45 = vmul.f32 %v6883_v34, %v6878_v61  ;;  %v3446_v60 = vmul.f32 %v6862_v32, %v6878_v61 }
 0x1c6   : > { %v5587_v28 = vpop.eup %5586  ;;  %1058 = vst.msk [vmem:[#allocation2 + $0xa8] sm:$0xff] %vm1032_vm1, %v1017_v0  ;;  %v1016_v59 = vmul.f32 %v5585_v18, %v6719_v55  ;;  %5596 = vpow2.f32 %v5067_v24  ;;  %v2844_v0 = vmul.f32 %v6857_v22, %v6878_v61  ;;  %v2912_v55 = vmul.f32 %v6916_v31, %v6869_v27 }
 0x1c7   : > { %5598 = vrcp.f32 %v925_v2  ;;  %v924_v41 = vadd.f32 1.0, %v5587_v28  ;;  %v2875_v24 = vadd.f32 %v2843_v29, %v2774_v51  ;;  %v3377_v18 = vmul.f32 %v6840_v44, %v6797_v7  ;;  %v6937_v28 = vld [vmem:[#allocation2 + $0x70] sm:$0xff]  ;;  %v6942_v2 = vld [vmem:[%s11327_s3 + $0xe] ss:$0 sm:$0xff] }
 0x1c8   : > { %1057 = vst.msk [vmem:[#allocation2 + $0xa0] sm:$0xff] %vm1032_vm1, %v1016_v59  ;;  %v6933_v21 = vadd.f32 %v3445_v16, %v3376_v33  ;;  %11834 = vst [vmem:[#allocation113_spill] sm:$0xff] %v6942_v2  ;;  %5500 = vset.pattern.permute.xlu1 %v11770_v48  ;;  %v1293_v29 = vadd.f32 %v1261_v3, %v1222_v39  ;;  %v6947_v51 = vmul.f32 %v6793_v5, %v6797_v7  ;;  %v6956_v26 = vpop.permute.xlu1 %1644  ;;  %v6961_v39 = vld [vmem:[%s11327_s3 + $0xf] ss:$0 sm:$0xff] }
 0x1c9   : > { %5600 = vrcp.f32 %v924_v41  ;;  %v6951_v16 = vmul.f32 %v6793_v5, %v6771_v1  ;;  %1709 = vperm.xlu1 %5500, %v6547_v49   ;;  %v1292_v33 = vadd.f32 %v1260_v37, %v1221_v20  ;;  %v1965_v41 = vadd.f32 %v1933_v38, %v1896_v42  ;;  %11837 = vst [vmem:[#allocation116_spill] sm:$0xff] %v6956_v26  ;;  %v6974_v38 = vld [vmem:[%s11327_s3 + $0x10] ss:$0 sm:$0xff] }
 0x1ca   : > { %11832 = vst [vmem:[#allocation111_spill] sm:$0xff] %v6933_v21  ;;  %11835 = vst [vmem:[#allocation114_spill] sm:$0xff] %v6947_v51  ;;  %v2567_v59 = vadd.f32 %v2535_v12, %v2498_v10  ;;  %v3513_v56 = vmul.f32 %v6942_v2, %v6878_v61  ;;  %v1964_v3 = vadd.f32 %v1932_v45, %v1895_v8  ;;  %v6968_v12 = vld [vmem:[#allocation2 + $0x88] sm:$0xff]  ;;  %v6979_v8 = vld [vmem:[%s11327_s3 + $0x11] ss:$0 sm:$0xff] }
 0x1cb   : > { %11836 = vst [vmem:[#allocation115_spill] sm:$0xff] %v6951_v16  ;;  %v5589_v52 = vpop.eup %5588  ;;  %11838 = vst [vmem:[#allocation117_spill] sm:$0xff] %v6961_v39  ;;  %v6963_v7 = vadd.f32 %v2844_v0, %v2775_v36  ;;  %v6965_v1 = vadd.f32 %v2912_v55, %v2875_v24  ;;  %v3476_v20 = vadd.f32 %v3444_v23, %v6867_v19 }
 0x1cc   : > { %v5591_v42 = vpop.eup %5590  ;;  %11840 = vst [vmem:[#allocation119_spill] sm:$0xff] %v6968_v12  ;;  %v1019_v10 = vmul.f32 %v5589_v52, %v6732_v30  ;;  %11841 = vst [vmem:[#allocation120_spill] sm:$0xff] %v6974_v38  ;;  %v1331_v36 = vmul.f32 %v6961_v39, %v6937_v28  ;;  %v1332_v19 = vmul.f32 %v6961_v39, %v6935_v62  ;;  %v6987_v52 = vpop.permute.xlu0 %3239 }
 0x1cd   : > { %11839 = vst [vmem:[#allocation118_spill] sm:$0xff] %v6965_v1  ;;  %v6985_v23 = vadd.f32 %v3446_v60, %v3377_v18  ;;  %v5593_v37 = vpop.eup %5592  ;;  %11843 = vst [vmem:[#allocation122_spill] sm:$0xff] %v6987_v52  ;;  %v927_v30 = vadd.f32 1.0, %v5591_v42  ;;  %v2001_v45 = vmul.f32 %v6974_v38, %v6937_v28  ;;  %v2002_v0 = vmul.f32 %v6974_v38, %v6935_v62 }
 0x1ce   : > { %v2604_v55 = vmul.f32 %v6979_v8, %v6935_v62  ;;  %v5595_v24 = vpop.eup %5594  ;;  %1060 = vst.msk [vmem:[#allocation2 + $0xb8] sm:$0xff] %vm1032_vm1, %v1019_v10  ;;  %v1018_v26 = vmul.f32 %v5593_v37, %v6738_v40  ;;  %v1125_v60 = vmul.f32 %v6793_v5, %v6935_v62  ;;  %5501 = vset.pattern.permute.xlu1 %v11773_v43  ;;  %v769_v40 = vpop.f32.mrf.mxu0  ;;  %v7011_v37 = vld [vmem:[#allocation2 + $0x80] sm:$0xff] }
 0x1cf   : > { %11842 = vst [vmem:[#allocation121_spill] sm:$0xff] %v6985_v23  ;;  %v7002_v18 = vmul.f32 %v6942_v2, %v6869_v27  ;;  %v7004_v42 = vadd.f32 %v3513_v56, %v3476_v20  ;;  %5602 = vrcp.f32 %v927_v30  ;;  %v926_v52 = vadd.f32 1.0, %v5595_v24  ;;  %2312 = vperm.xlu1 %5501, %v6547_v49   ;;  %11846 = vst [vmem:[#allocation125_spill] sm:$0xff] %v7011_v37  ;;  %v7024_v24 = vpop.permute.xlu1 %2260  ;;  %v7029_v49 = vld [vmem:[%s11327_s3 + $0x12] ss:$0 sm:$0xff] }
 0x1d0   : > { %v1196_v16 = vmul.f32 %v6806_v35, %v6968_v12  ;;  %v1801_v10 = vmul.f32 %v6780_v9, %v6935_v62  ;;  %1059 = vst.msk [vmem:[#allocation2 + $0xb0] sm:$0xff] %vm1032_vm1, %v1018_v26  ;;  %v1870_v51 = vmul.f32 %v6813_v46, %v6968_v12  ;;  %v7016_v56 = vadd.f32 %v1331_v36, %v1292_v33  ;;  %v7042_v36 = vld [vmem:[#allocation2 + $0x98] sm:$0xff] }
 0x1d1   : > { %11844 = vst [vmem:[#allocation123_spill] sm:$0xff] %v7002_v18  ;;  %11845 = vst [vmem:[#allocation124_spill] sm:$0xff] %v7004_v42  ;;  %v7018_v20 = vadd.f32 %v1332_v19, %v1293_v29  ;;  %v7022_v30 = vmul.f32 %v6916_v31, %v6937_v28  ;;  %5604 = vrcp.f32 %v926_v52  ;;  %v7031_v26 = vadd.f32 %v2001_v45, %v1964_v3  ;;  %v7040_v29 = vld [vmem:[%s11335_s11 + $0xf8] sm:$0xff]  ;;  %v7059_v45 = vpop.permute.xlu0 %3243 }
 0x1d2   : > { %11847 = vst [vmem:[#allocation126_spill] sm:$0xff] %v7016_v56  ;;  %11849 = vst [vmem:[#allocation128_spill] sm:$0xff] %v7024_v24  ;;  %v7033_v27 = vadd.f32 %v2002_v0, %v1965_v41  ;;  %v7035_v33 = vadd.f32 %v2604_v55, %v2567_v59  ;;  %v7046_v19 = vmul.f32 %v6780_v9, %v6968_v12 }
 0x1d3   : > { %11848 = vst [vmem:[#allocation127_spill] sm:$0xff] %v7018_v20  ;;  %11850 = vst [vmem:[#allocation129_spill] sm:$0xff] %v7029_v49  ;;  %v7050_v52 = vmul.f32 %v6835_v50, %v6968_v12  ;;  %v7053_v41 = vadd.f32 %v6577_v6, %v769_v40  ;;  %v7057_v59 = vmul.f32 %v7029_v49, %v6935_v62  ;;  %v5597_v3 = vpop.eup %5596  ;;  %5502 = vset.pattern.permute.xlu1 %v11770_v48  ;;  %v7070_v40 = vld [vmem:[#allocation2 + $0x90] sm:$0xff] }
 0x1d4   : > { %11851 = vst [vmem:[#allocation130_spill] sm:$0xff] %v7031_v26  ;;  %11852 = vst [vmem:[#allocation131_spill] sm:$0xff] %v7033_v27  ;;  %v1126_v0 = vmul.f32 %v6793_v5, %v7011_v37  ;;  %v1228_v55 = vadd.f32 %v1196_v16, %v1125_v60  ;;  %v1802_v24 = vmul.f32 %v6780_v9, %v7011_v37  ;;  %v5599_v6 = vpop.eup %5598  ;;  %v929_v42 = vadd.f32 1.0, %v5597_v3  ;;  %v7099_v26 = vld [vmem:[#allocation2 + $0xa0] sm:$0xff] }
 0x1d5   : > { %11853 = vst [vmem:[#allocation132_spill] sm:$0xff] %v7035_v33  ;;  %11854 = vst [vmem:[#allocation133_spill] sm:$0xff] %v7042_v36  ;;  %v7067_v61 = vmul.f32 %v6840_v44, %v6968_v12  ;;  %v1902_v33 = vadd.f32 %v1870_v51, %v1801_v10  ;;  %v2781_v16 = vmul.f32 %v6835_v50, %v7011_v37  ;;  %1714 = vperm.xlu1 %5502, %v7040_v29   ;;  %v7086_v10 = vld [vmem:[#allocation2 + $0xa8] sm:$0xff] }
 0x1d6   : > { %11855 = vst [vmem:[#allocation134_spill] sm:$0xff] %v7053_v41  ;;  %11856 = vst [vmem:[#allocation135_spill] sm:$0xff] %v7057_v59  ;;  %v1021_v60 = vmul.f32 %v5599_v6, %v6752_v57  ;;  %v1267_v27 = vmul.f32 %v6896_v47, %v7042_v36  ;;  %v1939_v48 = vmul.f32 %v6883_v34, %v7042_v36  ;;  %v5601_v51 = vpop.eup %5600  ;;  %v7097_v6 = vmul.f32 -1.442695, %v7053_v41 }
 0x1d7   : > { %11857 = vst [vmem:[#allocation136_spill] sm:$0xff] %v7059_v45  ;;  %11858 = vst [vmem:[#allocation137_spill] sm:$0xff] %v7070_v40  ;;  %v2404_v45 = vmul.f32 %v6788_v25, %v7011_v37  ;;  %v7084_v3 = vmul.f32 %v6840_v44, %v7011_v37  ;;  %v1129_v50 = vmul.f32 %v6793_v5, %v7042_v36  ;;  %v7101_v44 = vpop.permute.xlu1 %3829  ;;  %5606 = vrcp.f32 %v929_v42 }
 0x1d8   : > { %v1805_v20 = vmul.f32 %v6780_v9, %v7042_v36  ;;  %v7094_v57 = vmul.f32 %v6813_v46, %v7042_v36  ;;  %11860 = vst [vmem:[#allocation139_spill] sm:$0xff] %v7101_v44  ;;  %1062 = vst.msk [vmem:[#allocation2 + $0xc8] sm:$0xff] %vm1032_vm1, %v1021_v60  ;;  %v1020_v56 = vmul.f32 %v5601_v51, %v6758_v17  ;;  %v7118_v17 = vpop.permute.xlu0 %3247  ;;  %5608 = vpow2.f32 %v7097_v6 }
 0x1d9   : > { %v1197_v62 = vmul.f32 %v6806_v35, %v7070_v40  ;;  %v1871_v23 = vmul.f32 %v6813_v46, %v7070_v40  ;;  %v1128_v12 = vmul.f32 %v6793_v5, %v7070_v40  ;;  %v1804_v41 = vmul.f32 %v6780_v9, %v7070_v40  ;;  %5503 = vset.pattern.permute.xlu1 %v11773_v43 }
 0x1da   : > { %11859 = vst [vmem:[#allocation138_spill] sm:$0xff] %v7094_v57  ;;  %v2473_v44 = vmul.f32 %v6823_v63, %v7070_v40  ;;  %v2850_v60 = vmul.f32 %v6857_v22, %v7070_v40  ;;  %11861 = vst [vmem:[#allocation140_spill] sm:$0xff] %v7118_v17  ;;  %v1200_v42 = vmul.f32 %v6806_v35, %v7086_v10  ;;  %2316 = vperm.xlu1 %5503, %v7040_v29  }
 0x1db   : > { %1061 = vst.msk [vmem:[#allocation2 + $0xc0] sm:$0xff] %vm1032_vm1, %v1020_v56  ;;  %v1299_v51 = vadd.f32 %v1267_v27, %v1228_v55  ;;  %v1971_v5 = vadd.f32 %v1939_v48, %v1902_v33  ;;  %v2851_v9 = vmul.f32 %v6857_v22, %v7042_v36  ;;  %v1199_v25 = vmul.f32 %v6806_v35, %v7099_v26  ;;  %v7138_v22 = vld [vmem:[#allocation2 + $0xb8] sm:$0xff] }
 0x1dc   : > { %v1873_v43 = vmul.f32 %v6813_v46, %v7099_v26  ;;  %v1874_v17 = vmul.f32 %v6813_v46, %v7086_v10  ;;  %v1338_v56 = vmul.f32 %v6961_v39, %v7086_v10  ;;  %v1229_v37 = vadd.f32 %v1197_v62, %v1126_v0  ;;  %v5603_v48 = vpop.eup %5602  ;;  %v7148_v62 = vpop.permute.xlu1 %1649 }
 0x1dd   : > { %v1268_v27 = vmul.f32 %v6896_v47, %v7099_v26  ;;  %v1903_v33 = vadd.f32 %v1871_v23, %v1802_v24  ;;  %v3452_v55 = vmul.f32 %v6862_v32, %v7070_v40  ;;  %v1940_v35 = vmul.f32 %v6883_v34, %v7099_v26  ;;  %11862 = vst [vmem:[#allocation141_spill] sm:$0xff] %v7148_v62  ;;  %v5769_v62 = vld [vmem:[%s11335_s11 + $0xf0] sm:$0xff] }
 0x1de   : > { %v7142_v18 = vadd.f32 %v2473_v44, %v2404_v45  ;;  %v2882_v46 = vadd.f32 %v2850_v60, %v2781_v16  ;;  %v7146_v21 = vmul.f32 %v6862_v32, %v7042_v36  ;;  %v1023_v23 = vmul.f32 %v5603_v48, %v6774_v14  ;;  %5505 = vset.pattern.permute.xlu1 %v11780_v13  ;;  %v5605_v45 = vpop.eup %5604  ;;  %v7157_v44 = vld [vmem:[#allocation2 + $0xb0] sm:$0xff]  ;;  %v5768_v14 = vld [vmem:[%s11335_s11 + $0xe0] sm:$0xff] }
 0x1df   : > { %v1232_v24 = vadd.f32 %v1200_v42, %v1129_v50  ;;  %v2008_v0 = vmul.f32 %v6974_v38, %v7086_v10  ;;  %v7154_v40 = vadd.f32 %v2851_v9, %v7050_v52  ;;  %v1231_v16 = vadd.f32 %v1199_v25, %v1128_v12  ;;  %3885 = vperm.xlu1 %5505, %v5768_v14   ;;  %v7162_v50 = vpop.permute.xlu0 %3251  ;;  %v7170_v12 = vld [vmem:[#allocation2 + $0xc8] sm:$0xff] }
 0x1e0   : > { %v1905_v60 = vadd.f32 %v1873_v43, %v1804_v41  ;;  %v1906_v32 = vadd.f32 %v1874_v17, %v1805_v20  ;;  %v1370_v36 = vadd.f32 %v1338_v56, %v1299_v51  ;;  %11863 = vst [vmem:[#allocation142_spill] sm:$0xff] %v7162_v50  ;;  %1064 = vst.msk [vmem:[#allocation2 + $0xd8] sm:$0xff] %vm1032_vm1, %v1023_v23  ;;  %v7175_v20 = vld [vmem:[%s11327_s3 + $0x14] ss:$0 sm:$0xff]  ;;  %v7192_v43 = vld [vmem:[%s11327_s3 + $0x15] ss:$0 sm:$0xff]  ;;  %v7209_v14 = vpop.permute.xlu1 %2264 }
 0x1e1   : > { %v1022_v9 = vmul.f32 %v5605_v45, %v6801_v58  ;;  %v1271_v52 = vmul.f32 %v6896_v47, %v7138_v22  ;;  %v1300_v42 = vadd.f32 %v1268_v27, %v1229_v37  ;;  %v2919_v25 = vmul.f32 %v6916_v31, %v7099_v26  ;;  %11865 = vst [vmem:[#allocation144_spill] sm:$0xff] %v7192_v43 }
 0x1e2   : > { %v1972_v41 = vadd.f32 %v1940_v35, %v1903_v33  ;;  %v7179_v17 = vmul.f32 %v6891_v54, %v7099_v26  ;;  %v2920_v58 = vmul.f32 %v6916_v31, %v7086_v10  ;;  %v7184_v37 = vadd.f32 %v3452_v55, %v7084_v3  ;;  %v7186_v51 = vld [vmem:[#allocation2 + $0xc0] sm:$0xff]  ;;  %11867 = vst [vmem:[#allocation145_spill] sm:$0xff] %v7209_v14 }
 0x1e3   : > { %11864 = vst [vmem:[#allocation143_spill] sm:$0xff] %v7186_v51  ;;  %1063 = vst.msk [vmem:[#allocation2 + $0xd0] sm:$0xff] %vm1032_vm1, %v1022_v9  ;;  %v1270_v35 = vmul.f32 %v6896_v47, %v7157_v44  ;;  %v1943_v56 = vmul.f32 %v6883_v34, %v7138_v22  ;;  %v1409_v27 = vmul.f32 %v7175_v20, %v7138_v22  ;;  %v11866_v45 = vmov 2   ;;  %v7226_v14 = vpop.permute.xlu0 %3255 }
 0x1e4   : > { %v2040_v3 = vadd.f32 %v2008_v0, %v1971_v5  ;;  %v1942_v33 = vmul.f32 %v6883_v34, %v7157_v44  ;;  %v1339_v55 = vmul.f32 %v6961_v39, %v7157_v44  ;;  %v2009_v48 = vmul.f32 %v6974_v38, %v7157_v44  ;;  %5506 = vset.pattern.permute.xlu1 %v11866_v45  ;;  %v5607_v31 = vpop.eup %5606 }
 0x1e5   : > { %v2077_v23 = vmul.f32 %v7192_v43, %v7138_v22  ;;  %v1303_v9 = vadd.f32 %v1271_v52, %v1232_v24  ;;  %v1342_v5 = vmul.f32 %v6961_v39, %v7170_v12  ;;  %v2012_v0 = vmul.f32 %v6974_v38, %v7170_v12  ;;  %3291 = vperm.xlu1 %5506, %v5769_v62  }
 0x1e6   : > { %v2951_v50 = vadd.f32 %v2919_v25, %v2882_v46  ;;  %v1341_v47 = vmul.f32 %v6961_v39, %v7186_v51  ;;  %v2011_v45 = vmul.f32 %v6974_v38, %v7186_v51  ;;  %v1410_v24 = vmul.f32 %v7175_v20, %v7186_v51  ;;  %11868 = vst [vmem:[#allocation146_spill] sm:$0xff] %v7226_v14 }
 0x1e7   : > { %v2078_v52 = vmul.f32 %v7192_v43, %v7186_v51  ;;  %v1302_v46 = vadd.f32 %v1270_v35, %v1231_v16  ;;  %v1975_v25 = vadd.f32 %v1943_v56, %v1906_v32  ;;  %v1025_v54 = vmul.f32 %v5607_v31, %v6872_v4  ;;  %v7231_v59 = vld [vmem:[#allocation2 + $0xd8] sm:$0xff]  ;;  %v1655_v35 = vpop.permute.xlu1 %1654 }
 0x1e8   : > { %v7229_v62 = vadd.f32 %v1409_v27, %v1370_v36  ;;  %11870 = vst [vmem:[#allocation148_spill] sm:$0xff] %v7231_v59  ;;  %v1974_v39 = vadd.f32 %v1942_v33, %v1905_v60  ;;  %v1371_v1 = vadd.f32 %v1339_v55, %v1300_v42  ;;  %v2041_v63 = vadd.f32 %v2009_v48, %v1972_v41  ;;  %v7265_v55 = vpop.permute.xlu0 %3259 }
 0x1e9   : > { %v7235_v38 = vadd.f32 %v2077_v23, %v2040_v3  ;;  %v1374_v57 = vadd.f32 %v1342_v5, %v1303_v9  ;;  %v1413_v16 = vmul.f32 %v7175_v20, %v7231_v59  ;;  %v2044_v32 = vadd.f32 %v2012_v0, %v1975_v25  ;;  %1066 = vst.msk [vmem:[#allocation2 + $0xe8] sm:$0xff] %vm1032_vm1, %v1025_v54 }
 0x1ea   : > { %11869 = vst [vmem:[#allocation147_spill] sm:$0xff] %v7229_v62  ;;  %v2081_v4 = vmul.f32 %v7192_v43, %v7231_v59  ;;  %3295 = vperm.xlu1 %5506, %v7040_v29   ;;  %v7243_v31 = vld [vmem:[#allocation2 + $0xd0] sm:$0xff]  ;;  %v1373_v36 = vadd.f32 %v1341_v47, %v1302_v46  ;;  %v2043_v60 = vadd.f32 %v2011_v45, %v1974_v39  ;;  %v11419_v33 = vrot.slane %v7229_v62, 6 }
 0x1eb   : > { %11871 = vst [vmem:[#allocation149_spill] sm:$0xff] %v7235_v38  ;;  %11872 = vst [vmem:[#allocation150_spill] sm:$0xff] %v7243_v31  ;;  %v7245_v42 = vadd.f32 %v1410_v24, %v1371_v1  ;;  %v7247_v41 = vadd.f32 %v2078_v52, %v2041_v63  ;;  %v1412_v56 = vmul.f32 %v7175_v20, %v7243_v31  ;;  %v5294_v1 = vpop.f32.mrf.mxu0  ;;  %v11418_v23 = vrot.slane %v7235_v38, 7  ;;  %v7293_v46 = vld [vmem:[%s11327_s3 + $0x13] ss:$0 sm:$0xff] }
 0x1ec   : > { %v7251_v27 = vadd.f32 %v1413_v16, %v1374_v57  ;;  %v2080_v3 = vmul.f32 %v7192_v43, %v7243_v31  ;;  %v7255_v54 = vadd.f32 %v2081_v4, %v2044_v32  ;;  %v7260_v47 = vmul.f32 %v6979_v8, %v7157_v44  ;;  %11877 = vst [vmem:[#allocation155_spill] sm:$0xff] %v7265_v55 }
 0x1ed   : > { %11873 = vst [vmem:[#allocation151_spill] sm:$0xff] %v7245_v42  ;;  %11874 = vst [vmem:[#allocation152_spill] sm:$0xff] %v7247_v41  ;;  %v2952_v63 = vadd.f32 %v2920_v58, %v7154_v40  ;;  %v2988_v39 = vmul.f32 %v7029_v49, %v7157_v44  ;;  %v7267_v57 = vadd.f32 %v1412_v56, %v1373_v36  ;;  %v11416_v40 = vrot.slane %v7245_v42, 6  ;;  %v779_v4 = vpop.f32.mrf.mxu0  ;;  %v2269_v36 = vpop.permute.xlu1 %2268 }
 0x1ee   : > { %11875 = vst [vmem:[#allocation153_spill] sm:$0xff] %v7251_v27  ;;  %11876 = vst [vmem:[#allocation154_spill] sm:$0xff] %v7255_v54  ;;  %v7269_v48 = vadd.f32 %v2080_v3, %v2043_v60  ;;  %v2989_v9 = vmul.f32 %v7029_v49, %v7138_v22  ;;  %5507 = vset.pattern.permute.xlu1 %v11780_v13  ;;  %v11421_v5 = vrot.slane %v7251_v27, 6  ;;  %v11417_v58 = vrot.slane %v7247_v41, 7  ;;  %v7287_v13 = vld [vmem:[%s11327_s3 + $0x17] ss:$0 sm:$0xff] }
 0x1ef   : > { %11878 = vst [vmem:[#allocation156_spill] sm:$0xff] %v7267_v57  ;;  %v3521_v0 = vmul.f32 %v6942_v2, %v7099_v26  ;;  %3897 = vperm.xlu1 %5507, %v7040_v29   ;;  %v11415_v45 = vrot.slane %v7267_v57, 6  ;;  %v11420_v52 = vrot.slane %v7255_v54, 7  ;;  %v3020_v25 = vadd.f32 %v2988_v39, %v2951_v50 }
 0x1f0   : > { %v11422_v24 = vrot.slane %v7269_v48, 7  ;;  %v3057_v29 = vmul.f32 %v7287_v13, %v7186_v51  ;;  %v3485_v16 = vadd.f32 %v7146_v21, %v7067_v61  ;;  %v3522_v32 = vmul.f32 %v6942_v2, %v7086_v10 }
 0x1f1   : > { %v1505_v6 = vsel %vm1492_vm2, %v11415_v45, %v11421_v5  ;;  %v3058_v21 = vmul.f32 %v7287_v13, %v7170_v12  ;;  %v3590_v61 = vmul.f32 %v7293_v46, %v7157_v44  ;;  %v1508_v3 = vsel %vm1492_vm2, %v11419_v33, %v11416_v40  ;;  %v7329_v45 = vpop.permute.xlu0 %3263  ;;  %v11893_v5 = vld [vmem:[#allocation123_spill] sm:$0xff] }
 0x1f2   : > { %v2171_v50 = vsel %vm2158_vm3, %v11422_v24, %v11420_v52  ;;  %v1736_v60 = vmul.f32 %v1655_v35, %v1505_v6  ;;  %v2174_v39 = vsel %vm2158_vm3, %v11418_v23, %v11417_v58  ;;  %11879 = vst [vmem:[#allocation157_spill] sm:$0xff] %v7329_v45  ;;  %v7334_v35 = vld [vmem:[%s11327_s3 + $0x18] ss:$0 sm:$0xff]  ;;  %v3553_v6 = vadd.f32 %v3521_v0, %v7184_v37  ;;  %v11898_v45 = vld [vmem:[#allocation107_spill] sm:$0xff] }
 0x1f3   : > { %v2338_v56 = vmul.f32 %v2269_v36, %v2171_v50  ;;  %v3021_v36 = vadd.f32 %v2989_v9, %v2952_v63  ;;  %v7341_v50 = vld [vmem:[%s11795_s2] ss:$0 sm:$0xff]  ;;  %v7351_v33 = vadd.f32 %v3057_v29, %v3020_v25  ;;  %v3591_v63 = vmul.f32 %v7293_v46, %v7138_v22 }
 0x1f4   : > { %11880 = vst [vmem:[#allocation158_spill] sm:$0xff] %v7341_v50  ;;  %v7344_v40 = vadd.f32 %v7341_v50, %v5294_v1  ;;  %v7347_v58 = vadd.f32 %v7341_v50, %v779_v4  ;;  %v3659_v37 = vmul.f32 %v7334_v35, %v7186_v51  ;;  %v1733_v9 = vmul.f32 %v6827_v53, %v1508_v3  ;;  %v7364_v4 = vld [vmem:[%s11327_s3 + $0x16] ss:$0 sm:$0xff] }
 0x1f5   : > { %v7349_v23 = vadd.f32 %v2338_v56, %v1736_v60  ;;  %11881 = vst [vmem:[#allocation159_spill] sm:$0xff] %v7351_v33  ;;  %v2335_v0 = vmul.f32 %v6902_v15, %v2174_v39  ;;  %11882 = vst [vmem:[#allocation160_spill] sm:$0xff] %v7364_v4  ;;  %v7366_v25 = vadd.f32 %v3058_v21, %v3021_v36 }
 0x1f6   : > { %v5069_v1 = vmul.f32 -1.442695, %v7344_v40  ;;  %v5068_v52 = vmul.f32 -1.442695, %v7347_v58  ;;  %v3554_v29 = vadd.f32 %v3522_v32, %v3485_v16  ;;  %v3622_v60 = vadd.f32 %v3590_v61, %v3553_v6  ;;  %v7380_v32 = vpop.permute.xlu0 %3267  ;;  %v11886_v6 = vld [vmem:[#allocation138_spill] sm:$0xff] }
 0x1f7   : > { %11883 = vst [vmem:[#allocation161_spill] sm:$0xff] %v7366_v25  ;;  %v3660_v56 = vmul.f32 %v7334_v35, %v7170_v12  ;;  %v1941_v53 = vmul.f32 %v6883_v34, %v7086_v10  ;;  %v2574_v15 = vadd.f32 %v7179_v17, %v7142_v18  ;;  %v2680_v3 = vmul.f32 %v7364_v4, %v7186_v51 }
 0x1f8   : > { %5610 = vpow2.f32 %v5069_v1  ;;  %v3623_v39 = vadd.f32 %v3591_v63, %v3554_v29  ;;  %v7378_v16 = vadd.f32 %v3659_v37, %v3622_v60  ;;  %11885 = vst [vmem:[#allocation163_spill] sm:$0xff] %v7380_v32  ;;  %v2367_v61 = vadd.f32 %v2335_v0, %v1733_v9  ;;  %v11887_v63 = vld [vmem:[#allocation120_spill] sm:$0xff]  ;;  %v11889_v9 = vld [vmem:[#allocation102_spill] sm:$0xff]  ;;  %v11897_v32 = vld [vmem:[#allocation97_spill] sm:$0xff] }
 0x1f9   : > { %5612 = vpow2.f32 %v5068_v52  ;;  %v2643_v36 = vadd.f32 %v7260_v47, %v2574_v15  ;;  %v7385_v18 = vadd.f32 %v7022_v30, %v6963_v7  ;;  %v3515_v17 = vmul.f32 %v6942_v2, %v6937_v28  ;;  %v11890_v60 = vld [vmem:[#allocation118_spill] sm:$0xff]  ;;  %v11891_v7 = vld [vmem:[#allocation135_spill] sm:$0xff] }
 0x1fa   : > { %11884 = vst [vmem:[#allocation162_spill] sm:$0xff] %v7378_v16  ;;  %v1904_v1 = vadd.f32 %v11886_v6, %v7046_v19  ;;  %v2010_v37 = vmul.f32 %v11887_v63, %v7138_v22  ;;  %v11424_v52 = vrot.slane %v7366_v25, 1  ;;  %v7394_v29 = vadd.f32 %v3660_v56, %v3623_v39  ;;  %v11892_v15 = vld [vmem:[#allocation111_spill] sm:$0xff]  ;;  %v5609_v19 = vpop.eup %5608 }
 0x1fb   : > { %v2476_v47 = vmul.f32 %v11889_v9, %v7086_v10  ;;  %v2712_v0 = vadd.f32 %v2680_v3, %v2643_v36  ;;  %v7400_v30 = vadd.f32 %v11891_v7, %v11890_v60  ;;  %v7404_v24 = vadd.f32 %v11893_v5, %v11892_v15  ;;  %v11895_v7 = vld [vmem:[#allocation125_spill] sm:$0xff] }
 0x1fc   : > { %11888 = vst [vmem:[#allocation138_spill] sm:$0xff] %v7394_v29  ;;  %v1973_v6 = vadd.f32 %v1941_v53, %v1904_v1  ;;  %v2079_v21 = vmul.f32 %v7192_v43, %v7170_v12  ;;  %v11894_v56 = vrot.slane %v7351_v33, 1  ;;  %v928_v60 = vadd.f32 1.0, %v5609_v19  ;;  %v11896_v15 = vld [vmem:[#allocation133_spill] sm:$0xff] }
 0x1fd   : > { %v2744_v36 = vadd.f32 %v2712_v0, %v2367_v61  ;;  %v1402_v5 = vmul.f32 %v7175_v20, %v11895_v7  ;;  %v2070_v53 = vmul.f32 %v7192_v43, %v11895_v7  ;;  %v2407_v55 = vmul.f32 %v11897_v32, %v11896_v15  ;;  %v11901_v0 = vld [vmem:[#allocation119_spill] sm:$0xff] }
 0x1fe   : > { %v3152_v3 = vsel %vm3137_vm4, %v11894_v56, %v11424_v52  ;;  %v2042_v1 = vadd.f32 %v2010_v37, %v1973_v6  ;;  %v2545_v14 = vmul.f32 %v11898_v45, %v7138_v22  ;;  %v11433_v25 = vrot.slane %v7394_v29, 2  ;;  %v7424_v56 = vpop.permute.xlu0 %3271  ;;  %v11900_v52 = vld [vmem:[#allocation110_spill] sm:$0xff]  ;;  %v5297_v37 = vpop.f32.mrf.mxu0 }
 0x1ff   : > { %11899 = vst [vmem:[#allocation102_spill] sm:$0xff] %v7424_v56  ;;  %v3314_v61 = vmul.f32 %v11900_v52, %v3152_v3  ;;  %5614 = vrcp.f32 %v928_v60  ;;  %v1403_v19 = vmul.f32 %v7175_v20, %v11901_v0  ;;  %v2071_v39 = vmul.f32 %v7192_v43, %v11901_v0  ;;  %v11904_v60 = vld [vmem:[#allocation121_spill] sm:$0xff]  ;;  %v11906_v29 = vld [vmem:[#allocation126_spill] sm:$0xff] }
 0x200   : > { %v7431_v6 = vadd.f32 %v2079_v21, %v2042_v1  ;;  %v2508_v41 = vadd.f32 %v2476_v47, %v2407_v55  ;;  %v2614_v33 = vmul.f32 %v6979_v8, %v7170_v12  ;;  %v11903_v56 = vrot.slane %v7378_v16, 2  ;;  %v11905_v21 = vld [vmem:[#allocation112_spill] sm:$0xff]  ;;  %v3838_v1 = vpop.permute.xlu1 %3837  ;;  %v11908_v16 = vld [vmem:[#allocation130_spill] sm:$0xff] }
 0x201   : > { %v3346_v3 = vadd.f32 %v3314_v61, %v2744_v36  ;;  %v7442_v42 = vadd.f32 %v3515_v17, %v11904_v60  ;;  %v7446_v38 = vmul.f32 %v7293_v46, %v6937_v28  ;;  %v7450_v55 = vmul.f32 %v7293_v46, %v11905_v21  ;;  %v11911_v61 = vld [vmem:[#allocation100_spill] sm:$0xff] }
 0x202   : > { %11902 = vst [vmem:[#allocation118_spill] sm:$0xff] %v7431_v6  ;;  %v3754_v52 = vsel %vm3739_vm5, %v11903_v56, %v11433_v25  ;;  %v2577_v47 = vadd.f32 %v2545_v14, %v2508_v41  ;;  %v7453_v62 = vadd.f32 %v1402_v5, %v11906_v29  ;;  %v7456_v57 = vadd.f32 %v2070_v53, %v11908_v16  ;;  %v11912_v25 = vld [vmem:[#allocation127_spill] sm:$0xff]  ;;  %v7473_v27 = vpop.permute.xlu0 %3275 }
 0x203   : > { %v7459_v36 = vadd.f32 %v7341_v50, %v5297_v37  ;;  %v2683_v17 = vmul.f32 %v7364_v4, %v7231_v59  ;;  %v3916_v56 = vmul.f32 %v3838_v1, %v3754_v52  ;;  %v1201_v60 = vmul.f32 %v11911_v61, %v7157_v44  ;;  %v11914_v5 = vld [vmem:[#allocation131_spill] sm:$0xff]  ;;  %11916 = vst [vmem:[#allocation107_spill] sm:$0xff] %v7473_v27  ;;  %v11917_v52 = vld [vmem:[#allocation98_spill] sm:$0xff]  ;;  %v11918_v59 = vld [vmem:[#allocation108_spill] sm:$0xff] }
 0x204   : > { %11907 = vst [vmem:[#allocation135_spill] sm:$0xff] %v7453_v62  ;;  %11909 = vst [vmem:[#allocation111_spill] sm:$0xff] %v7456_v57  ;;  %v7466_v54 = vadd.f32 %v1403_v19, %v11912_v25  ;;  %v2646_v29 = vadd.f32 %v2614_v33, %v2577_v47  ;;  %v7470_v16 = vadd.f32 %v2071_v39, %v11914_v5  ;;  %v11448_v41 = vrot.slane %v7453_v62, 6  ;;  %v789_v39 = vpop.f32.mrf.mxu0  ;;  %v11919_v27 = vld [vmem:[#allocation101_spill] sm:$0xff] }
 0x205   : > { %11910 = vst [vmem:[#allocation123_spill] sm:$0xff] %v7459_v36  ;;  %v5611_v14 = vpop.eup %5610  ;;  %v5071_v53 = vmul.f32 -1.442695, %v7459_v36  ;;  %v3948_v2 = vadd.f32 %v3916_v56, %v3346_v3  ;;  %v1130_v1 = vmul.f32 %v11917_v52, %v7099_v26  ;;  %v1272_v25 = vmul.f32 %v11918_v59, %v7186_v51 }
 0x206   : > { %11913 = vst [vmem:[#allocation125_spill] sm:$0xff] %v7466_v54  ;;  %11915 = vst [vmem:[#allocation97_spill] sm:$0xff] %v7470_v16  ;;  %v5613_v37 = vpop.eup %5612  ;;  %v931_v19 = vadd.f32 1.0, %v5611_v14  ;;  %v2715_v47 = vadd.f32 %v2683_v17, %v2646_v29  ;;  %v1875_v3 = vmul.f32 %v11919_v27, %v7157_v44  ;;  %v11447_v56 = vrot.slane %v7466_v54, 6  ;;  %v11921_v17 = vld [vmem:[#allocation117_spill] sm:$0xff]  ;;  %v11922_v29 = vld [vmem:[#allocation95_spill] sm:$0xff] }
 0x207   : > { %v930_v43 = vadd.f32 1.0, %v5613_v37  ;;  %5616 = vpow2.f32 %v5071_v53  ;;  %v1233_v5 = vadd.f32 %v1201_v60, %v1130_v1  ;;  %v11450_v36 = vrot.slane %v7470_v16, 7  ;;  %v7490_v37 = vld [vmem:[%s11328_s4] ss:$0 sm:$0xff] }
 0x208   : > { %5618 = vrcp.f32 %v931_v19  ;;  %v2982_v14 = vmul.f32 %v7029_v49, %v11895_v7  ;;  %11920 = vst [vmem:[#allocation110_spill] sm:$0xff] %v7490_v37  ;;  %v1343_v60 = vmul.f32 %v11921_v17, %v7243_v31  ;;  %v1806_v1 = vmul.f32 %v11922_v29, %v7099_v26  ;;  %v11926_v29 = vld [vmem:[#allocation137_spill] sm:$0xff] }
 0x209   : > { %5620 = vrcp.f32 %v930_v43  ;;  %v1304_v53 = vadd.f32 %v1272_v25, %v1233_v5  ;;  %v7497_v43 = vadd.f32 %v7341_v50, %v789_v39  ;;  %v7500_v19 = vadd.f32 %v7490_v37, %v3948_v2  ;;  %v7516_v50 = vpop.permute.xlu0 %3279  ;;  %v11930_v49 = vld [vmem:[#allocation69_spill] sm:$0xff] }
 0x20a   : > { %v1515_v33 = vsel %vm1492_vm2, %v11448_v41, %v11447_v56  ;;  %v11925_v25 = vrot.slane %v7456_v57, 7  ;;  %v3051_v39 = vmul.f32 %v7287_v13, %v11926_v29  ;;  %11927 = vst [vmem:[#allocation112_spill] sm:$0xff] %v7516_v50  ;;  %v1907_v2 = vadd.f32 %v1875_v3, %v1806_v1  ;;  %v11928_v1 = vld [vmem:[#allocation134_spill] sm:$0xff]  ;;  %v11929_v50 = vld [vmem:[#allocation68_spill] sm:$0xff] }
 0x20b   : > { %11923 = vst [vmem:[#allocation119_spill] sm:$0xff] %v7497_v43  ;;  %11924 = vst [vmem:[#allocation121_spill] sm:$0xff] %v7500_v19  ;;  %v1944_v54 = vmul.f32 %v6883_v34, %v7186_v51  ;;  %v2013_v62 = vmul.f32 %v11887_v63, %v7243_v31  ;;  %v5070_v56 = vmul.f32 -1.442695, %v7497_v43  ;;  %v2408_v16 = vmul.f32 %v11897_v32, %v7099_v26 }
 0x20c   : > { %v2181_v5 = vsel %vm2158_vm3, %v11925_v25, %v11450_v36  ;;  %v5615_v41 = vpop.eup %5614  ;;  %v2477_v25 = vmul.f32 %v11889_v9, %v7157_v44  ;;  %v3014_v36 = vadd.f32 %v2982_v14, %v7385_v18  ;;  %v3050_v3 = vmul.f32 %v7287_v13, %v11901_v0 }
 0x20d   : > { %v1024_v57 = vmul.f32 %v5615_v41, %v11928_v1  ;;  %v1726_v37 = vmul.f32 %v11929_v50, %v1515_v33  ;;  %v2328_v63 = vmul.f32 %v11930_v49, %v2181_v5  ;;  %v3584_v43 = vmul.f32 %v7293_v46, %v11895_v7 }
 0x20e   : > { %v5116_v15 = vmul.f32 -1.442695, %v7500_v19  ;;  %v2546_v32 = vmul.f32 %v11898_v45, %v7186_v51  ;;  %v7538_v9 = vadd.f32 %v3051_v39, %v3014_v36  ;;  %5622 = vpow2.f32 %v5070_v56  ;;  %v7561_v39 = vpop.permute.xlu0 %3283 }
 0x20f   : > { %v11932_v18 = vrot.slane %v7269_v48, 7  ;;  %v11933_v14 = vrot.slane %v7431_v6, 7  ;;  %v7549_v49 = vadd.f32 %v2715_v47, %v7349_v23  ;;  %1065 = vst.msk [vmem:[#allocation2 + $0xe0] sm:$0xff] %vm1032_vm1, %v1024_v57  ;;  %v2673_v41 = vmul.f32 %v7364_v4, %v11901_v0  ;;  %11937 = vst [vmem:[#allocation131_spill] sm:$0xff] %v7561_v39 }
 0x210   : > { %11931 = vst [vmem:[#allocation126_spill] sm:$0xff] %v7538_v9  ;;  %v3653_v36 = vmul.f32 %v7334_v35, %v11926_v29  ;;  %v7556_v33 = vadd.f32 %v1343_v60, %v1304_v53  ;;  %v1976_v48 = vadd.f32 %v1944_v54, %v1907_v2  ;;  %v2509_v56 = vadd.f32 %v2477_v25, %v2408_v16  ;;  %v11938_v60 = vld [vmem:[#allocation132_spill] sm:$0xff] }
 0x211   : > { %v7546_v50 = vsel %vm2158_vm3, %v11933_v14, %v11932_v18  ;;  %11935 = vst [vmem:[#allocation100_spill] sm:$0xff] %v7549_v49  ;;  %v7559_v5 = vadd.f32 %v3050_v3, %v7400_v30  ;;  %v7565_v23 = vmul.f32 %v6979_v8, %v7243_v31  ;;  %v2360_v57 = vadd.f32 %v2328_v63, %v1726_v37 }
 0x212   : > { %11934 = vst [vmem:[#allocation130_spill] sm:$0xff] %v7546_v50  ;;  %v3616_v47 = vadd.f32 %v3584_v43, %v7442_v42  ;;  %v3652_v1 = vmul.f32 %v7334_v35, %v11901_v0  ;;  %5624 = vpow2.f32 %v5116_v15  ;;  %v7570_v53 = vadd.f32 %v2013_v62, %v1976_v48  ;;  %v11940_v62 = vld [vmem:[#allocation124_spill] sm:$0xff] }
 0x213   : > { %11936 = vst [vmem:[#allocation127_spill] sm:$0xff] %v7559_v5  ;;  %v7572_v54 = vadd.f32 %v2546_v32, %v2509_v56  ;;  %v11458_v30 = vrot.slane %v7538_v9, 1  ;;  %v2705_v2 = vadd.f32 %v2673_v41, %v11938_v60  ;;  %v3615_v25 = vadd.f32 %v7450_v55, %v7404_v24  ;;  %v11941_v32 = vld [vmem:[#allocation106_spill] sm:$0xff]  ;;  %v11942_v55 = vld [vmem:[#allocation105_spill] sm:$0xff]  ;;  %v11955_v50 = vld [vmem:[#allocation148_spill] sm:$0xff] }
 0x214   : > { %v5617_v16 = vpop.eup %5616  ;;  %v3651_v63 = vmul.f32 %v7334_v35, %v11895_v7  ;;  %v7580_v42 = vadd.f32 %v3653_v36, %v3616_v47  ;;  %v11459_v15 = vrot.slane %v7559_v5, 1  ;;  %v3614_v43 = vadd.f32 %v7446_v38, %v11940_v62  ;;  %v11946_v62 = vld [vmem:[#allocation78_spill] sm:$0xff]  ;;  %v11952_v5 = vld [vmem:[#allocation120_spill] sm:$0xff] }
 0x215   : > { %v5619_v37 = vpop.eup %5618  ;;  %v933_v3 = vadd.f32 1.0, %v5617_v16  ;;  %v1191_v18 = vmul.f32 %v11911_v61, %v11941_v32  ;;  %v2737_v48 = vadd.f32 %v2705_v2, %v2360_v57  ;;  %v3684_v24 = vadd.f32 %v3652_v1, %v3615_v25  ;;  %v11945_v2 = vld [vmem:[#allocation114_spill] sm:$0xff] }
 0x216   : > { %11939 = vst [vmem:[#allocation98_spill] sm:$0xff] %v7580_v42  ;;  %v5621_v14 = vpop.eup %5620  ;;  %v1027_v41 = vmul.f32 %v5619_v37, %v7344_v40  ;;  %v1192_v56 = vmul.f32 %v11911_v61, %v11942_v55  ;;  %v3159_v38 = vsel %vm3137_vm4, %v11459_v15, %v11458_v30  ;;  %v1262_v47 = vmul.f32 %v11918_v59, %v6937_v28  ;;  %v7600_v40 = vpop.permute.xlu0 %3287  ;;  %v7641_v15 = vld [vmem:[#allocation2 + $0x58] sm:$0xff] }
 0x217   : > { %v1026_v36 = vmul.f32 %v5621_v14, %v7347_v58  ;;  %5626 = vrcp.f32 %v933_v3  ;;  %11943 = vst [vmem:[#allocation108_spill] sm:$0xff] %v7600_v40  ;;  %v7602_v57 = vadd.f32 %v3651_v63, %v3614_v43  ;;  %v11460_v1 = vrot.slane %v7580_v42, 2  ;;  %v11951_v40 = vld [vmem:[#allocation133_spill] sm:$0xff] }
 0x218   : > { %1068 = vst.msk [vmem:[#allocation2 + $0xf8] sm:$0xff] %vm1032_vm1, %v1027_v41  ;;  %v1131_v58 = vmul.f32 %v11917_v52, %v7086_v10  ;;  %v1202_v16 = vmul.f32 %v11911_v61, %v7138_v22  ;;  %v1273_v60 = vmul.f32 %v11918_v59, %v7170_v12  ;;  %v1223_v25 = vadd.f32 %v1191_v18, %v11945_v2  ;;  %v11947_v52 = vld [vmem:[#allocation115_spill] sm:$0xff] }
 0x219   : > { %11944 = vst [vmem:[#allocation101_spill] sm:$0xff] %v7602_v57  ;;  %1067 = vst.msk [vmem:[#allocation2 + $0xf0] sm:$0xff] %vm1032_vm1, %v1026_v36  ;;  %v1263_v37 = vmul.f32 %v11918_v59, %v11905_v21  ;;  %v1333_v63 = vmul.f32 %v11921_v17, %v11895_v7  ;;  %v3307_v43 = vmul.f32 %v11946_v62, %v3159_v38  ;;  %v3716_v3 = vrot.slane %v3684_v24, 2  ;;  %v11949_v38 = vld [vmem:[#allocation99_spill] sm:$0xff] }
 0x21a   : > { %v1224_v14 = vadd.f32 %v1192_v56, %v11947_v52  ;;  %v1865_v61 = vmul.f32 %v11919_v27, %v11941_v32  ;;  %v1294_v41 = vadd.f32 %v1262_v47, %v1223_v25  ;;  %v1334_v36 = vmul.f32 %v11921_v17, %v11901_v0  ;;  %v7635_v56 = vld [vmem:[%s11327_s3 + $0x1] ss:$0 sm:$0xff]  ;;  %v3810_v19 = vpop.permute.xlu0 %3809 }
 0x21b   : > { %v1404_v18 = vmul.f32 %v7175_v20, %v11926_v29  ;;  %v1866_v59 = vmul.f32 %v11919_v27, %v11942_v55  ;;  %v5623_v2 = vpop.eup %5622  ;;  %v3761_v24 = vsel %vm3739_vm5, %v3716_v3, %v11460_v1  ;;  %11948 = vst [vmem:[#allocation117_spill] sm:$0xff] %v7635_v56  ;;  %v1796_v47 = vmul.f32 %v7635_v56, %v11949_v38  ;;  %v7645_v1 = vld [vmem:[#allocation2 + $0xe8] sm:$0xff] }
 0x21c   : > { %v1934_v25 = vmul.f32 %v6883_v34, %v6937_v28  ;;  %v932_v27 = vadd.f32 1.0, %v5623_v2  ;;  %v1295_v62 = vadd.f32 %v1263_v37, %v1224_v14  ;;  %v1365_v52 = vadd.f32 %v1333_v63, %v1294_v41  ;;  %11950 = vst [vmem:[#allocation95_spill] sm:$0xff] %v7645_v1 }
 0x21d   : > { %v1797_v30 = vmul.f32 %v7641_v15, %v7635_v56  ;;  %v1405_v39 = vmul.f32 %v7175_v20, %v11951_v40  ;;  %v1897_v9 = vadd.f32 %v1865_v61, %v1796_v47  ;;  %v1935_v38 = vmul.f32 %v6883_v34, %v11905_v21  ;;  %v11954_v61 = vld [vmem:[#allocation144_spill] sm:$0xff] }
 0x21e   : > { %v2003_v2 = vmul.f32 %v11952_v5, %v11895_v7  ;;  %v3339_v37 = vadd.f32 %v3307_v43, %v2737_v48  ;;  %v1366_v63 = vadd.f32 %v1334_v36, %v1295_v62  ;;  %v7653_v14 = vadd.f32 %v1404_v18, %v1365_v52 }
 0x21f   : > { %v1898_v41 = vadd.f32 %v1866_v59, %v1797_v30  ;;  %v7655_v49 = vpop.eup %5624  ;;  %5628 = vrcp.f32 %v932_v27  ;;  %v1966_v6 = vadd.f32 %v1934_v25, %v1897_v9  ;;  %v2004_v42 = vmul.f32 %v11952_v5, %v11901_v0  ;;  %v11960_v27 = vld [vmem:[#allocation123_spill] sm:$0xff] }
 0x220   : > { %11953 = vst [vmem:[#allocation137_spill] sm:$0xff] %v7653_v14  ;;  %v2072_v47 = vmul.f32 %v11954_v61, %v11926_v29  ;;  %v3909_v31 = vmul.f32 %v3810_v19, %v3761_v24  ;;  %v1234_v34 = vadd.f32 %v1202_v16, %v1131_v58  ;;  %v1344_v51 = vmul.f32 %v11921_v17, %v11955_v50  ;;  %v11958_v16 = vld [vmem:[#allocation104_spill] sm:$0xff] }
 0x221   : > { %v7665_v48 = vmul.f32 %v7175_v20, %v7645_v1  ;;  %v7667_v30 = vadd.f32 %v1405_v39, %v1366_v63  ;;  %v1967_v43 = vadd.f32 %v1935_v38, %v1898_v41  ;;  %v2035_v36 = vadd.f32 %v2003_v2, %v1966_v6  ;;  %v7716_v63 = vld [vmem:[#allocation2 + $0x68] sm:$0xff] }
 0x222   : > { %v2073_v9 = vmul.f32 %v11954_v61, %v11951_v40  ;;  %v11957_v5 = vrot.slane %v7602_v57, 2  ;;  %v7677_v58 = vadd.f32 %v3909_v31, %v3339_v37  ;;  %v1305_v17 = vadd.f32 %v1273_v60, %v1234_v34  ;;  %v7692_v31 = vld [vmem:[%s11327_s3 + $0x3] ss:$0 sm:$0xff]  ;;  %11963 = vst [vmem:[#allocation132_spill] sm:$0xff] %v7716_v63 }
 0x223   : > { %11956 = vst [vmem:[#allocation134_spill] sm:$0xff] %v7667_v30  ;;  %v2846_v18 = vmul.f32 %v11958_v16, %v6937_v28  ;;  %v11471_v39 = vrot.slane %v7653_v14, 6  ;;  %v2036_v24 = vadd.f32 %v2004_v42, %v1967_v43  ;;  %v7682_v6 = vadd.f32 %v2072_v47, %v2035_v36  ;;  %v11964_v43 = vld [vmem:[#allocation129_spill] sm:$0xff] }
 0x224   : > { %v7675_v19 = vsel %vm3739_vm5, %v11957_v5, %v3716_v3  ;;  %v5627_v59 = vpop.eup %5626  ;;  %v2845_v25 = vmul.f32 %v11958_v16, %v11942_v55  ;;  %v7687_v52 = vadd.f32 %v1344_v51, %v1305_v17  ;;  %v2777_v60 = vmul.f32 %v7692_v31, %v11941_v32  ;;  %v11961_v3 = vld [vmem:[#allocation109_spill] sm:$0xff]  ;;  %v7704_v51 = vld [vmem:[%s11327_s3 + $0x2] ss:$0 sm:$0xff]  ;;  %v7714_v32 = vld [vmem:[%s11327_s3 + $0x7] ss:$0 sm:$0xff] }
 0x225   : > { %11959 = vst [vmem:[#allocation68_spill] sm:$0xff] %v7682_v6  ;;  %v1029_v62 = vmul.f32 %v5627_v59, %v11960_v27  ;;  %v2915_v42 = vmul.f32 %v11961_v3, %v11895_v7  ;;  %v11470_v38 = vrot.slane %v7667_v30, 6  ;;  %v7699_v2 = vadd.f32 %v2073_v9, %v2036_v24  ;;  %v7740_v27 = vld [vmem:[%s11327_s3 + $0x9] ss:$0 sm:$0xff] }
 0x226   : > { %v2399_v55 = vmul.f32 %v7704_v51, %v7641_v15  ;;  %v2776_v37 = vmul.f32 %v7692_v31, %v7641_v15  ;;  %v2468_v41 = vmul.f32 %v7716_v63, %v7714_v32  ;;  %v2878_v47 = vadd.f32 %v2846_v18, %v2777_v60  ;;  %v5300_v60 = vpop.f32.mrf.mxu0 }
 0x227   : > { %11962 = vst [vmem:[#allocation69_spill] sm:$0xff] %v7699_v2  ;;  %1070 = vst.msk [vmem:[#allocation2 + $0x108] sm:$0xff] %vm1032_vm1, %v1029_v62  ;;  %v2914_v34 = vmul.f32 %v11961_v3, %v11905_v21  ;;  %v2984_v36 = vmul.f32 %v11964_v43, %v11926_v29  ;;  %v1513_v9 = vsel %vm1492_vm2, %v11471_v39, %v11470_v38  ;;  %v7758_v38 = vld [vmem:[#allocation2 + $0x60] sm:$0xff]  ;;  %v11968_v39 = vld [vmem:[#allocation113_spill] sm:$0xff]  ;;  %v11970_v14 = vrot.slane %v7699_v2, 7 }
 0x228   : > { %v2537_v17 = vmul.f32 %v11898_v45, %v11905_v21  ;;  %v2877_v16 = vadd.f32 %v2845_v25, %v2776_v37  ;;  %v2947_v18 = vadd.f32 %v2915_v42, %v2878_v47  ;;  %v2983_v59 = vmul.f32 %v11964_v43, %v11901_v0  ;;  %v7751_v37 = vld [vmem:[#allocation2 + $0xe0] sm:$0xff]  ;;  %11967 = vst [vmem:[#allocation105_spill] sm:$0xff] %v7758_v38  ;;  %v11969_v3 = vld [vmem:[#allocation76_spill] sm:$0xff] }
 0x229   : > { %v3053_v24 = vmul.f32 %v7287_v13, %v7099_v26  ;;  %v3448_v62 = vmul.f32 %v7740_v27, %v6937_v28  ;;  %v2606_v45 = vmul.f32 %v6979_v8, %v11901_v0  ;;  %v3052_v25 = vmul.f32 %v7287_v13, %v11951_v40  ;;  %11965 = vst [vmem:[#allocation124_spill] sm:$0xff] %v7751_v37  ;;  %v7756_v28 = vld [vmem:[%s11327_s3 + $0x4] ss:$0 sm:$0xff] }
 0x22a   : > { %v3447_v42 = vmul.f32 %v7740_v27, %v7716_v63  ;;  %v2946_v47 = vadd.f32 %v2914_v34, %v2877_v16  ;;  %v3016_v43 = vadd.f32 %v2984_v36, %v2947_v18  ;;  %11966 = vst [vmem:[#allocation106_spill] sm:$0xff] %v7756_v28  ;;  %v3379_v8 = vmul.f32 %v7758_v38, %v7756_v28 }
 0x22b   : > { %v3517_v5 = vmul.f32 %v11968_v39, %v11895_v7  ;;  %v1728_v30 = vmul.f32 %v11969_v3, %v1513_v9  ;;  %v11971_v34 = vrot.slane %v7682_v6, 7  ;;  %v3378_v16 = vmul.f32 %v7756_v28, %v7641_v15  ;;  %v799_v3 = vpop.f32.mrf.mxu0  ;;  %v11973_v6 = vld [vmem:[#allocation119_spill] sm:$0xff] }
 0x22c   : > { %v3516_v18 = vmul.f32 %v11968_v39, %v11905_v21  ;;  %v5629_v57 = vpop.eup %5628  ;;  %v3015_v63 = vadd.f32 %v2983_v59, %v2946_v47  ;;  %v7775_v38 = vadd.f32 %v3053_v24, %v3016_v43  ;;  %v3480_v7 = vadd.f32 %v3448_v62, %v3379_v8  ;;  %v11975_v59 = vld [vmem:[#allocation158_spill] sm:$0xff]  ;;  %v11976_v62 = vld [vmem:[#allocation77_spill] sm:$0xff] }
 0x22d   : > { %v2179_v36 = vsel %vm2158_vm3, %v11971_v34, %v11970_v14  ;;  %v3586_v9 = vmul.f32 %v7293_v46, %v11926_v29  ;;  %v1414_v2 = vmul.f32 %v7175_v20, %v7751_v37  ;;  %v1028_v14 = vmul.f32 %v5629_v57, %v11973_v6 }
 0x22e   : > { %11972 = vst [vmem:[#allocation114_spill] sm:$0xff] %v7775_v38  ;;  %v3479_v34 = vadd.f32 %v3447_v42, %v3378_v16  ;;  %v3585_v15 = vmul.f32 %v7293_v46, %v11901_v0  ;;  %v7784_v28 = vadd.f32 %v3052_v25, %v3015_v63  ;;  %v3549_v21 = vadd.f32 %v3517_v5, %v3480_v7 }
 0x22f   : > { %v3655_v39 = vmul.f32 %v7334_v35, %v7099_v26  ;;  %v7789_v24 = vadd.f32 %v11975_v59, %v5300_v60  ;;  %1069 = vst.msk [vmem:[#allocation2 + $0x100] sm:$0xff] %vm1032_vm1, %v1028_v14  ;;  %v2330_v47 = vmul.f32 %v11976_v62, %v2179_v36  ;;  %v2500_v43 = vadd.f32 %v2468_v41, %v2399_v55 }
 0x230   : > { %11974 = vst [vmem:[#allocation78_spill] sm:$0xff] %v7784_v28  ;;  %v3548_v8 = vadd.f32 %v3516_v18, %v3479_v34  ;;  %v7794_v57 = vadd.f32 %v11975_v59, %v799_v3  ;;  %v11483_v0 = vrot.slane %v7775_v38, 1  ;;  %v3618_v6 = vadd.f32 %v3586_v9, %v3549_v21 }
 0x231   : > { %v3654_v63 = vmul.f32 %v7334_v35, %v11951_v40  ;;  %v5073_v5 = vmul.f32 -1.442695, %v7789_v24  ;;  %v2082_v60 = vmul.f32 %v11954_v61, %v7751_v37  ;;  %v2569_v25 = vadd.f32 %v2537_v17, %v2500_v43  ;;  %v7813_v17 = vld [vmem:[%s11327_s3 + $0x5] ss:$0 sm:$0xff] }
 0x232   : > { %v2675_v42 = vmul.f32 %v7364_v4, %v11951_v40  ;;  %v5072_v55 = vmul.f32 -1.442695, %v7794_v57  ;;  %v11484_v41 = vrot.slane %v7784_v28, 1  ;;  %v3617_v36 = vadd.f32 %v3585_v15, %v3548_v8  ;;  %11978 = vst [vmem:[#allocation99_spill] sm:$0xff] %v7813_v17  ;;  %v7832_v15 = vld [vmem:[%s11327_s3 + $0x6] ss:$0 sm:$0xff] }
 0x233   : > { %v7806_v16 = vadd.f32 %v3655_v39, %v3618_v6  ;;  %5630 = vpow2.f32 %v5073_v5  ;;  %v4115_v18 = vadd.f32 1.0, %v7655_v49  ;;  %v1446_v7 = vadd.f32 %v1414_v2, %v7556_v33  ;;  %v11980_v33 = vld [vmem:[#allocation110_spill] sm:$0xff]  ;;  %11982 = vst [vmem:[#allocation144_spill] sm:$0xff] %v7832_v15  ;;  %v11986_v8 = vld [vmem:[#allocation89_spill] sm:$0xff] }
 0x234   : > { %5632 = vpow2.f32 %v5072_v55  ;;  %v1198_v9 = vmul.f32 %v7813_v17, %v11951_v40  ;;  %v2362_v3 = vadd.f32 %v2330_v47, %v1728_v30  ;;  %v2638_v14 = vadd.f32 %v2606_v45, %v2569_v25  ;;  %v7839_v30 = vld [vmem:[%s11327_s3] ss:$0 sm:$0xff]  ;;  %v7841_v45 = vld [vmem:[#allocation2 + $0x88] sm:$0xff] }
 0x235   : > { %11977 = vst [vmem:[#allocation115_spill] sm:$0xff] %v7806_v16  ;;  %v3157_v49 = vsel %vm3137_vm4, %v11484_v41, %v11483_v0  ;;  %v7823_v34 = vadd.f32 %v3654_v63, %v3617_v36  ;;  %v7827_v2 = vadd.f32 %v11980_v33, %v7677_v58  ;;  %v1876_v40 = vmul.f32 %v7832_v15, %v7138_v22  ;;  %v7848_v58 = vld [vmem:[%s11327_s3 + $0xa] ss:$0 sm:$0xff]  ;;  %v7862_v63 = vld [vmem:[%s11327_s3 + $0xb] ss:$0 sm:$0xff]  ;;  %v11991_v41 = vld [vmem:[#allocation153_spill] sm:$0xff] }
 0x236   : > { %11983 = vst [vmem:[#allocation148_spill] sm:$0xff] %v7839_v30  ;;  %v1127_v21 = vmul.f32 %v7841_v45, %v7839_v30  ;;  %11984 = vst [vmem:[#allocation104_spill] sm:$0xff] %v7848_v58  ;;  %v1269_v39 = vmul.f32 %v7848_v58, %v7086_v10  ;;  %v7853_v59 = vadd.f32 %v2082_v60, %v7570_v53  ;;  %v11489_v47 = vrot.slane %v7806_v16, 2  ;;  %v7869_v53 = vld [vmem:[%s11327_s3 + $0xf] ss:$0 sm:$0xff] }
 0x237   : > { %11979 = vst [vmem:[#allocation133_spill] sm:$0xff] %v7823_v34  ;;  %11981 = vst [vmem:[#allocation120_spill] sm:$0xff] %v7827_v2  ;;  %v2707_v62 = vadd.f32 %v2675_v42, %v2638_v14  ;;  %v1807_v43 = vmul.f32 %v7635_v56, %v7086_v10  ;;  %v3309_v6 = vmul.f32 %v11986_v8, %v3157_v49  ;;  %v1478_v42 = vrot.slane %v1446_v7, 6 }
 0x238   : > { %11985 = vst [vmem:[#allocation123_spill] sm:$0xff] %v7853_v59  ;;  %11987 = vst [vmem:[#allocation109_spill] sm:$0xff] %v7862_v63  ;;  %v1945_v5 = vmul.f32 %v7862_v63, %v7170_v12  ;;  %v1230_v25 = vadd.f32 %v1198_v9, %v1127_v21  ;;  %v1340_v60 = vmul.f32 %v7869_v53, %v7138_v22  ;;  %v11491_v14 = vrot.slane %v7823_v34, 2  ;;  %v7881_v9 = vld [vmem:[%s11327_s3 + $0x10] ss:$0 sm:$0xff]  ;;  %v7996_v34 = vld [vmem:[#allocation2 + $0xa0] sm:$0xff] }
 0x239   : > { %11988 = vst [vmem:[#allocation129_spill] sm:$0xff] %v7869_v53  ;;  %v7875_v55 = vadd.f32 %v7665_v48, %v7687_v52  ;;  %v2739_v36 = vadd.f32 %v2707_v62, %v2362_v3  ;;  %v1908_v49 = vadd.f32 %v1876_v40, %v1807_v43  ;;  %11990 = vst [vmem:[#allocation76_spill] sm:$0xff] %v7881_v9  ;;  %v5109_v52 = vmul.f32 -1.442695, %v7827_v2  ;;  %v3818_v40 = vpop.permute.xlu0 %3817  ;;  %v11993_v2 = vld [vmem:[#allocation79_spill] sm:$0xff] }
 0x23a   : > { %v2014_v21 = vmul.f32 %v7881_v9, %v11955_v50  ;;  %v1301_v8 = vadd.f32 %v1269_v39, %v1230_v25  ;;  %v1411_v7 = vmul.f32 %v7175_v20, %v7170_v12  ;;  %v2684_v48 = vmul.f32 %v7364_v4, %v7751_v37 }
 0x23b   : > { %11989 = vst [vmem:[#allocation113_spill] sm:$0xff] %v7875_v55  ;;  %v3759_v3 = vsel %vm3739_vm5, %v11491_v14, %v11489_v47  ;;  %v3341_v62 = vadd.f32 %v3309_v6, %v2739_v36  ;;  %v1977_v39 = vadd.f32 %v1945_v5, %v1908_v49  ;;  %v2083_v43 = vmul.f32 %v11954_v61, %v7645_v1  ;;  %v1660_v61 = vpop.permute.xlu1 %1659  ;;  %v12008_v14 = vld [vmem:[#allocation145_spill] sm:$0xff] }
 0x23c   : > { %v1372_v25 = vadd.f32 %v1340_v60, %v1301_v8  ;;  %v11992_v0 = vrot.slane %v11991_v41, 6  ;;  %v2647_v28 = vadd.f32 %v7565_v23, %v7572_v54  ;;  %v7907_v16 = vmul.f32 %v11993_v2, %v7675_v19  ;;  %v11997_v60 = vld [vmem:[#allocation154_spill] sm:$0xff]  ;;  %v7935_v8 = vld [vmem:[%s11327_s3 + $0x8] ss:$0 sm:$0xff] }
 0x23d   : > { %v11490_v47 = vrot.slane %v7875_v55, 6  ;;  %5634 = vrcp.f32 %v4115_v18  ;;  %v3911_v6 = vmul.f32 %v3818_v40, %v3759_v3  ;;  %v2046_v5 = vadd.f32 %v2014_v21, %v1977_v39 }
 0x23e   : > { %v1504_v38 = vsel %vm1492_vm2, %v11992_v0, %v1478_v42  ;;  %11994 = vst [vmem:[#allocation119_spill] sm:$0xff] %v7907_v16  ;;  %v7910_v36 = vadd.f32 %v1411_v7, %v1372_v25  ;;  %v11996_v41 = vrot.slane %v7853_v59, 7  ;;  %v11998_v49 = vrot.slane %v11997_v60, 7  ;;  %v7964_v25 = vld [vmem:[#allocation2 + $0x98] sm:$0xff] }
 0x23f   : > { %v7920_v23 = vadd.f32 %v2684_v48, %v2647_v28  ;;  %5636 = vpow2.f32 %v5109_v52  ;;  %v7926_v54 = vsel %vm1492_vm2, %v1478_v42, %v11490_v47  ;;  %v7928_v18 = vmul.f32 %v1660_v61, %v1504_v38  ;;  %v12004_v61 = vld [vmem:[#allocation156_spill] sm:$0xff]  ;;  %v12007_v47 = vld [vmem:[#allocation130_spill] sm:$0xff] }
 0x240   : > { %11995 = vst [vmem:[#allocation158_spill] sm:$0xff] %v7910_v36  ;;  %v7918_v0 = vsel %vm2158_vm3, %v11998_v49, %v11996_v41  ;;  %12001 = vst [vmem:[#allocation153_spill] sm:$0xff] %v7926_v54  ;;  %v5631_v19 = vpop.eup %5630  ;;  %v3943_v2 = vadd.f32 %v3911_v6, %v3341_v62  ;;  %v7930_v21 = vadd.f32 %v2083_v43, %v2046_v5  ;;  %v11492_v40 = vrot.slane %v7910_v36, 6  ;;  %v7946_v62 = vld [vmem:[#allocation2 + $0x90] sm:$0xff]  ;;  %v7953_v43 = vld [vmem:[%s11327_s3 + $0xd] ss:$0 sm:$0xff] }
 0x241   : > { %11999 = vst [vmem:[#allocation77_spill] sm:$0xff] %v7918_v0  ;;  %12000 = vst [vmem:[#allocation89_spill] sm:$0xff] %v7920_v23  ;;  %v2852_v28 = vmul.f32 %v7935_v8, %v7099_v26  ;;  %v5633_v7 = vpop.eup %5632  ;;  %v935_v48 = vadd.f32 1.0, %v5631_v19  ;;  %v2406_v42 = vmul.f32 %v7704_v51, %v11926_v29  ;;  %v2475_v38 = vmul.f32 %v7714_v32, %v7099_v26  ;;  %v7960_v26 = vld [vmem:[%s11327_s3 + $0xc] ss:$0 sm:$0xff]  ;;  %v12009_v36 = vld [vmem:[#allocation150_spill] sm:$0xff] }
 0x242   : > { %12002 = vst [vmem:[#allocation79_spill] sm:$0xff] %v7928_v18  ;;  %12003 = vst [vmem:[#allocation154_spill] sm:$0xff] %v7930_v21  ;;  %v2853_v52 = vmul.f32 %v7935_v8, %v7086_v10  ;;  %v934_v3 = vadd.f32 1.0, %v5633_v7  ;;  %v2783_v39 = vmul.f32 %v7946_v62, %v7692_v31  ;;  %v2921_v29 = vmul.f32 %v7953_v43, %v7157_v44  ;;  %v7979_v19 = vld [vmem:[%s11327_s3 + $0x12] ss:$0 sm:$0xff]  ;;  %v12006_v7 = vld [vmem:[#allocation143_spill] sm:$0xff] }
 0x243   : > { %5638 = vrcp.f32 %v935_v48  ;;  %v2544_v10 = vmul.f32 %v7960_v26, %v7157_v44  ;;  %v2784_v6 = vmul.f32 %v7964_v25, %v7692_v31  ;;  %v2922_v5 = vmul.f32 %v7953_v43, %v7138_v22  ;;  %12010 = vst [vmem:[#allocation156_spill] sm:$0xff] %v7996_v34  ;;  %v8012_v18 = vld [vmem:[%s11327_s3 + $0xe] ss:$0 sm:$0xff]  ;;  %v8041_v54 = vld [vmem:[#allocation2 + $0x78] sm:$0xff] }
 0x244   : > { %5640 = vrcp.f32 %v934_v3  ;;  %v12005_v41 = vrot.slane %v12004_v61, 6  ;;  %v2884_v49 = vadd.f32 %v2852_v28, %v2783_v39  ;;  %v2990_v48 = vmul.f32 %v7979_v19, %v12006_v7  ;;  %v7988_v61 = vld [vmem:[%s11327_s3 + $0x11] ss:$0 sm:$0xff]  ;;  %12013 = vst [vmem:[#allocation143_spill] sm:$0xff] %v8012_v18 }
 0x245   : > { %v2337_v16 = vmul.f32 %v12008_v14, %v12007_v47  ;;  %v2507_v3 = vadd.f32 %v2475_v38, %v2406_v42  ;;  %v2613_v28 = vmul.f32 %v7988_v61, %v12006_v7  ;;  %v2885_v39 = vadd.f32 %v2853_v52, %v2784_v6  ;;  %v12011_v14 = vld [vmem:[#allocation141_spill] sm:$0xff] }
 0x246   : > { %v1506_v60 = vsel %vm1492_vm2, %v11492_v40, %v12005_v41  ;;  %v2953_v41 = vadd.f32 %v2921_v29, %v2884_v49  ;;  %v2991_v40 = vmul.f32 %v7979_v19, %v7170_v12  ;;  %v3059_v55 = vmul.f32 %v7287_v13, %v12009_v36  ;;  %v12012_v29 = vld [vmem:[#allocation106_spill] sm:$0xff]  ;;  %v8005_v49 = vld [vmem:[#allocation2 + $0xa8] sm:$0xff] }
 0x247   : > { %v3454_v47 = vmul.f32 %v7996_v34, %v7740_v27  ;;  %v1735_v42 = vmul.f32 %v12011_v14, %v1506_v60  ;;  %v2576_v38 = vadd.f32 %v2544_v10, %v2507_v3  ;;  %v2954_v23 = vadd.f32 %v2922_v5, %v2885_v39 }
 0x248   : > { %v3060_v37 = vmul.f32 %v7287_v13, %v11955_v50  ;;  %v3022_v52 = vadd.f32 %v2990_v48, %v2953_v41  ;;  %v3385_v6 = vmul.f32 %v7946_v62, %v12012_v29  ;;  %v3455_v1 = vmul.f32 %v8005_v49, %v7740_v27 }
 0x249   : > { %v3523_v10 = vmul.f32 %v8012_v18, %v7157_v44  ;;  %v8017_v5 = vadd.f32 %v11980_v33, %v3943_v2  ;;  %v8019_v60 = vadd.f32 %v2613_v28, %v2576_v38  ;;  %v8023_v48 = vmul.f32 %v7364_v4, %v12009_v36  ;;  %v8037_v38 = vld [vmem:[#allocation2 + $0x70] sm:$0xff] }
 0x24a   : > { %v3386_v3 = vmul.f32 %v7964_v25, %v12012_v29  ;;  %v3023_v39 = vadd.f32 %v2991_v40, %v2954_v23  ;;  %v8027_v41 = vadd.f32 %v3059_v55, %v3022_v52  ;;  %v3486_v14 = vadd.f32 %v3454_v47, %v3385_v6  ;;  %v8031_v44 = vpop.eup %5634  ;;  %v12021_v52 = vld [vmem:[#allocation132_spill] sm:$0xff] }
 0x24b   : > { %12014 = vst [vmem:[#allocation130_spill] sm:$0xff] %v8017_v5  ;;  %v3524_v59 = vmul.f32 %v8012_v18, %v7138_v22  ;;  %12016 = vst [vmem:[#allocation150_spill] sm:$0xff] %v8031_v44  ;;  %v8033_v2 = vadd.f32 %v2337_v16, %v1735_v42  ;;  %v3592_v28 = vmul.f32 %v7293_v46, %v12006_v7  ;;  %v12020_v7 = vld [vmem:[#allocation105_spill] sm:$0xff]  ;;  %v8055_v44 = vld [vmem:[#allocation2 + $0x80] sm:$0xff] }
 0x24c   : > { %12015 = vst [vmem:[#allocation145_spill] sm:$0xff] %v8027_v41  ;;  %v1193_v33 = vmul.f32 %v8037_v38, %v7813_v17  ;;  %v1194_v55 = vmul.f32 %v8041_v54, %v7813_v17  ;;  %v8045_v23 = vpop.eup %5636  ;;  %v8047_v22 = vadd.f32 %v3060_v37, %v3023_v39  ;;  %v3487_v40 = vadd.f32 %v3455_v1, %v3386_v3 }
 0x24d   : > { %12017 = vst [vmem:[#allocation141_spill] sm:$0xff] %v8033_v2  ;;  %12018 = vst [vmem:[#allocation164_spill] sm:$0xff] %v8045_v23  ;;  %v3555_v16 = vadd.f32 %v3523_v10, %v3486_v14  ;;  %v3593_v47 = vmul.f32 %v7293_v46, %v7170_v12  ;;  %v1122_v42 = vmul.f32 %v7839_v30, %v12020_v7 }
 0x24e   : > { %12019 = vst [vmem:[#allocation165_spill] sm:$0xff] %v8047_v22  ;;  %v1123_v6 = vmul.f32 %v7839_v30, %v12021_v52  ;;  %v1264_v17 = vmul.f32 %v8055_v44, %v7848_v58  ;;  %v1867_v37 = vmul.f32 %v8037_v38, %v7832_v15  ;;  %v1265_v10 = vmul.f32 %v7848_v58, %v7841_v45 }
 0x24f   : > { %v1335_v12 = vmul.f32 %v7946_v62, %v7869_v53  ;;  %v1868_v3 = vmul.f32 %v8041_v54, %v7832_v15  ;;  %v1225_v39 = vadd.f32 %v1193_v33, %v1122_v42  ;;  %v1798_v30 = vmul.f32 %v12020_v7, %v7635_v56 }
 0x250   : > { %v1226_v14 = vadd.f32 %v1194_v55, %v1123_v6  ;;  %v1936_v21 = vmul.f32 %v8055_v44, %v7862_v63  ;;  %v5639_v23 = vpop.eup %5638  ;;  %v1336_v1 = vmul.f32 %v7964_v25, %v7869_v53  ;;  %v1406_v58 = vmul.f32 %v7996_v34, %v7175_v20 }
 0x251   : > { %v1799_v5 = vmul.f32 %v12021_v52, %v7635_v56  ;;  %v1937_v33 = vmul.f32 %v7862_v63, %v7841_v45  ;;  %v5641_v55 = vpop.eup %5640  ;;  %v1031_v42 = vmul.f32 %v5639_v23, %v7789_v24  ;;  %v1296_v7 = vadd.f32 %v1264_v17, %v1225_v39  ;;  %v8091_v24 = vld [vmem:[%s11327_s3 + $0x15] ss:$0 sm:$0xff] }
 0x252   : > { %v1899_v6 = vadd.f32 %v1867_v37, %v1798_v30  ;;  %v2005_v15 = vmul.f32 %v7946_v62, %v7881_v9  ;;  %v1030_v2 = vmul.f32 %v5641_v55, %v7794_v57  ;;  %v11524_v53 = vrot.slane %v8047_v22, 1  ;;  %v8283_v22 = vld [vmem:[#allocation2 + $0xf0] sm:$0xff] }
 0x253   : > { %v1900_v0 = vadd.f32 %v1868_v3, %v1799_v5  ;;  %v2006_v20 = vmul.f32 %v7964_v25, %v7881_v9  ;;  %1072 = vst.msk [vmem:[#allocation2 + $0x118] sm:$0xff] %vm1032_vm1, %v1031_v42  ;;  %v1297_v56 = vadd.f32 %v1265_v10, %v1226_v14  ;;  %v1367_v63 = vadd.f32 %v1335_v12, %v1296_v7  ;;  %v8099_v5 = vld [vmem:[%s11327_s3 + $0x14] ss:$0 sm:$0xff] }
 0x254   : > { %v1968_v4 = vadd.f32 %v1936_v21, %v1899_v6  ;;  %v2074_v17 = vmul.f32 %v8091_v24, %v7996_v34  ;;  %1071 = vst.msk [vmem:[#allocation2 + $0x110] sm:$0xff] %vm1032_vm1, %v1030_v2  ;;  %v3556_v57 = vadd.f32 %v3524_v59, %v3487_v40  ;;  %v3624_v30 = vadd.f32 %v3592_v28, %v3555_v16 }
 0x255   : > { %12022 = vst [vmem:[#allocation105_spill] sm:$0xff] %v8099_v5  ;;  %v1407_v21 = vmul.f32 %v8099_v5, %v8005_v49  ;;  %v1969_v23 = vadd.f32 %v1937_v33, %v1900_v0  ;;  %v1368_v37 = vadd.f32 %v1336_v1, %v1297_v56  ;;  %v8103_v10 = vadd.f32 %v1406_v58, %v1367_v63  ;;  %v2273_v1 = vpop.permute.xlu1 %2272 }
 0x256   : > { %v2037_v12 = vadd.f32 %v2005_v15, %v1968_v4  ;;  %v2075_v3 = vmul.f32 %v8091_v24, %v8005_v49  ;;  %v2779_v59 = vmul.f32 %v8037_v38, %v7692_v31  ;;  %v2847_v2 = vmul.f32 %v8041_v54, %v7935_v8 }
 0x257   : > { %12023 = vst [vmem:[#allocation132_spill] sm:$0xff] %v8103_v10  ;;  %v2038_v39 = vadd.f32 %v2006_v20, %v1969_v23  ;;  %v2848_v28 = vmul.f32 %v8055_v44, %v7935_v8  ;;  %v2778_v56 = vmul.f32 %v12021_v52, %v7692_v31  ;;  %v2916_v4 = vmul.f32 %v7953_v43, %v7841_v45  ;;  %v8134_v20 = vld [vmem:[#allocation2 + $0xb0] sm:$0xff] }
 0x258   : > { %v8113_v40 = vadd.f32 %v2074_v17, %v2037_v12  ;;  %v2917_v15 = vmul.f32 %v7953_v43, %v7946_v62  ;;  %v3661_v58 = vmul.f32 %v7334_v35, %v12009_v36  ;;  %v3662_v63 = vmul.f32 %v7334_v35, %v11955_v50 }
 0x259   : > { %v8125_v0 = vadd.f32 %v1407_v21, %v1368_v37  ;;  %v2880_v16 = vadd.f32 %v2848_v28, %v2779_v59  ;;  %v8127_v14 = vadd.f32 %v2075_v3, %v2038_v39  ;;  %v2879_v33 = vadd.f32 %v2847_v2, %v2778_v56 }
 0x25a   : > { %12024 = vst [vmem:[#allocation166_spill] sm:$0xff] %v8113_v40  ;;  %v2985_v55 = vmul.f32 %v7979_v19, %v7964_v25  ;;  %v2986_v42 = vmul.f32 %v7996_v34, %v7979_v19  ;;  %v3625_v7 = vadd.f32 %v3593_v47, %v3556_v57  ;;  %v11522_v6 = vrot.slane %v8103_v10, 6  ;;  %v8277_v10 = vld [vmem:[#allocation2 + $0xd0] sm:$0xff] }
 0x25b   : > { %12025 = vst [vmem:[#allocation167_spill] sm:$0xff] %v8125_v0  ;;  %12026 = vst [vmem:[#allocation168_spill] sm:$0xff] %v8127_v14  ;;  %v2949_v36 = vadd.f32 %v2917_v15, %v2880_v16  ;;  %v3055_v50 = vmul.f32 %v8134_v20, %v7287_v13  ;;  %v11521_v17 = vrot.slane %v8113_v40, 7  ;;  %v2948_v21 = vadd.f32 %v2916_v4, %v2879_v33  ;;  %v1665_v16 = vpop.permute.xlu1 %1664 }
 0x25c   : > { %v3449_v23 = vmul.f32 %v8041_v54, %v7740_v27  ;;  %v3450_v37 = vmul.f32 %v8055_v44, %v7740_v27  ;;  %v3054_v47 = vmul.f32 %v8005_v49, %v7287_v13  ;;  %v3381_v57 = vmul.f32 %v8037_v38, %v12012_v29 }
 0x25d   : > { %v3018_v12 = vadd.f32 %v2986_v42, %v2949_v36  ;;  %v3519_v3 = vmul.f32 %v8012_v18, %v7946_v62  ;;  %v11519_v39 = vrot.slane %v8125_v0, 6  ;;  %v11520_v59 = vrot.slane %v8127_v14, 7 }
 0x25e   : > { %v3017_v2 = vadd.f32 %v2985_v55, %v2948_v21  ;;  %v3380_v28 = vmul.f32 %v12012_v29, %v12021_v52  ;;  %v3482_v4 = vadd.f32 %v3450_v37, %v3381_v57  ;;  %v3518_v13 = vmul.f32 %v8012_v18, %v7841_v45 }
 0x25f   : > { %v8153_v56 = vadd.f32 %v3055_v50, %v3018_v12  ;;  %v3588_v15 = vmul.f32 %v7996_v34, %v7293_v46  ;;  %v1511_v33 = vsel %vm1492_vm2, %v11522_v6, %v11519_v39  ;;  %v2177_v55 = vsel %vm2158_vm3, %v11521_v17, %v11520_v59 }
 0x260   : > { %v2470_v42 = vmul.f32 %v8041_v54, %v7714_v32  ;;  %v3481_v36 = vadd.f32 %v3449_v23, %v3380_v28  ;;  %v8173_v50 = vadd.f32 %v3054_v47, %v3017_v2  ;;  %v3551_v21 = vadd.f32 %v3519_v3, %v3482_v4  ;;  %v12031_v2 = vld [vmem:[#allocation82_spill] sm:$0xff]  ;;  %v12032_v4 = vld [vmem:[#allocation83_spill] sm:$0xff] }
 0x261   : > { %12027 = vst [vmem:[#allocation169_spill] sm:$0xff] %v8153_v56  ;;  %v3587_v37 = vmul.f32 %v7964_v25, %v7293_v46  ;;  %v3657_v12 = vmul.f32 %v8134_v20, %v7334_v35  ;;  %v8179_v57 = vadd.f32 %v3661_v58, %v3624_v30  ;;  %v8181_v39 = vadd.f32 %v3662_v63, %v3625_v7 }
 0x262   : > { %12028 = vst [vmem:[#allocation170_spill] sm:$0xff] %v8173_v50  ;;  %v2401_v59 = vmul.f32 %v12021_v52, %v7704_v51  ;;  %v2539_v17 = vmul.f32 %v7960_v26, %v7841_v45  ;;  %v3550_v47 = vadd.f32 %v3518_v13, %v3481_v36  ;;  %v3620_v3 = vadd.f32 %v3588_v15, %v3551_v21  ;;  %v2277_v13 = vpop.permute.xlu1 %2276  ;;  %v12037_v36 = vld [vmem:[#allocation141_spill] sm:$0xff] }
 0x263   : > { %12029 = vst [vmem:[#allocation171_spill] sm:$0xff] %v8179_v57  ;;  %12030 = vst [vmem:[#allocation172_spill] sm:$0xff] %v8181_v39  ;;  %v3656_v46 = vmul.f32 %v8005_v49, %v7334_v35  ;;  %v1730_v28 = vmul.f32 %v12031_v2, %v1511_v33  ;;  %v2332_v30 = vmul.f32 %v12032_v4, %v2177_v55  ;;  %v11523_v7 = vrot.slane %v8173_v50, 1  ;;  %v12035_v55 = vld [vmem:[#allocation160_spill] sm:$0xff] }
 0x264   : > { %v2502_v58 = vadd.f32 %v2470_v42, %v2401_v59  ;;  %v2608_v63 = vmul.f32 %v7988_v61, %v7964_v25  ;;  %v2714_v52 = vadd.f32 %v8023_v48, %v8019_v60  ;;  %v3619_v6 = vadd.f32 %v3587_v37, %v3550_v47  ;;  %v12036_v60 = vld [vmem:[#allocation77_spill] sm:$0xff]  ;;  %v12057_v50 = vld [vmem:[#allocation148_spill] sm:$0xff] }
 0x265   : > { %v8197_v23 = vadd.f32 %v3657_v12, %v3620_v3  ;;  %v12034_v35 = vrot.slane %v8027_v41, 1  ;;  %v11526_v59 = vrot.slane %v8179_v57, 2  ;;  %v2677_v42 = vmul.f32 %v8005_v49, %v12035_v55  ;;  %v12040_v3 = vld [vmem:[#allocation130_spill] sm:$0xff] }
 0x266   : > { %v2571_v33 = vadd.f32 %v2539_v17, %v2502_v58  ;;  %v2339_v48 = vmul.f32 %v2273_v1, %v12036_v60  ;;  %v2746_v21 = vadd.f32 %v2714_v52, %v12037_v36  ;;  %v12038_v37 = vrot.slane %v8153_v56, 1  ;;  %v8223_v1 = vld [vmem:[#allocation2 + $0xb8] sm:$0xff]  ;;  %v12042_v60 = vld [vmem:[#allocation136_spill] sm:$0xff] }
 0x267   : > { %12033 = vst [vmem:[#allocation82_spill] sm:$0xff] %v8197_v23  ;;  %v3150_v15 = vsel %vm3137_vm4, %v12034_v35, %v11524_v53  ;;  %v8216_v47 = vadd.f32 %v3656_v46, %v3619_v6  ;;  %v5111_v2 = vmul.f32 -1.442695, %v12040_v3  ;;  %v11525_v17 = vrot.slane %v8181_v39, 2  ;;  %v12041_v35 = vld [vmem:[#allocation164_spill] sm:$0xff]  ;;  %v12043_v6 = vld [vmem:[#allocation154_spill] sm:$0xff] }
 0x268   : > { %v3155_v12 = vsel %vm3137_vm4, %v11523_v7, %v12038_v37  ;;  %v2364_v4 = vadd.f32 %v2332_v30, %v1730_v28  ;;  %v2640_v58 = vadd.f32 %v2608_v63, %v2571_v33  ;;  %v8221_v55 = vadd.f32 1.0, %v12041_v35  ;;  %v12044_v63 = vld [vmem:[#allocation93_spill] sm:$0xff]  ;;  %v8239_v7 = vld [vmem:[#allocation2 + $0xc8] sm:$0xff]  ;;  %v12058_v39 = vld [vmem:[#allocation104_spill] sm:$0xff]  ;;  %12059 = vst [vmem:[#allocation164_spill] sm:$0xff] %v8283_v22 }
 0x269   : > { %12039 = vst [vmem:[#allocation83_spill] sm:$0xff] %v8216_v47  ;;  %v2478_v52 = vmul.f32 %v8223_v1, %v7714_v32  ;;  %v3316_v36 = vmul.f32 %v12042_v60, %v3150_v15  ;;  %v3752_v28 = vsel %vm3739_vm5, %v11526_v59, %v11525_v17  ;;  %v3311_v33 = vmul.f32 %v12044_v63, %v3155_v12  ;;  %v12046_v37 = vld [vmem:[#allocation153_spill] sm:$0xff]  ;;  %v12048_v17 = vld [vmem:[#allocation123_spill] sm:$0xff] }
 0x26a   : > { %v2709_v30 = vadd.f32 %v2677_v42, %v2640_v58  ;;  %v2409_v35 = vmul.f32 %v8005_v49, %v7704_v51  ;;  %12045 = vst [vmem:[#allocation160_spill] sm:$0xff] %v8239_v7  ;;  %v2547_v15 = vmul.f32 %v8239_v7, %v7960_v26  ;;  %v11530_v53 = vrot.slane %v8216_v47, 2  ;;  %v3846_v58 = vpop.permute.xlu1 %3845  ;;  %v12050_v59 = vld [vmem:[#allocation79_spill] sm:$0xff] }
 0x26b   : > { %v3348_v60 = vadd.f32 %v3316_v36, %v2746_v21  ;;  %v1738_v46 = vmul.f32 %v1665_v16, %v12046_v37  ;;  %5642 = vpow2.f32 %v5111_v2  ;;  %v12047_v3 = vrot.slane %v12043_v6, 7  ;;  %v3826_v2 = vpop.permute.xlu0 %3825  ;;  %v8258_v36 = vld [vmem:[#allocation2 + $0xd8] sm:$0xff]  ;;  %v12055_v37 = vld [vmem:[#allocation99_spill] sm:$0xff] }
 0x26c   : > { %v12049_v42 = vrot.slane %v12048_v17, 7  ;;  %v2741_v63 = vadd.f32 %v2709_v30, %v2364_v4  ;;  %v2371_v56 = vadd.f32 %v2339_v48, %v12050_v59  ;;  %v2510_v14 = vadd.f32 %v2478_v52, %v2409_v35  ;;  %12052 = vst [vmem:[#allocation77_spill] sm:$0xff] %v8258_v36  ;;  %v12054_v59 = vld [vmem:[#allocation95_spill] sm:$0xff]  ;;  %v8269_v52 = vld [vmem:[#allocation2 + $0xc0] sm:$0xff] }
 0x26d   : > { %v3918_v0 = vmul.f32 %v3846_v58, %v3752_v28  ;;  %v12051_v21 = vrot.slane %v8197_v23, 2  ;;  %v2616_v17 = vmul.f32 %v8258_v36, %v7988_v61  ;;  %v1203_v28 = vmul.f32 %v8269_v52, %v12055_v37  ;;  %v12056_v58 = vld [vmem:[#allocation144_spill] sm:$0xff] }
 0x26e   : > { %v2169_v12 = vsel %vm2158_vm3, %v12049_v42, %v12047_v3  ;;  %v8265_v3 = vld [vmem:[%s11327_s3 + $0x16] ss:$0 sm:$0xff]  ;;  %v3343_v4 = vadd.f32 %v3311_v33, %v2741_v63  ;;  %v2579_v35 = vadd.f32 %v2547_v15, %v2510_v14  ;;  %v1132_v40 = vmul.f32 %v8134_v20, %v12057_v50  ;;  %v12061_v14 = vld [vmem:[#allocation129_spill] sm:$0xff] }
 0x26f   : > { %v3757_v16 = vsel %vm3739_vm5, %v11530_v53, %v12051_v21  ;;  %12053 = vst [vmem:[#allocation141_spill] sm:$0xff] %v8265_v3  ;;  %v2685_v48 = vmul.f32 %v8265_v3, %v12054_v59  ;;  %v2340_v30 = vmul.f32 %v2277_v13, %v2169_v12  ;;  %v3950_v42 = vadd.f32 %v3918_v0, %v3348_v60  ;;  %v12060_v13 = vld [vmem:[#allocation124_spill] sm:$0xff]  ;;  %v12062_v15 = vld [vmem:[#allocation117_spill] sm:$0xff] }
 0x270   : > { %v1877_v21 = vmul.f32 %v8269_v52, %v12056_v58  ;;  %v3913_v53 = vmul.f32 %v3826_v2, %v3757_v16  ;;  %v1274_v33 = vmul.f32 %v8277_v10, %v12058_v39  ;;  %v1195_v63 = vmul.f32 %v8055_v44, %v12055_v37  ;;  %v12063_v12 = vld [vmem:[#allocation109_spill] sm:$0xff] }
 0x271   : > { %v1345_v0 = vmul.f32 %v12061_v14, %v12060_v13  ;;  %v1808_v60 = vmul.f32 %v8134_v20, %v12062_v15  ;;  %v1946_v16 = vmul.f32 %v8277_v10, %v12063_v12  ;;  %v1869_v2 = vmul.f32 %v8055_v44, %v12056_v58 }
 0x272   : > { %v3945_v23 = vadd.f32 %v3913_v53, %v3343_v4  ;;  %v1235_v47 = vadd.f32 %v1203_v28, %v1132_v40  ;;  %v1124_v57 = vmul.f32 %v8037_v38, %v12057_v50  ;;  %v1266_v41 = vmul.f32 %v7946_v62, %v12058_v39 }
 0x273   : > { %v1909_v59 = vadd.f32 %v1877_v21, %v1808_v60  ;;  %v2015_v3 = vmul.f32 %v7881_v9, %v12060_v13  ;;  %v1800_v36 = vmul.f32 %v8037_v38, %v12062_v15  ;;  %v1938_v7 = vmul.f32 %v7946_v62, %v12063_v12  ;;  %v12064_v38 = vld [vmem:[#allocation110_spill] sm:$0xff] }
 0x274   : > { %v1306_v37 = vadd.f32 %v1274_v33, %v1235_v47  ;;  %v1416_v53 = vmul.f32 %v8099_v5, %v8283_v22  ;;  %v1227_v44 = vadd.f32 %v1195_v63, %v1124_v57  ;;  %v1337_v40 = vmul.f32 %v7996_v34, %v12061_v14 }
 0x275   : > { %v1978_v4 = vadd.f32 %v1946_v16, %v1909_v59  ;;  %v2084_v28 = vmul.f32 %v8091_v24, %v8283_v22  ;;  %v1901_v21 = vadd.f32 %v1869_v2, %v1800_v36  ;;  %v2007_v60 = vmul.f32 %v7996_v34, %v7881_v9 }
 0x276   : > { %v8312_v58 = vadd.f32 %v12064_v38, %v3945_v23  ;;  %v1377_v62 = vadd.f32 %v1345_v0, %v1306_v37  ;;  %v1298_v47 = vadd.f32 %v1266_v41, %v1227_v44  ;;  %v1408_v33 = vmul.f32 %v8134_v20, %v8099_v5 }
 0x277   : > { %5644 = vrcp.f32 %v8221_v55  ;;  %v2047_v57 = vadd.f32 %v2015_v3, %v1978_v4  ;;  %v1970_v63 = vadd.f32 %v1938_v7, %v1901_v21  ;;  %v2076_v59 = vmul.f32 %v8134_v20, %v8091_v24  ;;  %v12068_v3 = vld [vmem:[#allocation89_spill] sm:$0xff] }
 0x278   : > { %12065 = vst [vmem:[#allocation136_spill] sm:$0xff] %v8312_v58  ;;  %v2372_v16 = vadd.f32 %v2340_v30, %v1738_v46  ;;  %v2648_v36 = vadd.f32 %v2616_v17, %v2579_v35  ;;  %v8319_v2 = vadd.f32 %v1416_v53, %v1377_v62  ;;  %v1369_v9 = vadd.f32 %v1337_v40, %v1298_v47  ;;  %v5643_v34 = vpop.eup %5642  ;;  %v12071_v30 = vld [vmem:[#allocation133_spill] sm:$0xff]  ;;  %v12073_v53 = vld [vmem:[#allocation98_spill] sm:$0xff] }
 0x279   : > { %v8322_v23 = vadd.f32 %v12064_v38, %v3950_v42  ;;  %v8324_v41 = vadd.f32 %v2084_v28, %v2047_v57  ;;  %v2039_v37 = vadd.f32 %v2007_v60, %v1970_v63  ;;  %v2849_v55 = vmul.f32 %v7935_v8, %v7841_v45  ;;  %v1670_v38 = vpop.permute.xlu1 %1669 }
 0x27a   : > { %v8329_v7 = vadd.f32 %v12068_v3, %v2371_v56  ;;  %v2717_v0 = vadd.f32 %v2685_v48, %v2648_v36  ;;  %v5113_v46 = vmul.f32 -1.442695, %v8312_v58  ;;  %v8332_v17 = vadd.f32 %v1408_v33, %v1369_v9  ;;  %v8370_v36 = vld [vmem:[%s11327_s3 + $0x17] ss:$0 sm:$0xff]  ;;  %v12078_v3 = vld [vmem:[#allocation113_spill] sm:$0xff] }
 0x27b   : > { %12066 = vst [vmem:[#allocation154_spill] sm:$0xff] %v8322_v23  ;;  %12067 = vst [vmem:[#allocation93_spill] sm:$0xff] %v8324_v41  ;;  %v12072_v35 = vrot.slane %v12071_v30, 2  ;;  %v12074_v44 = vrot.slane %v12073_v53, 2  ;;  %v8342_v40 = vadd.f32 %v2076_v59, %v2039_v37  ;;  %v2780_v4 = vmul.f32 %v8041_v54, %v7692_v31  ;;  %v12088_v58 = vld [vmem:[#allocation160_spill] sm:$0xff] }
 0x27c   : > { %12069 = vst [vmem:[#allocation153_spill] sm:$0xff] %v8329_v7  ;;  %12070 = vst [vmem:[#allocation123_spill] sm:$0xff] %v8332_v17  ;;  %v2918_v56 = vmul.f32 %v7964_v25, %v7953_v43  ;;  %v8348_v48 = vadd.f32 1.0, %v5643_v34  ;;  %v8350_v9 = vadd.f32 %v2717_v0, %v2372_v16  ;;  %v11552_v28 = vrot.slane %v8319_v2, 6 }
 0x27d   : > { %v8340_v42 = vsel %vm3739_vm5, %v12074_v44, %v12072_v35  ;;  %12076 = vst [vmem:[#allocation124_spill] sm:$0xff] %v8342_v40  ;;  %v2479_v21 = vmul.f32 %v8269_v52, %v7714_v32  ;;  %v8356_v60 = vmul.f32 -1.442695, %v8322_v23  ;;  %v11551_v62 = vrot.slane %v8324_v41, 7  ;;  %v12087_v23 = vld [vmem:[#allocation99_spill] sm:$0xff] }
 0x27e   : > { %12075 = vst [vmem:[#allocation79_spill] sm:$0xff] %v8340_v42  ;;  %12077 = vst [vmem:[#allocation117_spill] sm:$0xff] %v8350_v9  ;;  %v2881_v47 = vadd.f32 %v2849_v55, %v2780_v4  ;;  %v2987_v33 = vmul.f32 %v8005_v49, %v7979_v19  ;;  %5646 = vpow2.f32 %v5113_v46  ;;  %v2410_v34 = vmul.f32 %v8134_v20, %v7704_v51 }
 0x27f   : > { %v2548_v57 = vmul.f32 %v8277_v10, %v7960_v26  ;;  %v11553_v63 = vrot.slane %v8332_v17, 6  ;;  %v11561_v59 = vrot.slane %v8342_v40, 7  ;;  %v3056_v37 = vmul.f32 %v8370_v36, %v8223_v1 }
 0x280   : > { %v2950_v16 = vadd.f32 %v2918_v56, %v2881_v47  ;;  %v3451_v55 = vmul.f32 %v7841_v45, %v7740_v27  ;;  %v12079_v0 = vrot.slane %v12078_v3, 6  ;;  %v2511_v30 = vadd.f32 %v2479_v21, %v2410_v34  ;;  %v12081_v34 = vld [vmem:[#allocation147_spill] sm:$0xff] }
 0x281   : > { %v2617_v35 = vmul.f32 %v7988_v61, %v12060_v13  ;;  %v2472_v53 = vmul.f32 %v7841_v45, %v7714_v32  ;;  %v12080_v44 = vrot.slane %v12043_v6, 7  ;;  %v3382_v47 = vmul.f32 %v8041_v54, %v12012_v29 }
 0x282   : > { %v1502_v46 = vsel %vm1492_vm2, %v12079_v0, %v11552_v28  ;;  %v3019_v56 = vadd.f32 %v2987_v33, %v2950_v16  ;;  %v3520_v21 = vmul.f32 %v8012_v18, %v7964_v25  ;;  %v12082_v3 = vrot.slane %v12081_v34, 6  ;;  %v8409_v33 = vld [vmem:[%s11327_s3 + $0x13] ss:$0 sm:$0xff]  ;;  %v2281_v34 = vpop.permute.xlu1 %2280 }
 0x283   : > { %v2168_v4 = vsel %vm2158_vm3, %v12080_v44, %v11551_v62  ;;  %v2403_v6 = vmul.f32 %v8041_v54, %v7704_v51  ;;  %v2541_v44 = vmul.f32 %v7964_v25, %v7960_v26  ;;  %12083 = vst [vmem:[#allocation109_spill] sm:$0xff] %v8409_v33  ;;  %v3589_v16 = vmul.f32 %v8409_v33, %v8005_v49  ;;  %v12084_v62 = vld [vmem:[#allocation149_spill] sm:$0xff] }
 0x284   : > { %v1509_v0 = vsel %vm1492_vm2, %v11553_v63, %v12082_v3  ;;  %v12085_v28 = vrot.slane %v12084_v62, 7  ;;  %v8419_v54 = vadd.f32 %v3056_v37, %v3019_v56  ;;  %v3483_v63 = vadd.f32 %v3451_v55, %v3382_v47  ;;  %v8423_v42 = vpop.eup %5644  ;;  %v8427_v62 = vld [vmem:[#allocation2 + $0xf8] sm:$0xff]  ;;  %v12093_v56 = vld [vmem:[#allocation92_spill] sm:$0xff] }
 0x285   : > { %v1204_v17 = vmul.f32 %v12088_v58, %v12087_v23  ;;  %12089 = vst [vmem:[#allocation89_spill] sm:$0xff] %v8423_v42  ;;  %v1739_v9 = vmul.f32 %v1670_v38, %v1502_v46  ;;  %v2341_v7 = vmul.f32 %v2281_v34, %v2168_v4  ;;  %v2504_v41 = vadd.f32 %v2472_v53, %v2403_v6  ;;  %v12091_v38 = vld [vmem:[#allocation77_spill] sm:$0xff]  ;;  %v12092_v53 = vld [vmem:[#allocation90_spill] sm:$0xff]  ;;  %v12095_v23 = vld [vmem:[#allocation95_spill] sm:$0xff] }
 0x286   : > { %v2175_v3 = vsel %vm2158_vm3, %v11561_v59, %v12085_v28  ;;  %12086 = vst [vmem:[#allocation110_spill] sm:$0xff] %v8419_v54  ;;  %v2610_v33 = vmul.f32 %v8005_v49, %v7988_v61  ;;  %v3552_v40 = vadd.f32 %v3520_v21, %v3483_v63  ;;  %v8432_v28 = vld [vmem:[%s11327_s3 + $0x18] ss:$0 sm:$0xff]  ;;  %v1133_v55 = vmul.f32 %v8223_v1, %v12057_v50 }
 0x287   : > { %12090 = vst [vmem:[#allocation133_spill] sm:$0xff] %v8432_v28  ;;  %v3658_v37 = vmul.f32 %v8432_v28, %v8223_v1  ;;  %v1275_v46 = vmul.f32 %v12091_v38, %v12058_v39  ;;  %v1732_v4 = vmul.f32 %v12092_v53, %v1509_v0  ;;  %v2334_v47 = vmul.f32 %v12093_v56, %v2175_v3  ;;  %v12094_v63 = vld [vmem:[#allocation141_spill] sm:$0xff]  ;;  %v12096_v39 = vld [vmem:[#allocation158_spill] sm:$0xff]  ;;  %v12098_v0 = vld [vmem:[#allocation151_spill] sm:$0xff] }
 0x288   : > { %v2573_v6 = vadd.f32 %v2541_v44, %v2504_v41  ;;  %v2679_v21 = vmul.f32 %v12094_v63, %v8223_v1  ;;  %v11569_v34 = vrot.slane %v8419_v54, 1  ;;  %v3621_v59 = vadd.f32 %v3589_v16, %v3552_v40  ;;  %v12100_v3 = vld [vmem:[#allocation159_spill] sm:$0xff]  ;;  %v12102_v16 = vld [vmem:[#allocation118_spill] sm:$0xff] }
 0x289   : > { %v1236_v42 = vadd.f32 %v1204_v17, %v1133_v55  ;;  %v1346_v28 = vmul.f32 %v12061_v14, %v12095_v23  ;;  %v1417_v50 = vmul.f32 %v8099_v5, %v8427_v62  ;;  %v12097_v29 = vrot.slane %v12096_v39, 6  ;;  %v12104_v39 = vld [vmem:[#allocation152_spill] sm:$0xff] }
 0x28a   : > { %v2642_v18 = vadd.f32 %v2610_v33, %v2573_v6  ;;  %v12099_v53 = vrot.slane %v12098_v0, 6  ;;  %v2474_v44 = vmul.f32 %v7964_v25, %v7714_v32  ;;  %v12101_v40 = vrot.slane %v12100_v3, 1 }
 0x28b   : > { %v3690_v17 = vadd.f32 %v3658_v37, %v3621_v59  ;;  %v1307_v33 = vadd.f32 %v1275_v46, %v1236_v42  ;;  %v12103_v55 = vrot.slane %v12102_v16, 7  ;;  %v12105_v56 = vrot.slane %v12104_v39, 7  ;;  %v5647_v3 = vpop.eup %5646  ;;  %v12106_v46 = vld [vmem:[#allocation116_spill] sm:$0xff]  ;;  %v12107_v16 = vld [vmem:[#allocation103_spill] sm:$0xff] }
 0x28c   : > { %v1507_v41 = vsel %vm1492_vm2, %v12099_v53, %v12097_v29  ;;  %v3153_v23 = vsel %vm3137_vm4, %v11569_v34, %v12101_v40  ;;  %v2686_v29 = vmul.f32 %v12094_v63, %v8283_v22  ;;  %v2366_v25 = vadd.f32 %v2334_v47, %v1732_v4  ;;  %v3834_v34 = vpop.permute.xlu0 %3833 }
 0x28d   : > { %v2173_v6 = vsel %vm2158_vm3, %v12105_v56, %v12103_v55  ;;  %v2405_v0 = vmul.f32 %v7841_v45, %v7704_v51  ;;  %v2543_v53 = vmul.f32 %v8005_v49, %v7960_v26  ;;  %v2580_v59 = vadd.f32 %v2548_v57, %v2511_v30  ;;  %v12108_v55 = vld [vmem:[#allocation128_spill] sm:$0xff] }
 0x28e   : > { %v2711_v42 = vadd.f32 %v2679_v21, %v2642_v18  ;;  %v1378_v37 = vadd.f32 %v1346_v28, %v1307_v33  ;;  %v1734_v40 = vmul.f32 %v12106_v46, %v1507_v41  ;;  %v3313_v39 = vmul.f32 %v12107_v16, %v3153_v23  ;;  %v12109_v21 = vld [vmem:[#allocation162_spill] sm:$0xff]  ;;  %v12111_v23 = vld [vmem:[#allocation145_spill] sm:$0xff] }
 0x28f   : > { %v2336_v56 = vmul.f32 %v12108_v55, %v2173_v6  ;;  %v2506_v54 = vadd.f32 %v2474_v44, %v2405_v0  ;;  %v2612_v4 = vmul.f32 %v8223_v1, %v7988_v61  ;;  %v2373_v47 = vadd.f32 %v2341_v7, %v1739_v9  ;;  %v12113_v9 = vld [vmem:[#allocation161_spill] sm:$0xff]  ;;  %v12115_v6 = vld [vmem:[#allocation171_spill] sm:$0xff]  ;;  %v12117_v0 = vld [vmem:[#allocation138_spill] sm:$0xff] }
 0x290   : > { %v2649_v45 = vadd.f32 %v2617_v35, %v2580_v59  ;;  %v3722_v5 = vrot.slane %v3690_v17, 2  ;;  %v8480_v14 = vadd.f32 %v1417_v50, %v1378_v37  ;;  %v4112_v22 = vadd.f32 1.0, %v5647_v3  ;;  %v12119_v3 = vld [vmem:[#allocation83_spill] sm:$0xff] }
 0x291   : > { %v2743_v57 = vadd.f32 %v2711_v42, %v2366_v25  ;;  %v2575_v18 = vadd.f32 %v2543_v53, %v2506_v54  ;;  %v2681_v30 = vmul.f32 %v12094_v63, %v12088_v58  ;;  %5648 = vrcp.f32 %v8348_v48  ;;  %v3842_v53 = vpop.permute.xlu0 %3841  ;;  %v12121_v42 = vld [vmem:[#allocation115_spill] sm:$0xff] }
 0x292   : > { %v2718_v28 = vadd.f32 %v2686_v29, %v2649_v45  ;;  %v12110_v41 = vrot.slane %v12109_v21, 2  ;;  %v12112_v7 = vrot.slane %v12111_v23, 1  ;;  %v12114_v35 = vrot.slane %v12113_v9, 1  ;;  %v12125_v45 = vld [vmem:[#allocation82_spill] sm:$0xff] }
 0x293   : > { %v3345_v17 = vadd.f32 %v3313_v39, %v2743_v57  ;;  %v2368_v54 = vadd.f32 %v2336_v56, %v1734_v40  ;;  %v2644_v33 = vadd.f32 %v2612_v4, %v2575_v18  ;;  %v12116_v25 = vrot.slane %v12115_v6, 2  ;;  %v12124_v56 = vld [vmem:[#allocation122_spill] sm:$0xff] }
 0x294   : > { %v3755_v44 = vsel %vm3739_vm5, %v3722_v5, %v12110_v41  ;;  %v3151_v50 = vsel %vm3137_vm4, %v12114_v35, %v12112_v7  ;;  %v12118_v48 = vrot.slane %v12117_v0, 2  ;;  %5650 = vpow2.f32 %v8356_v60  ;;  %v12129_v41 = vld [vmem:[#allocation144_spill] sm:$0xff] }
 0x295   : > { %v12120_v59 = vrot.slane %v12119_v3, 2  ;;  %v12122_v37 = vrot.slane %v12121_v42, 2  ;;  %v8510_v40 = vadd.f32 %v2718_v28, %v2373_v47  ;;  %v11577_v16 = vrot.slane %v8480_v14, 6 }
 0x296   : > { %v3753_v29 = vsel %vm3739_vm5, %v12118_v48, %v12116_v25  ;;  %5652 = vrcp.f32 %v4112_v22  ;;  %v3915_v39 = vmul.f32 %v3834_v34, %v3755_v44  ;;  %v2713_v55 = vadd.f32 %v2681_v30, %v2644_v33  ;;  %v1675_v44 = vpop.permute.xlu1 %1674 }
 0x297   : > { %v8508_v46 = vsel %vm3739_vm5, %v12122_v37, %v12120_v59  ;;  %v3315_v4 = vmul.f32 %v12124_v56, %v3151_v50  ;;  %v12126_v57 = vrot.slane %v12125_v45, 2  ;;  %v12128_v18 = vrot.slane %v8319_v2, 6  ;;  %v12130_v2 = vld [vmem:[#allocation156_spill] sm:$0xff] }
 0x298   : > { %12123 = vst [vmem:[#allocation98_spill] sm:$0xff] %v8508_v46  ;;  %v3917_v28 = vmul.f32 %v3842_v53, %v3753_v29  ;;  %v2854_v22 = vmul.f32 %v8134_v20, %v7935_v8  ;;  %v3947_v34 = vadd.f32 %v3915_v39, %v3345_v17  ;;  %v2745_v30 = vadd.f32 %v2713_v55, %v2368_v54  ;;  %v12131_v54 = vld [vmem:[#allocation76_spill] sm:$0xff]  ;;  %v8557_v29 = vld [vmem:[%s11328_s4] ss:$0 sm:$0xff] }
 0x299   : > { %v8518_v60 = vsel %vm3739_vm5, %v12126_v57, %v3722_v5  ;;  %v1501_v47 = vsel %vm1492_vm2, %v12128_v18, %v11577_v16  ;;  %v1809_v21 = vmul.f32 %v8223_v1, %v12062_v15  ;;  %v1878_v5 = vmul.f32 %v12088_v58, %v12129_v41  ;;  %v8542_v15 = vld [vmem:[#allocation2 + $0xe8] sm:$0xff] }
 0x29a   : > { %12127 = vst [vmem:[#allocation113_spill] sm:$0xff] %v8518_v60  ;;  %v1947_v23 = vmul.f32 %v12091_v38, %v12063_v12  ;;  %v2785_v7 = vmul.f32 %v12130_v2, %v7692_v31  ;;  %v2855_v9 = vmul.f32 %v8223_v1, %v7935_v8  ;;  %v2923_v35 = vmul.f32 %v8269_v52, %v7953_v43  ;;  %v12134_v57 = vld [vmem:[#allocation143_spill] sm:$0xff] }
 0x29b   : > { %v8540_v50 = vmul.f32 %v1675_v44, %v1501_v47  ;;  %v3347_v17 = vadd.f32 %v3315_v4, %v2745_v30  ;;  %v2016_v33 = vmul.f32 %v8542_v15, %v12131_v54  ;;  %v2085_v12 = vmul.f32 %v8091_v24, %v8427_v62  ;;  %v12133_v4 = vld [vmem:[#allocation106_spill] sm:$0xff] }
 0x29c   : > { %v2786_v6 = vmul.f32 %v8005_v49, %v7692_v31  ;;  %v2886_v25 = vadd.f32 %v2854_v22, %v2785_v7  ;;  %v2924_v0 = vmul.f32 %v12088_v58, %v7953_v43  ;;  %v2992_v48 = vmul.f32 %v8277_v10, %v7979_v19 }
 0x29d   : > { %v8560_v53 = vadd.f32 %v8557_v29, %v3947_v34  ;;  %v1910_v3 = vadd.f32 %v1878_v5, %v1809_v21  ;;  %v2411_v59 = vmul.f32 %v8223_v1, %v7704_v51  ;;  %v3456_v31 = vmul.f32 %v8134_v20, %v7740_v27 }
 0x29e   : > { %v2887_v42 = vadd.f32 %v2855_v9, %v2786_v6  ;;  %v2955_v37 = vadd.f32 %v2923_v35, %v2886_v25  ;;  %v2993_v39 = vmul.f32 %v12091_v38, %v7979_v19  ;;  %v3061_v55 = vmul.f32 %v8370_v36, %v12060_v13  ;;  %v8580_v21 = vpop.eup %5648  ;;  %v12138_v6 = vld [vmem:[#allocation133_spill] sm:$0xff] }
 0x29f   : > { %12132 = vst [vmem:[#allocation147_spill] sm:$0xff] %v8560_v53  ;;  %v2480_v56 = vmul.f32 %v12088_v58, %v7714_v32  ;;  %v3387_v45 = vmul.f32 %v12130_v2, %v12133_v4  ;;  %v3457_v51 = vmul.f32 %v8223_v1, %v7740_v27  ;;  %v3525_v18 = vmul.f32 %v8269_v52, %v12134_v57  ;;  %v12136_v27 = vld [vmem:[#allocation109_spill] sm:$0xff] }
 0x2a0   : > { %v3949_v47 = vadd.f32 %v3917_v28, %v3347_v17  ;;  %v2956_v22 = vadd.f32 %v2924_v0, %v2887_v42  ;;  %v3024_v34 = vadd.f32 %v2992_v48, %v2955_v37  ;;  %v3062_v30 = vmul.f32 %v8542_v15, %v8370_v36  ;;  %12135 = vst [vmem:[#allocation149_spill] sm:$0xff] %v8580_v21 }
 0x2a1   : > { %v3388_v32 = vmul.f32 %v8005_v49, %v12133_v4  ;;  %v3488_v41 = vadd.f32 %v3456_v31, %v3387_v45  ;;  %v3526_v5 = vmul.f32 %v12088_v58, %v12134_v57  ;;  %v3594_v44 = vmul.f32 %v12136_v27, %v8277_v10  ;;  %v8590_v35 = vpop.eup %5650 }
 0x2a2   : > { %v1979_v2 = vadd.f32 %v1947_v23, %v1910_v3  ;;  %v2549_v28 = vmul.f32 %v12091_v38, %v7960_v26  ;;  %v3025_v7 = vadd.f32 %v2993_v39, %v2956_v22  ;;  %v3093_v9 = vadd.f32 %v3061_v55, %v3024_v34  ;;  %12137 = vst [vmem:[#allocation160_spill] sm:$0xff] %v8590_v35 }
 0x2a3   : > { %v3489_v17 = vadd.f32 %v3457_v51, %v3388_v32  ;;  %v3557_v54 = vadd.f32 %v3525_v18, %v3488_v41  ;;  %v3595_v49 = vmul.f32 %v12136_v27, %v12091_v38  ;;  %v3663_v25 = vmul.f32 %v12138_v6, %v12060_v13  ;;  %v8596_v0 = vpop.eup %5652  ;;  %v4231_v51 = vld [vmem:[%s11329_s5 + $0x20] sm:$0xff]  ;;  %v4230_v32 = vld [vmem:[%s11329_s5 + $0x18] sm:$0xff]  ;;  %v2285_v41 = vpop.permute.xlu1 %2284 }
 0x2a4   : > { %12139 = vst [vmem:[#allocation77_spill] sm:$0xff] %v8596_v0  ;;  %v5115_v48 = vmul.f32 -1.442695, %v8560_v53  ;;  %v8600_v23 = vadd.f32 %v8557_v29, %v3949_v47  ;;  %v2048_v26 = vadd.f32 %v2016_v33, %v1979_v2  ;;  %v8602_v3 = vadd.f32 %v3062_v30, %v3025_v7  ;;  %v4232_v33 = vld [vmem:[%s11329_s5 + $0x28] sm:$0xff]  ;;  %v8636_v2 = vld [vmem:[#allocation2 + $0xe0] sm:$0xff]  ;;  %v12154_v53 = vld [vmem:[#allocation172_spill] sm:$0xff] }
 0x2a5   : > { %v3558_v31 = vadd.f32 %v3526_v5, %v3489_v17  ;;  %v3626_v42 = vadd.f32 %v3594_v44, %v3557_v54  ;;  %v3664_v37 = vmul.f32 %v8542_v15, %v12138_v6  ;;  %v2856_v39 = vmul.f32 %v8269_v52, %v7935_v8  ;;  %5301 = vmatprep.subr.mxu1 %v4232_v33  ;;  %v12142_v54 = vld [vmem:[#allocation165_spill] sm:$0xff] }
 0x2a6   : > { %12140 = vst [vmem:[#allocation90_spill] sm:$0xff] %v8600_v23  ;;  %v8608_v55 = vadd.f32 %v2085_v12, %v2048_v26  ;;  %v2512_v13 = vadd.f32 %v2480_v56, %v2411_v59  ;;  %v2618_v4 = vmul.f32 %v8542_v15, %v7988_v61  ;;  %v3125_v45 = vrot.slane %v3093_v9, 1  ;;  %v8621_v12 = vld [vmem:[%s11327_s3 + $0x3] ss:$0 sm:$0xff]  ;;  %5302 = vmatpush3.msra.mxu1 %v4232_v33 }
 0x2a7   : > { %v3627_v18 = vadd.f32 %v3595_v49, %v3558_v31  ;;  %v3695_v47 = vadd.f32 %v3663_v25, %v3626_v42  ;;  %12141 = vst [vmem:[#allocation92_spill] sm:$0xff] %v8621_v12  ;;  %v2787_v59 = vmul.f32 %v8621_v12, %v8134_v20  ;;  %v2925_v61 = vmul.f32 %v8277_v10, %v7953_v43  ;;  %v12144_v42 = vld [vmem:[#allocation164_spill] sm:$0xff] }
 0x2a8   : > { %v5117_v56 = vmul.f32 -1.442695, %v8600_v23  ;;  %v2581_v22 = vadd.f32 %v2549_v28, %v2512_v13  ;;  %v2687_v34 = vmul.f32 %v12094_v63, %v8427_v62  ;;  %v11578_v30 = vrot.slane %v8602_v3, 1  ;;  %5303 = vmatprep.subr.mxu1 %v4231_v51 }
 0x2a9   : > { %5654 = vpow2.f32 %v5115_v48  ;;  %v8634_v5 = vadd.f32 %v3664_v37, %v3627_v18  ;;  %v2888_v44 = vadd.f32 %v2856_v39, %v2787_v59  ;;  %v2994_v28 = vmul.f32 %v8636_v2, %v7979_v19  ;;  %5304 = vmatpush3.msra.mxu1 %v4231_v51  ;;  %v4229_v48 = vld [vmem:[%s11329_s5 + $0x10] sm:$0xff]  ;;  %v8657_v39 = vld [vmem:[%s11327_s3 + $0x9] ss:$0 sm:$0xff] }
 0x2aa   : > { %v11576_v7 = vrot.slane %v8608_v55, 7  ;;  %v2650_v9 = vadd.f32 %v2618_v4, %v2581_v22  ;;  %v3148_v17 = vsel %vm3137_vm4, %v3125_v45, %v11578_v30  ;;  %v12143_v49 = vrot.slane %v12142_v54, 1  ;;  %5305 = vmatprep.subr.mxu1 %v4230_v32  ;;  %v12145_v4 = vld [vmem:[#allocation93_spill] sm:$0xff]  ;;  %v12147_v18 = vld [vmem:[#allocation99_spill] sm:$0xff]  ;;  %v8678_v22 = vld [vmem:[%s11327_s3 + $0x4] ss:$0 sm:$0xff] }
 0x2ab   : > { %v3727_v26 = vrot.slane %v3695_v47, 2  ;;  %v2957_v31 = vadd.f32 %v2925_v61, %v2888_v44  ;;  %v3063_v37 = vmul.f32 %v8370_v36, %v12144_v42  ;;  %v3458_v13 = vmul.f32 %v8657_v39, %v8269_v52  ;;  %5306 = vmatpush3.msra.mxu1 %v4230_v32  ;;  %v4228_v59 = vld [vmem:[%s11329_s5 + $0x8] sm:$0xff]  ;;  %v12148_v32 = vld [vmem:[#allocation142_spill] sm:$0xff]  ;;  %v12149_v54 = vld [vmem:[#allocation140_spill] sm:$0xff] }
 0x2ac   : > { %v3149_v25 = vsel %vm3137_vm4, %v12143_v49, %v3125_v45  ;;  %5656 = vpow2.f32 %v5117_v56  ;;  %v12146_v45 = vrot.slane %v12145_v4, 7  ;;  %v8667_v51 = vadd.f32 %v2687_v34, %v2650_v9  ;;  %5307 = vmatprep.subr.mxu1 %v4229_v48  ;;  %v12150_v4 = vld [vmem:[#allocation148_spill] sm:$0xff]  ;;  %v12153_v30 = vld [vmem:[#allocation129_spill] sm:$0xff] }
 0x2ad   : > { %v1205_v47 = vmul.f32 %v8277_v10, %v12147_v18  ;;  %v11581_v61 = vrot.slane %v8634_v5, 2  ;;  %v3026_v56 = vadd.f32 %v2994_v28, %v2957_v31  ;;  %v3389_v34 = vmul.f32 %v8678_v22, %v8134_v20  ;;  %v12151_v28 = vld [vmem:[#allocation104_spill] sm:$0xff]  ;;  %5308 = vmatpush3.msra.mxu1 %v4229_v48  ;;  %v4227_v18 = vld [vmem:[%s11329_s5] sm:$0xff] }
 0x2ae   : > { %v2167_v33 = vsel %vm2158_vm3, %v12146_v45, %v11576_v7  ;;  %v3527_v44 = vmul.f32 %v8277_v10, %v12134_v57  ;;  %v3318_v9 = vmul.f32 %v12148_v32, %v3148_v17  ;;  %v3317_v49 = vmul.f32 %v12149_v54, %v3149_v25  ;;  %v8693_v20 = vld [vmem:[#allocation2 + $0x100] sm:$0xff]  ;;  %v3854_v7 = vpop.permute.xlu1 %3853  ;;  %5309 = vmatprep.subr.mxu1 %v4228_v59 }
 0x2af   : > { %v1134_v45 = vmul.f32 %v8269_v52, %v12150_v4  ;;  %v1276_v31 = vmul.f32 %v8636_v2, %v12151_v28  ;;  %v3750_v17 = vsel %vm3739_vm5, %v3727_v26, %v11581_v61  ;;  %v8699_v25 = vadd.f32 %v3063_v37, %v3026_v56  ;;  %v12152_v4 = vld [vmem:[#allocation153_spill] sm:$0xff]  ;;  %5310 = vmatpush3.msra.mxu1 %v4228_v59  ;;  %v3850_v37 = vpop.permute.xlu0 %3849 }
 0x2b0   : > { %v3490_v32 = vadd.f32 %v3458_v13, %v3389_v34  ;;  %v3596_v54 = vmul.f32 %v8636_v2, %v12136_v27  ;;  %v2342_v48 = vmul.f32 %v2285_v41, %v2167_v33  ;;  %v3350_v28 = vadd.f32 %v3318_v9, %v12152_v4  ;;  %v8715_v41 = vld [vmem:[%s11327_s3 + $0x6] ss:$0 sm:$0xff]  ;;  %5311 = vmatprep.subr.mxu1 %v4227_v18  ;;  %v8726_v9 = vld [vmem:[%s11327_s3 + $0x1] ss:$0 sm:$0xff] }
 0x2b1   : > { %v1237_v16 = vadd.f32 %v1205_v47, %v1134_v45  ;;  %v1347_v23 = vmul.f32 %v12153_v30, %v12144_v42  ;;  %v12155_v0 = vrot.slane %v12154_v53, 2  ;;  %v3665_v13 = vmul.f32 %v12138_v6, %v12144_v42  ;;  %12156 = vst [vmem:[#allocation141_spill] sm:$0xff] %v8715_v41  ;;  %v12157_v47 = vld [vmem:[#allocation100_spill] sm:$0xff]  ;;  %5312 = vmatpush3.msra.mxu1 %v4227_v18 }
 0x2b2   : > { %v3559_v56 = vadd.f32 %v3527_v44, %v3490_v32  ;;  %v1879_v33 = vmul.f32 %v8715_v41, %v8277_v10  ;;  %v3920_v30 = vmul.f32 %v3854_v7, %v3750_v17  ;;  %v3349_v53 = vadd.f32 %v3317_v49, %v12157_v47  ;;  %12159 = vst [vmem:[#allocation95_spill] sm:$0xff] %v8726_v9  ;;  %v8733_v7 = vld [vmem:[%s11327_s3 + $0xb] ss:$0 sm:$0xff] }
 0x2b3   : > { %v3751_v61 = vsel %vm3739_vm5, %v12155_v0, %v3727_v26  ;;  %v1308_v59 = vadd.f32 %v1276_v31, %v1237_v16  ;;  %v12158_v0 = vld [vmem:[#allocation105_spill] sm:$0xff]  ;;  %v1810_v45 = vmul.f32 %v8726_v9, %v8269_v52  ;;  %12160 = vst [vmem:[#allocation158_spill] sm:$0xff] %v8733_v7  ;;  %v1948_v16 = vmul.f32 %v8733_v7, %v8636_v2 }
 0x2b4   : > { %v1418_v26 = vmul.f32 %v12158_v0, %v8693_v20  ;;  %v3628_v44 = vadd.f32 %v3596_v54, %v3559_v56  ;;  %v2374_v49 = vadd.f32 %v2342_v48, %v8540_v50  ;;  %v3919_v31 = vmul.f32 %v3850_v37, %v3751_v61  ;;  %v8745_v56 = vld [vmem:[%s11327_s3 + $0x10] ss:$0 sm:$0xff] }
 0x2b5   : > { %v1379_v18 = vadd.f32 %v1347_v23, %v1308_v59  ;;  %v2858_v17 = vmul.f32 %v8277_v10, %v7935_v8  ;;  %v3952_v32 = vadd.f32 %v3920_v30, %v3350_v28  ;;  %v1911_v4 = vadd.f32 %v1879_v33, %v1810_v45  ;;  %12161 = vst [vmem:[#allocation151_spill] sm:$0xff] %v8745_v56 }
 0x2b6   : > { %v8740_v54 = vadd.f32 %v3665_v13, %v3628_v44  ;;  %v2017_v47 = vmul.f32 %v8745_v56, %v12144_v42  ;;  %v8749_v34 = vpop.eup %5654  ;;  %v3951_v50 = vadd.f32 %v3919_v31, %v3349_v53  ;;  %v2789_v23 = vmul.f32 %v8621_v12, %v8269_v52 }
 0x2b7   : > { %12162 = vst [vmem:[#allocation159_spill] sm:$0xff] %v8749_v34  ;;  %v2857_v61 = vmul.f32 %v12088_v58, %v7935_v8  ;;  %v2927_v48 = vmul.f32 %v8636_v2, %v7953_v43  ;;  %v8757_v28 = vadd.f32 %v1418_v26, %v1379_v18  ;;  %v12163_v37 = vrot.slane %v8699_v25, 1 }
 0x2b8   : > { %v12164_v13 = vrot.slane %v8602_v3, 1  ;;  %v1980_v30 = vadd.f32 %v1948_v16, %v1911_v4  ;;  %v2086_v53 = vmul.f32 %v8091_v24, %v8693_v20  ;;  %v2788_v59 = vmul.f32 %v8621_v12, %v8223_v1 }
 0x2b9   : > { %v2890_v8 = vadd.f32 %v2858_v17, %v2789_v23  ;;  %v2926_v44 = vmul.f32 %v12091_v38, %v7953_v43  ;;  %v2996_v26 = vmul.f32 %v7979_v19, %v12144_v42  ;;  %v8773_v45 = vpop.eup %5656  ;;  %v8776_v3 = vadd.f32 %v8667_v51, %v2374_v49  ;;  %v12168_v49 = vld [vmem:[#allocation146_spill] sm:$0xff]  ;;  %v12172_v51 = vld [vmem:[#allocation117_spill] sm:$0xff] }
 0x2ba   : > { %v3147_v33 = vsel %vm3137_vm4, %v12164_v13, %v12163_v37  ;;  %12165 = vst [vmem:[#allocation118_spill] sm:$0xff] %v8773_v45  ;;  %v8779_v16 = vadd.f32 %v8557_v29, %v3952_v32  ;;  %v11582_v24 = vrot.slane %v8740_v54, 2  ;;  %v2049_v31 = vadd.f32 %v2017_v47, %v1980_v30 }
 0x2bb   : > { %v2889_v18 = vadd.f32 %v2857_v61, %v2788_v59  ;;  %v2959_v4 = vadd.f32 %v2927_v48, %v2890_v8  ;;  %v2995_v17 = vmul.f32 %v8542_v15, %v7979_v19  ;;  %v3065_v43 = vmul.f32 %v8370_v36, %v8693_v20  ;;  %v8800_v48 = vld [vmem:[%s11327_s3 + $0x2] ss:$0 sm:$0xff] }
 0x2bc   : > { %12166 = vst [vmem:[#allocation152_spill] sm:$0xff] %v8779_v16  ;;  %v8787_v23 = vadd.f32 %v8557_v29, %v3951_v50  ;;  %v3319_v37 = vmul.f32 %v12168_v49, %v3147_v33  ;;  %v3460_v32 = vmul.f32 %v8657_v39, %v8277_v10  ;;  %v8793_v13 = vadd.f32 %v2086_v53, %v2049_v31 }
 0x2bd   : > { %v2958_v47 = vadd.f32 %v2926_v44, %v2889_v18  ;;  %v3028_v61 = vadd.f32 %v2996_v26, %v2959_v4  ;;  %v3064_v19 = vmul.f32 %v8370_v36, %v8427_v62  ;;  %v2412_v50 = vmul.f32 %v8800_v48, %v8269_v52  ;;  %v8819_v44 = vld [vmem:[%s11327_s3 + $0x7] ss:$0 sm:$0xff]  ;;  %v3858_v18 = vpop.permute.xlu0 %3857 }
 0x2be   : > { %12167 = vst [vmem:[#allocation116_spill] sm:$0xff] %v8787_v23  ;;  %v3391_v33 = vmul.f32 %v8678_v22, %v8269_v52  ;;  %v3459_v30 = vmul.f32 %v8657_v39, %v12088_v58  ;;  %v3529_v53 = vmul.f32 %v8636_v2, %v12134_v57  ;;  %v12169_v59 = vrot.slane %v8634_v5, 2  ;;  %12170 = vst [vmem:[#allocation103_spill] sm:$0xff] %v8819_v44 }
 0x2bf   : > { %v2481_v52 = vmul.f32 %v8819_v44, %v8277_v10  ;;  %v3027_v26 = vadd.f32 %v2995_v17, %v2958_v47  ;;  %v8823_v31 = vadd.f32 %v3065_v43, %v3028_v61  ;;  %v3390_v4 = vmul.f32 %v8678_v22, %v8223_v1  ;;  %v8836_v17 = vld [vmem:[%s11327_s3 + $0xc] ss:$0 sm:$0xff] }
 0x2c0   : > { %v3749_v8 = vsel %vm3739_vm5, %v12169_v59, %v11582_v24  ;;  %v3492_v49 = vadd.f32 %v3460_v32, %v3391_v33  ;;  %v3528_v5 = vmul.f32 %v12091_v38, %v12134_v57  ;;  %v3598_v59 = vmul.f32 %v12136_v27, %v12144_v42  ;;  %v1680_v24 = vpop.permute.xlu1 %1679 }
 0x2c1   : > { %12171 = vst [vmem:[#allocation128_spill] sm:$0xff] %v8823_v31  ;;  %v3351_v35 = vadd.f32 %v3319_v37, %v12172_v51  ;;  %v2550_v1 = vmul.f32 %v8836_v17, %v8636_v2  ;;  %v8840_v43 = vadd.f32 %v3064_v19, %v3027_v26  ;;  %v3491_v32 = vadd.f32 %v3459_v30, %v3390_v4  ;;  %v8856_v30 = vld [vmem:[%s11327_s3 + $0x11] ss:$0 sm:$0xff] }
 0x2c2   : > { %v3561_v57 = vadd.f32 %v3529_v53, %v3492_v49  ;;  %v3597_v47 = vmul.f32 %v8542_v15, %v12136_v27  ;;  %v3667_v51 = vmul.f32 %v12138_v6, %v8693_v20  ;;  %v12173_v37 = vrot.slane %v8757_v28, 6 }
 0x2c3   : > { %v12174_v61 = vrot.slane %v8480_v14, 6  ;;  %v3921_v45 = vmul.f32 %v3858_v18, %v3749_v8  ;;  %v2513_v21 = vadd.f32 %v2481_v52, %v2412_v50  ;;  %v11583_v19 = vrot.slane %v8823_v31, 1  ;;  %v8872_v18 = vld [vmem:[%s11327_s3 + $0x5] ss:$0 sm:$0xff] }
 0x2c4   : > { %v2619_v53 = vmul.f32 %v8856_v30, %v12144_v42  ;;  %v3560_v26 = vadd.f32 %v3528_v5, %v3491_v32  ;;  %v3630_v4 = vadd.f32 %v3598_v59, %v3561_v57  ;;  %v3666_v14 = vmul.f32 %v12138_v6, %v8427_v62  ;;  %12177 = vst [vmem:[#allocation162_spill] sm:$0xff] %v8872_v18 }
 0x2c5   : > { %v1500_v33 = vsel %vm1492_vm2, %v12174_v61, %v12173_v37  ;;  %v3953_v49 = vadd.f32 %v3921_v45, %v3351_v35  ;;  %v12175_v37 = vrot.slane %v8793_v13, 7  ;;  %v12176_v50 = vrot.slane %v8608_v55, 7  ;;  %v8881_v55 = vld [vmem:[#allocation2 + $0x108] sm:$0xff]  ;;  %v2289_v61 = vpop.permute.xlu1 %2288 }
 0x2c6   : > { %v11584_v52 = vrot.slane %v8840_v43, 1  ;;  %v1206_v5 = vmul.f32 %v8872_v18, %v12091_v38  ;;  %v8877_v59 = vmul.f32 -1.442695, %v8779_v16  ;;  %v2582_v35 = vadd.f32 %v2550_v1, %v2513_v21 }
 0x2c7   : > { %v2166_v8 = vsel %vm2158_vm3, %v12176_v50, %v12175_v37  ;;  %v3629_v45 = vadd.f32 %v3597_v47, %v3560_v26  ;;  %v8879_v32 = vadd.f32 %v3667_v51, %v3630_v4  ;;  %v8883_v57 = vmul.f32 %v1680_v24, %v1500_v33  ;;  %v8894_v50 = vld [vmem:[%s11327_s3] ss:$0 sm:$0xff]  ;;  %v8901_v24 = vld [vmem:[%s11327_s3 + $0xa] ss:$0 sm:$0xff] }
 0x2c8   : > { %v3145_v37 = vsel %vm3137_vm4, %v11584_v52, %v11583_v19  ;;  %12179 = vst [vmem:[#allocation161_spill] sm:$0xff] %v8894_v50  ;;  %v1135_v21 = vmul.f32 %v8894_v50, %v12088_v58  ;;  %12180 = vst [vmem:[#allocation171_spill] sm:$0xff] %v8901_v24  ;;  %v1277_v1 = vmul.f32 %v8901_v24, %v8542_v15  ;;  %v8921_v52 = vld [vmem:[%s11327_s3 + $0xf] ss:$0 sm:$0xff]  ;;  %5658 = vpow2.f32 %v8877_v59 }
 0x2c9   : > { %12178 = vst [vmem:[#allocation145_spill] sm:$0xff] %v8879_v32  ;;  %v8905_v47 = vmul.f32 %v2289_v61, %v2166_v8  ;;  %v8907_v51 = vadd.f32 %v2619_v53, %v2582_v35  ;;  %v8911_v33 = vmul.f32 %v12094_v63, %v8693_v20  ;;  %v8913_v26 = vadd.f32 %v3666_v14, %v3629_v45  ;;  %v12183_v35 = vld [vmem:[#allocation157_spill] sm:$0xff] }
 0x2ca   : > { %v8916_v4 = vadd.f32 %v8557_v29, %v3953_v49  ;;  %v1238_v19 = vadd.f32 %v1206_v5, %v1135_v21  ;;  %12182 = vst [vmem:[#allocation83_spill] sm:$0xff] %v8921_v52  ;;  %v1348_v8 = vmul.f32 %v8921_v52, %v8427_v62  ;;  %v1880_v53 = vmul.f32 %v8715_v41, %v12091_v38 }
 0x2cb   : > { %v3321_v61 = vmul.f32 %v12183_v35, %v3145_v37  ;;  %v1419_v49 = vmul.f32 %v12158_v0, %v8881_v55  ;;  %v3461_v5 = vmul.f32 %v8657_v39, %v12091_v38  ;;  %v3462_v21 = vmul.f32 %v8657_v39, %v8636_v2 }
 0x2cc   : > { %12181 = vst [vmem:[#allocation138_spill] sm:$0xff] %v8916_v4  ;;  %v1309_v45 = vadd.f32 %v1277_v1, %v1238_v19  ;;  %v1811_v16 = vmul.f32 %v8726_v9, %v12088_v58  ;;  %v1949_v34 = vmul.f32 %v8733_v7, %v8542_v15  ;;  %v3392_v35 = vmul.f32 %v8678_v22, %v12088_v58  ;;  %v8947_v19 = vld [vmem:[%s11327_s3 + $0xe] ss:$0 sm:$0xff]  ;;  %v8955_v7 = vld [vmem:[#allocation2 + $0x110] sm:$0xff] }
 0x2cd   : > { %v3393_v0 = vmul.f32 %v8678_v22, %v8277_v10  ;;  %12184 = vst [vmem:[#allocation115_spill] sm:$0xff] %v8947_v19  ;;  %v3530_v1 = vmul.f32 %v8947_v19, %v8542_v15  ;;  %v3531_v31 = vmul.f32 %v8947_v19, %v12144_v42  ;;  %v2018_v37 = vmul.f32 %v8745_v56, %v8427_v62 }
 0x2ce   : > { %v1380_v14 = vadd.f32 %v1348_v8, %v1309_v45  ;;  %v1912_v52 = vadd.f32 %v1880_v53, %v1811_v16  ;;  %v8958_v9 = vadd.f32 %v3321_v61, %v8776_v3  ;;  %v12185_v24 = vrot.slane %v8879_v32, 2  ;;  %v8966_v8 = vpop.permute.xlu1 %1684  ;;  %v8975_v3 = vld [vmem:[%s11327_s3 + $0x15] ss:$0 sm:$0xff]  ;;  %v3866_v32 = vpop.permute.xlu0 %3865 }
 0x2cf   : > { %v12186_v50 = vrot.slane %v8913_v26, 2  ;;  %v3493_v45 = vadd.f32 %v3461_v5, %v3392_v35  ;;  %v3599_v16 = vmul.f32 %v12136_v27, %v8427_v62  ;;  %v3494_v56 = vadd.f32 %v3462_v21, %v3393_v0  ;;  %12188 = vst [vmem:[#allocation82_spill] sm:$0xff] %v8975_v3 }
 0x2d0   : > { %v8970_v53 = vadd.f32 %v1419_v49, %v1380_v14  ;;  %v1981_v18 = vadd.f32 %v1949_v34, %v1912_v52  ;;  %v2087_v61 = vmul.f32 %v8975_v3, %v8881_v55  ;;  %v8983_v5 = vmul.f32 %v12138_v6, %v8881_v55  ;;  %v8988_v34 = vld [vmem:[%s11327_s3 + $0x8] ss:$0 sm:$0xff]  ;;  %v9007_v3 = vld [vmem:[%s11327_s3 + $0xd] ss:$0 sm:$0xff] }
 0x2d1   : > { %v3747_v41 = vsel %vm3739_vm5, %v12186_v50, %v12185_v24  ;;  %v3562_v50 = vadd.f32 %v3530_v1, %v3493_v45  ;;  %v3600_v24 = vmul.f32 %v12136_v27, %v8693_v20  ;;  %12189 = vst [vmem:[#allocation144_spill] sm:$0xff] %v8988_v34  ;;  %v2860_v52 = vmul.f32 %v8988_v34, %v8636_v2 }
 0x2d2   : > { %12187 = vst [vmem:[#allocation122_spill] sm:$0xff] %v8970_v53  ;;  %v8992_v14 = vmul.f32 %v3866_v32, %v3747_v41  ;;  %v3563_v49 = vadd.f32 %v3531_v31, %v3494_v56  ;;  %v8996_v21 = vmul.f32 %v12138_v6, %v8955_v7  ;;  %v2050_v35 = vadd.f32 %v2018_v37, %v1981_v18  ;;  %v2293_v32 = vpop.permute.xlu1 %2292 }
 0x2d3   : > { %v8998_v0 = vadd.f32 %v3599_v16, %v3562_v50  ;;  %v2791_v1 = vmul.f32 %v8621_v12, %v8277_v10  ;;  %v2859_v45 = vmul.f32 %v8988_v34, %v12091_v38  ;;  %12190 = vst [vmem:[#allocation156_spill] sm:$0xff] %v9007_v3  ;;  %v2929_v41 = vmul.f32 %v9007_v3, %v12144_v42  ;;  %v9023_v50 = vld [vmem:[%s11327_s3 + $0x12] ss:$0 sm:$0xff] }
 0x2d4   : > { %v11617_v56 = vrot.slane %v8970_v53, 6  ;;  %v9012_v31 = vadd.f32 %v2087_v61, %v2050_v35  ;;  %v2482_v18 = vmul.f32 %v8819_v44, %v12091_v38  ;;  %v2790_v10 = vmul.f32 %v8621_v12, %v12088_v58 }
 0x2d5   : > { %v2892_v37 = vadd.f32 %v2860_v52, %v2791_v1  ;;  %v2928_v16 = vmul.f32 %v9007_v3, %v8542_v15  ;;  %v2998_v61 = vmul.f32 %v9023_v50, %v8693_v20  ;;  %v11614_v35 = vmov 0.0  }
 0x2d6   : > { %12191 = vst [vmem:[#allocation76_spill] sm:$0xff] %v9012_v31  ;;  %1037 = vst.msk [vmem:[#allocation2 + $0x120] sm:$0xff] %vm1032_vm1, %v11614_v35  ;;  %5361 = vmatprep.subr.mxu0 %v11614_v35  ;;  %v12192_v52 = vrot.slane %v8757_v28, 6  ;;  %v3632_v3 = vadd.f32 %v3600_v24, %v3563_v49  ;;  %v2413_v34 = vmul.f32 %v8800_v48, %v12088_v58  ;;  %v11618_v28 = vrot.slane %v9012_v31, 7 }
 0x2d7   : > { %1033 = vst.msk [vmem:[#allocation2] sm:$0xff] %vm1032_vm1, %v11614_v35  ;;  %1034 = vst.msk [vmem:[#allocation2 + $0x8] sm:$0xff] %vm1032_vm1, %v11614_v35  ;;  %v3464_v12 = vmul.f32 %v8657_v39, %v12144_v42  ;;  %v2891_v44 = vadd.f32 %v2859_v45, %v2790_v10  ;;  %v2961_v60 = vadd.f32 %v2929_v41, %v2892_v37  ;;  %v12193_v10 = vrot.slane %v8793_v13, 7 }
 0x2d8   : > { %1035 = vst.msk [vmem:[#allocation2 + $0x10] sm:$0xff] %vm1032_vm1, %v11614_v35  ;;  %1036 = vst.msk [vmem:[#allocation2 + $0x18] sm:$0xff] %vm1032_vm1, %v11614_v35  ;;  %v1499_v1 = vsel %vm1492_vm2, %v12192_v52, %v11617_v56  ;;  %v2997_v46 = vmul.f32 %v9023_v50, %v8427_v62  ;;  %v2514_v53 = vadd.f32 %v2482_v18, %v2413_v34  ;;  %v12195_v56 = vrot.slane %v8840_v43, 1 }
 0x2d9   : > { %1038 = vst.msk [vmem:[#allocation2 + $0x128] sm:$0xff] %vm1032_vm1, %v11614_v35  ;;  %1039 = vst.msk [vmem:[#allocation2 + $0x130] sm:$0xff] %vm1032_vm1, %v11614_v35  ;;  %v3395_v24 = vmul.f32 %v8678_v22, %v8636_v2  ;;  %v3533_v58 = vmul.f32 %v8947_v19, %v8693_v20  ;;  %v2960_v49 = vadd.f32 %v2928_v16, %v2891_v44  ;;  %v12196_v13 = vrot.slane %v8699_v25, 1 }
 0x2da   : > { %1040 = vst.msk [vmem:[#allocation2 + $0x138] sm:$0xff] %vm1032_vm1, %v11614_v35  ;;  %v3067_v35 = vmul.f32 %v8370_v36, %v8955_v7  ;;  %v3030_v52 = vadd.f32 %v2998_v61, %v2961_v60  ;;  %v3066_v45 = vmul.f32 %v8370_v36, %v8881_v55  ;;  %v3463_v41 = vmul.f32 %v8657_v39, %v8542_v15  ;;  %v3862_v61 = vpop.permute.xlu1 %3861 }
 0x2db   : > { %v2165_v34 = vsel %vm2158_vm3, %v12193_v10, %v11618_v28  ;;  %v2551_v18 = vmul.f32 %v8836_v17, %v8542_v15  ;;  %v3496_v37 = vadd.f32 %v3464_v12, %v3395_v24  ;;  %v3602_v60 = vmul.f32 %v12136_v27, %v8955_v7 }
 0x2dc   : > { %v3029_v44 = vadd.f32 %v2997_v46, %v2960_v49  ;;  %v9077_v16 = vadd.f32 %v3067_v35, %v3030_v52  ;;  %v3394_v36 = vmul.f32 %v8678_v22, %v12091_v38  ;;  %v3146_v10 = vsel %vm3137_vm4, %v12196_v13, %v12195_v56  ;;  %v9093_v49 = vld [vmem:[#allocation2 + $0x118] sm:$0xff] }
 0x2dd   : > { %v2344_v28 = vmul.f32 %v2293_v32, %v2165_v34  ;;  %v2620_v12 = vmul.f32 %v8856_v30, %v8427_v62  ;;  %v9089_v24 = vld [vmem:[#allocation2 + $0x120] sm:$0xff]  ;;  %v3532_v46 = vmul.f32 %v8947_v19, %v8427_v62  ;;  %v3565_v35 = vadd.f32 %v3533_v58, %v3496_v37  ;;  %v12199_v58 = vld [vmem:[#allocation155_spill] sm:$0xff] }
 0x2de   : > { %12194 = vst [vmem:[#allocation106_spill] sm:$0xff] %v9077_v16  ;;  %v9095_v38 = vadd.f32 %v3066_v45, %v3029_v44  ;;  %v3495_v43 = vadd.f32 %v3463_v41, %v3394_v36  ;;  %v3601_v25 = vmul.f32 %v12136_v27, %v8881_v55  ;;  %v12197_v56 = vrot.slane %v8913_v26, 2 }
 0x2df   : > { %v12198_v32 = vrot.slane %v8740_v54, 2  ;;  %v3634_v34 = vadd.f32 %v3602_v60, %v3565_v35  ;;  %v3671_v13 = vmul.f32 %v12138_v6, %v9089_v24  ;;  %v3320_v37 = vmul.f32 %v12199_v58, %v3146_v10 }
 0x2e0   : > { %v1742_v45 = vmul.f32 %v8966_v8, %v1499_v1  ;;  %v9111_v41 = vadd.f32 %v8983_v5, %v8998_v0  ;;  %v2583_v44 = vadd.f32 %v2551_v18, %v2514_v53  ;;  %v11623_v26 = vrot.slane %v9077_v16, 1 }
 0x2e1   : > { %v3748_v52 = vsel %vm3739_vm5, %v12198_v32, %v12197_v56  ;;  %v2689_v54 = vmul.f32 %v12094_v63, %v8881_v55  ;;  %v3564_v36 = vadd.f32 %v3532_v46, %v3495_v43  ;;  %v3670_v60 = vmul.f32 %v12138_v6, %v9093_v49 }
 0x2e2   : > { %v3922_v31 = vmul.f32 %v3862_v61, %v3748_v52  ;;  %v3352_v35 = vadd.f32 %v3320_v37, %v8510_v40  ;;  %v9120_v61 = vadd.f32 %v8996_v21, %v3632_v3  ;;  %v2652_v8 = vadd.f32 %v2620_v12, %v2583_v44  ;;  %v12203_v52 = vld [vmem:[#allocation102_spill] sm:$0xff] }
 0x2e3   : > { %v11625_v1 = vrot.slane %v9095_v38, 1  ;;  %v3466_v53 = vmul.f32 %v8657_v39, %v8693_v20  ;;  %v2376_v5 = vadd.f32 %v2344_v28, %v1742_v45  ;;  %v3633_v0 = vadd.f32 %v3601_v25, %v3564_v36 }
 0x2e4   : > { %12200 = vst [vmem:[#allocation143_spill] sm:$0xff] %v9120_v61  ;;  %v9125_v18 = vadd.f32 %v3671_v13, %v3634_v34  ;;  %v3954_v63 = vadd.f32 %v3922_v31, %v3352_v35  ;;  %v3397_v3 = vmul.f32 %v8678_v22, %v12144_v42  ;;  %v3465_v21 = vmul.f32 %v8657_v39, %v8427_v62  ;;  %v9163_v35 = vld [vmem:[#allocation2 + $0x128] sm:$0xff] }
 0x2e5   : > { %v3143_v40 = vsel %vm3137_vm4, %v11625_v1, %v11623_v26  ;;  %v3535_v28 = vmul.f32 %v8947_v19, %v8955_v7  ;;  %v3955_v10 = vadd.f32 %v8992_v14, %v8958_v9  ;;  %v11624_v31 = vrot.slane %v9111_v41, 2  ;;  %v3874_v14 = vpop.permute.xlu0 %3873  ;;  %v12231_v26 = vld [vmem:[#allocation158_spill] sm:$0xff] }
 0x2e6   : > { %12201 = vst [vmem:[#allocation109_spill] sm:$0xff] %v9125_v18  ;;  %v2721_v12 = vadd.f32 %v2689_v54, %v2652_v8  ;;  %v9142_v46 = vadd.f32 %v3670_v60, %v3633_v0  ;;  %v11621_v43 = vrot.slane %v9120_v61, 2  ;;  %v3396_v25 = vmul.f32 %v8678_v22, %v8542_v15  ;;  %v1387_v8 = vld [vmem:[#allocation2 + $0x130] sm:$0xff] }
 0x2e7   : > { %v3498_v42 = vadd.f32 %v3466_v53, %v3397_v3  ;;  %v3534_v56 = vmul.f32 %v8947_v19, %v8881_v55  ;;  %v3323_v34 = vmul.f32 %v12203_v52, %v3143_v40  ;;  %v11620_v13 = vrot.slane %v9125_v18, 2  ;;  %v12212_v52 = vld [vmem:[#allocation98_spill] sm:$0xff] }
 0x2e8   : > { %12202 = vst [vmem:[#allocation133_spill] sm:$0xff] %v9142_v46  ;;  %v2753_v32 = vadd.f32 %v2721_v12, %v2376_v5  ;;  %v9152_v9 = vadd.f32 %v8557_v29, %v3954_v63  ;;  %v3497_v58 = vadd.f32 %v3465_v21, %v3396_v25  ;;  %v3603_v45 = vmul.f32 %v12136_v27, %v9093_v49  ;;  %v12209_v12 = vld [vmem:[#allocation79_spill] sm:$0xff]  ;;  %v12210_v25 = vld [vmem:[#allocation84_spill] sm:$0xff] }
 0x2e9   : > { %v3567_v37 = vadd.f32 %v3535_v28, %v3498_v42  ;;  %v3604_v44 = vmul.f32 %v12136_v27, %v9089_v24  ;;  %v5119_v54 = vmul.f32 -1.442695, %v8787_v23  ;;  %v2720_v36 = vadd.f32 %v8911_v33, %v8907_v51  ;;  %v12206_v28 = vld [vmem:[#allocation120_spill] sm:$0xff] }
 0x2ea   : > { %12204 = vst [vmem:[#allocation165_spill] sm:$0xff] %v9152_v9  ;;  %v11622_v60 = vrot.slane %v9142_v46, 2  ;;  %v5121_v53 = vmul.f32 -1.442695, %v8916_v4  ;;  %v2375_v5 = vadd.f32 %v8905_v47, %v8883_v57  ;;  %v3745_v59 = vsel %vm3739_vm5, %v11624_v31, %v11621_v43  ;;  %v12230_v43 = vld [vmem:[#allocation95_spill] sm:$0xff] }
 0x2eb   : > { %v3566_v0 = vadd.f32 %v3534_v56, %v3497_v58  ;;  %v9175_v51 = vadd.f32 %v8557_v29, %v3955_v10  ;;  %v3355_v33 = vadd.f32 %v3323_v34, %v2753_v32  ;;  %v5122_v57 = vmul.f32 -1.442695, %v9152_v9  ;;  %v12207_v29 = vld [vmem:[#allocation89_spill] sm:$0xff]  ;;  %v12213_v34 = vld [vmem:[#allocation94_spill] sm:$0xff]  ;;  %v12233_v4 = vld [vmem:[#allocation151_spill] sm:$0xff] }
 0x2ec   : > { %v3743_v63 = vsel %vm3739_vm5, %v11622_v60, %v11620_v13  ;;  %v3636_v40 = vadd.f32 %v3604_v44, %v3567_v37  ;;  %v3672_v3 = vmul.f32 %v12138_v6, %v9163_v35  ;;  %v3673_v21 = vmul.f32 %v12138_v6, %v1387_v8  ;;  %v1388_v32 = vld [vmem:[#allocation2 + $0x138] sm:$0xff] }
 0x2ed   : > { %12205 = vst [vmem:[#allocation164_spill] sm:$0xff] %v9175_v51  ;;  %v3635_v47 = vadd.f32 %v3603_v45, %v3566_v0  ;;  %v9189_v10 = vmul.f32 %v12207_v29, %v12206_v28  ;;  %v9193_v42 = vmul.f32 %v12210_v25, %v12209_v12  ;;  %5660 = vpow2.f32 %v5119_v54  ;;  %v12215_v37 = vld [vmem:[#allocation113_spill] sm:$0xff]  ;;  %v12216_v45 = vld [vmem:[#allocation139_spill] sm:$0xff]  ;;  %v3882_v0 = vpop.permute.xlu0 %3881 }
 0x2ee   : > { %v3925_v56 = vmul.f32 %v3874_v14, %v3745_v59  ;;  %v9197_v58 = vmul.f32 %v12213_v34, %v12212_v52  ;;  %v9201_v44 = vmul.f32 %v12216_v45, %v12215_v37  ;;  %5662 = vpow2.f32 %v5121_v53  ;;  %v12227_v52 = vld [vmem:[#allocation161_spill] sm:$0xff]  ;;  %v9245_v45 = vld [vmem:[#allocation2 + $0xf0] sm:$0xff] }
 0x2ef   : > { %12208 = vst [vmem:[#allocation93_spill] sm:$0xff] %v9189_v10  ;;  %12211 = vst [vmem:[#allocation99_spill] sm:$0xff] %v9193_v42  ;;  %v9203_v8 = vadd.f32 %v2720_v36, %v2375_v5  ;;  %v9206_v28 = vmul.f32 -1.442695, %v9175_v51  ;;  %v9210_v54 = vmul.f32 %v3882_v0, %v3743_v63  ;;  %v3467_v14 = vmul.f32 %v8657_v39, %v8881_v55  ;;  %v9221_v36 = vld [vmem:[%s11327_s3 + $0x14] ss:$0 sm:$0xff]  ;;  %v9230_v39 = vpop.permute.xlu1 %1689  ;;  %v9260_v10 = vpop.eup %5658 }
 0x2f0   : > { %12214 = vst [vmem:[#allocation142_spill] sm:$0xff] %v9197_v58  ;;  %12217 = vst [vmem:[#allocation140_spill] sm:$0xff] %v9201_v44  ;;  %v9208_v29 = vadd.f32 %v3925_v56, %v3355_v33  ;;  %5664 = vpow2.f32 %v5122_v57  ;;  %v9214_v59 = vadd.f32 %v3672_v3, %v3635_v47  ;;  %v9216_v12 = vadd.f32 %v3673_v21, %v3636_v40  ;;  %v12223_v63 = vld [vmem:[#allocation162_spill] sm:$0xff]  ;;  %v12224_v47 = vld [vmem:[#allocation141_spill] sm:$0xff] }
 0x2f1   : > { %12218 = vst [vmem:[#allocation148_spill] sm:$0xff] %v9206_v28  ;;  %12220 = vst [vmem:[#allocation153_spill] sm:$0xff] %v9210_v54  ;;  %v9224_v53 = vmul.f32 %v9221_v36, %v1388_v32  ;;  %v3398_v5 = vmul.f32 %v8678_v22, %v8427_v62  ;;  %v3536_v33 = vmul.f32 %v8947_v19, %v9093_v49  ;;  %v12225_v3 = vld [vmem:[#allocation82_spill] sm:$0xff]  ;;  %v5837_v22 = vld [vmem:[#allocation2 + $0xd0] sm:$0xff] }
 0x2f2   : > { %12219 = vst [vmem:[#allocation104_spill] sm:$0xff] %v9208_v29  ;;  %12221 = vst [vmem:[#allocation129_spill] sm:$0xff] %v9214_v59  ;;  %v1207_v57 = vmul.f32 %v12223_v63, %v8636_v2  ;;  %v1881_v40 = vmul.f32 %v12224_v47, %v8636_v2  ;;  %v9237_v21 = vmul.f32 %v12225_v3, %v1388_v32  ;;  %v12229_v0 = vld [vmem:[#allocation171_spill] sm:$0xff]  ;;  %v12243_v16 = vrot.slane %v9214_v59, 2 }
 0x2f3   : > { %12222 = vst [vmem:[#allocation172_spill] sm:$0xff] %v9224_v53  ;;  %v3605_v25 = vmul.f32 %v12136_v27, %v9163_v35  ;;  %v9242_v56 = vmul.f32 %v12138_v6, %v1388_v32  ;;  %v1136_v34 = vmul.f32 %v5837_v22, %v12227_v52  ;;  %v3499_v37 = vadd.f32 %v3467_v14, %v3398_v5  ;;  %v12232_v6 = vld [vmem:[#allocation83_spill] sm:$0xff]  ;;  %v9266_v27 = vld [vmem:[#allocation2 + $0xd8] sm:$0xff] }
 0x2f4   : > { %12226 = vst [vmem:[#allocation100_spill] sm:$0xff] %v9237_v21  ;;  %12228 = vst [vmem:[#allocation105_spill] sm:$0xff] %v9245_v45  ;;  %v1278_v13 = vmul.f32 %v9245_v45, %v12229_v0  ;;  %v1812_v60 = vmul.f32 %v5837_v22, %v12230_v43  ;;  %v1950_v31 = vmul.f32 %v9245_v45, %v12231_v26 }
 0x2f5   : > { %v1349_v32 = vmul.f32 %v12232_v6, %v8693_v20  ;;  %v1882_v14 = vmul.f32 %v12224_v47, %v8542_v15  ;;  %v3568_v5 = vadd.f32 %v3536_v33, %v3499_v37  ;;  %v1239_v51 = vadd.f32 %v1207_v57, %v1136_v34  ;;  %12234 = vst [vmem:[#allocation146_spill] sm:$0xff] %v9260_v10  ;;  %v9272_v57 = vpop.permute.xlu1 %2296 }
 0x2f6   : > { %v1913_v9 = vadd.f32 %v1881_v40, %v1812_v60  ;;  %v2019_v23 = vmul.f32 %v12233_v4, %v8693_v20  ;;  %v1420_v28 = vmul.f32 %v9221_v36, %v8955_v7  ;;  %v1208_v1 = vmul.f32 %v12223_v63, %v8542_v15 }
 0x2f7   : > { %v1813_v29 = vmul.f32 %v9266_v27, %v12230_v43  ;;  %v1951_v33 = vmul.f32 %v12231_v26, %v8427_v62  ;;  %v1310_v60 = vadd.f32 %v1278_v13, %v1239_v51  ;;  %v2088_v34 = vmul.f32 %v12225_v3, %v8955_v7 }
 0x2f8   : > { %v1982_v40 = vadd.f32 %v1950_v31, %v1913_v9  ;;  %v2414_v37 = vmul.f32 %v5837_v22, %v8800_v48  ;;  %v1137_v10 = vmul.f32 %v9266_v27, %v12227_v52  ;;  %v1279_v54 = vmul.f32 %v12229_v0, %v8427_v62  ;;  %v12235_v31 = vld [vmem:[#allocation103_spill] sm:$0xff] }
 0x2f9   : > { %v1914_v18 = vadd.f32 %v1882_v14, %v1813_v29  ;;  %v2020_v44 = vmul.f32 %v12233_v4, %v8881_v55  ;;  %v3637_v58 = vadd.f32 %v3605_v25, %v3568_v5  ;;  %v1381_v13 = vadd.f32 %v1349_v32, %v1310_v60  ;;  %v12238_v32 = vld [vmem:[#allocation92_spill] sm:$0xff]  ;;  %v1695_v53 = vpop.permute.xlu1 %1694 }
 0x2fa   : > { %v2051_v51 = vadd.f32 %v2019_v23, %v1982_v40  ;;  %v2483_v9 = vmul.f32 %v12235_v31, %v8636_v2  ;;  %v9285_v42 = vpop.eup %5660  ;;  %v1240_v61 = vadd.f32 %v1208_v1, %v1137_v10  ;;  %v1350_v22 = vmul.f32 %v12232_v6, %v8881_v55  ;;  %v12239_v5 = vld [vmem:[#allocation144_spill] sm:$0xff] }
 0x2fb   : > { %12236 = vst [vmem:[#allocation117_spill] sm:$0xff] %v9285_v42  ;;  %v1983_v46 = vadd.f32 %v1951_v33, %v1914_v18  ;;  %v2089_v62 = vmul.f32 %v12225_v3, %v9093_v49  ;;  %v9291_v29 = vpop.eup %5662  ;;  %v2552_v25 = vmul.f32 %v9245_v45, %v8836_v17  ;;  %v1421_v23 = vmul.f32 %v9221_v36, %v9093_v49  ;;  %v12240_v33 = vld [vmem:[#allocation156_spill] sm:$0xff] }
 0x2fc   : > { %12237 = vst [vmem:[#allocation157_spill] sm:$0xff] %v9291_v29  ;;  %v2793_v14 = vmul.f32 %v8636_v2, %v12238_v32  ;;  %v2862_v1 = vmul.f32 %v9245_v45, %v12239_v5  ;;  %v2120_v10 = vadd.f32 %v2088_v34, %v2051_v51  ;;  %v1311_v60 = vadd.f32 %v1279_v54, %v1240_v61 }
 0x2fd   : > { %v2052_v18 = vadd.f32 %v2020_v44, %v1983_v46  ;;  %v2931_v40 = vmul.f32 %v12240_v33, %v8693_v20  ;;  %v9303_v42 = vpop.eup %5664  ;;  %v12242_v29 = vrot.slane %v9216_v12, 2  ;;  %v2515_v21 = vadd.f32 %v2483_v9, %v2414_v37 }
 0x2fe   : > { %12241 = vst [vmem:[#allocation155_spill] sm:$0xff] %v9303_v42  ;;  %v2861_v34 = vmul.f32 %v12239_v5, %v8542_v15  ;;  %v2894_v61 = vadd.f32 %v2862_v1, %v2793_v14  ;;  %v1452_v46 = vadd.f32 %v1420_v28, %v1381_v13  ;;  %v1382_v44 = vadd.f32 %v1350_v22, %v1311_v60 }
 0x2ff   : > { %v9311_v19 = vsel %vm3739_vm5, %v12243_v16, %v12242_v29  ;;  %v9315_v54 = vadd.f32 %v2089_v62, %v2052_v18  ;;  %v3000_v51 = vmul.f32 %v9023_v50, %v8955_v7  ;;  %v2621_v42 = vmul.f32 %v8856_v30, %v8693_v20  ;;  %v9323_v29 = vld [vmem:[#allocation2 + $0xf8] sm:$0xff] }
 0x300   : > { %12244 = vst [vmem:[#allocation102_spill] sm:$0xff] %v9311_v19  ;;  %v2792_v16 = vmul.f32 %v9266_v27, %v12238_v32  ;;  %v2930_v37 = vmul.f32 %v9323_v29, %v12240_v33  ;;  %v2963_v9 = vadd.f32 %v2931_v40, %v2894_v61  ;;  %v9328_v28 = vadd.f32 %v9242_v56, %v3637_v58  ;;  %v9337_v32 = vld [vmem:[%s11327_s3 + $0x17] ss:$0 sm:$0xff]  ;;  %v9344_v58 = vld [vmem:[%s11327_s3 + $0x16] ss:$0 sm:$0xff] }
 0x301   : > { %12245 = vst [vmem:[#allocation120_spill] sm:$0xff] %v9315_v54  ;;  %v2152_v13 = vrot.slane %v2120_v10, 7  ;;  %v2584_v22 = vadd.f32 %v2552_v25, %v2515_v21  ;;  %v9330_v62 = vadd.f32 %v1421_v23, %v1382_v44  ;;  %v2999_v1 = vmul.f32 %v9023_v50, %v8881_v55  ;;  %12247 = vst [vmem:[#allocation79_spill] sm:$0xff] %v9337_v32  ;;  %v2301_v10 = vpop.permute.xlu1 %2300 }
 0x302   : > { %12246 = vst [vmem:[#allocation89_spill] sm:$0xff] %v9328_v28  ;;  %v2893_v14 = vadd.f32 %v2861_v34, %v2792_v16  ;;  %v3032_v60 = vadd.f32 %v3000_v51, %v2963_v9  ;;  %v3069_v18 = vmul.f32 %v9337_v32, %v9089_v24  ;;  %v1484_v40 = vrot.slane %v1452_v46, 6 }
 0x303   : > { %v2690_v21 = vmul.f32 %v9344_v58, %v8955_v7  ;;  %v11636_v56 = vrot.slane %v9315_v54, 7  ;;  %v2484_v25 = vmul.f32 %v12235_v31, %v8542_v15  ;;  %v2653_v23 = vadd.f32 %v2621_v42, %v2584_v22 }
 0x304   : > { %v2962_v34 = vadd.f32 %v2930_v37, %v2893_v14  ;;  %v3068_v61 = vmul.f32 %v9337_v32, %v9093_v49  ;;  %v1209_v46 = vmul.f32 %v9245_v45, %v12223_v63  ;;  %v2415_v16 = vmul.f32 %v9266_v27, %v8800_v48  ;;  %v12249_v14 = vld [vmem:[#allocation76_spill] sm:$0xff] }
 0x305   : > { %v2163_v51 = vsel %vm2158_vm3, %v2152_v13, %v11636_v56  ;;  %v2553_v15 = vmul.f32 %v9323_v29, %v8836_v17  ;;  %v9364_v37 = vadd.f32 %v3069_v18, %v3032_v60  ;;  %v1138_v9 = vmul.f32 %v12227_v52, %v8636_v2 }
 0x306   : > { %v3031_v42 = vadd.f32 %v2999_v1, %v2962_v34  ;;  %v1280_v22 = vmul.f32 %v12229_v0, %v8693_v20  ;;  %v12250_v44 = vrot.slane %v12249_v14, 7  ;;  %v2346_v19 = vmul.f32 %v2301_v10, %v2163_v51  ;;  %v12253_v10 = vld [vmem:[#allocation122_spill] sm:$0xff] }
 0x307   : > { %12248 = vst [vmem:[#allocation84_spill] sm:$0xff] %v9364_v37  ;;  %v2516_v59 = vadd.f32 %v2484_v25, %v2415_v16  ;;  %v2622_v27 = vmul.f32 %v8856_v30, %v8881_v55  ;;  %v12251_v1 = vrot.slane %v9330_v62, 6  ;;  %v1241_v34 = vadd.f32 %v1209_v46, %v1138_v9 }
 0x308   : > { %v2164_v56 = vsel %vm2158_vm3, %v12250_v44, %v2152_v13  ;;  %v9380_v18 = vadd.f32 %v3068_v61, %v3031_v42  ;;  %v1351_v54 = vmul.f32 %v12232_v6, %v8955_v7  ;;  %v2691_v25 = vmul.f32 %v9344_v58, %v9093_v49  ;;  %v3870_v61 = vpop.permute.xlu1 %3869  ;;  %v12256_v42 = vld [vmem:[#allocation128_spill] sm:$0xff] }
 0x309   : > { %v1497_v60 = vsel %vm1492_vm2, %v1484_v40, %v12251_v1  ;;  %v2345_v14 = vmul.f32 %v9272_v57, %v2164_v56  ;;  %v2585_v13 = vadd.f32 %v2553_v15, %v2516_v59  ;;  %v12254_v44 = vrot.slane %v12253_v10, 6 }
 0x30a   : > { %12252 = vst [vmem:[#allocation98_spill] sm:$0xff] %v9380_v18  ;;  %v1744_v32 = vmul.f32 %v1695_v53, %v1497_v60  ;;  %v11642_v16 = vrot.slane %v9364_v37, 1  ;;  %v12255_v46 = vrot.slane %v9095_v38, 1  ;;  %v12257_v9 = vrot.slane %v12256_v42, 1  ;;  %v12259_v60 = vld [vmem:[#allocation145_spill] sm:$0xff] }
 0x30b   : > { %v1498_v51 = vsel %vm1492_vm2, %v12254_v44, %v1484_v40  ;;  %v1312_v53 = vadd.f32 %v1280_v22, %v1241_v34  ;;  %v2654_v15 = vadd.f32 %v2622_v27, %v2585_v13  ;;  %v12258_v1 = vrot.slane %v9111_v41, 2 }
 0x30c   : > { %v3144_v57 = vsel %vm3137_vm4, %v12257_v9, %v12255_v46  ;;  %v1743_v59 = vmul.f32 %v9230_v39, %v1498_v51  ;;  %v2378_v56 = vadd.f32 %v2346_v19, %v1744_v32  ;;  %v12260_v10 = vrot.slane %v12259_v60, 2  ;;  %v12261_v19 = vld [vmem:[#allocation163_spill] sm:$0xff] }
 0x30d   : > { %v11643_v44 = vrot.slane %v9380_v18, 1  ;;  %v1383_v38 = vadd.f32 %v1351_v54, %v1312_v53  ;;  %v1422_v42 = vmul.f32 %v9221_v36, %v9089_v24  ;;  %v1883_v22 = vmul.f32 %v9245_v45, %v12224_v47 }
 0x30e   : > { %v3746_v40 = vsel %vm3739_vm5, %v12260_v10, %v12258_v1  ;;  %v2377_v34 = vadd.f32 %v2345_v14, %v1743_v59  ;;  %v2723_v39 = vadd.f32 %v2691_v25, %v2654_v15  ;;  %v3322_v32 = vmul.f32 %v12261_v19, %v3144_v57 }
 0x30f   : > { %v3924_v27 = vmul.f32 %v3870_v61, %v3746_v40  ;;  %v11641_v41 = vrot.slane %v9328_v28, 2  ;;  %v3141_v54 = vsel %vm3137_vm4, %v11643_v44, %v11642_v16  ;;  %v1814_v13 = vmul.f32 %v12230_v43, %v8636_v2  ;;  %v9546_v28 = vld [vmem:[#allocation2 + $0x8] sm:$0xff] }
 0x310   : > { %v1952_v51 = vmul.f32 %v12231_v26, %v8693_v20  ;;  %v2722_v14 = vadd.f32 %v2690_v21, %v2653_v23  ;;  %v2755_v25 = vadd.f32 %v2723_v39, %v2378_v56  ;;  %v3354_v46 = vadd.f32 %v3322_v32, %v9203_v8  ;;  %v12266_v8 = vld [vmem:[#allocation112_spill] sm:$0xff] }
 0x311   : > { %v2485_v61 = vmul.f32 %v9245_v45, %v12235_v31  ;;  %v12262_v9 = vrot.slane %v9216_v12, 2  ;;  %v9433_v53 = vadd.f32 %v1422_v42, %v1383_v38  ;;  %v1915_v59 = vadd.f32 %v1883_v22, %v1814_v13  ;;  %v9444_v12 = vld [vmem:[#allocation2] sm:$0xff]  ;;  %v9452_v42 = vld [vmem:[#allocation2 + $0x10] sm:$0xff] }
 0x312   : > { %v2021_v21 = vmul.f32 %v12233_v4, %v8955_v7  ;;  %v9437_v23 = vadd.f32 %v2722_v14, %v2377_v34  ;;  %v3325_v56 = vmul.f32 %v12266_v8, %v3141_v54  ;;  %v9440_v15 = vadd.f32 %v3924_v27, %v3354_v46  ;;  %v9454_v22 = vld [vmem:[#allocation2 + $0x20] sm:$0xff] }
 0x313   : > { %v9431_v57 = vsel %vm3739_vm5, %v12262_v9, %v11641_v41  ;;  %12264 = vst [vmem:[#allocation113_spill] sm:$0xff] %v9433_v53  ;;  %v2416_v1 = vmul.f32 %v8800_v48, %v8636_v2  ;;  %v1984_v60 = vadd.f32 %v1952_v51, %v1915_v59  ;;  %v2090_v10 = vmul.f32 %v12225_v3, %v9089_v24  ;;  %v9469_v51 = vld [vmem:[#allocation2 + $0x30] sm:$0xff] }
 0x314   : > { %12263 = vst [vmem:[#allocation94_spill] sm:$0xff] %v9431_v57  ;;  %12265 = vst [vmem:[#allocation139_spill] sm:$0xff] %v9437_v23  ;;  %v2554_v40 = vmul.f32 %v8836_v17, %v8693_v20  ;;  %v1210_v38 = vmul.f32 %v9323_v29, %v12223_v63  ;;  %v9456_v34 = vadd.f32 %v3325_v56, %v2755_v25  ;;  %v11644_v32 = vrot.slane %v9433_v53, 6  ;;  %v9463_v20 = vld [vmem:[#allocation2 + $0xe8] sm:$0xff] }
 0x315   : > { %12267 = vst [vmem:[#allocation162_spill] sm:$0xff] %v9440_v15  ;;  %v2517_v39 = vadd.f32 %v2485_v61, %v2416_v1  ;;  %v2623_v2 = vmul.f32 %v8856_v30, %v8955_v7  ;;  %v2692_v19 = vmul.f32 %v9344_v58, %v9089_v24  ;;  %v2053_v27 = vadd.f32 %v2021_v21, %v1984_v60  ;;  %v1700_v21 = vpop.permute.xlu1 %1699  ;;  %v12279_v15 = vld [vmem:[#allocation6_spill] sm:$0xff] }
 0x316   : > { %12268 = vst [vmem:[#allocation141_spill] sm:$0xff] %v9456_v34  ;;  %v1139_v54 = vmul.f32 %v9463_v20, %v12227_v52  ;;  %v1110_v13 = vmul.f32 %v12227_v52, %v9444_v12  ;;  %v1281_v14 = vmul.f32 %v12229_v0, %v8881_v55  ;;  %v1141_v7 = vmul.f32 %v9323_v29, %v12227_v52 }
 0x317   : > { %v1181_v24 = vmul.f32 %v12223_v63, %v9452_v42  ;;  %v1212_v25 = vmul.f32 %v12223_v63, %v8881_v55  ;;  %v2586_v46 = vadd.f32 %v2554_v40, %v2517_v39  ;;  %v1352_v9 = vmul.f32 %v12232_v6, %v9093_v49 }
 0x318   : > { %v1242_v61 = vadd.f32 %v1210_v38, %v1139_v54  ;;  %v1252_v59 = vmul.f32 %v12229_v0, %v9454_v22  ;;  %v9485_v8 = vmul.f32 %v9221_v36, %v9163_v35  ;;  %v1283_v60 = vmul.f32 %v12229_v0, %v9093_v49 }
 0x319   : > { %v1213_v56 = vadd.f32 %v1181_v24, %v1110_v13  ;;  %v1244_v1 = vadd.f32 %v1212_v25, %v1141_v7  ;;  %v12269_v40 = vrot.slane %v9330_v62, 6  ;;  %v9495_v39 = vadd.f32 %v2090_v10, %v2053_v27  ;;  %v9507_v10 = vld [vmem:[#allocation2 + $0x40] sm:$0xff] }
 0x31a   : > { %v1815_v54 = vmul.f32 %v9463_v20, %v12230_v43  ;;  %v1323_v41 = vmul.f32 %v12232_v6, %v9469_v51  ;;  %v2655_v13 = vadd.f32 %v2623_v2, %v2586_v46  ;;  %v1884_v7 = vmul.f32 %v9323_v29, %v12224_v47 }
 0x31b   : > { %v1496_v38 = vsel %vm1492_vm2, %v12269_v40, %v11644_v32  ;;  %12270 = vst [vmem:[#allocation82_spill] sm:$0xff] %v9495_v39  ;;  %v1284_v24 = vadd.f32 %v1252_v59, %v1213_v56  ;;  %v1315_v25 = vadd.f32 %v1283_v60, %v1244_v1  ;;  %v1313_v62 = vadd.f32 %v1281_v14, %v1242_v61 }
 0x31c   : > { %v9503_v16 = vmul.f32 %v1700_v21, %v1496_v38  ;;  %v1354_v40 = vmul.f32 %v12232_v6, %v9163_v35  ;;  %v1394_v27 = vmul.f32 %v9507_v10, %v9221_v36  ;;  %v9513_v44 = vmul.f32 %v12231_v26, %v8881_v55 }
 0x31d   : > { %v9517_v2 = vmul.f32 %v12233_v4, %v9093_v49  ;;  %v1355_v46 = vadd.f32 %v1323_v41, %v1284_v24  ;;  %v1786_v14 = vmul.f32 %v12230_v43, %v9444_v12  ;;  %v1817_v21 = vmul.f32 %v9323_v29, %v12230_v43 }
 0x31e   : > { %12271 = vst [vmem:[#allocation161_spill] sm:$0xff] %v9503_v16  ;;  %v1386_v59 = vadd.f32 %v1354_v40, %v1315_v25  ;;  %v1855_v56 = vmul.f32 %v12224_v47, %v9452_v42  ;;  %v1886_v60 = vmul.f32 %v12224_v47, %v8881_v55  ;;  %v1924_v41 = vmul.f32 %v12231_v26, %v9454_v22  ;;  %v12275_v25 = vld [vmem:[#allocation172_spill] sm:$0xff] }
 0x31f   : > { %12272 = vst [vmem:[#allocation171_spill] sm:$0xff] %v9517_v2  ;;  %v9526_v1 = vadd.f32 %v1394_v27, %v1355_v46  ;;  %v1955_v38 = vmul.f32 %v12231_v26, %v9093_v49  ;;  %v9534_v24 = vadd.f32 %v2692_v19, %v2655_v13  ;;  %v1993_v32 = vmul.f32 %v12233_v4, %v9469_v51 }
 0x320   : > { %v9537_v40 = vadd.f32 %v12275_v25, %v1386_v59  ;;  %v1887_v43 = vadd.f32 %v1855_v56, %v1786_v14  ;;  %v9541_v27 = vadd.f32 %v1884_v7, %v1815_v54  ;;  %v1918_v47 = vadd.f32 %v1886_v60, %v1817_v21  ;;  %v9557_v7 = vld [vmem:[#allocation2 + $0x18] sm:$0xff]  ;;  %v9563_v56 = vld [vmem:[#allocation2 + $0x28] sm:$0xff] }
 0x321   : > { %12273 = vst [vmem:[#allocation95_spill] sm:$0xff] %v9526_v1  ;;  %12274 = vst [vmem:[#allocation158_spill] sm:$0xff] %v9534_v24  ;;  %v11647_v46 = vrot.slane %v9526_v1, 6  ;;  %v2024_v61 = vmul.f32 %v12233_v4, %v9163_v35  ;;  %v2062_v13 = vmul.f32 %v9507_v10, %v12225_v3  ;;  %v2388_v14 = vmul.f32 %v8800_v48, %v9444_v12 }
 0x322   : > { %12276 = vst [vmem:[#allocation83_spill] sm:$0xff] %v9537_v40  ;;  %v11646_v26 = vrot.slane %v9537_v40, 6  ;;  %v1956_v19 = vadd.f32 %v1924_v41, %v1887_v43  ;;  %v9555_v54 = vmul.f32 %v12225_v3, %v9163_v35  ;;  %v1987_v59 = vadd.f32 %v1955_v38, %v1918_v47  ;;  %v9576_v38 = vld [vmem:[%s11327_s3 + $0x3] ss:$0 sm:$0xff]  ;;  %v9580_v47 = vld [vmem:[#allocation2 + $0x38] sm:$0xff] }
 0x323   : > { %v2457_v4 = vmul.f32 %v12235_v31, %v9452_v42  ;;  %v2526_v21 = vmul.f32 %v8836_v17, %v9454_v22  ;;  %v9565_v60 = vadd.f32 %v1352_v9, %v1313_v62  ;;  %v2765_v43 = vmul.f32 %v9576_v38, %v9444_v12 }
 0x324   : > { %12277 = vst [vmem:[#allocation151_spill] sm:$0xff] %v9555_v54  ;;  %v1524_v41 = vsel %vm1492_vm2, %v11646_v26, %v11647_v46  ;;  %v2025_v25 = vadd.f32 %v1993_v32, %v1956_v19  ;;  %v2056_v9 = vadd.f32 %v2024_v61, %v1987_v59  ;;  %v2595_v57 = vmul.f32 %v8856_v30, %v9469_v51  ;;  %v12286_v54 = vld [vmem:[#allocation115_spill] sm:$0xff] }
 0x325   : > { %v2489_v62 = vadd.f32 %v2457_v4, %v2388_v14  ;;  %v2766_v34 = vmul.f32 %v9576_v38, %v9546_v28  ;;  %v2834_v32 = vmul.f32 %v12239_v5, %v9452_v42  ;;  %v2835_v19 = vmul.f32 %v12239_v5, %v9557_v7  ;;  %v12280_v14 = vld [vmem:[#allocation100_spill] sm:$0xff] }
 0x326   : > { %v9586_v26 = vadd.f32 %v2062_v13, %v2025_v25  ;;  %v2903_v46 = vmul.f32 %v12240_v33, %v9454_v22  ;;  %v1717_v61 = vmul.f32 %v12279_v15, %v1524_v41  ;;  %v9596_v59 = vadd.f32 %v12280_v14, %v2056_v9  ;;  %v12282_v15 = vld [vmem:[#allocation79_spill] sm:$0xff] }
 0x327   : > { %v2558_v4 = vadd.f32 %v2526_v21, %v2489_v62  ;;  %v2904_v40 = vmul.f32 %v12240_v33, %v9563_v56  ;;  %v2866_v13 = vadd.f32 %v2834_v32, %v2765_v43  ;;  %v2867_v25 = vadd.f32 %v2835_v19, %v2766_v34  ;;  %v9608_v9 = vld [vmem:[#allocation2 + $0x48] sm:$0xff]  ;;  %v9615_v62 = vld [vmem:[%s11327_s3 + $0x4] ss:$0 sm:$0xff] }
 0x328   : > { %12278 = vst [vmem:[#allocation103_spill] sm:$0xff] %v9586_v26  ;;  %12281 = vst [vmem:[#allocation92_spill] sm:$0xff] %v9596_v59  ;;  %v2972_v37 = vmul.f32 %v9023_v50, %v9469_v51  ;;  %v2973_v23 = vmul.f32 %v9023_v50, %v9580_v47  ;;  %v11655_v18 = vrot.slane %v9586_v26, 7  ;;  %v11654_v24 = vrot.slane %v9596_v59, 7 }
 0x329   : > { %v3041_v41 = vmul.f32 %v9507_v10, %v12282_v15  ;;  %v3042_v21 = vmul.f32 %v9608_v9, %v12282_v15  ;;  %v2935_v43 = vadd.f32 %v2903_v46, %v2866_v13  ;;  %v2936_v34 = vadd.f32 %v2904_v40, %v2867_v25  ;;  %12283 = vst [vmem:[#allocation144_spill] sm:$0xff] %v9615_v62  ;;  %v9632_v46 = vld [vmem:[%s11327_s3 + $0x9] ss:$0 sm:$0xff] }
 0x32a   : > { %v3367_v32 = vmul.f32 %v9615_v62, %v9444_v12  ;;  %v3368_v19 = vmul.f32 %v9615_v62, %v9546_v28  ;;  %v2190_v14 = vsel %vm2158_vm3, %v11654_v24, %v11655_v18  ;;  %v2664_v40 = vmul.f32 %v9507_v10, %v9344_v58  ;;  %12284 = vst [vmem:[#allocation156_spill] sm:$0xff] %v9632_v46  ;;  %v12285_v25 = vld [vmem:[#allocation7_spill] sm:$0xff] }
 0x32b   : > { %v3436_v12 = vmul.f32 %v9632_v46, %v9452_v42  ;;  %v3437_v13 = vmul.f32 %v9632_v46, %v9557_v7  ;;  %v2319_v45 = vmul.f32 %v12285_v25, %v2190_v14  ;;  %v2627_v59 = vadd.f32 %v2595_v57, %v2558_v4  ;;  %v9650_v14 = vld [vmem:[%s11327_s3 + $0x13] ss:$0 sm:$0xff] }
 0x32c   : > { %v3004_v53 = vadd.f32 %v2972_v37, %v2935_v43  ;;  %v3005_v16 = vadd.f32 %v2973_v23, %v2936_v34  ;;  %v3505_v2 = vmul.f32 %v12286_v54, %v9454_v22  ;;  %v3506_v26 = vmul.f32 %v12286_v54, %v9563_v56 }
 0x32d   : > { %v3468_v24 = vadd.f32 %v3436_v12, %v3367_v32  ;;  %v3469_v18 = vadd.f32 %v3437_v13, %v3368_v19  ;;  %v2351_v1 = vadd.f32 %v2319_v45, %v1717_v61  ;;  %v3574_v37 = vmul.f32 %v9650_v14, %v9469_v51  ;;  %v9659_v45 = vld [vmem:[%s11327_s3 + $0x18] ss:$0 sm:$0xff] }
 0x32e   : > { %v9643_v62 = vadd.f32 %v3041_v41, %v3004_v53  ;;  %v9645_v15 = vadd.f32 %v3042_v21, %v3005_v16  ;;  %v3575_v4 = vmul.f32 %v9650_v14, %v9580_v47  ;;  %v3643_v16 = vmul.f32 %v9659_v45, %v9507_v10 }
 0x32f   : > { %v3537_v57 = vadd.f32 %v3505_v2, %v3468_v24  ;;  %v3538_v23 = vadd.f32 %v3506_v26, %v3469_v18  ;;  %v2696_v53 = vadd.f32 %v2664_v40, %v2627_v59  ;;  %v3644_v2 = vmul.f32 %v9659_v45, %v9608_v9  ;;  %v2305_v40 = vpop.permute.xlu1 %2304 }
 0x330   : > { %12287 = vst [vmem:[#allocation76_spill] sm:$0xff] %v9643_v62  ;;  %v11662_v61 = vrot.slane %v9643_v62, 1  ;;  %v11664_v41 = vrot.slane %v9645_v15, 1  ;;  %v2417_v18 = vmul.f32 %v9463_v20, %v8800_v48  ;;  %v2486_v24 = vmul.f32 %v9323_v29, %v12235_v31  ;;  %v12289_v31 = vld [vmem:[#allocation120_spill] sm:$0xff] }
 0x331   : > { %v3606_v26 = vadd.f32 %v3574_v37, %v3537_v57  ;;  %v3607_v21 = vadd.f32 %v3575_v4, %v3538_v23  ;;  %v9673_v43 = vmul.f32 %v8836_v17, %v8881_v55  ;;  %v2728_v59 = vadd.f32 %v2696_v53, %v2351_v1 }
 0x332   : > { %v3168_v34 = vsel %vm3137_vm4, %v11662_v61, %v11664_v41  ;;  %v1111_v48 = vmul.f32 %v12227_v52, %v9546_v28  ;;  %v12288_v20 = vrot.slane %v9495_v39, 7  ;;  %v12290_v29 = vrot.slane %v12289_v31, 7  ;;  %v12293_v52 = vld [vmem:[#allocation18_spill] sm:$0xff]  ;;  %v9749_v31 = vld [vmem:[%s11327_s3 + $0x10] ss:$0 sm:$0xff] }
 0x333   : > { %v9691_v55 = vadd.f32 %v9513_v44, %v9541_v27  ;;  %v9693_v1 = vadd.f32 %v3643_v16, %v3606_v26  ;;  %v9695_v19 = vadd.f32 %v3644_v2, %v3607_v21  ;;  %v9699_v12 = vmul.f32 %v8856_v30, %v9093_v49  ;;  %v9741_v26 = vld [vmem:[%s11327_s3 + $0xb] ss:$0 sm:$0xff] }
 0x334   : > { %v2162_v32 = vsel %vm2158_vm3, %v12290_v29, %v12288_v20  ;;  %v3298_v13 = vmul.f32 %v12293_v52, %v3168_v34  ;;  %v1182_v25 = vmul.f32 %v12223_v63, %v9557_v7  ;;  %v1253_v37 = vmul.f32 %v12229_v0, %v9563_v56  ;;  %v9717_v63 = vld [vmem:[%s11327_s3 + $0x1] ss:$0 sm:$0xff]  ;;  %v9762_v52 = vld [vmem:[%s11327_s3 + $0x2] ss:$0 sm:$0xff] }
 0x335   : > { %12291 = vst [vmem:[#allocation122_spill] sm:$0xff] %v9693_v1  ;;  %12292 = vst [vmem:[#allocation128_spill] sm:$0xff] %v9699_v12  ;;  %v9708_v44 = vmul.f32 %v9344_v58, %v9163_v35  ;;  %v11661_v27 = vrot.slane %v9693_v1, 2  ;;  %v11663_v57 = vrot.slane %v9695_v19, 2  ;;  %v1324_v49 = vmul.f32 %v12232_v6, %v9580_v47  ;;  %v9724_v35 = vld [vmem:[%s11327_s3 + $0x6] ss:$0 sm:$0xff] }
 0x336   : > { %v3330_v23 = vadd.f32 %v3298_v13, %v2728_v59  ;;  %v1214_v4 = vadd.f32 %v1182_v25, %v1111_v48  ;;  %v1787_v0 = vmul.f32 %v9717_v63, %v9546_v28  ;;  %v1856_v16 = vmul.f32 %v9724_v35, %v9557_v7  ;;  %v12296_v59 = vld [vmem:[#allocation27_spill] sm:$0xff]  ;;  %v9769_v25 = vld [vmem:[%s11327_s3 + $0x7] ss:$0 sm:$0xff] }
 0x337   : > { %12294 = vst [vmem:[#allocation145_spill] sm:$0xff] %v9708_v44  ;;  %v9728_v53 = vmul.f32 %v2305_v40, %v2162_v32  ;;  %v3770_v6 = vsel %vm3739_vm5, %v11661_v27, %v11663_v57  ;;  %v1395_v2 = vmul.f32 %v9608_v9, %v9221_v36  ;;  %v1925_v21 = vmul.f32 %v9741_v26, %v9563_v56  ;;  %v9784_v27 = vld [vmem:[%s11328_s4] ss:$0 sm:$0xff] }
 0x338   : > { %v3900_v34 = vmul.f32 %v12296_v59, %v3770_v6  ;;  %v1285_v48 = vadd.f32 %v1253_v37, %v1214_v4  ;;  %v1888_v20 = vadd.f32 %v1856_v16, %v1787_v0  ;;  %v1994_v29 = vmul.f32 %v9749_v31, %v9580_v47 }
 0x339   : > { %12295 = vst [vmem:[#allocation163_spill] sm:$0xff] %v9728_v53  ;;  %v9755_v32 = vadd.f32 %v9485_v8, %v9565_v60  ;;  %v2063_v40 = vmul.f32 %v9608_v9, %v12225_v3  ;;  %v2389_v13 = vmul.f32 %v9762_v52, %v9546_v28  ;;  %v2458_v8 = vmul.f32 %v9769_v25, %v9557_v7 }
 0x33a   : > { %v3932_v60 = vadd.f32 %v3900_v34, %v3330_v23  ;;  %v1356_v37 = vadd.f32 %v1324_v49, %v1285_v48  ;;  %v1957_v4 = vadd.f32 %v1925_v21, %v1888_v20  ;;  %v2527_v0 = vmul.f32 %v8836_v17, %v9563_v56 }
 0x33b   : > { %12297 = vst [vmem:[#allocation112_spill] sm:$0xff] %v9755_v32  ;;  %v9775_v16 = vadd.f32 %v2486_v24, %v2417_v18  ;;  %v2490_v6 = vadd.f32 %v2458_v8, %v2389_v13  ;;  %v2767_v28 = vmul.f32 %v9576_v38, %v9452_v42  ;;  %v2836_v59 = vmul.f32 %v12239_v5, %v9454_v22  ;;  %v9803_v8 = vld [vmem:[#allocation2 + $0x50] sm:$0xff] }
 0x33c   : > { %v9787_v49 = vadd.f32 %v9784_v27, %v3932_v60  ;;  %v9789_v23 = vadd.f32 %v1395_v2, %v1356_v37  ;;  %v2026_v17 = vadd.f32 %v1994_v29, %v1957_v4  ;;  %v2596_v18 = vmul.f32 %v8856_v30, %v9580_v47  ;;  %v12299_v30 = vld [vmem:[#allocation79_spill] sm:$0xff]  ;;  %v12300_v37 = vld [vmem:[#allocation144_spill] sm:$0xff] }
 0x33d   : > { %v2665_v24 = vmul.f32 %v9608_v9, %v9344_v58  ;;  %v2868_v21 = vadd.f32 %v2836_v59, %v2767_v28  ;;  %v2905_v5 = vmul.f32 %v12240_v33, %v9469_v51  ;;  %v2974_v34 = vmul.f32 %v9507_v10, %v9023_v50  ;;  %v12301_v59 = vld [vmem:[#allocation95_spill] sm:$0xff] }
 0x33e   : > { %12298 = vst [vmem:[#allocation172_spill] sm:$0xff] %v9787_v49  ;;  %v5100_v48 = vmul.f32 -1.442695, %v9787_v49  ;;  %v11666_v20 = vrot.slane %v9789_v23, 6  ;;  %v9801_v2 = vadd.f32 %v2063_v40, %v2026_v17  ;;  %v2559_v29 = vadd.f32 %v2527_v0, %v2490_v6  ;;  %v12303_v17 = vld [vmem:[#allocation9_spill] sm:$0xff] }
 0x33f   : > { %v2937_v13 = vadd.f32 %v2905_v5, %v2868_v21  ;;  %v3043_v60 = vmul.f32 %v9803_v8, %v12299_v30  ;;  %v3369_v4 = vmul.f32 %v12300_v37, %v9452_v42  ;;  %v3438_v28 = vmul.f32 %v9632_v46, %v9454_v22 }
 0x340   : > { %5666 = vpow2.f32 %v5100_v48  ;;  %v12302_v61 = vrot.slane %v12301_v59, 6  ;;  %v11667_v0 = vrot.slane %v9801_v2, 7  ;;  %v3507_v6 = vmul.f32 %v12286_v54, %v9469_v51  ;;  %v12304_v48 = vld [vmem:[#allocation103_spill] sm:$0xff]  ;;  %v9834_v54 = vld [vmem:[%s11327_s3] ss:$0 sm:$0xff] }
 0x341   : > { %v2628_v5 = vadd.f32 %v2596_v18, %v2559_v29  ;;  %v3006_v57 = vadd.f32 %v2974_v34, %v2937_v13  ;;  %v3470_v41 = vadd.f32 %v3438_v28, %v3369_v4  ;;  %v12305_v1 = vrot.slane %v12304_v48, 7  ;;  %v12306_v34 = vld [vmem:[#allocation12_spill] sm:$0xff] }
 0x342   : > { %v1523_v40 = vsel %vm1492_vm2, %v12302_v61, %v11666_v20  ;;  %v3576_v61 = vmul.f32 %v9650_v14, %v9507_v10  ;;  %v3645_v20 = vmul.f32 %v9803_v8, %v9659_v45  ;;  %v1112_v18 = vmul.f32 %v9834_v54, %v9452_v42 }
 0x343   : > { %v1718_v21 = vmul.f32 %v12303_v17, %v1523_v40  ;;  %v2189_v59 = vsel %vm2158_vm3, %v12305_v1, %v11667_v0  ;;  %v9839_v13 = vadd.f32 %v3043_v60, %v3006_v57  ;;  %v3539_v4 = vadd.f32 %v3507_v6, %v3470_v41  ;;  %v9844_v1 = vld [vmem:[%s11327_s3 + $0x5] ss:$0 sm:$0xff]  ;;  %v9851_v17 = vld [vmem:[%s11327_s3 + $0xa] ss:$0 sm:$0xff]  ;;  %v9858_v41 = vld [vmem:[%s11327_s3 + $0xf] ss:$0 sm:$0xff] }
 0x344   : > { %v2320_v29 = vmul.f32 %v12306_v34, %v2189_v59  ;;  %v1183_v28 = vmul.f32 %v9844_v1, %v9454_v22  ;;  %v2697_v40 = vadd.f32 %v2665_v24, %v2628_v5  ;;  %v1254_v48 = vmul.f32 %v9851_v17, %v9469_v51 }
 0x345   : > { %12307 = vst [vmem:[#allocation6_spill] sm:$0xff] %v9839_v13  ;;  %v1325_v57 = vmul.f32 %v9858_v41, %v9507_v10  ;;  %v1788_v60 = vmul.f32 %v9717_v63, %v9452_v42  ;;  %v3107_v6 = vrot.slane %v9839_v13, 1  ;;  %v3608_v5 = vadd.f32 %v3576_v61, %v3539_v4  ;;  %v12309_v4 = vld [vmem:[#allocation25_spill] sm:$0xff] }
 0x346   : > { %v2352_v24 = vadd.f32 %v2320_v29, %v1718_v21  ;;  %v1215_v59 = vadd.f32 %v1183_v28, %v1112_v18  ;;  %v1396_v34 = vmul.f32 %v9803_v8, %v9221_v36  ;;  %v1857_v0 = vmul.f32 %v9724_v35, %v9454_v22 }
 0x347   : > { %v1926_v62 = vmul.f32 %v9741_v26, %v9469_v51  ;;  %v1995_v44 = vmul.f32 %v9749_v31, %v9507_v10  ;;  %v12308_v21 = vrot.slane %v9645_v15, 1  ;;  %v9879_v18 = vadd.f32 %v3645_v20, %v3608_v5  ;;  %v9894_v20 = vld [vmem:[%s11327_s3 + $0xc] ss:$0 sm:$0xff] }
 0x348   : > { %v2729_v39 = vadd.f32 %v2697_v40, %v2352_v24  ;;  %v1286_v29 = vadd.f32 %v1254_v48, %v1215_v59  ;;  %v1889_v12 = vadd.f32 %v1857_v0, %v1788_v60  ;;  %v2390_v53 = vmul.f32 %v9762_v52, %v9452_v42  ;;  %v12310_v40 = vld [vmem:[#allocation171_spill] sm:$0xff] }
 0x349   : > { %v3167_v61 = vsel %vm3137_vm4, %v12308_v21, %v3107_v6  ;;  %v2459_v49 = vmul.f32 %v9769_v25, %v9454_v22  ;;  %v9888_v24 = vadd.f32 %v12310_v40, %v9691_v55  ;;  %v11673_v15 = vrot.slane %v9879_v18, 2  ;;  %v9903_v55 = vld [vmem:[%s11327_s3 + $0x11] ss:$0 sm:$0xff]  ;;  %v12312_v21 = vld [vmem:[#allocation29_spill] sm:$0xff] }
 0x34a   : > { %v3299_v28 = vmul.f32 %v12309_v4, %v3167_v61  ;;  %v1357_v13 = vadd.f32 %v1325_v57, %v1286_v29  ;;  %v2528_v0 = vmul.f32 %v9894_v20, %v9469_v51  ;;  %v1958_v42 = vadd.f32 %v1926_v62, %v1889_v12 }
 0x34b   : > { %v2064_v60 = vmul.f32 %v9803_v8, %v12225_v3  ;;  %v2597_v57 = vmul.f32 %v9903_v55, %v9507_v10  ;;  %v12311_v5 = vrot.slane %v9695_v19, 2  ;;  %v2491_v62 = vadd.f32 %v2459_v49, %v2390_v53 }
 0x34c   : > { %v3331_v48 = vadd.f32 %v3299_v28, %v2729_v39  ;;  %v9913_v39 = vadd.f32 %v1396_v34, %v1357_v13  ;;  %v2768_v3 = vmul.f32 %v9576_v38, %v9557_v7  ;;  %v2027_v29 = vadd.f32 %v1995_v44, %v1958_v42  ;;  %v9925_v13 = vld [vmem:[%s11327_s3 + $0x8] ss:$0 sm:$0xff] }
 0x34d   : > { %v3769_v59 = vsel %vm3739_vm5, %v12311_v5, %v11673_v15  ;;  %v2666_v4 = vmul.f32 %v9803_v8, %v9344_v58  ;;  %v5667_v28 = vpop.eup %5666  ;;  %v2560_v40 = vadd.f32 %v2528_v0, %v2491_v62  ;;  %v2837_v53 = vmul.f32 %v9925_v13, %v9563_v56 }
 0x34e   : > { %v3901_v61 = vmul.f32 %v12312_v21, %v3769_v59  ;;  %v11672_v19 = vrot.slane %v9913_v39, 6  ;;  %v2906_v49 = vmul.f32 %v12240_v33, %v9580_v47  ;;  %v4099_v34 = vadd.f32 1.0, %v5667_v28 }
 0x34f   : > { %v9931_v42 = vadd.f32 %v2064_v60, %v2027_v29  ;;  %v2975_v5 = vmul.f32 %v9608_v9, %v9023_v50  ;;  %v12313_v0 = vrot.slane %v9789_v23, 6  ;;  %v2629_v62 = vadd.f32 %v2597_v57, %v2560_v40  ;;  %v9947_v60 = vld [vmem:[#allocation2 + $0x58] sm:$0xff]  ;;  %v12315_v23 = vld [vmem:[#allocation14_spill] sm:$0xff] }
 0x350   : > { %v3933_v44 = vadd.f32 %v3901_v61, %v3331_v48  ;;  %v2869_v21 = vadd.f32 %v2837_v53, %v2768_v3  ;;  %v3370_v12 = vmul.f32 %v12300_v37, %v9557_v7  ;;  %5668 = vrcp.f32 %v4099_v34  ;;  %v9957_v3 = vld [vmem:[%s11327_s3 + $0xe] ss:$0 sm:$0xff] }
 0x351   : > { %v1522_v59 = vsel %vm1492_vm2, %v12313_v0, %v11672_v19  ;;  %v11674_v48 = vrot.slane %v9931_v42, 7  ;;  %v3044_v50 = vmul.f32 %v9947_v60, %v12299_v30  ;;  %v3439_v57 = vmul.f32 %v9632_v46, %v9563_v56  ;;  %v12317_v0 = vld [vmem:[#allocation16_spill] sm:$0xff] }
 0x352   : > { %v9944_v33 = vadd.f32 %v9784_v27, %v3933_v44  ;;  %v1719_v61 = vmul.f32 %v12315_v23, %v1522_v59  ;;  %v2938_v29 = vadd.f32 %v2906_v49, %v2869_v21  ;;  %v3508_v28 = vmul.f32 %v9957_v3, %v9580_v47 }
 0x353   : > { %v12316_v53 = vrot.slane %v9801_v2, 7  ;;  %v2698_v34 = vadd.f32 %v2666_v4, %v2629_v62  ;;  %v3577_v44 = vmul.f32 %v9650_v14, %v9608_v9  ;;  %v3471_v23 = vadd.f32 %v3439_v57, %v3370_v12 }
 0x354   : > { %12314 = vst [vmem:[#allocation100_spill] sm:$0xff] %v9944_v33  ;;  %v5101_v40 = vmul.f32 -1.442695, %v9944_v33  ;;  %v3007_v21 = vadd.f32 %v2975_v5, %v2938_v29  ;;  %v1113_v19 = vmul.f32 %v9834_v54, %v9557_v7  ;;  %v3646_v15 = vmul.f32 %v9947_v60, %v9659_v45  ;;  %v10056_v33 = vld [vmem:[%s11327_s3 + $0x12] ss:$0 sm:$0xff] }
 0x355   : > { %v2188_v49 = vsel %vm2158_vm3, %v12316_v53, %v11674_v48  ;;  %v1184_v2 = vmul.f32 %v9844_v1, %v9563_v56  ;;  %v1255_v4 = vmul.f32 %v9851_v17, %v9580_v47  ;;  %v3540_v48 = vadd.f32 %v3508_v28, %v3471_v23  ;;  %12327 = vst [vmem:[#allocation18_spill] sm:$0xff] %v10056_v33 }
 0x356   : > { %v2321_v59 = vmul.f32 %v12317_v0, %v2188_v49  ;;  %5670 = vpow2.f32 %v5101_v40  ;;  %v9979_v53 = vadd.f32 %v3044_v50, %v3007_v21  ;;  %v1326_v12 = vmul.f32 %v9858_v41, %v9608_v9 }
 0x357   : > { %v1216_v5 = vadd.f32 %v1184_v2, %v1113_v19  ;;  %v1789_v29 = vmul.f32 %v9717_v63, %v9557_v7  ;;  %v1858_v57 = vmul.f32 %v9724_v35, %v9563_v56  ;;  %v1927_v40 = vmul.f32 %v9741_v26, %v9580_v47 }
 0x358   : > { %v2353_v62 = vadd.f32 %v2321_v59, %v1719_v61  ;;  %v11676_v0 = vrot.slane %v9979_v53, 1  ;;  %v3609_v61 = vadd.f32 %v3577_v44, %v3540_v48  ;;  %v1397_v50 = vmul.f32 %v9947_v60, %v9221_v36 }
 0x359   : > { %v1287_v28 = vadd.f32 %v1255_v4, %v1216_v5  ;;  %v1890_v59 = vadd.f32 %v1858_v57, %v1789_v29  ;;  %v1996_v19 = vmul.f32 %v9749_v31, %v9608_v9  ;;  %v2391_v21 = vmul.f32 %v9762_v52, %v9557_v7  ;;  %v12319_v4 = vld [vmem:[#allocation36_spill] sm:$0xff]  ;;  %v12320_v29 = vld [vmem:[#allocation151_spill] sm:$0xff] }
 0x35a   : > { %v2730_v49 = vadd.f32 %v2698_v34, %v2353_v62  ;;  %v9998_v23 = vadd.f32 %v9673_v43, %v9775_v16  ;;  %v3166_v48 = vsel %vm3137_vm4, %v3107_v6, %v11676_v0  ;;  %v10006_v44 = vadd.f32 %v3646_v15, %v3609_v61  ;;  %v10014_v43 = vld [vmem:[%s11327_s3 + $0x15] ss:$0 sm:$0xff] }
 0x35b   : > { %v2460_v2 = vmul.f32 %v9769_v25, %v9563_v56  ;;  %v3300_v62 = vmul.f32 %v12319_v4, %v3166_v48  ;;  %v1358_v5 = vadd.f32 %v1326_v12, %v1287_v28  ;;  %v1959_v7 = vadd.f32 %v1927_v40, %v1890_v59 }
 0x35c   : > { %v2065_v16 = vmul.f32 %v10014_v43, %v9947_v60  ;;  %v10020_v6 = vadd.f32 %v12320_v29, %v9888_v24  ;;  %v11675_v15 = vrot.slane %v10006_v44, 2  ;;  %v2529_v61 = vmul.f32 %v9894_v20, %v9580_v47  ;;  %v1705_v29 = vpop.permute.xlu1 %1704 }
 0x35d   : > { %v2492_v57 = vadd.f32 %v2460_v2, %v2391_v21  ;;  %v3332_v12 = vadd.f32 %v3300_v62, %v2730_v49  ;;  %v10025_v40 = vadd.f32 %v1397_v50, %v1358_v5  ;;  %v2028_v28 = vadd.f32 %v1996_v19, %v1959_v7  ;;  %v5669_v34 = vpop.eup %5668  ;;  %v10042_v50 = vld [vmem:[%s11327_s3 + $0xd] ss:$0 sm:$0xff]  ;;  %v12324_v2 = vld [vmem:[#allocation172_spill] sm:$0xff] }
 0x35e   : > { %12321 = vst [vmem:[#allocation7_spill] sm:$0xff] %v10020_v6  ;;  %v2598_v59 = vmul.f32 %v9903_v55, %v9608_v9  ;;  %v12323_v48 = vrot.slane %v9879_v18, 2  ;;  %v2769_v21 = vmul.f32 %v9576_v38, %v9454_v22  ;;  %v2838_v49 = vmul.f32 %v9925_v13, %v9469_v51  ;;  %v12325_v18 = vld [vmem:[#allocation44_spill] sm:$0xff] }
 0x35f   : > { %12322 = vst [vmem:[#allocation115_spill] sm:$0xff] %v10025_v40  ;;  %v2907_v19 = vmul.f32 %v10042_v50, %v9507_v10  ;;  %v4195_v4 = vmul.f32 %v5669_v34, %v12324_v2  ;;  %v11680_v5 = vrot.slane %v10025_v40, 6  ;;  %v10049_v7 = vadd.f32 %v2065_v16, %v2028_v28  ;;  %v10068_v28 = vld [vmem:[#allocation2 + $0x60] sm:$0xff]  ;;  %v12329_v2 = vld [vmem:[#allocation21_spill] sm:$0xff] }
 0x360   : > { %v3768_v24 = vsel %vm3739_vm5, %v12323_v48, %v11675_v15  ;;  %v2561_v48 = vadd.f32 %v2529_v61, %v2492_v57  ;;  %v2667_v15 = vmul.f32 %v9947_v60, %v9344_v58  ;;  %v2870_v0 = vadd.f32 %v2838_v49, %v2769_v21 }
 0x361   : > { %v3902_v62 = vmul.f32 %v12325_v18, %v3768_v24  ;;  %12326 = vst [vmem:[#allocation120_spill] sm:$0xff] %v10049_v7  ;;  %v2976_v34 = vmul.f32 %v10056_v33, %v9803_v8  ;;  %5313 = vmatprep.mubr.msk.f32.mxu1 %vm1032_vm1, %v4195_v4  ;;  %v12328_v16 = vrot.slane %v9913_v39, 6  ;;  %v11687_v61 = vrot.slane %v10049_v7, 7 }
 0x362   : > { %v3045_v21 = vmul.f32 %v10068_v28, %v12299_v30  ;;  %v2939_v33 = vadd.f32 %v2907_v19, %v2870_v0  ;;  %v3440_v39 = vmul.f32 %v9632_v46, %v9469_v51  ;;  %v3509_v0 = vmul.f32 %v9957_v3, %v9507_v10  ;;  %v12331_v19 = vld [vmem:[#allocation23_spill] sm:$0xff] }
 0x363   : > { %v3934_v24 = vadd.f32 %v3902_v62, %v3332_v12  ;;  %v1521_v57 = vsel %vm1492_vm2, %v12328_v16, %v11680_v5  ;;  %v5671_v49 = vpop.eup %5670  ;;  %v3371_v12 = vmul.f32 %v12300_v37, %v9454_v22  ;;  %v12330_v16 = vrot.slane %v9931_v42, 7  ;;  %v2309_v42 = vpop.permute.xlu1 %2308 }
 0x364   : > { %v1720_v18 = vmul.f32 %v12329_v2, %v1521_v57  ;;  %v4100_v4 = vadd.f32 1.0, %v5671_v49  ;;  %v3008_v2 = vadd.f32 %v2976_v34, %v2939_v33  ;;  %v3578_v49 = vmul.f32 %v9803_v8, %v9650_v14  ;;  %v12333_v33 = vld [vmem:[#allocation163_spill] sm:$0xff] }
 0x365   : > { %v10078_v62 = vadd.f32 %v9784_v27, %v3934_v24  ;;  %v2187_v5 = vsel %vm2158_vm3, %v12330_v16, %v11687_v61  ;;  %v3472_v37 = vadd.f32 %v3440_v39, %v3371_v12  ;;  %v11688_v24 = vrot.slane %v10020_v6, 7  ;;  %v12336_v39 = vld [vmem:[#allocation113_spill] sm:$0xff]  ;;  %v12356_v6 = vld [vmem:[#allocation79_spill] sm:$0xff] }
 0x366   : > { %v2322_v57 = vmul.f32 %v12331_v19, %v2187_v5  ;;  %5672 = vrcp.f32 %v4100_v4  ;;  %v2630_v46 = vadd.f32 %v2598_v59, %v2561_v48  ;;  %v10093_v40 = vadd.f32 %v3045_v21, %v3008_v2  ;;  %v12332_v5 = vld [vmem:[#allocation161_spill] sm:$0xff]  ;;  %v12338_v59 = vld [vmem:[#allocation128_spill] sm:$0xff] }
 0x367   : > { %v5102_v7 = vmul.f32 -1.442695, %v10078_v62  ;;  %v3541_v16 = vadd.f32 %v3509_v0, %v3472_v37  ;;  %v3647_v61 = vmul.f32 %v10068_v28, %v9659_v45  ;;  %v10099_v34 = vadd.f32 %v12333_v33, %v12332_v5  ;;  %v12339_v37 = vld [vmem:[#allocation82_spill] sm:$0xff] }
 0x368   : > { %v2354_v30 = vadd.f32 %v2322_v57, %v1720_v18  ;;  %v12335_v12 = vrot.slane %v9755_v32, 6  ;;  %v12337_v19 = vrot.slane %v12336_v39, 6  ;;  %v2656_v48 = vadd.f32 %v12338_v59, %v9998_v23 }
 0x369   : > { %12334 = vst [vmem:[#allocation27_spill] sm:$0xff] %v10099_v34  ;;  %5674 = vpow2.f32 %v5102_v7  ;;  %v12340_v21 = vrot.slane %v12339_v37, 7  ;;  %v2699_v0 = vadd.f32 %v2667_v15, %v2630_v46  ;;  %v11690_v57 = vrot.slane %v10093_v40, 1 }
 0x36a   : > { %v1495_v4 = vsel %vm1492_vm2, %v12337_v19, %v12335_v12  ;;  %v3610_v2 = vadd.f32 %v3578_v49, %v3541_v16  ;;  %v1114_v33 = vmul.f32 %v9834_v54, %v9454_v22  ;;  %v1185_v12 = vmul.f32 %v9844_v1, %v9469_v51  ;;  %v12342_v49 = vld [vmem:[#allocation85_spill] sm:$0xff] }
 0x36b   : > { %v2161_v18 = vsel %vm2158_vm3, %v12340_v21, %v11688_v24  ;;  %v1256_v23 = vmul.f32 %v9851_v17, %v9507_v10  ;;  %v1746_v7 = vmul.f32 %v1705_v29, %v1495_v4  ;;  %v2731_v39 = vadd.f32 %v2699_v0, %v2354_v30  ;;  %v12343_v29 = vld [vmem:[#allocation145_spill] sm:$0xff] }
 0x36c   : > { %v2348_v5 = vmul.f32 %v2309_v42, %v2161_v18  ;;  %v12341_v19 = vrot.slane %v9979_v53, 1  ;;  %v10128_v15 = vadd.f32 %v3647_v61, %v3610_v2  ;;  %v1217_v16 = vadd.f32 %v1185_v12, %v1114_v33 }
 0x36d   : > { %v1327_v59 = vmul.f32 %v9858_v41, %v9803_v8  ;;  %v1859_v37 = vmul.f32 %v9724_v35, %v9469_v51  ;;  %v10136_v30 = vadd.f32 %v12343_v29, %v2656_v48  ;;  %v1790_v53 = vmul.f32 %v9717_v63, %v9454_v22 }
 0x36e   : > { %v3165_v46 = vsel %vm3137_vm4, %v12341_v19, %v11690_v57  ;;  %v11689_v4 = vrot.slane %v10128_v15, 2  ;;  %v1928_v61 = vmul.f32 %v9741_v26, %v9507_v10  ;;  %v10143_v21 = vadd.f32 %v2348_v5, %v1746_v7  ;;  %v12347_v7 = vld [vmem:[#allocation46_spill] sm:$0xff] }
 0x36f   : > { %v3301_v42 = vmul.f32 %v12342_v49, %v3165_v46  ;;  %12344 = vst [vmem:[#allocation95_spill] sm:$0xff] %v10136_v30  ;;  %v1288_v0 = vadd.f32 %v1256_v23, %v1217_v16  ;;  %v1398_v2 = vmul.f32 %v10068_v28, %v9221_v36  ;;  %v12346_v48 = vrot.slane %v10006_v44, 2  ;;  %v12348_v44 = vld [vmem:[#allocation105_spill] sm:$0xff] }
 0x370   : > { %12345 = vst [vmem:[#allocation9_spill] sm:$0xff] %v10143_v21  ;;  %v1891_v12 = vadd.f32 %v1859_v37, %v1790_v53  ;;  %v1997_v19 = vmul.f32 %v9803_v8, %v9749_v31  ;;  %v2461_v5 = vmul.f32 %v9769_v25, %v9469_v51  ;;  %v2392_v36 = vmul.f32 %v9762_v52, %v9454_v22 }
 0x371   : > { %v3333_v18 = vadd.f32 %v3301_v42, %v2731_v39  ;;  %v3767_v33 = vsel %vm3739_vm5, %v12346_v48, %v11689_v4  ;;  %v1359_v23 = vadd.f32 %v1327_v59, %v1288_v0  ;;  %v2530_v46 = vmul.f32 %v9894_v20, %v9507_v10  ;;  %v10166_v42 = vld [vmem:[#allocation2 + $0x100] sm:$0xff] }
 0x372   : > { %v3903_v39 = vmul.f32 %v12347_v7, %v3767_v33  ;;  %v10164_v49 = vmul.f32 %v9834_v54, %v12348_v44  ;;  %12349 = vst [vmem:[#allocation103_spill] sm:$0xff] %v10166_v42  ;;  %v10170_v16 = vmul.f32 %v10166_v42, %v9844_v1  ;;  %v1960_v37 = vadd.f32 %v1928_v61, %v1891_v12  ;;  %v12350_v12 = vld [vmem:[#allocation100_spill] sm:$0xff] }
 0x373   : > { %v2066_v59 = vmul.f32 %v10068_v28, %v10014_v43  ;;  %v10174_v53 = vadd.f32 %v1398_v2, %v1359_v23  ;;  %v2493_v22 = vadd.f32 %v2461_v5, %v2392_v36  ;;  %v2599_v0 = vmul.f32 %v9903_v55, %v9803_v8  ;;  %v5673_v48 = vpop.eup %5672 }
 0x374   : > { %v3935_v29 = vadd.f32 %v3903_v39, %v3333_v18  ;;  %v2029_v33 = vadd.f32 %v1997_v19, %v1960_v37  ;;  %v2770_v7 = vmul.f32 %v9576_v38, %v9563_v56  ;;  %v2839_v44 = vmul.f32 %v9925_v13, %v9580_v47  ;;  %v12352_v37 = vld [vmem:[#allocation18_spill] sm:$0xff] }
 0x375   : > { %v2908_v61 = vmul.f32 %v10042_v50, %v9608_v9  ;;  %v4196_v24 = vmul.f32 %v5673_v48, %v12350_v12  ;;  %v11695_v2 = vrot.slane %v10174_v53, 6  ;;  %v2562_v5 = vadd.f32 %v2530_v46, %v2493_v22  ;;  %v12355_v22 = vld [vmem:[#allocation32_spill] sm:$0xff] }
 0x376   : > { %v10186_v18 = vadd.f32 %v9784_v27, %v3935_v29  ;;  %v5675_v39 = vpop.eup %5674  ;;  %v10189_v23 = vadd.f32 %v2066_v59, %v2029_v33  ;;  %v2668_v19 = vmul.f32 %v10068_v28, %v9344_v58  ;;  %v2871_v36 = vadd.f32 %v2839_v44, %v2770_v7  ;;  %v12353_v29 = vld [vmem:[#allocation115_spill] sm:$0xff] }
 0x377   : > { %v2977_v4 = vmul.f32 %v12352_v37, %v9947_v60  ;;  %5314 = vmatmul.mubr.msk.f32.vlgmr.msra.gmra.mxu1 %vm1032_vm1, %v4196_v24  ;;  %v4101_v57 = vadd.f32 1.0, %v5675_v39  ;;  %v12354_v12 = vrot.slane %v12353_v29, 6  ;;  %v2631_v59 = vadd.f32 %v2599_v0, %v2562_v5  ;;  %v10205_v44 = vld [vmem:[#allocation2 + $0x68] sm:$0xff]  ;;  %v12357_v39 = vld [vmem:[#allocation144_spill] sm:$0xff] }
 0x378   : > { %12351 = vst [vmem:[#allocation12_spill] sm:$0xff] %v10186_v18  ;;  %v5103_v48 = vmul.f32 -1.442695, %v10186_v18  ;;  %v11696_v58 = vrot.slane %v10189_v23, 7  ;;  %v2940_v7 = vadd.f32 %v2908_v61, %v2871_v36  ;;  %v3046_v24 = vmul.f32 %v10205_v44, %v12356_v6  ;;  %v12358_v29 = vld [vmem:[#allocation156_spill] sm:$0xff] }
 0x379   : > { %v1520_v46 = vsel %vm1492_vm2, %v12354_v12, %v11695_v2  ;;  %5676 = vrcp.f32 %v4101_v57  ;;  %v3372_v32 = vmul.f32 %v12357_v39, %v9563_v56  ;;  %v3441_v42 = vmul.f32 %v12358_v29, %v9580_v47  ;;  %v12359_v5 = vld [vmem:[#allocation120_spill] sm:$0xff]  ;;  %v12361_v57 = vld [vmem:[#allocation34_spill] sm:$0xff] }
 0x37a   : > { %v1721_v33 = vmul.f32 %v12355_v22, %v1520_v46  ;;  %v3510_v0 = vmul.f32 %v9957_v3, %v9608_v9  ;;  %5678 = vpow2.f32 %v5103_v48  ;;  %v12360_v61 = vrot.slane %v12359_v5, 7 }
 0x37b   : > { %v2700_v12 = vadd.f32 %v2668_v19, %v2631_v59  ;;  %v3009_v6 = vadd.f32 %v2977_v4, %v2940_v7  ;;  %v3473_v22 = vadd.f32 %v3441_v42, %v3372_v32  ;;  %v3579_v2 = vmul.f32 %v9947_v60, %v9650_v14 }
 0x37c   : > { %v2186_v36 = vsel %vm2158_vm3, %v12360_v61, %v11696_v58  ;;  %v3648_v30 = vmul.f32 %v10205_v44, %v9659_v45  ;;  %v1115_v48 = vmul.f32 %v9834_v54, %v9563_v56  ;;  %v1186_v5 = vmul.f32 %v9844_v1, %v9580_v47 }
 0x37d   : > { %v2323_v46 = vmul.f32 %v12361_v57, %v2186_v36  ;;  %v10226_v21 = vadd.f32 %v3046_v24, %v3009_v6  ;;  %v1257_v4 = vmul.f32 %v9851_v17, %v9608_v9  ;;  %v3542_v59 = vadd.f32 %v3510_v0, %v3473_v22  ;;  %v10243_v6 = vld [vmem:[#allocation2 + $0x110] sm:$0xff] }
 0x37e   : > { %v1328_v32 = vmul.f32 %v9947_v60, %v9858_v41  ;;  %v1791_v42 = vmul.f32 %v9717_v63, %v9563_v56  ;;  %v1218_v24 = vadd.f32 %v1186_v5, %v1115_v48  ;;  %v1860_v61 = vmul.f32 %v9724_v35, %v9580_v47  ;;  %12362 = vst [vmem:[#allocation25_spill] sm:$0xff] %v10243_v6 }
 0x37f   : > { %v2355_v19 = vadd.f32 %v2323_v46, %v1721_v33  ;;  %v11701_v7 = vrot.slane %v10226_v21, 1  ;;  %v1929_v36 = vmul.f32 %v9741_v26, %v9608_v9  ;;  %v10247_v33 = vmul.f32 %v10243_v6, %v9851_v17  ;;  %v10252_v46 = vld [vmem:[%s11327_s3 + $0x14] ss:$0 sm:$0xff] }
 0x380   : > { %v3611_v57 = vadd.f32 %v3579_v2, %v3542_v59  ;;  %v1399_v22 = vmul.f32 %v10252_v46, %v10205_v44  ;;  %v12364_v48 = vrot.slane %v10093_v40, 1  ;;  %v1289_v58 = vadd.f32 %v1257_v4, %v1218_v24  ;;  %v12365_v40 = vld [vmem:[#allocation54_spill] sm:$0xff] }
 0x381   : > { %12363 = vst [vmem:[#allocation171_spill] sm:$0xff] %v10247_v33  ;;  %v2732_v0 = vadd.f32 %v2700_v12, %v2355_v19  ;;  %v1892_v6 = vadd.f32 %v1860_v61, %v1791_v42  ;;  %v1998_v2 = vmul.f32 %v9947_v60, %v9749_v31  ;;  %v2393_v19 = vmul.f32 %v9762_v52, %v9563_v56  ;;  %v10281_v56 = vld [vmem:[%s11327_s3 + $0x16] ss:$0 sm:$0xff] }
 0x382   : > { %v3164_v5 = vsel %vm3137_vm4, %v12364_v48, %v11701_v7  ;;  %v10264_v12 = vadd.f32 %v3648_v30, %v3611_v57  ;;  %v2462_v59 = vmul.f32 %v9769_v25, %v9580_v47  ;;  %v2531_v34 = vmul.f32 %v9894_v20, %v9608_v9  ;;  %12366 = vst [vmem:[#allocation29_spill] sm:$0xff] %v10281_v56 }
 0x383   : > { %v3302_v33 = vmul.f32 %v12365_v40, %v3164_v5  ;;  %v1360_v18 = vadd.f32 %v1328_v32, %v1289_v58  ;;  %v1961_v48 = vadd.f32 %v1929_v36, %v1892_v6  ;;  %v2067_v4 = vmul.f32 %v10205_v44, %v10014_v43 }
 0x384   : > { %v11700_v42 = vrot.slane %v10264_v12, 2  ;;  %v2494_v30 = vadd.f32 %v2462_v59, %v2393_v19  ;;  %v2600_v24 = vmul.f32 %v9947_v60, %v9903_v55  ;;  %v2669_v61 = vmul.f32 %v10281_v56, %v10205_v44 }
 0x385   : > { %v3334_v57 = vadd.f32 %v3302_v33, %v2732_v0  ;;  %v10285_v58 = vadd.f32 %v1399_v22, %v1360_v18  ;;  %v2030_v32 = vadd.f32 %v1998_v2, %v1961_v48  ;;  %v2840_v36 = vmul.f32 %v9925_v13, %v9507_v10  ;;  %v12368_v0 = vld [vmem:[#allocation63_spill] sm:$0xff] }
 0x386   : > { %v12367_v6 = vrot.slane %v10128_v15, 2  ;;  %v2563_v19 = vadd.f32 %v2531_v34, %v2494_v30  ;;  %v2771_v59 = vmul.f32 %v9576_v38, %v9469_v51  ;;  %v2909_v33 = vmul.f32 %v10042_v50, %v9803_v8  ;;  %v5677_v18 = vpop.eup %5676 }
 0x387   : > { %v11705_v2 = vrot.slane %v10285_v58, 6  ;;  %v10301_v40 = vadd.f32 %v2067_v4, %v2030_v32  ;;  %v2978_v15 = vmul.f32 %v10068_v28, %v12352_v37  ;;  %v5679_v48 = vpop.eup %5678  ;;  %v3373_v30 = vmul.f32 %v12357_v39, %v9469_v51 }
 0x388   : > { %v3766_v5 = vsel %vm3739_vm5, %v12367_v6, %v11700_v42  ;;  %v4197_v6 = vmul.f32 %v5677_v18, %v10078_v62  ;;  %v2872_v34 = vadd.f32 %v2840_v36, %v2771_v59  ;;  %v3442_v42 = vmul.f32 %v12358_v29, %v9507_v10  ;;  %v12370_v62 = vld [vmem:[#allocation39_spill] sm:$0xff]  ;;  %v10319_v18 = vld [vmem:[#allocation2 + $0x70] sm:$0xff] }
 0x389   : > { %v3904_v22 = vmul.f32 %v12368_v0, %v3766_v5  ;;  %v4102_v7 = vadd.f32 1.0, %v5679_v48  ;;  %v12369_v4 = vrot.slane %v10174_v53, 6  ;;  %v11704_v5 = vrot.slane %v10301_v40, 7 }
 0x38a   : > { %5316 = vmatprep.mubr.msk.f32.mxu1 %vm1032_vm1, %v4197_v6  ;;  %v2941_v59 = vadd.f32 %v2909_v33, %v2872_v34  ;;  %v3474_v0 = vadd.f32 %v3442_v42, %v3373_v30  ;;  %v12373_v48 = vrot.slane %v10189_v23, 7  ;;  %v3511_v6 = vmul.f32 %v9957_v3, %v9803_v8  ;;  %v12374_v34 = vld [vmem:[#allocation41_spill] sm:$0xff] }
 0x38b   : > { %v3936_v56 = vadd.f32 %v3904_v22, %v3334_v57  ;;  %v1519_v32 = vsel %vm1492_vm2, %v12369_v4, %v11705_v2  ;;  %v10324_v57 = vld [vmem:[%s11327_s3 + $0x17] ss:$0 sm:$0xff]  ;;  %5680 = vrcp.f32 %v4102_v7  ;;  %v3580_v42 = vmul.f32 %v10068_v28, %v9650_v14 }
 0x38c   : > { %v1722_v36 = vmul.f32 %v12370_v62, %v1519_v32  ;;  %12371 = vst [vmem:[#allocation14_spill] sm:$0xff] %v10324_v57  ;;  %v3047_v53 = vmul.f32 %v10324_v57, %v10319_v18  ;;  %v2185_v33 = vsel %vm2158_vm3, %v12373_v48, %v11704_v5  ;;  %v3010_v32 = vadd.f32 %v2978_v15, %v2941_v59 }
 0x38d   : > { %v10329_v22 = vadd.f32 %v9784_v27, %v3936_v56  ;;  %v2324_v4 = vmul.f32 %v12374_v34, %v2185_v33  ;;  %v3649_v7 = vmul.f32 %v10319_v18, %v9659_v45  ;;  %v3543_v30 = vadd.f32 %v3511_v6, %v3474_v0 }
 0x38e   : > { %v1116_v23 = vmul.f32 %v9834_v54, %v9469_v51  ;;  %v1187_v62 = vmul.f32 %v9844_v1, %v9507_v10  ;;  %v2632_v5 = vadd.f32 %v2600_v24, %v2563_v19  ;;  %v10349_v2 = vadd.f32 %v3047_v53, %v3010_v32  ;;  %v10366_v32 = vld [vmem:[#allocation2 + $0x120] sm:$0xff] }
 0x38f   : > { %12372 = vst [vmem:[#allocation16_spill] sm:$0xff] %v10329_v22  ;;  %v5104_v56 = vmul.f32 -1.442695, %v10329_v22  ;;  %v2356_v48 = vadd.f32 %v2324_v4, %v1722_v36  ;;  %v1258_v15 = vmul.f32 %v9851_v17, %v9803_v8  ;;  %v3612_v59 = vadd.f32 %v3580_v42, %v3543_v30  ;;  %12375 = vst [vmem:[#allocation6_spill] sm:$0xff] %v10366_v32 }
 0x390   : > { %v1219_v33 = vadd.f32 %v1187_v62, %v1116_v23  ;;  %v1329_v34 = vmul.f32 %v10068_v28, %v9858_v41  ;;  %v2701_v0 = vadd.f32 %v2669_v61, %v2632_v5  ;;  %v11711_v6 = vrot.slane %v10349_v2, 1  ;;  %v12377_v23 = vld [vmem:[#allocation61_spill] sm:$0xff] }
 0x391   : > { %5682 = vpow2.f32 %v5104_v56  ;;  %v1792_v22 = vmul.f32 %v9717_v63, %v9469_v51  ;;  %v1861_v24 = vmul.f32 %v9724_v35, %v9507_v10  ;;  %v10360_v19 = vadd.f32 %v3649_v7, %v3612_v59 }
 0x392   : > { %v1290_v36 = vadd.f32 %v1258_v15, %v1219_v33  ;;  %v1400_v53 = vmul.f32 %v10319_v18, %v10252_v46  ;;  %v1930_v4 = vmul.f32 %v9803_v8, %v9741_v26  ;;  %v10370_v61 = vmul.f32 %v10366_v32, %v9858_v41 }
 0x393   : > { %v12376_v5 = vrot.slane %v10226_v21, 1  ;;  %v1893_v7 = vadd.f32 %v1861_v24, %v1792_v22  ;;  %v1999_v56 = vmul.f32 %v10068_v28, %v9749_v31  ;;  %v2733_v30 = vadd.f32 %v2701_v0, %v2356_v48 }
 0x394   : > { %v11709_v15 = vrot.slane %v10360_v19, 2  ;;  %v1361_v59 = vadd.f32 %v1329_v34, %v1290_v36  ;;  %v1243_v33 = vadd.f32 %v10170_v16, %v10164_v49  ;;  %v2068_v21 = vmul.f32 %v10319_v18, %v10014_v43  ;;  %v12379_v16 = vld [vmem:[#allocation64_spill] sm:$0xff] }
 0x395   : > { %v3163_v42 = vsel %vm3137_vm4, %v12376_v5, %v11711_v6  ;;  %v1962_v32 = vadd.f32 %v1930_v4, %v1893_v7  ;;  %v2394_v5 = vmul.f32 %v9762_v52, %v9469_v51  ;;  %v12378_v48 = vrot.slane %v10264_v12, 2 }
 0x396   : > { %v3303_v62 = vmul.f32 %v12377_v23, %v3163_v42  ;;  %v10394_v24 = vadd.f32 %v1400_v53, %v1361_v59  ;;  %v2463_v49 = vmul.f32 %v9769_v25, %v9507_v10  ;;  %v2772_v4 = vmul.f32 %v9576_v38, %v9580_v47  ;;  %v12381_v23 = vld [vmem:[#allocation12_spill] sm:$0xff] }
 0x397   : > { %v3765_v0 = vsel %vm3739_vm5, %v12378_v48, %v11709_v15  ;;  %v2031_v36 = vadd.f32 %v1999_v56, %v1962_v32  ;;  %v2841_v51 = vmul.f32 %v9925_v13, %v9608_v9  ;;  %v2532_v12 = vmul.f32 %v9894_v20, %v9803_v8 }
 0x398   : > { %v3335_v22 = vadd.f32 %v3303_v62, %v2733_v30  ;;  %v3905_v34 = vmul.f32 %v12379_v16, %v3765_v0  ;;  %v11710_v42 = vrot.slane %v10394_v24, 6  ;;  %v2601_v53 = vmul.f32 %v10068_v28, %v9903_v55  ;;  %v5681_v7 = vpop.eup %5680  ;;  %v12383_v16 = vld [vmem:[#allocation29_spill] sm:$0xff] }
 0x399   : > { %v2910_v10 = vmul.f32 %v10042_v50, %v9947_v60  ;;  %v10410_v32 = vadd.f32 %v2068_v21, %v2031_v36  ;;  %v2873_v56 = vadd.f32 %v2841_v51, %v2772_v4  ;;  %v2979_v38 = vmul.f32 %v10205_v44, %v12352_v37  ;;  %v10427_v36 = vld [vmem:[#allocation2 + $0x78] sm:$0xff] }
 0x39a   : > { %v3937_v30 = vadd.f32 %v3905_v34, %v3335_v22  ;;  %v4198_v62 = vmul.f32 %v5681_v7, %v12381_v23  ;;  %v12382_v59 = vrot.slane %v10285_v58, 6  ;;  %v2495_v0 = vadd.f32 %v2463_v49, %v2394_v5  ;;  %v12385_v58 = vld [vmem:[#allocation49_spill] sm:$0xff] }
 0x39b   : > { %12380 = vst [vmem:[#allocation36_spill] sm:$0xff] %v10410_v32  ;;  %v2670_v15 = vmul.f32 %v10319_v18, %v12383_v16  ;;  %v2132_v22 = vrot.slane %v10410_v32, 7  ;;  %v2942_v34 = vadd.f32 %v2910_v10, %v2873_v56  ;;  %v3048_v4 = vmul.f32 %v10427_v36, %v10324_v57 }
 0x39c   : > { %v1518_v48 = vsel %vm1492_vm2, %v12382_v59, %v11710_v42  ;;  %v10424_v21 = vadd.f32 %v9784_v27, %v3937_v30  ;;  %5317 = vmatmul.mubr.msk.f32.gmra.mxu1 %vm1032_vm1, %v4198_v62  ;;  %v3374_v5 = vmul.f32 %v12357_v39, %v9580_v47  ;;  %v3443_v49 = vmul.f32 %v12358_v29, %v9608_v9  ;;  %v12387_v39 = vld [vmem:[#allocation51_spill] sm:$0xff] }
 0x39d   : > { %v1723_v51 = vmul.f32 %v12385_v58, %v1518_v48  ;;  %v3512_v7 = vmul.f32 %v9957_v3, %v9947_v60  ;;  %v12386_v56 = vrot.slane %v10301_v40, 7  ;;  %v2564_v62 = vadd.f32 %v2532_v12, %v2495_v0  ;;  %v12388_v3 = vld [vmem:[#allocation171_spill] sm:$0xff]  ;;  %v12390_v0 = vld [vmem:[#allocation158_spill] sm:$0xff] }
 0x39e   : > { %12384 = vst [vmem:[#allocation151_spill] sm:$0xff] %v10424_v21  ;;  %v5683_v30 = vpop.eup %5682  ;;  %v5105_v10 = vmul.f32 -1.442695, %v10424_v21  ;;  %v3011_v59 = vadd.f32 %v2979_v38, %v2942_v34  ;;  %v3475_v42 = vadd.f32 %v3443_v49, %v3374_v5  ;;  %v3581_v29 = vmul.f32 %v10205_v44, %v9650_v14  ;;  %v12389_v38 = vld [vmem:[#allocation27_spill] sm:$0xff]  ;;  %v12391_v5 = vld [vmem:[#allocation9_spill] sm:$0xff] }
 0x39f   : > { %v2184_v23 = vsel %vm2158_vm3, %v12386_v56, %v2132_v22  ;;  %v4103_v48 = vadd.f32 1.0, %v5683_v30  ;;  %v1314_v6 = vadd.f32 %v12388_v3, %v1243_v33  ;;  %v2633_v21 = vadd.f32 %v2601_v53, %v2564_v62  ;;  %v12392_v49 = vld [vmem:[#allocation95_spill] sm:$0xff]  ;;  %v12396_v56 = vld [vmem:[#allocation106_spill] sm:$0xff] }
 0x3a0   : > { %v2325_v58 = vmul.f32 %v12387_v39, %v2184_v23  ;;  %5684 = vpow2.f32 %v5105_v10  ;;  %v10450_v57 = vadd.f32 %v3048_v4, %v3011_v59  ;;  %v3544_v32 = vadd.f32 %v3512_v7, %v3475_v42  ;;  %v10470_v7 = vld [vmem:[#allocation2 + $0x130] sm:$0xff]  ;;  %v12398_v59 = vld [vmem:[#allocation67_spill] sm:$0xff] }
 0x3a1   : > { %5686 = vrcp.f32 %v4103_v48  ;;  %v3650_v12 = vmul.f32 %v10427_v36, %v9659_v45  ;;  %v10456_v34 = vadd.f32 %v12390_v0, %v12389_v38  ;;  %v10460_v30 = vadd.f32 %v12392_v49, %v12391_v5  ;;  %v12399_v3 = vld [vmem:[#allocation103_spill] sm:$0xff] }
 0x3a2   : > { %v2357_v40 = vadd.f32 %v2325_v58, %v1723_v51  ;;  %v2702_v14 = vadd.f32 %v2670_v15, %v2633_v21  ;;  %v3112_v33 = vrot.slane %v10450_v57, 1  ;;  %v3613_v53 = vadd.f32 %v3581_v29, %v3544_v32  ;;  %v12394_v21 = vld [vmem:[#allocation98_spill] sm:$0xff] }
 0x3a3   : > { %v1117_v4 = vmul.f32 %v9834_v54, %v9580_v47  ;;  %v1188_v42 = vmul.f32 %v9844_v1, %v9608_v9  ;;  %v1259_v45 = vmul.f32 %v9947_v60, %v9851_v17  ;;  %v1385_v51 = vadd.f32 %v10370_v61, %v1314_v6 }
 0x3a4   : > { %v1424_v10 = vmul.f32 %v10470_v7, %v10252_v46  ;;  %v2734_v15 = vadd.f32 %v2702_v14, %v2357_v40  ;;  %v12393_v32 = vrot.slane %v10349_v2, 1  ;;  %v12395_v1 = vrot.slane %v12394_v21, 1 }
 0x3a5   : > { %v12397_v23 = vrot.slane %v12396_v56, 1  ;;  %v10488_v6 = vadd.f32 %v3650_v12, %v3613_v53  ;;  %v1220_v61 = vadd.f32 %v1188_v42, %v1117_v4  ;;  %v1330_v62 = vmul.f32 %v10205_v44, %v9858_v41  ;;  %v10514_v53 = vld [vmem:[#allocation2 + $0xf0] sm:$0xff] }
 0x3a6   : > { %v3162_v54 = vsel %vm3137_vm4, %v12393_v32, %v3112_v33  ;;  %v1793_v2 = vmul.f32 %v9717_v63, %v9580_v47  ;;  %v1862_v39 = vmul.f32 %v9724_v35, %v9608_v9  ;;  %v1931_v58 = vmul.f32 %v9947_v60, %v9741_v26 }
 0x3a7   : > { %v10486_v17 = vsel %vm3137_vm4, %v12397_v23, %v12395_v1  ;;  %v3304_v48 = vmul.f32 %v12398_v59, %v3162_v54  ;;  %v3714_v29 = vrot.slane %v10488_v6, 2  ;;  %v1885_v40 = vmul.f32 %v12399_v3, %v9724_v35  ;;  %v12403_v54 = vld [vmem:[#allocation6_spill] sm:$0xff]  ;;  %v5883_v23 = vld [vmem:[#allocation2 + $0x38] sm:$0xff] }
 0x3a8   : > { %v1291_v12 = vadd.f32 %v1259_v45, %v1220_v61  ;;  %v1401_v41 = vmul.f32 %v10427_v36, %v10252_v46  ;;  %v10504_v38 = vadd.f32 %v1424_v10, %v1385_v51  ;;  %v1894_v5 = vadd.f32 %v1862_v39, %v1793_v2  ;;  %v12401_v46 = vld [vmem:[#allocation25_spill] sm:$0xff]  ;;  %v12402_v45 = vld [vmem:[#allocation71_spill] sm:$0xff]  ;;  %v5884_v2 = vld [vmem:[#allocation2 + $0x40] sm:$0xff] }
 0x3a9   : > { %v3336_v0 = vadd.f32 %v3304_v48, %v2734_v15  ;;  %v2000_v47 = vmul.f32 %v10205_v44, %v9749_v31  ;;  %v12400_v49 = vrot.slane %v10360_v19, 2  ;;  %v1816_v35 = vmul.f32 %v10514_v53, %v9717_v63 }
 0x3aa   : > { %v10520_v4 = vmul.f32 %v12401_v46, %v9741_v26  ;;  %v1362_v42 = vadd.f32 %v1330_v62, %v1291_v12  ;;  %v1963_v10 = vadd.f32 %v1931_v58, %v1894_v5  ;;  %v2069_v15 = vmul.f32 %v10427_v36, %v10014_v43  ;;  %v12404_v5 = vld [vmem:[#allocation16_spill] sm:$0xff] }
 0x3ab   : > { %v3764_v14 = vsel %vm3739_vm5, %v12400_v49, %v3714_v29  ;;  %v2464_v19 = vmul.f32 %v9769_v25, %v9608_v9  ;;  %v10527_v32 = vadd.f32 %v1885_v40, %v1816_v35  ;;  %v10531_v21 = vmul.f32 %v12403_v54, %v9749_v31  ;;  %v10543_v31 = vld [vmem:[%s11327_s3 + $0x3] ss:$0 sm:$0xff] }
 0x3ac   : > { %v3906_v51 = vmul.f32 %v12402_v45, %v3764_v14  ;;  %v1433_v63 = vadd.f32 %v1401_v41, %v1362_v42  ;;  %v2842_v26 = vmul.f32 %v9925_v13, %v9803_v8  ;;  %v2032_v56 = vadd.f32 %v2000_v47, %v1963_v10 }
 0x3ad   : > { %v2395_v61 = vmul.f32 %v5883_v23, %v9762_v52  ;;  %v2533_v62 = vmul.f32 %v9947_v60, %v9894_v20  ;;  %v5685_v59 = vpop.eup %5684  ;;  %v2602_v48 = vmul.f32 %v10205_v44, %v9903_v55  ;;  %v2773_v39 = vmul.f32 %v10543_v31, %v5884_v2  ;;  %v12409_v23 = vld [vmem:[#allocation135_spill] sm:$0xff] }
 0x3ae   : > { %v3938_v1 = vadd.f32 %v3906_v51, %v3336_v0  ;;  %v1465_v9 = vrot.slane %v1433_v63, 6  ;;  %v2911_v58 = vmul.f32 %v10068_v28, %v10042_v50  ;;  %v5687_v40 = vpop.eup %5686  ;;  %v4104_v12 = vadd.f32 1.0, %v5685_v59  ;;  %v12407_v63 = vld [vmem:[#allocation14_spill] sm:$0xff]  ;;  %v12411_v59 = vld [vmem:[#allocation59_spill] sm:$0xff] }
 0x3af   : > { %v2101_v41 = vadd.f32 %v2069_v15, %v2032_v56  ;;  %v2496_v0 = vadd.f32 %v2464_v19, %v2395_v61  ;;  %v4199_v44 = vmul.f32 %v5687_v40, %v12404_v5  ;;  %v12405_v47 = vrot.slane %v10394_v24, 6  ;;  %v10563_v19 = vld [vmem:[#allocation2 + $0x80] sm:$0xff]  ;;  %v12412_v40 = vld [vmem:[#allocation65_spill] sm:$0xff] }
 0x3b0   : > { %v10549_v60 = vadd.f32 %v9784_v27, %v3938_v1  ;;  %v2671_v14 = vmul.f32 %v10427_v36, %v12383_v16  ;;  %v2874_v35 = vadd.f32 %v2842_v26, %v2773_v39  ;;  %5688 = vrcp.f32 %v4104_v12  ;;  %v12406_v27 = vld [vmem:[#allocation56_spill] sm:$0xff] }
 0x3b1   : > { %v1517_v49 = vsel %vm1492_vm2, %v12405_v47, %v1465_v9  ;;  %v2133_v45 = vrot.slane %v2101_v41, 7  ;;  %v2565_v51 = vadd.f32 %v2533_v62, %v2496_v0  ;;  %5319 = vmatprep.mubr.msk.f32.mxu1 %vm1032_vm1, %v4199_v44  ;;  %v2980_v24 = vmul.f32 %v10319_v18, %v12352_v37  ;;  %v12413_v41 = vld [vmem:[#allocation111_spill] sm:$0xff]  ;;  %v10581_v44 = vpop.permute.xlu1 %3877  ;;  %v12415_v47 = vld [vmem:[#allocation66_spill] sm:$0xff] }
 0x3b2   : > { %v5106_v42 = vmul.f32 -1.442695, %v10549_v60  ;;  %v1724_v10 = vmul.f32 %v12406_v27, %v1517_v49  ;;  %v2943_v15 = vadd.f32 %v2911_v58, %v2874_v35  ;;  %v3049_v1 = vmul.f32 %v10563_v19, %v12407_v63 }
 0x3b3   : > { %v2183_v26 = vsel %vm2158_vm3, %v2132_v22, %v2133_v45  ;;  %v2634_v56 = vadd.f32 %v2602_v48, %v2565_v51  ;;  %v12410_v61 = vrot.slane %v12409_v23, 6  ;;  %v12414_v0 = vrot.slane %v12413_v41, 7 }
 0x3b4   : > { %5690 = vpow2.f32 %v5106_v42  ;;  %v2326_v39 = vmul.f32 %v12411_v59, %v2183_v26  ;;  %v3012_v58 = vadd.f32 %v2980_v24, %v2943_v15  ;;  %v2396_v48 = vmul.f32 %v5884_v2, %v9762_v52  ;;  %v12418_v26 = vld [vmem:[#allocation137_spill] sm:$0xff]  ;;  %v12422_v59 = vld [vmem:[#allocation68_spill] sm:$0xff] }
 0x3b5   : > { %v1516_v62 = vsel %vm1492_vm2, %v1465_v9, %v12410_v61  ;;  %v2182_v5 = vsel %vm2158_vm3, %v2133_v45, %v12414_v0  ;;  %v2465_v49 = vmul.f32 %v9803_v8, %v9769_v25  ;;  %v2534_v9 = vmul.f32 %v10068_v28, %v9894_v20  ;;  %v12416_v45 = vld [vmem:[#allocation101_spill] sm:$0xff] }
 0x3b6   : > { %v1725_v12 = vmul.f32 %v12412_v40, %v1516_v62  ;;  %v2327_v22 = vmul.f32 %v12415_v47, %v2182_v5  ;;  %v10591_v35 = vmul.f32 %v10470_v7, %v10014_v43  ;;  %v2358_v42 = vadd.f32 %v2326_v39, %v1724_v10  ;;  %v12420_v61 = vld [vmem:[#allocation125_spill] sm:$0xff] }
 0x3b7   : > { %v2703_v51 = vadd.f32 %v2671_v14, %v2634_v56  ;;  %v3081_v27 = vadd.f32 %v3049_v1, %v3012_v58  ;;  %v12417_v15 = vrot.slane %v12416_v45, 2  ;;  %v2497_v24 = vadd.f32 %v2465_v49, %v2396_v48  ;;  %v12424_v39 = vld [vmem:[#allocation97_spill] sm:$0xff]  ;;  %v12431_v45 = vld [vmem:[#allocation72_spill] sm:$0xff] }
 0x3b8   : > { %v2603_v36 = vmul.f32 %v10319_v18, %v9903_v55  ;;  %v12419_v23 = vrot.slane %v12418_v26, 6  ;;  %v12421_v62 = vrot.slane %v12420_v61, 6  ;;  %v2359_v1 = vadd.f32 %v2327_v22, %v1725_v12  ;;  %v12426_v5 = vld [vmem:[#allocation73_spill] sm:$0xff]  ;;  %v12427_v22 = vld [vmem:[#allocation74_spill] sm:$0xff]  ;;  %v10639_v26 = vld [vmem:[#allocation2 + $0x90] sm:$0xff] }
 0x3b9   : > { %v3763_v2 = vsel %vm3739_vm5, %v3714_v29, %v12417_v15  ;;  %v2735_v14 = vadd.f32 %v2703_v51, %v2358_v42  ;;  %v3113_v10 = vrot.slane %v3081_v27, 1  ;;  %v2672_v6 = vmul.f32 %v10563_v19, %v12383_v16  ;;  %v12428_v42 = vld [vmem:[#allocation70_spill] sm:$0xff] }
 0x3ba   : > { %v1514_v43 = vsel %vm1492_vm2, %v12421_v62, %v12419_v23  ;;  %v2566_v56 = vadd.f32 %v2534_v9, %v2497_v24  ;;  %v12423_v29 = vrot.slane %v12422_v59, 7  ;;  %v12425_v58 = vrot.slane %v12424_v39, 7  ;;  %v10627_v9 = vpop.permute.xlu1 %1709 }
 0x3bb   : > { %v2398_v41 = vmul.f32 %v9803_v8, %v9762_v52  ;;  %v2467_v0 = vmul.f32 %v10068_v28, %v9769_v25  ;;  %v3161_v12 = vsel %vm3137_vm4, %v3112_v33, %v3113_v10  ;;  %v1727_v47 = vmul.f32 %v12426_v5, %v1514_v43  ;;  %v12429_v8 = vld [vmem:[#allocation127_spill] sm:$0xff]  ;;  %v12432_v43 = vld [vmem:[#allocation78_spill] sm:$0xff]  ;;  %v12443_v5 = vld [vmem:[#allocation69_spill] sm:$0xff] }
 0x3bc   : > { %v2180_v40 = vsel %vm2158_vm3, %v12425_v58, %v12423_v29  ;;  %v2536_v49 = vmul.f32 %v10319_v18, %v9894_v20  ;;  %v3305_v51 = vmul.f32 %v12428_v42, %v3161_v12  ;;  %v2635_v52 = vadd.f32 %v2603_v36, %v2566_v56  ;;  %v12437_v58 = vld [vmem:[#allocation132_spill] sm:$0xff]  ;;  %v12445_v42 = vld [vmem:[#allocation151_spill] sm:$0xff] }
 0x3bd   : > { %v2329_v48 = vmul.f32 %v12427_v22, %v2180_v40  ;;  %v12430_v27 = vrot.slane %v12429_v8, 1  ;;  %v2499_v57 = vadd.f32 %v2467_v0, %v2398_v41  ;;  %v1986_v33 = vadd.f32 %v10520_v4, %v10527_v32  ;;  %v5689_v32 = vpop.eup %5688  ;;  %v12439_v41 = vld [vmem:[#allocation134_spill] sm:$0xff] }
 0x3be   : > { %v3907_v15 = vmul.f32 %v12431_v45, %v3763_v2  ;;  %v2605_v24 = vmul.f32 %v10563_v19, %v9903_v55  ;;  %v2674_v23 = vmul.f32 %v10639_v26, %v12383_v16  ;;  %v3337_v36 = vadd.f32 %v3305_v51, %v2735_v14  ;;  %v12436_v2 = vld [vmem:[#allocation75_spill] sm:$0xff]  ;;  %v10668_v45 = vld [vmem:[%s11327_s3 + $0x2] ss:$0 sm:$0xff] }
 0x3bf   : > { %v3160_v25 = vsel %vm3137_vm4, %v3113_v10, %v12430_v27  ;;  %v2704_v61 = vadd.f32 %v2672_v6, %v2635_v52  ;;  %v2568_v62 = vadd.f32 %v2536_v49, %v2499_v57  ;;  %v12433_v56 = vrot.slane %v12432_v43, 1  ;;  %v12434_v10 = vld [vmem:[#allocation126_spill] sm:$0xff] }
 0x3c0   : > { %v12435_v59 = vrot.slane %v12434_v10, 1  ;;  %v3306_v29 = vmul.f32 %v12436_v2, %v3160_v25  ;;  %v2361_v39 = vadd.f32 %v2329_v48, %v1727_v47  ;;  %v12438_v40 = vrot.slane %v12437_v58, 6  ;;  %v12441_v6 = vld [vmem:[#allocation166_spill] sm:$0xff]  ;;  %v12446_v25 = vld [vmem:[#allocation87_spill] sm:$0xff]  ;;  %v12448_v10 = vld [vmem:[#allocation81_spill] sm:$0xff] }
 0x3c1   : > { %v12440_v0 = vrot.slane %v12439_v41, 6  ;;  %v12442_v12 = vrot.slane %v12441_v6, 7  ;;  %v12444_v22 = vrot.slane %v12443_v5, 7  ;;  %v4200_v51 = vmul.f32 %v5689_v32, %v12445_v42  ;;  %v5691_v47 = vpop.eup %5690  ;;  %v12449_v58 = vld [vmem:[#allocation119_spill] sm:$0xff] }
 0x3c2   : > { %v3158_v4 = vsel %vm3137_vm4, %v12435_v59, %v12433_v56  ;;  %v3939_v52 = vadd.f32 %v3907_v15, %v3337_v36  ;;  %v2736_v8 = vadd.f32 %v2704_v61, %v2359_v1  ;;  %v2637_v27 = vadd.f32 %v2605_v24, %v2568_v62  ;;  %v10675_v56 = vld [vmem:[%s11327_s3 + $0x7] ss:$0 sm:$0xff]  ;;  %v10685_v15 = vld [vmem:[%s11328_s4] ss:$0 sm:$0xff]  ;;  %v12447_v61 = vld [vmem:[#allocation80_spill] sm:$0xff] }
 0x3c3   : > { %v1512_v14 = vsel %vm1492_vm2, %v12440_v0, %v12438_v40  ;;  %v2178_v49 = vsel %vm2158_vm3, %v12444_v22, %v12442_v12  ;;  %v2055_v48 = vadd.f32 %v10531_v21, %v1986_v33  ;;  %v3308_v57 = vmul.f32 %v12446_v25, %v3158_v4  ;;  %5320 = vmatmul.mubr.msk.f32.gmra.mxu1 %vm1032_vm1, %v4200_v51  ;;  %v10680_v33 = vpop.permute.xlu1 %2312  ;;  %v12450_v12 = vld [vmem:[#allocation107_spill] sm:$0xff] }
 0x3c4   : > { %v2400_v43 = vmul.f32 %v10668_v45, %v10068_v28  ;;  %v2469_v1 = vmul.f32 %v10675_v56, %v10319_v18  ;;  %v4105_v21 = vadd.f32 1.0, %v5691_v47  ;;  %v10688_v28 = vadd.f32 %v10685_v15, %v3939_v52  ;;  %v12453_v42 = vld [vmem:[#allocation143_spill] sm:$0xff]  ;;  %v12457_v47 = vld [vmem:[#allocation114_spill] sm:$0xff] }
 0x3c5   : > { %v3338_v24 = vadd.f32 %v3306_v29, %v2736_v8  ;;  %v2706_v36 = vadd.f32 %v2674_v23, %v2637_v27  ;;  %v1729_v62 = vmul.f32 %v12447_v61, %v1512_v14  ;;  %v2331_v59 = vmul.f32 %v12448_v10, %v2178_v49  ;;  %v5891_v29 = vld [vmem:[#allocation2 + $0xa0] sm:$0xff]  ;;  %v12451_v49 = vld [vmem:[#allocation133_spill] sm:$0xff]  ;;  %v12459_v25 = vld [vmem:[#allocation139_spill] sm:$0xff] }
 0x3c6   : > { %v2501_v4 = vadd.f32 %v2469_v1, %v2400_v43  ;;  %v2538_v32 = vmul.f32 %v10563_v19, %v9894_v20  ;;  %5692 = vrcp.f32 %v4105_v21  ;;  %v5107_v2 = vmul.f32 -1.442695, %v10688_v28  ;;  %v12455_v8 = vld [vmem:[#allocation170_spill] sm:$0xff] }
 0x3c7   : > { %v3940_v40 = vadd.f32 %v12449_v58, %v3338_v24  ;;  %v2738_v41 = vadd.f32 %v2706_v36, %v2361_v39  ;;  %v10697_v0 = vadd.f32 %v10591_v35, %v2055_v48  ;;  %v2607_v23 = vmul.f32 %v10639_v26, %v9903_v55  ;;  %v10722_v21 = vpop.permute.xlu1 %1714  ;;  %v12460_v24 = vld [vmem:[#allocation99_spill] sm:$0xff] }
 0x3c8   : > { %v2570_v6 = vadd.f32 %v2538_v32, %v2501_v4  ;;  %v2676_v14 = vmul.f32 %v5891_v29, %v12383_v16  ;;  %v3324_v5 = vmul.f32 %v12450_v12, %v10486_v17  ;;  %5694 = vpow2.f32 %v5107_v2  ;;  %v12462_v58 = vld [vmem:[#allocation123_spill] sm:$0xff] }
 0x3c9   : > { %v10705_v20 = vadd.f32 %v10685_v15, %v3940_v40  ;;  %v3340_v22 = vadd.f32 %v3308_v57, %v2738_v41  ;;  %v12452_v39 = vrot.slane %v12451_v49, 2  ;;  %v12454_v35 = vrot.slane %v12453_v42, 2  ;;  %v12464_v41 = vld [vmem:[#allocation167_spill] sm:$0xff]  ;;  %v12466_v49 = vld [vmem:[#allocation124_spill] sm:$0xff] }
 0x3ca   : > { %v2363_v52 = vadd.f32 %v2331_v59, %v1729_v62  ;;  %v2639_v55 = vadd.f32 %v2607_v23, %v2570_v6  ;;  %v12456_v27 = vrot.slane %v12455_v8, 1  ;;  %v12458_v48 = vrot.slane %v12457_v47, 1  ;;  %v10727_v59 = vld [vmem:[#allocation2 + $0xf8] sm:$0xff]  ;;  %v12468_v42 = vld [vmem:[#allocation168_spill] sm:$0xff] }
 0x3cb   : > { %v3744_v51 = vsel %vm3739_vm5, %v12454_v35, %v12452_v39  ;;  %v3356_v43 = vadd.f32 %v3324_v5, %v12459_v25  ;;  %v5108_v1 = vmul.f32 -1.442695, %v10705_v20  ;;  %v3942_v36 = vadd.f32 %v12460_v24, %v3340_v22  ;;  %v10742_v22 = vld [vmem:[#allocation2 + $0x108] sm:$0xff]  ;;  %v10764_v25 = vld [vmem:[#allocation2 + $0x118] sm:$0xff]  ;;  %v12470_v24 = vld [vmem:[#allocation86_spill] sm:$0xff] }
 0x3cc   : > { %v3156_v17 = vsel %vm3137_vm4, %v12458_v48, %v12456_v27  ;;  %v3926_v57 = vmul.f32 %v10581_v44, %v3744_v51  ;;  %v1488_v61 = vrot.slane %v10504_v38, 6  ;;  %v2156_v62 = vrot.slane %v10697_v0, 7  ;;  %v12461_v44 = vld [vmem:[#allocation91_spill] sm:$0xff] }
 0x3cd   : > { %v2708_v10 = vadd.f32 %v2676_v14, %v2639_v55  ;;  %v2863_v4 = vmul.f32 %v10727_v59, %v9925_v13  ;;  %5696 = vpow2.f32 %v5108_v1  ;;  %v10732_v32 = vadd.f32 %v10685_v15, %v3942_v36  ;;  %v5893_v14 = vld [vmem:[#allocation2 + $0xe8] sm:$0xff]  ;;  %v10769_v36 = vpop.permute.xlu1 %2316 }
 0x3ce   : > { %v3310_v2 = vmul.f32 %v12461_v44, %v3156_v17  ;;  %v12463_v40 = vrot.slane %v12462_v58, 6  ;;  %v12465_v6 = vrot.slane %v12464_v41, 6  ;;  %v2794_v5 = vmul.f32 %v5893_v14, %v10543_v31  ;;  %v10760_v27 = vld [vmem:[%s11327_s3 + $0xc] ss:$0 sm:$0xff]  ;;  %v10775_v58 = vld [vmem:[%s11327_s3 + $0x11] ss:$0 sm:$0xff] }
 0x3cf   : > { %v2740_v12 = vadd.f32 %v2708_v10, %v2363_v52  ;;  %v2932_v13 = vmul.f32 %v10742_v22, %v10042_v50  ;;  %v12467_v39 = vrot.slane %v12466_v49, 7  ;;  %v12469_v35 = vrot.slane %v12468_v42, 7  ;;  %v12474_v41 = vld [vmem:[#allocation142_spill] sm:$0xff] }
 0x3d0   : > { %v1510_v23 = vsel %vm1492_vm2, %v12465_v6, %v12463_v40  ;;  %v5110_v55 = vmul.f32 -1.442695, %v10732_v32  ;;  %v2402_v52 = vmul.f32 %v10668_v45, %v10319_v18  ;;  %v2471_v8 = vmul.f32 %v10675_v56, %v10563_v19  ;;  %v12471_v19 = vld [vmem:[#allocation88_spill] sm:$0xff] }
 0x3d1   : > { %v2176_v51 = vsel %vm2158_vm3, %v12469_v35, %v12467_v39  ;;  %v2540_v47 = vmul.f32 %v10760_v27, %v10639_v26  ;;  %v3342_v48 = vadd.f32 %v3310_v2, %v2740_v12  ;;  %v2895_v17 = vadd.f32 %v2863_v4, %v2794_v5  ;;  %v12472_v4 = vld [vmem:[#allocation112_spill] sm:$0xff]  ;;  %v12475_v12 = vld [vmem:[#allocation110_spill] sm:$0xff]  ;;  %v12477_v5 = vld [vmem:[#allocation169_spill] sm:$0xff] }
 0x3d2   : > { %v3001_v1 = vmul.f32 %v10764_v25, %v12352_v37  ;;  %v1731_v18 = vmul.f32 %v12470_v24, %v1510_v23  ;;  %5698 = vpow2.f32 %v5110_v55  ;;  %v2333_v10 = vmul.f32 %v12471_v19, %v2176_v51  ;;  %v5898_v51 = vld [vmem:[#allocation2 + $0xb0] sm:$0xff] }
 0x3d3   : > { %v2503_v44 = vadd.f32 %v2471_v8, %v2402_v52  ;;  %v2609_v26 = vmul.f32 %v10775_v58, %v5891_v29  ;;  %v12473_v2 = vrot.slane %v12472_v4, 6  ;;  %v3944_v6 = vadd.f32 %v12474_v41, %v3342_v48  ;;  %v5693_v52 = vpop.eup %5692 }
 0x3d4   : > { %v2964_v23 = vadd.f32 %v2932_v13, %v2895_v17  ;;  %v12476_v14 = vrot.slane %v12475_v12, 1  ;;  %v12478_v49 = vrot.slane %v12477_v5, 1  ;;  %v10791_v42 = vadd.f32 %v3926_v57, %v3356_v43  ;;  %v12479_v13 = vld [vmem:[#allocation7_spill] sm:$0xff] }
 0x3d5   : > { %v1494_v40 = vsel %vm1492_vm2, %v12473_v2, %v1488_v61  ;;  %v2572_v35 = vadd.f32 %v2540_v47, %v2503_v44  ;;  %v2678_v55 = vmul.f32 %v5898_v51, %v12383_v16  ;;  %v12480_v8 = vrot.slane %v12479_v13, 7  ;;  %v10806_v57 = vld [vmem:[#allocation2 + $0x128] sm:$0xff]  ;;  %v12481_v44 = vld [vmem:[#allocation96_spill] sm:$0xff]  ;;  %v5695_v2 = vpop.eup %5694 }
 0x3d6   : > { %v3154_v39 = vsel %vm3137_vm4, %v12478_v49, %v12476_v14  ;;  %v10794_v29 = vmul.f32 %v10627_v9, %v1494_v40  ;;  %v10804_v17 = vadd.f32 %v10685_v15, %v3944_v6  ;;  %v3033_v43 = vadd.f32 %v3001_v1, %v2964_v23  ;;  %v5900_v1 = vld [vmem:[%s11327_s3 + $0x8] ss:$0 sm:$0xff] }
 0x3d7   : > { %v2160_v48 = vsel %vm2158_vm3, %v12480_v8, %v2156_v62  ;;  %v3070_v9 = vmul.f32 %v10806_v57, %v12407_v63  ;;  %v4201_v47 = vmul.f32 %v5693_v52, %v10549_v60  ;;  %v2365_v24 = vadd.f32 %v2333_v10, %v1731_v18  ;;  %v3886_v18 = vpop.permute.xlu1 %3885 }
 0x3d8   : > { %v2641_v19 = vadd.f32 %v2609_v26, %v2572_v35  ;;  %v3312_v4 = vmul.f32 %v12481_v44, %v3154_v39  ;;  %v5112_v40 = vmul.f32 -1.442695, %v10804_v17  ;;  %v2795_v41 = vmul.f32 %v10543_v31, %v10514_v53 }
 0x3d9   : > { %v2864_v6 = vmul.f32 %v5900_v1, %v12399_v3  ;;  %v2865_v23 = vmul.f32 %v5900_v1, %v10742_v22  ;;  %5322 = vmatprep.mubr.msk.f32.mxu1 %vm1032_vm1, %v4201_v47  ;;  %v4106_v60 = vadd.f32 1.0, %v5695_v2  ;;  %v2487_v26 = vmul.f32 %v10675_v56, %v12399_v3  ;;  %v5901_v2 = vld [vmem:[#allocation2 + $0x138] sm:$0xff] }
 0x3da   : > { %v2710_v10 = vadd.f32 %v2678_v55, %v2641_v19  ;;  %v2796_v12 = vmul.f32 %v10727_v59, %v10543_v31  ;;  %5700 = vpow2.f32 %v5112_v40  ;;  %v2418_v14 = vmul.f32 %v10668_v45, %v10514_v53  ;;  %v5697_v55 = vpop.eup %5696 }
 0x3db   : > { %v2896_v5 = vadd.f32 %v2864_v6, %v2795_v41  ;;  %v2933_v49 = vmul.f32 %v12401_v46, %v10042_v50  ;;  %5702 = vrcp.f32 %v4106_v60  ;;  %v2556_v35 = vmul.f32 %v10760_v27, %v12401_v46  ;;  %v3292_v1 = vpop.permute.xlu1 %3291 }
 0x3dc   : > { %v2742_v39 = vadd.f32 %v2710_v10, %v2365_v24  ;;  %v2897_v51 = vadd.f32 %v2865_v23, %v2796_v12  ;;  %v2934_v3 = vmul.f32 %v10764_v25, %v10042_v50  ;;  %v3002_v31 = vmul.f32 %v12403_v54, %v12352_v37  ;;  %v12482_v50 = vld [vmem:[#allocation140_spill] sm:$0xff] }
 0x3dd   : > { %v2965_v52 = vadd.f32 %v2933_v49, %v2896_v5  ;;  %v3003_v53 = vmul.f32 %v10806_v57, %v12352_v37  ;;  %v4107_v13 = vadd.f32 1.0, %v5697_v55  ;;  %v3102_v8 = vadd.f32 %v3070_v9, %v3033_v43  ;;  %v12485_v55 = vld [vmem:[#allocation92_spill] sm:$0xff] }
 0x3de   : > { %v3344_v47 = vadd.f32 %v3312_v4, %v2742_v39  ;;  %v2519_v19 = vadd.f32 %v2487_v26, %v2418_v14  ;;  %v2966_v24 = vadd.f32 %v2934_v3, %v2897_v51  ;;  %v3071_v46 = vmul.f32 %v10470_v7, %v12407_v63 }
 0x3df   : > { %v3034_v44 = vadd.f32 %v3002_v31, %v2965_v52  ;;  %v3072_v40 = vmul.f32 %v5901_v2, %v12407_v63  ;;  %5704 = vrcp.f32 %v4107_v13  ;;  %v2625_v37 = vmul.f32 %v10775_v58, %v12403_v54  ;;  %v5699_v23 = vpop.eup %5698  ;;  %v12487_v52 = vld [vmem:[#allocation129_spill] sm:$0xff] }
 0x3e0   : > { %v3946_v41 = vadd.f32 %v12482_v50, %v3344_v47  ;;  %v2588_v6 = vadd.f32 %v2556_v35, %v2519_v19  ;;  %v3035_v43 = vadd.f32 %v3003_v53, %v2966_v24  ;;  %v2419_v4 = vmul.f32 %v10727_v59, %v10668_v45  ;;  %v3890_v59 = vpop.permute.xlu0 %3889  ;;  %v12489_v53 = vld [vmem:[#allocation109_spill] sm:$0xff]  ;;  %v3296_v47 = vpop.permute.xlu1 %3295  ;;  %v12491_v19 = vld [vmem:[#allocation83_spill] sm:$0xff] }
 0x3e1   : > { %v3103_v9 = vadd.f32 %v3071_v46, %v3034_v44  ;;  %v2488_v60 = vmul.f32 %v10742_v22, %v10675_v56  ;;  %v2349_v10 = vmul.f32 %v10680_v33, %v2160_v48  ;;  %v4109_v63 = vadd.f32 1.0, %v5699_v23  ;;  %v12483_v33 = vld [vmem:[#allocation84_spill] sm:$0xff]  ;;  %v12493_v44 = vld [vmem:[#allocation131_spill] sm:$0xff] }
 0x3e2   : > { %v10849_v26 = vadd.f32 %v10685_v15, %v3946_v41  ;;  %v2557_v12 = vmul.f32 %v10764_v25, %v10760_v27  ;;  %v3134_v14 = vrot.slane %v3102_v8, 1  ;;  %v3104_v54 = vadd.f32 %v3072_v40, %v3035_v43 }
 0x3e3   : > { %v3135_v5 = vrot.slane %v3103_v9, 1  ;;  %v2520_v49 = vadd.f32 %v2488_v60, %v2419_v4  ;;  %5706 = vrcp.f32 %v4109_v63  ;;  %v2657_v45 = vadd.f32 %v2625_v37, %v2588_v6  ;;  %v12496_v63 = vld [vmem:[#allocation153_spill] sm:$0xff] }
 0x3e4   : > { %v5114_v39 = vmul.f32 -1.442695, %v10849_v26  ;;  %v2694_v56 = vmul.f32 %v10470_v7, %v12383_v16  ;;  %v12484_v22 = vrot.slane %v12483_v33, 1  ;;  %v3136_v35 = vrot.slane %v3104_v54, 1  ;;  %v3894_v60 = vpop.permute.xlu0 %3893  ;;  %v12500_v33 = vld [vmem:[#allocation104_spill] sm:$0xff] }
 0x3e5   : > { %v2589_v51 = vadd.f32 %v2557_v12, %v2520_v49  ;;  %v2626_v27 = vmul.f32 %v10806_v57, %v10775_v58  ;;  %v2381_v25 = vadd.f32 %v2349_v10, %v10794_v29  ;;  %v12486_v3 = vrot.slane %v12485_v55, 7  ;;  %v12495_v10 = vld [vmem:[#allocation141_spill] sm:$0xff]  ;;  %v3898_v49 = vpop.permute.xlu1 %3897  ;;  %v12502_v55 = vld [vmem:[#allocation122_spill] sm:$0xff] }
 0x3e6   : > { %v3140_v48 = vsel %vm3137_vm4, %v12484_v22, %v3134_v14  ;;  %v12488_v31 = vrot.slane %v12487_v52, 2  ;;  %v12490_v13 = vrot.slane %v12489_v53, 2  ;;  %5708 = vpow2.f32 %v5114_v39 }
 0x3e7   : > { %v2159_v7 = vsel %vm2158_vm3, %v2156_v62, %v12486_v3  ;;  %v12492_v58 = vrot.slane %v12491_v19, 6  ;;  %v3138_v62 = vsel %vm3137_vm4, %v3135_v5, %v3136_v35  ;;  %v5701_v24 = vpop.eup %5700  ;;  %v3326_v46 = vmul.f32 %v12493_v44, %v3140_v48  ;;  %v12501_v48 = vld [vmem:[#allocation94_spill] sm:$0xff] }
 0x3e8   : > { %v3742_v8 = vsel %vm3739_vm5, %v12490_v13, %v12488_v31  ;;  %v2350_v0 = vmul.f32 %v10769_v36, %v2159_v7  ;;  %v2726_v40 = vadd.f32 %v2694_v56, %v2657_v45  ;;  %v3139_v50 = vsel %vm3137_vm4, %v3134_v14, %v3135_v5  ;;  %v5703_v6 = vpop.eup %5702  ;;  %v12494_v36 = vld [vmem:[#allocation162_spill] sm:$0xff]  ;;  %v12504_v7 = vld [vmem:[#allocation89_spill] sm:$0xff]  ;;  %v12506_v31 = vld [vmem:[#allocation159_spill] sm:$0xff] }
 0x3e9   : > { %v1493_v29 = vsel %vm1492_vm2, %v1488_v61, %v12492_v58  ;;  %v3928_v57 = vmul.f32 %v3886_v18, %v3742_v8  ;;  %v3328_v41 = vmul.f32 %v3292_v1, %v3138_v62  ;;  %v4111_v37 = vadd.f32 1.0, %v5701_v24  ;;  %v12507_v13 = vld [vmem:[#allocation102_spill] sm:$0xff] }
 0x3ea   : > { %v1748_v38 = vmul.f32 %v10722_v21, %v1493_v29  ;;  %v2658_v23 = vadd.f32 %v2626_v27, %v2589_v51  ;;  %v2695_v61 = vmul.f32 %v5901_v2, %v12383_v16  ;;  %v10891_v18 = vadd.f32 %v10685_v15, %v12494_v36  ;;  %v12497_v21 = vld [vmem:[#allocation108_spill] sm:$0xff] }
 0x3eb   : > { %v4202_v43 = vmul.f32 %v5703_v6, %v10688_v28  ;;  %v3358_v9 = vadd.f32 %v3326_v46, %v10456_v34  ;;  %v2758_v4 = vadd.f32 %v2726_v40, %v2381_v25  ;;  %v3959_v1 = vadd.f32 %v12496_v63, %v12495_v10  ;;  %v12498_v28 = vld [vmem:[#allocation76_spill] sm:$0xff]  ;;  %v12514_v10 = vld [vmem:[#allocation117_spill] sm:$0xff] }
 0x3ec   : > { %v2382_v12 = vadd.f32 %v2350_v0, %v1748_v38  ;;  %5710 = vrcp.f32 %v4111_v37  ;;  %v3327_v14 = vmul.f32 %v12497_v21, %v3139_v50  ;;  %v10900_v16 = vadd.f32 %v10685_v15, %v10791_v42  ;;  %v5705_v39 = vpop.eup %5704  ;;  %v12510_v50 = vld [vmem:[#allocation130_spill] sm:$0xff] }
 0x3ed   : > { %5323 = vmatmul.mubr.msk.f32.gmra.mxu1 %vm1032_vm1, %v4202_v43  ;;  %v3960_v2 = vadd.f32 %v3928_v57, %v3358_v9  ;;  %v3360_v54 = vadd.f32 %v3328_v41, %v2758_v4  ;;  %v12499_v5 = vrot.slane %v12498_v28, 1  ;;  %v2727_v45 = vadd.f32 %v2695_v61, %v2658_v23  ;;  %v12509_v57 = vld [vmem:[#allocation93_spill] sm:$0xff]  ;;  %v12512_v38 = vld [vmem:[#allocation118_spill] sm:$0xff]  ;;  %v12513_v4 = vld [vmem:[#allocation160_spill] sm:$0xff] }
 0x3ee   : > { %v10909_v22 = vadd.f32 %v10685_v15, %v12500_v33  ;;  %v3359_v42 = vadd.f32 %v3327_v14, %v10460_v30  ;;  %v3930_v51 = vmul.f32 %v3894_v60, %v12501_v48  ;;  %v5124_v27 = vmul.f32 -1.442695, %v10891_v18  ;;  %v12508_v30 = vld [vmem:[#allocation148_spill] sm:$0xff]  ;;  %v12511_v41 = vld [vmem:[#allocation149_spill] sm:$0xff] }
 0x3ef   : > { %v3169_v34 = vsel %vm3137_vm4, %v3136_v35, %v12499_v5  ;;  %v4203_v25 = vmul.f32 %v5705_v39, %v10705_v20  ;;  %v12503_v3 = vrot.slane %v12502_v55, 2  ;;  %v12505_v35 = vrot.slane %v12504_v7, 2  ;;  %v12516_v28 = vld [vmem:[#allocation77_spill] sm:$0xff] }
 0x3f0   : > { %v3329_v56 = vmul.f32 %v3296_v47, %v3169_v34  ;;  %v4114_v53 = vadd.f32 1.0, %v12506_v31  ;;  %v3929_v8 = vmul.f32 %v3890_v59, %v12507_v13  ;;  %v2759_v47 = vadd.f32 %v2727_v45, %v2382_v12  ;;  %v5707_v0 = vpop.eup %5706  ;;  %v12517_v34 = vld [vmem:[#allocation146_spill] sm:$0xff]  ;;  %v12518_v45 = vld [vmem:[#allocation157_spill] sm:$0xff]  ;;  %v12520_v31 = vld [vmem:[#allocation147_spill] sm:$0xff] }
 0x3f1   : > { %v3771_v52 = vsel %vm3739_vm5, %v12505_v35, %v12503_v3  ;;  %5712 = vpow2.f32 %v12508_v30  ;;  %v5126_v58 = vmul.f32 -1.442695, %v10900_v16  ;;  %5325 = vmatprep.mubr.msk.f32.mxu1 %vm1032_vm1, %v4203_v25  ;;  %v10927_v20 = vadd.f32 %v10685_v15, %v3960_v2 }
 0x3f2   : > { %v3931_v19 = vmul.f32 %v3898_v49, %v3771_v52  ;;  %v3962_v29 = vadd.f32 %v3930_v51, %v3360_v54  ;;  %5326 = vmatmul.mubr.msk.f32.gmra.mxu1 %vm1032_vm1, %v12509_v57  ;;  %v3361_v62 = vadd.f32 %v3329_v56, %v2759_v47  ;;  %v5125_v24 = vmul.f32 -1.442695, %v10909_v22  ;;  %v12515_v54 = vld [vmem:[#allocation136_spill] sm:$0xff]  ;;  %v12519_v56 = vld [vmem:[#allocation155_spill] sm:$0xff]  ;;  %v12521_v47 = vld [vmem:[#allocation121_spill] sm:$0xff] }
 0x3f3   : > { %v10933_v59 = vadd.f32 %v10685_v15, %v3959_v1  ;;  %v3961_v44 = vadd.f32 %v3929_v8, %v3359_v42  ;;  %5714 = vpow2.f32 %v5124_v27  ;;  %v4205_v46 = vmul.f32 %v5707_v0, %v10732_v32  ;;  %v5709_v40 = vpop.eup %5708 }
 0x3f4   : > { %v4206_v6 = vmul.f32 %v12511_v41, %v12510_v50  ;;  %5716 = vrcp.f32 %v4114_v53  ;;  %v4116_v37 = vadd.f32 1.0, %v12512_v38  ;;  %v3963_v23 = vadd.f32 %v3931_v19, %v3361_v62  ;;  %v12522_v19 = vld [vmem:[#allocation150_spill] sm:$0xff] }
 0x3f5   : > { %5718 = vpow2.f32 %v5126_v58  ;;  %5328 = vmatprep.mubr.msk.f32.mxu1 %vm1032_vm1, %v4205_v46  ;;  %v5128_v61 = vmul.f32 -1.442695, %v10927_v20  ;;  %v4113_v36 = vadd.f32 1.0, %v5709_v40  ;;  %v10942_v43 = vadd.f32 %v10685_v15, %v3962_v29  ;;  %v12523_v62 = vld [vmem:[#allocation90_spill] sm:$0xff] }
 0x3f6   : > { %5329 = vmatmul.mubr.msk.f32.gmra.mxu1 %vm1032_vm1, %v4206_v6  ;;  %5720 = vpow2.f32 %v5125_v24  ;;  %v5127_v32 = vmul.f32 -1.442695, %v10933_v59  ;;  %v10947_v9 = vadd.f32 %v10685_v15, %v3961_v44  ;;  %v4117_v60 = vadd.f32 1.0, %v12513_v4  ;;  %v12524_v40 = vld [vmem:[#allocation154_spill] sm:$0xff] }
 0x3f7   : > { %5722 = vrcp.f32 %v4113_v36  ;;  %v4118_v63 = vadd.f32 1.0, %v12514_v10  ;;  %v10952_v1 = vadd.f32 %v10685_v15, %v3963_v23  ;;  %v5130_v21 = vmul.f32 -1.442695, %v10942_v43 }
 0x3f8   : > { %5724 = vrcp.f32 %v4116_v37  ;;  %v5129_v2 = vmul.f32 -1.442695, %v10947_v9  ;;  %v4208_v5 = vmul.f32 %v12516_v28, %v12515_v54  ;;  %v4119_v49 = vadd.f32 1.0, %v12517_v34  ;;  %v12525_v37 = vld [vmem:[#allocation116_spill] sm:$0xff] }
 0x3f9   : > { %v5711_v12 = vpop.eup %5710  ;;  %5726 = vpow2.f32 %v5128_v61  ;;  %v5131_v15 = vmul.f32 -1.442695, %v10952_v1  ;;  %v4121_v33 = vadd.f32 1.0, %v12519_v56  ;;  %v4211_v30 = vmul.f32 %v12522_v19, %v12521_v47  ;;  %v12529_v28 = vld [vmem:[#allocation164_spill] sm:$0xff] }
 0x3fa   : > { %v4207_v14 = vmul.f32 %v5711_v12, %v10804_v17  ;;  %5728 = vpow2.f32 %v5127_v32  ;;  %v4120_v17 = vadd.f32 1.0, %v12518_v45  ;;  %v12526_v32 = vld [vmem:[#allocation152_spill] sm:$0xff] }
 0x3fb   : > { %5730 = vrcp.f32 %v4117_v60 }
 0x3fc   : > { %5732 = vrcp.f32 %v4118_v63  ;;  %5331 = vmatprep.mubr.msk.f32.mxu1 %vm1032_vm1, %v4207_v14  ;;  %v12527_v63 = vld [vmem:[#allocation138_spill] sm:$0xff]  ;;  %v12528_v14 = vld [vmem:[#allocation165_spill] sm:$0xff] }
 0x3fd   : > { %5332 = vmatmul.mubr.msk.f32.gmra.mxu1 %vm1032_vm1, %v4208_v5  ;;  %5734 = vpow2.f32 %v5130_v21 }
 0x3fe   : > { %v5713_v39 = vpop.eup %5712  ;;  %5736 = vpow2.f32 %v5129_v2 }
 0x3ff   : > { %5738 = vrcp.f32 %v4119_v49  ;;  %v4122_v27 = vadd.f32 1.0, %v5713_v39 }
 0x400   : > { %v5715_v42 = vpop.eup %5714  ;;  %5740 = vpow2.f32 %v5131_v15 }
 0x401   : > { %v5717_v48 = vpop.eup %5716  ;;  %5742 = vrcp.f32 %v4120_v17  ;;  %v4123_v55 = vadd.f32 1.0, %v5715_v42 }
 0x402   : > { %v5719_v51 = vpop.eup %5718  ;;  %5744 = vrcp.f32 %v4121_v33  ;;  %v4210_v53 = vmul.f32 %v5717_v48, %v12520_v31 }
 0x403   : > { %v5721_v25 = vpop.eup %5720  ;;  %5746 = vrcp.f32 %v4122_v27  ;;  %v4125_v58 = vadd.f32 1.0, %v5719_v51 }
 0x404   : > { %v5723_v3 = vpop.eup %5722  ;;  %v4124_v13 = vadd.f32 1.0, %v5721_v25  ;;  %5748 = vrcp.f32 %v4123_v55  ;;  %v11011_v25 = vld [vmem:[%s11330_s6] ss:$0 sm:$0xff] }
 0x405   : > { %v5725_v7 = vpop.eup %5724  ;;  %v4209_v35 = vmul.f32 %v5723_v3, %v10849_v26 }
 0x406   : > { %v5727_v52 = vpop.eup %5726  ;;  %v4212_v24 = vmul.f32 %v5725_v7, %v12523_v62  ;;  %5750 = vrcp.f32 %v4124_v13 }
 0x407   : > { %v5729_v8 = vpop.eup %5728  ;;  %5334 = vmatprep.mubr.msk.f32.mxu1 %vm1032_vm1, %v4209_v35  ;;  %v4127_v57 = vadd.f32 1.0, %v5727_v52  ;;  %5752 = vrcp.f32 %v4125_v58 }
 0x408   : > { %v5731_v29 = vpop.eup %5730  ;;  %5335 = vmatmul.mubr.msk.f32.gmra.mxu1 %vm1032_vm1, %v4210_v53  ;;  %v4126_v44 = vadd.f32 1.0, %v5729_v8 }
 0x409   : > { %v5733_v0 = vpop.eup %5732  ;;  %5337 = vmatprep.mubr.msk.f32.mxu1 %vm1032_vm1, %v4211_v30  ;;  %v4213_v50 = vmul.f32 %v5731_v29, %v12524_v40  ;;  %5754 = vrcp.f32 %v4127_v57 }
 0x40a   : > { %v5735_v26 = vpop.eup %5734  ;;  %v4214_v23 = vmul.f32 %v5733_v0, %v12525_v37  ;;  %5756 = vrcp.f32 %v4126_v44 }
 0x40b   : > { %v5737_v46 = vpop.eup %5736  ;;  %v4129_v38 = vadd.f32 1.0, %v5735_v26 }
 0x40c   : > { %v5739_v41 = vpop.eup %5738  ;;  %5338 = vmatmul.mubr.msk.f32.gmra.mxu1 %vm1032_vm1, %v4212_v24  ;;  %v4128_v61 = vadd.f32 1.0, %v5737_v46 }
 0x40d   : > { %v5741_v6 = vpop.eup %5740  ;;  %5340 = vmatprep.mubr.msk.f32.mxu1 %vm1032_vm1, %v4213_v50  ;;  %v4215_v4 = vmul.f32 %v5739_v41, %v12526_v32  ;;  %5758 = vrcp.f32 %v4129_v38 }
 0x40e   : > { %v5743_v36 = vpop.eup %5742  ;;  %v4130_v10 = vadd.f32 1.0, %v5741_v6  ;;  %5760 = vrcp.f32 %v4128_v61 }
 0x40f   : > { %v5745_v60 = vpop.eup %5744  ;;  %v4216_v12 = vmul.f32 %v5743_v36, %v12527_v63 }
 0x410   : > { %5341 = vmatmul.mubr.msk.f32.gmra.mxu1 %vm1032_vm1, %v4214_v23  ;;  %v5747_v21 = vpop.eup %5746  ;;  %v4217_v2 = vmul.f32 %v5745_v60, %v12528_v14  ;;  %5762 = vrcp.f32 %v4130_v10 }
 0x411   : > { %5343 = vmatprep.mubr.msk.f32.mxu1 %vm1032_vm1, %v4215_v4  ;;  %v5749_v54 = vpop.eup %5748  ;;  %v4218_v5 = vmul.f32 %v5747_v21, %v12529_v28 }
 0x412   : > { %v4219_v49 = vmul.f32 %v5749_v54, %v10891_v18 }
 0x413   : > { %v5751_v34 = vpop.eup %5750 }
 0x414   : > { %5344 = vmatmul.mubr.msk.f32.gmra.mxu1 %vm1032_vm1, %v4216_v12  ;;  %v5753_v15 = vpop.eup %5752  ;;  %v4220_v45 = vmul.f32 %v5751_v34, %v10909_v22 }
 0x415   : > { %5346 = vmatprep.mubr.msk.f32.mxu1 %vm1032_vm1, %v4217_v2  ;;  %v4221_v56 = vmul.f32 %v5753_v15, %v10900_v16 }
 0x416   : > { %v5755_v39 = vpop.eup %5754 }
 0x417   : > { %v5757_v17 = vpop.eup %5756  ;;  %v4223_v33 = vmul.f32 %v5755_v39, %v10927_v20  ;;  %v4632_v20 = vld [vmem:[%s11331_s7] sm:$0xff] }
 0x418   : > { %5347 = vmatmul.mubr.msk.f32.gmra.mxu1 %vm1032_vm1, %v4218_v5  ;;  %v4222_v18 = vmul.f32 %v5757_v17, %v10933_v59  ;;  %5362 = vmatpush3.msra.mxu0 %v4632_v20  ;;  %v12530_v59 = vmov 0.0  }
 0x419   : > { %5349 = vmatprep.mubr.msk.f32.mxu1 %vm1032_vm1, %v4219_v49  ;;  %5366 = vmatprep.subr.mxu0 %v12530_v59 }
 0x41a   : > { %v5759_v42 = vpop.eup %5758  ;;  %5363 = vmatprep.mubr.msk.f32.mxu0 %vm5969_vm6, %v12530_v59 }
 0x41b   : > { %v5761_v48 = vpop.eup %5760  ;;  %v4225_v22 = vmul.f32 %v5759_v42, %v10942_v43 }
 0x41c   : > { %5350 = vmatmul.mubr.msk.f32.gmra.mxu1 %vm1032_vm1, %v4220_v45  ;;  %v4224_v27 = vmul.f32 %v5761_v48, %v10947_v9 }
 0x41d   : > { %5352 = vmatprep.mubr.msk.f32.mxu1 %vm1032_vm1, %v4221_v56  ;;  %v5763_v51 = vpop.eup %5762 }
 0x41e   : > { %v4226_v16 = vmul.f32 %v5763_v51, %v10952_v1 }
 0x420   : > { %5353 = vmatmul.mubr.msk.f32.gmra.mxu1 %vm1032_vm1, %v4222_v18 }
 0x421   : > { %5355 = vmatprep.mubr.msk.f32.mxu1 %vm1032_vm1, %v4223_v33 }
 0x424   : > { %5356 = vmatmul.mubr.msk.f32.gmra.mxu1 %vm1032_vm1, %v4224_v27 }
 0x425   : > { %5358 = vmatprep.mubr.msk.f32.mxu1 %vm1032_vm1, %v4225_v22 }
 0x428   : > { %5359 = vmatmul.mubr.msk.f32.gmra.mxu1 %vm1032_vm1, %v4226_v16 }
 0x437   : > { %v5315_v43 = vpop.f32.mrf.mxu1 }
 0x438   : > { %v11017_v7 = vadd.f32 %v5315_v43, %v11011_v25 }
 0x439   : > { %v4402_v9 = vpop.f32.mrf.mxu1 }
 0x43a   : > { %v11014_v3 = vadd.f32 %v11011_v25, %v4402_v9  ;;  %v4562_v53 = vsel %vm486_vm0, %v11017_v7, 0.0 }
 0x43c   : > { %v4561_v31 = vsel %vm486_vm0, %v11014_v3, 0.0 }
 0x43d   : > { %v4563_v8 = vadd.f32 %v4562_v53, %v4561_v31 }
 0x45c   : > { %v5318_v1 = vpop.f32.mrf.mxu1 }
 0x45d   : > { %v11029_v19 = vadd.f32 %v5318_v1, %v11011_v25 }
 0x45e   : > { %v4412_v55 = vpop.f32.mrf.mxu1 }
 0x45f   : > { %v11020_v35 = vadd.f32 %v11011_v25, %v4412_v55  ;;  %v4566_v29 = vsel %vm486_vm0, %v11029_v19, 0.0 }
 0x461   : > { %v4564_v13 = vsel %vm486_vm0, %v11020_v35, 0.0 }
 0x462   : > { %v4565_v30 = vadd.f32 %v4564_v13, %v4563_v8 }
 0x464   : > { %v4567_v0 = vadd.f32 %v4566_v29, %v4565_v30 }
 0x483   : > { %v5321_v52 = vpop.f32.mrf.mxu1 }
 0x484   : > { %v11039_v26 = vadd.f32 %v5321_v52, %v11011_v25 }
 0x485   : > { %v4422_v47 = vpop.f32.mrf.mxu1 }
 0x486   : > { %v11032_v58 = vadd.f32 %v11011_v25, %v4422_v47  ;;  %v4570_v44 = vsel %vm486_vm0, %v11039_v26, 0.0 }
 0x488   : > { %v4568_v57 = vsel %vm486_vm0, %v11032_v58, 0.0 }
 0x489   : > { %v4569_v62 = vadd.f32 %v4568_v57, %v4567_v0 }
 0x48b   : > { %v4571_v40 = vadd.f32 %v4570_v44, %v4569_v62 }
 0x4ad   : > { %v5324_v24 = vpop.f32.mrf.mxu1 }
 0x4ae   : > { %v11044_v50 = vadd.f32 %v5324_v24, %v11011_v25 }
 0x4af   : > { %v4432_v46 = vpop.f32.mrf.mxu1 }
 0x4b0   : > { %v11047_v41 = vadd.f32 %v11011_v25, %v4432_v46  ;;  %v4574_v23 = vsel %vm486_vm0, %v11044_v50, 0.0 }
 0x4b2   : > { %v4572_v6 = vsel %vm486_vm0, %v11047_v41, 0.0  ;;  %v5327_v38 = vpop.f32.mrf.mxu1 }
 0x4b3   : > { %v4573_v37 = vadd.f32 %v4572_v6, %v4571_v40  ;;  %v11054_v36 = vadd.f32 %v5327_v38, %v11011_v25 }
 0x4b4   : > { %v4442_v61 = vpop.f32.mrf.mxu1 }
 0x4b5   : > { %v11057_v32 = vadd.f32 %v11011_v25, %v4442_v61  ;;  %v4575_v4 = vadd.f32 %v4574_v23, %v4573_v37  ;;  %v4578_v21 = vsel %vm486_vm0, %v11054_v36, 0.0 }
 0x4b6   : > { %v5330_v60 = vpop.f32.mrf.mxu1 }
 0x4b7   : > { %v4576_v10 = vsel %vm486_vm0, %v11057_v32, 0.0  ;;  %v11069_v28 = vadd.f32 %v5330_v60, %v11011_v25 }
 0x4b8   : > { %v4577_v63 = vadd.f32 %v4576_v10, %v4575_v4  ;;  %v4452_v12 = vpop.f32.mrf.mxu1 }
 0x4b9   : > { %v11064_v14 = vadd.f32 %v11011_v25, %v4452_v12  ;;  %v4582_v39 = vsel %vm486_vm0, %v11069_v28, 0.0 }
 0x4ba   : > { %v4579_v2 = vadd.f32 %v4578_v21, %v4577_v63 }
 0x4bb   : > { %v4580_v54 = vsel %vm486_vm0, %v11064_v14, 0.0 }
 0x4bc   : > { %v4581_v34 = vadd.f32 %v4580_v54, %v4579_v2 }
 0x4bd   : > { %v5333_v5 = vpop.f32.mrf.mxu1 }
 0x4be   : > { %v4583_v45 = vadd.f32 %v4582_v39, %v4581_v34  ;;  %v11079_v56 = vadd.f32 %v5333_v5, %v11011_v25 }
 0x4bf   : > { %v4462_v49 = vpop.f32.mrf.mxu1 }
 0x4c0   : > { %v11072_v15 = vadd.f32 %v11011_v25, %v4462_v49  ;;  %v4586_v18 = vsel %vm486_vm0, %v11079_v56, 0.0 }
 0x4c2   : > { %v4584_v17 = vsel %vm486_vm0, %v11072_v15, 0.0 }
 0x4c3   : > { %v4585_v33 = vadd.f32 %v4584_v17, %v4583_v45 }
 0x4c5   : > { %v4587_v51 = vadd.f32 %v4586_v18, %v4585_v33 }
 0x4c8   : > { %v5336_v42 = vpop.f32.mrf.mxu1 }
 0x4c9   : > { %v11084_v22 = vadd.f32 %v5336_v42, %v11011_v25 }
 0x4ca   : > { %v4472_v48 = vpop.f32.mrf.mxu1 }
 0x4cb   : > { %v11087_v27 = vadd.f32 %v11011_v25, %v4472_v48  ;;  %v4590_v1 = vsel %vm486_vm0, %v11084_v22, 0.0 }
 0x4cc   : > { %v5339_v16 = vpop.f32.mrf.mxu1 }
 0x4cd   : > { %v4588_v20 = vsel %vm486_vm0, %v11087_v27, 0.0  ;;  %v11094_v55 = vadd.f32 %v5339_v16, %v11011_v25 }
 0x4ce   : > { %v4589_v43 = vadd.f32 %v4588_v20, %v4587_v51  ;;  %v4482_v9 = vpop.f32.mrf.mxu1 }
 0x4cf   : > { %v11097_v52 = vadd.f32 %v11011_v25, %v4482_v9  ;;  %v4594_v30 = vsel %vm486_vm0, %v11094_v55, 0.0 }
 0x4d0   : > { %v4591_v31 = vadd.f32 %v4590_v1, %v4589_v43  ;;  %v5342_v53 = vpop.f32.mrf.mxu1 }
 0x4d1   : > { %v4592_v13 = vsel %vm486_vm0, %v11097_v52, 0.0  ;;  %v11104_v29 = vadd.f32 %v5342_v53, %v11011_v25 }
 0x4d2   : > { %v4593_v8 = vadd.f32 %v4592_v13, %v4591_v31  ;;  %v4492_v47 = vpop.f32.mrf.mxu1 }
 0x4d3   : > { %v11107_v0 = vadd.f32 %v11011_v25, %v4492_v47  ;;  %v4598_v40 = vsel %vm486_vm0, %v11104_v29, 0.0 }
 0x4d4   : > { %v4595_v57 = vadd.f32 %v4594_v30, %v4593_v8  ;;  %v5345_v62 = vpop.f32.mrf.mxu1 }
 0x4d5   : > { %v4596_v24 = vsel %vm486_vm0, %v11107_v0, 0.0  ;;  %v11114_v6 = vadd.f32 %v5345_v62, %v11011_v25 }
 0x4d6   : > { %v4597_v44 = vadd.f32 %v4596_v24, %v4595_v57  ;;  %v4502_v46 = vpop.f32.mrf.mxu1 }
 0x4d7   : > { %v11117_v38 = vadd.f32 %v11011_v25, %v4502_v46  ;;  %v4602_v10 = vsel %vm486_vm0, %v11114_v6, 0.0 }
 0x4d8   : > { %v4599_v37 = vadd.f32 %v4598_v40, %v4597_v44  ;;  %v5348_v23 = vpop.f32.mrf.mxu1 }
 0x4d9   : > { %v4600_v61 = vsel %vm486_vm0, %v11117_v38, 0.0  ;;  %v11124_v63 = vadd.f32 %v5348_v23, %v11011_v25 }
 0x4da   : > { %v4601_v4 = vadd.f32 %v4600_v61, %v4599_v37  ;;  %v4512_v60 = vpop.f32.mrf.mxu1 }
 0x4db   : > { %v11127_v12 = vadd.f32 %v11011_v25, %v4512_v60  ;;  %v4606_v49 = vsel %vm486_vm0, %v11124_v63, 0.0 }
 0x4dc   : > { %v4603_v21 = vadd.f32 %v4602_v10, %v4601_v4  ;;  %v5351_v2 = vpop.f32.mrf.mxu1 }
 0x4dd   : > { %v4604_v54 = vsel %vm486_vm0, %v11127_v12, 0.0  ;;  %v11134_v39 = vadd.f32 %v5351_v2, %v11011_v25 }
 0x4de   : > { %v4605_v5 = vadd.f32 %v4604_v54, %v4603_v21  ;;  %v4522_v34 = vpop.f32.mrf.mxu1 }
 0x4df   : > { %v11137_v45 = vadd.f32 %v11011_v25, %v4522_v34  ;;  %v4610_v51 = vsel %vm486_vm0, %v11134_v39, 0.0 }
 0x4e0   : > { %v4607_v17 = vadd.f32 %v4606_v49, %v4605_v5  ;;  %v5354_v33 = vpop.f32.mrf.mxu1 }
 0x4e1   : > { %v4608_v42 = vsel %vm486_vm0, %v11137_v45, 0.0  ;;  %v11144_v16 = vadd.f32 %v5354_v33, %v11011_v25  ;;  %v4633_v33 = vld [vmem:[%s11332_s8] sm:$0x1] }
 0x4e2   : > { %v4609_v18 = vadd.f32 %v4608_v42, %v4607_v17  ;;  %v4532_v48 = vpop.f32.mrf.mxu1 }
 0x4e3   : > { %v11147_v20 = vadd.f32 %v11011_v25, %v4532_v48  ;;  %v4614_v13 = vsel %vm486_vm0, %v11144_v16, 0.0 }
 0x4e4   : > { %v4611_v43 = vadd.f32 %v4610_v51, %v4609_v18  ;;  %v5357_v9 = vpop.f32.mrf.mxu1 }
 0x4e5   : > { %v4612_v1 = vsel %vm486_vm0, %v11147_v20, 0.0  ;;  %v11154_v8 = vadd.f32 %v5357_v9, %v11011_v25 }
 0x4e6   : > { %v4613_v31 = vadd.f32 %v4612_v1, %v4611_v43  ;;  %v4542_v53 = vpop.f32.mrf.mxu1 }
 0x4e7   : > { %v11157_v47 = vadd.f32 %v11011_v25, %v4542_v53  ;;  %v4618_v46 = vsel %vm486_vm0, %v11154_v8, 0.0 }
 0x4e8   : > { %v4615_v30 = vadd.f32 %v4614_v13, %v4613_v31  ;;  %v5360_v57 = vpop.f32.mrf.mxu1 }
 0x4e9   : > { %v4616_v62 = vsel %vm486_vm0, %v11157_v47, 0.0  ;;  %v11164_v40 = vadd.f32 %v5360_v57, %v11011_v25 }
 0x4ea   : > { %v4617_v24 = vadd.f32 %v4616_v62, %v4615_v30  ;;  %v4552_v44 = vpop.f32.mrf.mxu1  ;;  %v4796_v30 = vsub.s32 0, %v6795_v11 }
 0x4eb   : > { %v11167_v37 = vadd.f32 %v11011_v25, %v4552_v44  ;;  %v4622_v60 = vsel %vm486_vm0, %v11164_v40, 0.0  ;;  %v4708_v25 = vld [vmem:[%s11333_s9] sm:$0xf] }
 0x4ec   : > { %v4619_v23 = vadd.f32 %v4618_v46, %v4617_v24  ;;  %v12531_v46 = vld [vmem:[#allocation8_spill] sm:$0xff] }
 0x4ed   : > { %v4620_v61 = vsel %vm486_vm0, %v11167_v37, 0.0 }
 0x4ee   : > { %v4621_v4 = vadd.f32 %v4620_v61, %v4619_v23 }
 0x4f0   : > { %v4623_v10 = vadd.f32 %v4622_v60, %v4621_v4  ;;  %v12532_v60 = vld [vmem:[#allocation37_spill] sm:$0xff] }
 0x4f2   : > { %v4624_v21 = vrot.slane %v4623_v10, 4 }
 0x4f4   : > { %v4625_v2 = vadd.f32 %v4624_v21, %v4623_v10  ;;  %v12533_v21 = vld [vmem:[#allocation10_spill] sm:$0xff] }
 0x4f6   : > { %v4626_v54 = vrot.slane %v4625_v2, 2 }
 0x4f8   : > { %v4627_v5 = vadd.f32 %v4626_v54, %v4625_v2 }
 0x4fa   : > { %v4628_v34 = vrot.slane %v4627_v5, 1 }
 0x4fc   : > { %v4629_v49 = vadd.f32 %v4628_v34, %v4627_v5  ;;  %v12535_v5 = vld [vmem:[#allocation11_spill] sm:$0xff] }
 0x4fe   : > { %v4631_v17 = vmul.f32 0.00390625, %v4629_v49 }
 0x500   : > { %5364 = vmatmul.mubr.msk.f32.vlgmr.msra.gmra.mxu0 %vm486_vm0, %v4631_v17 }
 0x501   : > { %5368 = vmatprep.mubr.msk.f32.mxu0 %vm5969_vm6, %v12530_v59  ;;  %5367 = vmatpush3.msk.msra.mxu0 %vm4714_vm7, %v4708_v25  ;;  %v4709_v59 = vld [vmem:[%s11334_s10] sm:$0x1]  ;;  %v12537_v25 = vld [vmem:[#allocation13_spill] sm:$0xff] }
 0x5c0   : > { %v4703_v42 = vpop.f32.mrf.mxu0 }
 0x5c1   : > { %v4704_v18 = vadd.f32 %v4703_v42, %v4633_v33 }
 0x5c2   : > { %v5365_v48 = vpop.f32.mrf.mxu0 }
 0x5c3   : > { %v4707_v51 = vmax.f32 %v4704_v18, 0.0  ;;  %v12539_v48 = vld [vmem:[#allocation15_spill] sm:$0xff] }
 0x5c5   : > { %5369 = vmatmul.mubr.msk.f32.vlgmr.msra.gmra.mxu0 %vm4710_vm8, %v4707_v51 }
 0x685   : > { %v4784_v43 = vpop.f32.mrf.mxu0 }
 0x686   : > { %v4785_v9 = vadd.f32 %v4784_v43, %v4709_v59 }
 0x687   : > { %v5370_v1 = vpop.f32.mrf.mxu0 }
 0x688   : > { %v5168_v31 = vmul.f32 -1.442695, %v4785_v9  ;;  %v12541_v9 = vld [vmem:[#allocation17_spill] sm:$0xff] }
 0x68a   : > { %5764 = vpow2.f32 %v5168_v31 }
 0x697   : > { %v5765_v53 = vpop.eup %5764 }
 0x698   : > { %v4791_v13 = vadd.f32 1.0, %v5765_v53 }
 0x69a   : > { %5766 = vrcp.f32 %v4791_v13  ;;  %v12543_v13 = vld [vmem:[#allocation19_spill] sm:$0xff] }
 0x6a7   : > { %v5767_v57 = vpop.eup %5766 }
 0x6a8   : > { %v11186_v62 = vrot.slane %v5767_v57, %v4796_v30 }
 0x6aa   : > { %v4798_v24 = vmul.f32 %v11186_v62, %v11014_v3  ;;  %v4814_v44 = vmul.f32 %v11186_v62, %v11097_v52  ;;  %v4799_v61 = vmul.f32 %v11186_v62, %v11017_v7  ;;  %v4815_v4 = vmul.f32 %v11186_v62, %v11094_v55  ;;  %v12534_v52 = vld [vmem:[#allocation38_spill] sm:$0xff] }
 0x6ab   : > { %v4800_v10 = vmul.f32 %v11186_v62, %v11020_v35  ;;  %v4816_v3 = vmul.f32 %v11186_v62, %v11107_v0  ;;  %v4801_v7 = vmul.f32 %v11186_v62, %v11029_v19  ;;  %v4817_v55 = vmul.f32 %v11186_v62, %v11104_v29  ;;  %v12536_v35 = vld [vmem:[#allocation40_spill] sm:$0xff]  ;;  %v12538_v19 = vld [vmem:[#allocation42_spill] sm:$0xff] }
 0x6ac   : > { %v4830_v23 = vadd.f32 %v4798_v24, %v12531_v46  ;;  %v4846_v11 = vadd.f32 %v4814_v44, %v12532_v60  ;;  %v4831_v2 = vadd.f32 %v4799_v61, %v12533_v21  ;;  %v4847_v54 = vadd.f32 %v4815_v4, %v12534_v52  ;;  %v12545_v44 = vld [vmem:[#allocation20_spill] sm:$0xff]  ;;  %v12547_v4 = vld [vmem:[#allocation22_spill] sm:$0xff] }
 0x6ad   : > { %v4832_v34 = vadd.f32 %v4800_v10, %v12535_v5  ;;  %v4848_v49 = vadd.f32 %v4816_v3, %v12536_v35  ;;  %v4802_v17 = vmul.f32 %v11186_v62, %v11032_v58  ;;  %v4833_v33 = vadd.f32 %v4801_v7, %v12537_v25  ;;  %v12540_v58 = vld [vmem:[#allocation43_spill] sm:$0xff]  ;;  %v12549_v21 = vld [vmem:[#allocation24_spill] sm:$0xff]  ;;  %v12555_v25 = vld [vmem:[#allocation30_spill] sm:$0xff] }
 0x6ae   : > { %4862 = vxpose.xlu0.b32.start [1/16] (narrow) %v4830_v23, 8  ;;  %4894 = vxpose.xlu1.b32.start [1/16] (narrow) %v4846_v11, 8  ;;  %v4818_v0 = vmul.f32 %v11186_v62, %v11117_v38  ;;  %v4849_v42 = vadd.f32 %v4817_v55, %v12538_v19  ;;  %v4803_v18 = vmul.f32 %v11186_v62, %v11039_v26  ;;  %v12542_v26 = vld [vmem:[#allocation45_spill] sm:$0xff]  ;;  %v12553_v55 = vld [vmem:[#allocation28_spill] sm:$0xff] }
 0x6af   : > { %v4834_v51 = vadd.f32 %v4802_v17, %v12539_v48  ;;  %v4819_v29 = vmul.f32 %v11186_v62, %v11114_v6  ;;  %v4804_v43 = vmul.f32 %v11186_v62, %v11047_v41  ;;  %v4820_v38 = vmul.f32 %v11186_v62, %v11127_v12  ;;  %v12544_v41 = vld [vmem:[#allocation47_spill] sm:$0xff] }
 0x6b0   : > { %v4850_v59 = vadd.f32 %v4818_v0, %v12540_v58  ;;  %v4835_v1 = vadd.f32 %v4803_v18, %v12541_v9  ;;  %v4805_v53 = vmul.f32 %v11186_v62, %v11044_v50  ;;  %v4821_v6 = vmul.f32 %v11186_v62, %v11124_v63  ;;  %v12546_v50 = vld [vmem:[#allocation48_spill] sm:$0xff] }
 0x6b1   : > { %v4851_v31 = vadd.f32 %v4819_v29, %v12542_v26  ;;  %v4836_v30 = vadd.f32 %v4804_v43, %v12543_v13  ;;  %v4852_v57 = vadd.f32 %v4820_v38, %v12544_v41  ;;  %v4806_v24 = vmul.f32 %v11186_v62, %v11057_v32  ;;  %v12548_v32 = vld [vmem:[#allocation50_spill] sm:$0xff]  ;;  %v12560_v58 = vld [vmem:[#allocation60_spill] sm:$0xff]  ;;  %v12561_v43 = vld [vmem:[#allocation35_spill] sm:$0xff] }
 0x6b2   : > { %4863 = vxpose.xlu0.b32.cont [2/16] (narrow) %v4831_v2, 8  ;;  %4895 = vxpose.xlu1.b32.cont [2/16] (narrow) %v4847_v54, 8  ;;  %v4837_v46 = vadd.f32 %v4805_v53, %v12545_v44  ;;  %v4822_v12 = vmul.f32 %v11186_v62, %v11137_v45  ;;  %v4853_v23 = vadd.f32 %v4821_v6, %v12546_v50  ;;  %v12551_v54 = vld [vmem:[#allocation26_spill] sm:$0xff] }
 0x6b3   : > { %v4807_v61 = vmul.f32 %v11186_v62, %v11054_v36  ;;  %v4838_v60 = vadd.f32 %v4806_v24, %v12547_v4  ;;  %v4823_v63 = vmul.f32 %v11186_v62, %v11134_v39  ;;  %v4808_v10 = vmul.f32 %v11186_v62, %v11064_v14  ;;  %v12550_v36 = vld [vmem:[#allocation52_spill] sm:$0xff]  ;;  %v12552_v14 = vld [vmem:[#allocation53_spill] sm:$0xff] }
 0x6b4   : > { %v4854_v11 = vadd.f32 %v4822_v12, %v12548_v32  ;;  %v4824_v45 = vmul.f32 %v11186_v62, %v11147_v20  ;;  %v4809_v52 = vmul.f32 %v11186_v62, %v11069_v28  ;;  %v4825_v39 = vmul.f32 %v11186_v62, %v11144_v16  ;;  %v12554_v28 = vld [vmem:[#allocation55_spill] sm:$0xff] }
 0x6b5   : > { %v4839_v2 = vadd.f32 %v4807_v61, %v12549_v21  ;;  %v4855_v3 = vadd.f32 %v4823_v63, %v12550_v36  ;;  %v4840_v7 = vadd.f32 %v4808_v10, %v12551_v54  ;;  %v4826_v20 = vmul.f32 %v11186_v62, %v11157_v47  ;;  %v12558_v47 = vld [vmem:[#allocation58_spill] sm:$0xff] }
 0x6b6   : > { %4864 = vxpose.xlu0.b32.cont [3/16] (narrow) %v4832_v34, 8  ;;  %4896 = vxpose.xlu1.b32.cont [3/16] (narrow) %v4848_v49, 8  ;;  %v4856_v5 = vadd.f32 %v4824_v45, %v12552_v14  ;;  %v4810_v34 = vmul.f32 %v11186_v62, %v11072_v15  ;;  %v4841_v35 = vadd.f32 %v4809_v52, %v12553_v55  ;;  %v12556_v15 = vld [vmem:[#allocation57_spill] sm:$0xff] }
 0x6b7   : > { %v4857_v49 = vadd.f32 %v4825_v39, %v12554_v28  ;;  %v4811_v17 = vmul.f32 %v11186_v62, %v11079_v56  ;;  %v4827_v16 = vmul.f32 %v11186_v62, %v11154_v8  ;;  %v4858_v0 = vadd.f32 %v4826_v20, %v12556_v15  ;;  %v12559_v8 = vld [vmem:[#allocation33_spill] sm:$0xff] }
 0x6b8   : > { %v4812_v19 = vmul.f32 %v11186_v62, %v11087_v27  ;;  %v4828_v56 = vmul.f32 %v11186_v62, %v11167_v37  ;;  %v4829_v27 = vmul.f32 %v11186_v62, %v11164_v40  ;;  %v12562_v37 = vld [vmem:[#allocation62_spill] sm:$0xff] }
 0x6b9   : > { %v4859_v48 = vadd.f32 %v4827_v16, %v12558_v47 }
 0x6ba   : > { %4865 = vxpose.xlu0.b32.cont [4/16] (narrow) %v4833_v33, 8  ;;  %4897 = vxpose.xlu1.b32.cont [4/16] (narrow) %v4849_v42, 8  ;;  %v4842_v33 = vadd.f32 %v4810_v34, %v12555_v25  ;;  %v12557_v42 = vld [vmem:[#allocation31_spill] sm:$0xff]  ;;  %v4844_v29 = vadd.f32 %v4812_v19, %v12559_v8 }
 0x6bb   : > { %v4843_v18 = vadd.f32 %v4811_v17, %v12557_v42 }
 0x6be   : > { %4866 = vxpose.xlu0.b32.cont [5/16] (narrow) %v4834_v51, 8  ;;  %4898 = vxpose.xlu1.b32.cont [5/16] (narrow) %v4850_v59, 8  ;;  %v4813_v51 = vmul.f32 %v11186_v62, %v11084_v22  ;;  %v4860_v59 = vadd.f32 %v4828_v56, %v12560_v58 }
 0x6c0   : > { %v4845_v9 = vadd.f32 %v4813_v51, %v12561_v43 }
 0x6c2   : > { %4867 = vxpose.xlu0.b32.cont [6/16] (narrow) %v4835_v1, 8  ;;  %4899 = vxpose.xlu1.b32.cont [6/16] (narrow) %v4851_v31, 8  ;;  %v4861_v1 = vadd.f32 %v4829_v27, %v12562_v37 }
 0x6c6   : > { %4868 = vxpose.xlu0.b32.cont [7/16] (narrow) %v4836_v30, 8  ;;  %4900 = vxpose.xlu1.b32.cont [7/16] (narrow) %v4852_v57, 8 }
 0x6ca   : > { %4869 = vxpose.xlu0.b32.cont [8/16] (narrow) %v4837_v46, 8  ;;  %4901 = vxpose.xlu1.b32.cont [8/16] (narrow) %v4853_v23, 8 }
 0x6ce   : > { %4870 = vxpose.xlu0.b32.cont [9/16] (narrow) %v4838_v60, 8  ;;  %4902 = vxpose.xlu1.b32.cont [9/16] (narrow) %v4854_v11, 8 }
 0x6d2   : > { %4871 = vxpose.xlu0.b32.cont [10/16] (narrow) %v4839_v2, 8  ;;  %4903 = vxpose.xlu1.b32.cont [10/16] (narrow) %v4855_v3, 8 }
 0x6d6   : > { %4872 = vxpose.xlu0.b32.cont [11/16] (narrow) %v4840_v7, 8  ;;  %4904 = vxpose.xlu1.b32.cont [11/16] (narrow) %v4856_v5, 8 }
 0x6da   : > { %4873 = vxpose.xlu0.b32.cont [12/16] (narrow) %v4841_v35, 8  ;;  %4905 = vxpose.xlu1.b32.cont [12/16] (narrow) %v4857_v49, 8 }
 0x6de   : > { %4874 = vxpose.xlu0.b32.cont [13/16] (narrow) %v4842_v33, 8  ;;  %4906 = vxpose.xlu1.b32.cont [13/16] (narrow) %v4858_v0, 8 }
 0x6e2   : > { %4875 = vxpose.xlu0.b32.cont [14/16] (narrow) %v4843_v18, 8  ;;  %4907 = vxpose.xlu1.b32.cont [14/16] (narrow) %v4859_v48, 8 }
 0x6e6   : > { %4876 = vxpose.xlu0.b32.cont [15/16] (narrow) %v4844_v29, 8  ;;  %4908 = vxpose.xlu1.b32.cont [15/16] (narrow) %v4860_v59, 8 }
 0x6ea   : > { %4877 = vxpose.xlu0.b32.end [16/16] (narrow) %v4845_v9, 8  ;;  %4909 = vxpose.xlu1.b32.end [16/16] (narrow) %v4861_v1, 8 }
 0x72a   : > { %v4878_v22 = vpop.trf.xlu0  ;;  %v4910_v40 = vpop.trf.xlu1 }
 0x72b   : > { %4926 = vst [vmem:[%s406_s19] sm:$0xff] %v4878_v22  ;;  %4927 = vst [vmem:[%s406_s19 + $0x8] sm:$0xff] %v4910_v40 }
 0x72c   : > { %5915 = shalt.err (!%p5912_p3)
}
 0x72d   : > { %s5916_s29 = scalar_lea.hbm %s4941_s16, 256  ;;  %s5920_s28 = scalar_lea.hbm %s11336_s12, 512 }
 0x72e   : > { %p5917_p4 = scmp.ne.s32.totalorder %s4941_s16, %s5916_s29  ;;  %p5921_p9 = scmp.lt.s32.totalorder %s4941_s16, %s11336_s12 }
 0x72f   : > { %p5922_p10 = scmp.lt.s32.totalorder %s5920_s28, %s5916_s29 }
 0x730   : > { %p5918_p7 = pnand %p5917_p4, %p6074_p5 }
 0x731   : > { %p5923_p11 = por %p5922_p10, %p5921_p9 }
 0x732   : > { %p5919_p8 = pneg %p5918_p7 }
 0x734   : > { %p5924_p12 = pnand %p5923_p11, %p5919_p8 }
 0x736   : > { %5927 = shalt.err (!%p5924_p12)
}
 0x737   : > { %5371 = dma.vmem_to_hbm [thread:$0]  (%p6074_p5), %s11286_s20, 256, %s4941_s16, %s4929_s26  }
 0x738 PF: > { %p5377_p13 = scmp.ge.s32.totalorder %s5962_s24, 2  ;;  %s4955_s0 = sand.u32 1, %s5950_s21  }
 0x739   : > { %s4956_s1 = scalar_lea.sflag [#allocation4], %s4955_s0 }
 0x73a   : > { %p5374_p0 = pnand %p5377_p13, %p6078_p6 }
 0x73c   : > { %p5375_p1 = pneg %p5374_p0 }
 0x73e   : > { %5945 = dma.done.wait (%p5375_p1), %s4956_s1, 256  }
 0x73f   : > { %5947 = vsyncadd (%p5375_p1), %s4956_s1, 4294967040  ;;  %p22_p2 = scmp.ge.s32.totalorder %s6061_s27, 4   ;;  %s12563_s21 = smov %s5954_s22 }
 0x740   : > { %s12564_s22 = smov %s5958_s23  ;;  %s12565_s23 = smov %s6072_s30 }
 0x741   : > { %s12566_s24 = smov %s6061_s27  ;;  %24 = sbr.rel (!%p22_p2) target bundleno = 7 (0x7), region = 103 }
 0x746   :  { %4961 = vsyncpa [#allocation4], 1 }
 0x747   :  { %4963 = vsyncpa [#allocation4 + $0x1], 1 }

</bundles_post_ra>
